<compile_context>
chip_gen: v7x
topology: tpu7x:2x2x1
jax: 0.10.0
libtpu: 0.0.40
codegen_flags: <defaults>
</compile_context>

<pallas_src>
import numpy as np
import jax
import jax.numpy as jnp
from jax.experimental import pallas as pl
from jax.experimental.pallas import tpu as pltpu

N_QUBITS = 8
N_LAYERS = 4
BN_EPS = 1e-5


# ------------------------------ Pallas kernel ------------------------------

def _hybrid_kernel(patches_ref, xflat_ref,
                   w1_ref, b1_ref,
                   g2_ref, w2_ref, b2_ref,
                   g3_ref, w3_ref, b3_ref,
                   poolT_ref, cfc1_wp_ref, cfc1_b_ref, cfc2_w_ref, cfc2_b_ref,
                   qp1_w_ref, qp1_b_ref, qp2_w_ref, qp2_b_ref,
                   ut_ref, zsign_ref,
                   f1a_ref, f1b_ref, f1_b_ref,
                   f2_w_ref, f2_b_ref, f3_w_ref, f3_b_ref, f4_w_ref, f4_b_ref,
                   o_ref):
    """One grid step == one sample.  Every intermediate lives in vregs/VMEM."""
    f32 = jnp.float32
    bf16 = jnp.bfloat16

    def mm(a, b, precision=None):
        return jnp.dot(a, b, preferred_element_type=f32, precision=precision)

    def relu(v):
        return jnp.maximum(v, 0.0)

    # ---- conv1 (5x5, s2, p2): host-side im2col GEMM, K padded 25 -> 32 ----
    y1 = relu(mm(patches_ref[0], w1_ref[...]) + b1_ref[...])            # (196, 16)

    # ---- conv2 (3x3, s2, p1): implicit GEMM via constant 0/1 gather mats;
    #      eval-mode BatchNorm2d(16) scale folded into w2.  No padded K. ----
    acc2 = jnp.zeros((49, 32), f32)
    for t in range(9):
        acc2 = acc2 + mm(mm(g2_ref[t], y1), w2_ref[t])
    y2 = relu(acc2 + b2_ref[...])                                       # (49, 32)

    # ---- conv3 (3x3, s1, p1): same trick; BatchNorm2d(32) scale in w3. ----
    acc3 = jnp.zeros((49, 64), f32)
    for t in range(9):
        acc3 = acc3 + mm(mm(g3_ref[t], y2), w3_ref[t])
    y3 = relu(acc3 + b3_ref[...])                                       # (49, 64)

    # ---- AdaptiveAvgPool2d(2) + Flatten + Linear(256,128) + ReLU
    #      (+ Dropout==identity) + Linear(128,64) + ReLU --------------------
    pooled = mm(poolT_ref[...], y3)                                     # (4, 64)
    c = cfc1_b_ref[...]                                                 # (1, 128)
    for w4 in range(4):
        c = c + mm(pooled[w4:w4 + 1, :], cfc1_wp_ref[w4 * 64:(w4 + 1) * 64, :])
    c = relu(c)
    c = relu(mm(c, cfc2_w_ref[...]) + cfc2_b_ref[...])                  # (1, 64)

    # ---- quantum preprocessor: Linear(784,512)+ReLU -> Linear(512,256)+Tanh
    #      (bf16 weights, f32 accumulate; elementwise stays f32) ------------
    xq = xflat_ref[0]                                                   # (1, 784)
    q = relu(mm(xq.astype(bf16), qp1_w_ref[...]) + qp1_b_ref[...])      # (1, 512)
    q = jnp.tanh(mm(q.astype(bf16), qp2_w_ref[...]) + qp2_b_ref[...])   # (1, 256)

    # ---- quantum circuit: F.normalize(p=2) / AmplitudeEmbedding(normalize)
    #      -> psi = x @ U^T (real 4-layer RY+CNOT unitary) -> probs = psi^2
    #      -> <Z_0..3>.  rsqrt keeps the divide on the EUP slot. -------------
    ssq = jnp.sum(q * q, axis=-1, keepdims=True)
    qn = q * jax.lax.rsqrt(jnp.maximum(ssq, 1e-24))
    psi = mm(qn, ut_ref[...], precision=jax.lax.Precision.HIGHEST)      # (1, 256)
    probs = psi * psi
    qf = mm(probs, zsign_ref[...])                                      # (1, 4)

    # ---- fusion classifier: f1 split (64 | 4) so the (1,68) concat never
    #      materializes; eval-mode BatchNorm1d scales folded into f2/f3. ----
    f = relu(mm(c, f1a_ref[...]) + mm(qf, f1b_ref[...]) + f1_b_ref[...])
    f = relu(mm(f, f2_w_ref[...]) + f2_b_ref[...])                      # (1, 64)
    f = relu(mm(f, f3_w_ref[...]) + f3_b_ref[...])                      # (1, 32)
    # f4 zero-padded to 128 output lanes -> lane-dense store; logit in lane 0.
    o_ref[0] = jax.nn.sigmoid(mm(f, f4_w_ref[...]) + f4_b_ref[...])     # (1, 128)


# ------------------------- host-side constant builders ---------------------

def build_pool_matrix_t():
    """AdaptiveAvgPool2d(2) on a 7x7 map as a (4, 49) averaging matrix."""
    pt = np.zeros((4, 49), np.float32)
    wins = [(0, 4), (3, 7)]                      # PyTorch adaptive windows 7 -> 2
    for oi, (h0, h1) in enumerate(wins):
        for oj, (w0, w1) in enumerate(wins):
            row = oi * 2 + oj
            cnt = (h1 - h0) * (w1 - w0)
            for hh in range(h0, h1):
                for ww in range(w0, w1):
                    pt[row, hh * 7 + ww] = 1.0 / cnt
    return pt


def build_gather(out_hw, in_hw, k, stride, pad):
    """0/1 matrices G[t]: (out_hw^2, in_hw^2); G[t] @ fmap == the shifted /
    strided window of the zero-padded map for kernel tap t (implicit GEMM)."""
    g = np.zeros((k * k, out_hw * out_hw, in_hw * in_hw), np.float32)
    for dy in range(k):
        for dx in range(k):
            t = dy * k + dx
            for i in range(out_hw):
                for j in range(out_hw):
                    ih = i * stride - pad + dy
                    iw = j * stride - pad + dx
                    if 0 <= ih < in_hw and 0 <= iw < in_hw:
                        g[t, i * out_hw + j, ih * in_hw + iw] = 1.0
    return g


def build_circuit_unitary(weights):
    """Full 256x256 real unitary of the 4-layer RY + CNOT-chain circuit.
    PennyLane convention: wire 0 is the most-significant qubit."""
    dim = 2 ** N_QUBITS
    u = np.eye(dim)
    cnot = np.array([[1, 0, 0, 0],
                     [0, 1, 0, 0],
                     [0, 0, 0, 1],
                     [0, 0, 1, 0]], dtype=np.float64)
    for layer in range(N_LAYERS):
        ry_full = np.array([[1.0]])
        for qb in range(N_QUBITS):
            th = float(weights[layer * N_QUBITS + qb])
            cth, sth = np.cos(th / 2.0), np.sin(th / 2.0)
            ry = np.array([[cth, -sth], [sth, cth]])
            ry_full = np.kron(ry_full, ry)
        u = ry_full @ u
        for i in range(N_QUBITS - 1):
            gate = np.kron(np.kron(np.eye(2 ** i), cnot),
                           np.eye(2 ** (N_QUBITS - i - 2)))
            u = gate @ u
    return u


def build_z_signs():
    """signs[j, i] = <basis j| Z_i |basis j> for wires i = 0..3 (wire 0 = MSB)."""
    dim = 2 ** N_QUBITS
    z = np.zeros((dim, 4), np.float32)
    for j in range(dim):
        for i in range(4):
            bit = (j >> (N_QUBITS - 1 - i)) & 1
            z[j, i] = 1.0 - 2.0 * bit
    return z


# -------------------------------- parameters -------------------------------

def init_params(seed=0):
    rng = np.random.default_rng(seed)

    def lin(fan_in, fan_out):
        bound = 1.0 / np.sqrt(fan_in)
        w = rng.uniform(-bound, bound, (fan_in, fan_out)).astype(np.float32)
        b = rng.uniform(-bound, bound, (fan_out,)).astype(np.float32)
        return w, b

    # Eval-mode BatchNorm with default running stats (mean=0, var=1, beta=0):
    # fold reduces to a scalar scale on the following layer's input weights.
    bn_scale = np.float32(1.0 / np.sqrt(1.0 + BN_EPS))

    p = {}
    # conv1: (5,5,1,16) -> (25,16), rows ordered (ky,kx); K zero-padded to 32.
    w1, b1 = lin(25, 16)
    p["w1"] = np.pad(w1, ((0, 7), (0, 0)))
    p["b1"] = b1.reshape(1, 16)

    # conv2: per-tap (9,16,32); preceding BN2d(16) scale folded in.
    w2, b2 = lin(9 * 16, 32)
    p["w2"] = (w2 * bn_scale).reshape(9, 16, 32)
    p["b2"] = b2.reshape(1, 32)
    p["g2"] = build_gather(7, 14, 3, 2, 1)          # (9, 49, 196)

    # conv3: per-tap (9,32,64); preceding BN2d(32) scale folded in.
    w3, b3 = lin(9 * 32, 64)
    p["w3"] = (w3 * bn_scale).reshape(9, 32, 64)
    p["b3"] = b3.reshape(1, 64)
    p["g3"] = build_gather(7, 7, 3, 1, 1)           # (9, 49, 49)

    # AdaptiveAvgPool2d(2) + Linear(256,128): pool as (4,49); cfc1 weights
    # permuted to pool-window-major rows (p*64 + c  <-  PyTorch's c*4 + p).
    p["poolT"] = build_pool_matrix_t()
    cfc1_w, cfc1_b = lin(256, 128)
    p["cfc1_wp"] = cfc1_w.reshape(64, 4, 128).transpose(1, 0, 2).reshape(256, 128)
    p["cfc1_b"] = cfc1_b.reshape(1, 128)
    cfc2_w, cfc2_b = lin(128, 64)
    p["cfc2_w"], p["cfc2_b"] = cfc2_w, cfc2_b.reshape(1, 64)

    # quantum preprocessor
    qp1_w, qp1_b = lin(784, 512)
    qp2_w, qp2_b = lin(512, 256)
    p["qp1_w"], p["qp1_b"] = qp1_w, qp1_b.reshape(1, 512)
    p["qp2_w"], p["qp2_b"] = qp2_w, qp2_b.reshape(1, 256)

    # quantum circuit weights -> fixed real unitary (transposed: row-vec form)
    qw = rng.uniform(0.0, 2.0 * np.pi, (N_LAYERS * N_QUBITS,))
    p["u_t"] = build_circuit_unitary(qw).T.astype(np.float32)
    p["z_signs"] = build_z_signs()

    # fusion classifier: split f1 (64 | 4); fold BatchNorm1d scales into f2/f3
    f1_w, f1_b = lin(64 + 4, 128)
    p["f1a_w"], p["f1b_w"], p["f1_b"] = f1_w[:64], f1_w[64:], f1_b.reshape(1, 128)
    f2_w, f2_b = lin(128, 64)
    p["f2_w"], p["f2_b"] = f2_w * bn_scale, f2_b.reshape(1, 64)
    f3_w, f3_b = lin(64, 32)
    p["f3_w"], p["f3_b"] = f3_w * bn_scale, f3_b.reshape(1, 32)
    f4_w, f4_b = lin(32, 1)
    p["f4_w"] = np.pad(f4_w, ((0, 0), (0, 127)))            # (32,128), logit lane 0
    p["f4_b"] = np.pad(f4_b.reshape(1, 1), ((0, 0), (0, 127)))

    bf16_names = {"qp1_w", "qp2_w"}                         # big weights -> bf16
    return {k: jnp.asarray(v, jnp.bfloat16 if k in bf16_names else jnp.float32)
            for k, v in p.items()}


_WEIGHT_ORDER = ["w1", "b1", "g2", "w2", "b2", "g3", "w3", "b3",
                 "poolT", "cfc1_wp", "cfc1_b", "cfc2_w", "cfc2_b",
                 "qp1_w", "qp1_b", "qp2_w", "qp2_b", "u_t", "z_signs",
                 "f1a_w", "f1b_w", "f1_b", "f2_w", "f2_b",
                 "f3_w", "f3_b", "f4_w", "f4_b"]


# --------------------------------- forward ---------------------------------

def hybrid_qnn_forward(x, p):
    bsz = x.shape[0]
    x = x.astype(jnp.float32)

    # conv1 im2col on the raw image only (cheap XLA glue); K padded 25 -> 32.
    xp = jnp.pad(x.reshape(bsz, 28, 28, 1), ((0, 0), (2, 2), (2, 2), (0, 0)))
    cols = [xp[:, ky:ky + 2 * 14:2, kx:kx + 2 * 14:2, :]
            for ky in range(5) for kx in range(5)]
    patches = jnp.concatenate(cols, axis=-1).reshape(bsz, 196, 25)
    patches = jnp.pad(patches, ((0, 0), (0, 0), (0, 7)))            # (B, 196, 32)
    xflat = x.reshape(bsz, 1, 784)

    weights = [p[name] for name in _WEIGHT_ORDER]

    def const_spec(a):
        # full-array block, constant index map: weights resident, no re-DMA
        return pl.BlockSpec(a.shape, lambda b, _nd=a.ndim: (0,) * _nd)

    in_specs = ([pl.BlockSpec((1, 196, 32), lambda b: (b, 0, 0)),
                 pl.BlockSpec((1, 1, 784), lambda b: (b, 0, 0))]
                + [const_spec(a) for a in weights])

    out = pl.pallas_call(
        _hybrid_kernel,
        out_shape=jax.ShapeDtypeStruct((bsz, 1, 128), jnp.float32),
        grid=(bsz,),
        in_specs=in_specs,
        out_specs=pl.BlockSpec((1, 1, 128), lambda b: (b, 0, 0)),
        compiler_params=pltpu.CompilerParams(
            dimension_semantics=("parallel",)),
    )(patches, xflat, *weights)

    return out[:, 0, :1]                                            # (B, 1)


if __name__ == "__main__":
    x = jax.random.normal(jax.random.PRNGKey(0), (2, 1, 28, 28), jnp.float32)
    params = init_params(0)

    fwd = jax.jit(hybrid_qnn_forward)
    out = jax.block_until_ready(fwd(x, params))

    assert out.shape == (2, 1), out.shape
    assert bool(jnp.all(jnp.isfinite(out)))
    assert bool(jnp.all((out >= 0.0) & (out <= 1.0)))               # sigmoid output
    print("KERNEL_OK")
</pallas_src>

<mosaic_0001>
module attributes {stable_mosaic.version = 11 : i64} {
  func.func @_hybrid_kernel(%arg0: i32, %arg1: memref<1x196x32xf32, #tpu.memory_space<vmem>>, %arg2: memref<1x1x784xf32, #tpu.memory_space<vmem>>, %arg3: memref<32x16xf32, #tpu.memory_space<vmem>>, %arg4: memref<1x16xf32, #tpu.memory_space<vmem>>, %arg5: memref<9x49x196xf32, #tpu.memory_space<vmem>>, %arg6: memref<9x16x32xf32, #tpu.memory_space<vmem>>, %arg7: memref<1x32xf32, #tpu.memory_space<vmem>>, %arg8: memref<9x49x49xf32, #tpu.memory_space<vmem>>, %arg9: memref<9x32x64xf32, #tpu.memory_space<vmem>>, %arg10: memref<1x64xf32, #tpu.memory_space<vmem>>, %arg11: memref<4x49xf32, #tpu.memory_space<vmem>>, %arg12: memref<256x128xf32, #tpu.memory_space<vmem>>, %arg13: memref<1x128xf32, #tpu.memory_space<vmem>>, %arg14: memref<128x64xf32, #tpu.memory_space<vmem>>, %arg15: memref<1x64xf32, #tpu.memory_space<vmem>>, %arg16: memref<784x512xbf16, #tpu.memory_space<vmem>>, %arg17: memref<1x512xf32, #tpu.memory_space<vmem>>, %arg18: memref<512x256xbf16, #tpu.memory_space<vmem>>, %arg19: memref<1x256xf32, #tpu.memory_space<vmem>>, %arg20: memref<256x256xf32, #tpu.memory_space<vmem>>, %arg21: memref<256x4xf32, #tpu.memory_space<vmem>>, %arg22: memref<64x128xf32, #tpu.memory_space<vmem>>, %arg23: memref<4x128xf32, #tpu.memory_space<vmem>>, %arg24: memref<1x128xf32, #tpu.memory_space<vmem>>, %arg25: memref<128x64xf32, #tpu.memory_space<vmem>>, %arg26: memref<1x64xf32, #tpu.memory_space<vmem>>, %arg27: memref<64x32xf32, #tpu.memory_space<vmem>>, %arg28: memref<1x32xf32, #tpu.memory_space<vmem>>, %arg29: memref<32x128xf32, #tpu.memory_space<vmem>>, %arg30: memref<1x128xf32, #tpu.memory_space<vmem>>, %arg31: memref<1x1x128xf32, #tpu.memory_space<vmem>>) attributes {dimension_semantics = [#tpu.dimension_semantics<parallel>], iteration_bounds = array<i64: 2>, scalar_prefetch = 0 : i64, scratch_operands = 0 : i64, tpu.core_type = #tpu.core_type<tc>, window_params = [{transform_indices = @transform_0, window_bounds = array<i64: 1, 196, 32>}, {transform_indices = @transform_1, window_bounds = array<i64: 1, 1, 784>}, {pipeline_mode = #tpu.pipeline_mode<synchronous>, transform_indices = @transform_2, window_bounds = array<i64: 32, 16>}, {pipeline_mode = #tpu.pipeline_mode<synchronous>, transform_indices = @transform_3, window_bounds = array<i64: 1, 16>}, {pipeline_mode = #tpu.pipeline_mode<synchronous>, transform_indices = @transform_4, window_bounds = array<i64: 9, 49, 196>}, {pipeline_mode = #tpu.pipeline_mode<synchronous>, transform_indices = @transform_5, window_bounds = array<i64: 9, 16, 32>}, {pipeline_mode = #tpu.pipeline_mode<synchronous>, transform_indices = @transform_6, window_bounds = array<i64: 1, 32>}, {pipeline_mode = #tpu.pipeline_mode<synchronous>, transform_indices = @transform_7, window_bounds = array<i64: 9, 49, 49>}, {pipeline_mode = #tpu.pipeline_mode<synchronous>, transform_indices = @transform_8, window_bounds = array<i64: 9, 32, 64>}, {pipeline_mode = #tpu.pipeline_mode<synchronous>, transform_indices = @transform_9, window_bounds = array<i64: 1, 64>}, {pipeline_mode = #tpu.pipeline_mode<synchronous>, transform_indices = @transform_10, window_bounds = array<i64: 4, 49>}, {pipeline_mode = #tpu.pipeline_mode<synchronous>, transform_indices = @transform_11, window_bounds = array<i64: 256, 128>}, {pipeline_mode = #tpu.pipeline_mode<synchronous>, transform_indices = @transform_12, window_bounds = array<i64: 1, 128>}, {pipeline_mode = #tpu.pipeline_mode<synchronous>, transform_indices = @transform_13, window_bounds = array<i64: 128, 64>}, {pipeline_mode = #tpu.pipeline_mode<synchronous>, transform_indices = @transform_14, window_bounds = array<i64: 1, 64>}, {pipeline_mode = #tpu.pipeline_mode<synchronous>, transform_indices = @transform_15, window_bounds = array<i64: 784, 512>}, {pipeline_mode = #tpu.pipeline_mode<synchronous>, transform_indices = @transform_16, window_bounds = array<i64: 1, 512>}, {pipeline_mode = #tpu.pipeline_mode<synchronous>, transform_indices = @transform_17, window_bounds = array<i64: 512, 256>}, {pipeline_mode = #tpu.pipeline_mode<synchronous>, transform_indices = @transform_18, window_bounds = array<i64: 1, 256>}, {pipeline_mode = #tpu.pipeline_mode<synchronous>, transform_indices = @transform_19, window_bounds = array<i64: 256, 256>}, {pipeline_mode = #tpu.pipeline_mode<synchronous>, transform_indices = @transform_20, window_bounds = array<i64: 256, 4>}, {pipeline_mode = #tpu.pipeline_mode<synchronous>, transform_indices = @transform_21, window_bounds = array<i64: 64, 128>}, {pipeline_mode = #tpu.pipeline_mode<synchronous>, transform_indices = @transform_22, window_bounds = array<i64: 4, 128>}, {pipeline_mode = #tpu.pipeline_mode<synchronous>, transform_indices = @transform_23, window_bounds = array<i64: 1, 128>}, {pipeline_mode = #tpu.pipeline_mode<synchronous>, transform_indices = @transform_24, window_bounds = array<i64: 128, 64>}, {pipeline_mode = #tpu.pipeline_mode<synchronous>, transform_indices = @transform_25, window_bounds = array<i64: 1, 64>}, {pipeline_mode = #tpu.pipeline_mode<synchronous>, transform_indices = @transform_26, window_bounds = array<i64: 64, 32>}, {pipeline_mode = #tpu.pipeline_mode<synchronous>, transform_indices = @transform_27, window_bounds = array<i64: 1, 32>}, {pipeline_mode = #tpu.pipeline_mode<synchronous>, transform_indices = @transform_28, window_bounds = array<i64: 32, 128>}, {pipeline_mode = #tpu.pipeline_mode<synchronous>, transform_indices = @transform_29, window_bounds = array<i64: 1, 128>}, {transform_indices = @transform_30, window_bounds = array<i64: 1, 1, 128>}]} {
    %c0 = arith.constant 0 : index
    %c0_0 = arith.constant 0 : index
    %c0_1 = arith.constant 0 : index
    %0 = vector.load %arg1[%c0, %c0_0, %c0_1] : memref<1x196x32xf32, #tpu.memory_space<vmem>>, vector<1x196x32xf32>
    %1 = vector.shape_cast %0 : vector<1x196x32xf32> to vector<196x32xf32>
    %c0_2 = arith.constant 0 : index
    %c0_3 = arith.constant 0 : index
    %2 = vector.load %arg3[%c0_2, %c0_3] : memref<32x16xf32, #tpu.memory_space<vmem>>, vector<32x16xf32>
    %cst = arith.constant dense<0.000000e+00> : vector<196x16xf32>
    %3 = tpu.matmul %1, %2, %cst {dimension_numbers = #tpu.dot_dimension_numbers<[1], [0], [0], [1], [0, 0, 1, 1], [], []>} : vector<196x32xf32>, vector<32x16xf32>, vector<196x16xf32> -> vector<196x16xf32>
    %c0_4 = arith.constant 0 : index
    %c0_5 = arith.constant 0 : index
    %4 = vector.load %arg4[%c0_4, %c0_5] : memref<1x16xf32, #tpu.memory_space<vmem>>, vector<1x16xf32>
    %5 = vector.broadcast %4 : vector<1x16xf32> to vector<196x16xf32>
    %6 = arith.addf %3, %5 : vector<196x16xf32>
    %cst_6 = arith.constant 0.000000e+00 : f32
    %7 = vector.broadcast %cst_6 : f32 to vector<196x16xf32>
    %8 = arith.maximumf %6, %7 : vector<196x16xf32>
    %cst_7 = arith.constant 0.000000e+00 : f32
    %9 = vector.broadcast %cst_7 : f32 to vector<49x32xf32>
    %c0_8 = arith.constant 0 : index
    %c0_9 = arith.constant 0 : index
    %c0_10 = arith.constant 0 : index
    %10 = vector.load %arg5[%c0_8, %c0_9, %c0_10] : memref<9x49x196xf32, #tpu.memory_space<vmem>>, vector<1x49x196xf32>
    %11 = vector.shape_cast %10 : vector<1x49x196xf32> to vector<49x196xf32>
    %cst_11 = arith.constant dense<0.000000e+00> : vector<49x16xf32>
    %12 = tpu.matmul %11, %8, %cst_11 {dimension_numbers = #tpu.dot_dimension_numbers<[1], [0], [0], [1], [0, 0, 1, 1], [], []>} : vector<49x196xf32>, vector<196x16xf32>, vector<49x16xf32> -> vector<49x16xf32>
    %c0_12 = arith.constant 0 : index
    %c0_13 = arith.constant 0 : index
    %c0_14 = arith.constant 0 : index
    %13 = vector.load %arg6[%c0_12, %c0_13, %c0_14] : memref<9x16x32xf32, #tpu.memory_space<vmem>>, vector<1x16x32xf32>
    %14 = vector.shape_cast %13 : vector<1x16x32xf32> to vector<16x32xf32>
    %cst_15 = arith.constant dense<0.000000e+00> : vector<49x32xf32>
    %15 = tpu.matmul %12, %14, %cst_15 {dimension_numbers = #tpu.dot_dimension_numbers<[1], [0], [0], [1], [0, 0, 1, 1], [], []>} : vector<49x16xf32>, vector<16x32xf32>, vector<49x32xf32> -> vector<49x32xf32>
    %16 = arith.addf %9, %15 : vector<49x32xf32>
    %c1 = arith.constant 1 : index
    %c0_16 = arith.constant 0 : index
    %c0_17 = arith.constant 0 : index
    %17 = vector.load %arg5[%c1, %c0_16, %c0_17] : memref<9x49x196xf32, #tpu.memory_space<vmem>>, vector<1x49x196xf32>
    %18 = vector.shape_cast %17 : vector<1x49x196xf32> to vector<49x196xf32>
    %cst_18 = arith.constant dense<0.000000e+00> : vector<49x16xf32>
    %19 = tpu.matmul %18, %8, %cst_18 {dimension_numbers = #tpu.dot_dimension_numbers<[1], [0], [0], [1], [0, 0, 1, 1], [], []>} : vector<49x196xf32>, vector<196x16xf32>, vector<49x16xf32> -> vector<49x16xf32>
    %c1_19 = arith.constant 1 : index
    %c0_20 = arith.constant 0 : index
    %c0_21 = arith.constant 0 : index
    %20 = vector.load %arg6[%c1_19, %c0_20, %c0_21] : memref<9x16x32xf32, #tpu.memory_space<vmem>>, vector<1x16x32xf32>
    %21 = vector.shape_cast %20 : vector<1x16x32xf32> to vector<16x32xf32>
    %cst_22 = arith.constant dense<0.000000e+00> : vector<49x32xf32>
    %22 = tpu.matmul %19, %21, %cst_22 {dimension_numbers = #tpu.dot_dimension_numbers<[1], [0], [0], [1], [0, 0, 1, 1], [], []>} : vector<49x16xf32>, vector<16x32xf32>, vector<49x32xf32> -> vector<49x32xf32>
    %23 = arith.addf %16, %22 : vector<49x32xf32>
    %c2 = arith.constant 2 : index
    %c0_23 = arith.constant 0 : index
    %c0_24 = arith.constant 0 : index
    %24 = vector.load %arg5[%c2, %c0_23, %c0_24] : memref<9x49x196xf32, #tpu.memory_space<vmem>>, vector<1x49x196xf32>
    %25 = vector.shape_cast %24 : vector<1x49x196xf32> to vector<49x196xf32>
    %cst_25 = arith.constant dense<0.000000e+00> : vector<49x16xf32>
    %26 = tpu.matmul %25, %8, %cst_25 {dimension_numbers = #tpu.dot_dimension_numbers<[1], [0], [0], [1], [0, 0, 1, 1], [], []>} : vector<49x196xf32>, vector<196x16xf32>, vector<49x16xf32> -> vector<49x16xf32>
    %c2_26 = arith.constant 2 : index
    %c0_27 = arith.constant 0 : index
    %c0_28 = arith.constant 0 : index
    %27 = vector.load %arg6[%c2_26, %c0_27, %c0_28] : memref<9x16x32xf32, #tpu.memory_space<vmem>>, vector<1x16x32xf32>
    %28 = vector.shape_cast %27 : vector<1x16x32xf32> to vector<16x32xf32>
    %cst_29 = arith.constant dense<0.000000e+00> : vector<49x32xf32>
    %29 = tpu.matmul %26, %28, %cst_29 {dimension_numbers = #tpu.dot_dimension_numbers<[1], [0], [0], [1], [0, 0, 1, 1], [], []>} : vector<49x16xf32>, vector<16x32xf32>, vector<49x32xf32> -> vector<49x32xf32>
    %30 = arith.addf %23, %29 : vector<49x32xf32>
    %c3 = arith.constant 3 : index
    %c0_30 = arith.constant 0 : index
    %c0_31 = arith.constant 0 : index
    %31 = vector.load %arg5[%c3, %c0_30, %c0_31] : memref<9x49x196xf32, #tpu.memory_space<vmem>>, vector<1x49x196xf32>
    %32 = vector.shape_cast %31 : vector<1x49x196xf32> to vector<49x196xf32>
    %cst_32 = arith.constant dense<0.000000e+00> : vector<49x16xf32>
    %33 = tpu.matmul %32, %8, %cst_32 {dimension_numbers = #tpu.dot_dimension_numbers<[1], [0], [0], [1], [0, 0, 1, 1], [], []>} : vector<49x196xf32>, vector<196x16xf32>, vector<49x16xf32> -> vector<49x16xf32>
    %c3_33 = arith.constant 3 : index
    %c0_34 = arith.constant 0 : index
    %c0_35 = arith.constant 0 : index
    %34 = vector.load %arg6[%c3_33, %c0_34, %c0_35] : memref<9x16x32xf32, #tpu.memory_space<vmem>>, vector<1x16x32xf32>
    %35 = vector.shape_cast %34 : vector<1x16x32xf32> to vector<16x32xf32>
    %cst_36 = arith.constant dense<0.000000e+00> : vector<49x32xf32>
    %36 = tpu.matmul %33, %35, %cst_36 {dimension_numbers = #tpu.dot_dimension_numbers<[1], [0], [0], [1], [0, 0, 1, 1], [], []>} : vector<49x16xf32>, vector<16x32xf32>, vector<49x32xf32> -> vector<49x32xf32>
    %37 = arith.addf %30, %36 : vector<49x32xf32>
    %c4 = arith.constant 4 : index
    %c0_37 = arith.constant 0 : index
    %c0_38 = arith.constant 0 : index
    %38 = vector.load %arg5[%c4, %c0_37, %c0_38] : memref<9x49x196xf32, #tpu.memory_space<vmem>>, vector<1x49x196xf32>
    %39 = vector.shape_cast %38 : vector<1x49x196xf32> to vector<49x196xf32>
    %cst_39 = arith.constant dense<0.000000e+00> : vector<49x16xf32>
    %40 = tpu.matmul %39, %8, %cst_39 {dimension_numbers = #tpu.dot_dimension_numbers<[1], [0], [0], [1], [0, 0, 1, 1], [], []>} : vector<49x196xf32>, vector<196x16xf32>, vector<49x16xf32> -> vector<49x16xf32>
    %c4_40 = arith.constant 4 : index
    %c0_41 = arith.constant 0 : index
    %c0_42 = arith.constant 0 : index
    %41 = vector.load %arg6[%c4_40, %c0_41, %c0_42] : memref<9x16x32xf32, #tpu.memory_space<vmem>>, vector<1x16x32xf32>
    %42 = vector.shape_cast %41 : vector<1x16x32xf32> to vector<16x32xf32>
    %cst_43 = arith.constant dense<0.000000e+00> : vector<49x32xf32>
    %43 = tpu.matmul %40, %42, %cst_43 {dimension_numbers = #tpu.dot_dimension_numbers<[1], [0], [0], [1], [0, 0, 1, 1], [], []>} : vector<49x16xf32>, vector<16x32xf32>, vector<49x32xf32> -> vector<49x32xf32>
    %44 = arith.addf %37, %43 : vector<49x32xf32>
    %c5 = arith.constant 5 : index
    %c0_44 = arith.constant 0 : index
    %c0_45 = arith.constant 0 : index
    %45 = vector.load %arg5[%c5, %c0_44, %c0_45] : memref<9x49x196xf32, #tpu.memory_space<vmem>>, vector<1x49x196xf32>
    %46 = vector.shape_cast %45 : vector<1x49x196xf32> to vector<49x196xf32>
    %cst_46 = arith.constant dense<0.000000e+00> : vector<49x16xf32>
    %47 = tpu.matmul %46, %8, %cst_46 {dimension_numbers = #tpu.dot_dimension_numbers<[1], [0], [0], [1], [0, 0, 1, 1], [], []>} : vector<49x196xf32>, vector<196x16xf32>, vector<49x16xf32> -> vector<49x16xf32>
    %c5_47 = arith.constant 5 : index
    %c0_48 = arith.constant 0 : index
    %c0_49 = arith.constant 0 : index
    %48 = vector.load %arg6[%c5_47, %c0_48, %c0_49] : memref<9x16x32xf32, #tpu.memory_space<vmem>>, vector<1x16x32xf32>
    %49 = vector.shape_cast %48 : vector<1x16x32xf32> to vector<16x32xf32>
    %cst_50 = arith.constant dense<0.000000e+00> : vector<49x32xf32>
    %50 = tpu.matmul %47, %49, %cst_50 {dimension_numbers = #tpu.dot_dimension_numbers<[1], [0], [0], [1], [0, 0, 1, 1], [], []>} : vector<49x16xf32>, vector<16x32xf32>, vector<49x32xf32> -> vector<49x32xf32>
    %51 = arith.addf %44, %50 : vector<49x32xf32>
    %c6 = arith.constant 6 : index
    %c0_51 = arith.constant 0 : index
    %c0_52 = arith.constant 0 : index
    %52 = vector.load %arg5[%c6, %c0_51, %c0_52] : memref<9x49x196xf32, #tpu.memory_space<vmem>>, vector<1x49x196xf32>
    %53 = vector.shape_cast %52 : vector<1x49x196xf32> to vector<49x196xf32>
    %cst_53 = arith.constant dense<0.000000e+00> : vector<49x16xf32>
    %54 = tpu.matmul %53, %8, %cst_53 {dimension_numbers = #tpu.dot_dimension_numbers<[1], [0], [0], [1], [0, 0, 1, 1], [], []>} : vector<49x196xf32>, vector<196x16xf32>, vector<49x16xf32> -> vector<49x16xf32>
    %c6_54 = arith.constant 6 : index
    %c0_55 = arith.constant 0 : index
    %c0_56 = arith.constant 0 : index
    %55 = vector.load %arg6[%c6_54, %c0_55, %c0_56] : memref<9x16x32xf32, #tpu.memory_space<vmem>>, vector<1x16x32xf32>
    %56 = vector.shape_cast %55 : vector<1x16x32xf32> to vector<16x32xf32>
    %cst_57 = arith.constant dense<0.000000e+00> : vector<49x32xf32>
    %57 = tpu.matmul %54, %56, %cst_57 {dimension_numbers = #tpu.dot_dimension_numbers<[1], [0], [0], [1], [0, 0, 1, 1], [], []>} : vector<49x16xf32>, vector<16x32xf32>, vector<49x32xf32> -> vector<49x32xf32>
    %58 = arith.addf %51, %57 : vector<49x32xf32>
    %c7 = arith.constant 7 : index
    %c0_58 = arith.constant 0 : index
    %c0_59 = arith.constant 0 : index
    %59 = vector.load %arg5[%c7, %c0_58, %c0_59] : memref<9x49x196xf32, #tpu.memory_space<vmem>>, vector<1x49x196xf32>
    %60 = vector.shape_cast %59 : vector<1x49x196xf32> to vector<49x196xf32>
    %cst_60 = arith.constant dense<0.000000e+00> : vector<49x16xf32>
    %61 = tpu.matmul %60, %8, %cst_60 {dimension_numbers = #tpu.dot_dimension_numbers<[1], [0], [0], [1], [0, 0, 1, 1], [], []>} : vector<49x196xf32>, vector<196x16xf32>, vector<49x16xf32> -> vector<49x16xf32>
    %c7_61 = arith.constant 7 : index
    %c0_62 = arith.constant 0 : index
    %c0_63 = arith.constant 0 : index
    %62 = vector.load %arg6[%c7_61, %c0_62, %c0_63] : memref<9x16x32xf32, #tpu.memory_space<vmem>>, vector<1x16x32xf32>
    %63 = vector.shape_cast %62 : vector<1x16x32xf32> to vector<16x32xf32>
    %cst_64 = arith.constant dense<0.000000e+00> : vector<49x32xf32>
    %64 = tpu.matmul %61, %63, %cst_64 {dimension_numbers = #tpu.dot_dimension_numbers<[1], [0], [0], [1], [0, 0, 1, 1], [], []>} : vector<49x16xf32>, vector<16x32xf32>, vector<49x32xf32> -> vector<49x32xf32>
    %65 = arith.addf %58, %64 : vector<49x32xf32>
    %c8 = arith.constant 8 : index
    %c0_65 = arith.constant 0 : index
    %c0_66 = arith.constant 0 : index
    %66 = vector.load %arg5[%c8, %c0_65, %c0_66] : memref<9x49x196xf32, #tpu.memory_space<vmem>>, vector<1x49x196xf32>
    %67 = vector.shape_cast %66 : vector<1x49x196xf32> to vector<49x196xf32>
    %cst_67 = arith.constant dense<0.000000e+00> : vector<49x16xf32>
    %68 = tpu.matmul %67, %8, %cst_67 {dimension_numbers = #tpu.dot_dimension_numbers<[1], [0], [0], [1], [0, 0, 1, 1], [], []>} : vector<49x196xf32>, vector<196x16xf32>, vector<49x16xf32> -> vector<49x16xf32>
    %c8_68 = arith.constant 8 : index
    %c0_69 = arith.constant 0 : index
    %c0_70 = arith.constant 0 : index
    %69 = vector.load %arg6[%c8_68, %c0_69, %c0_70] : memref<9x16x32xf32, #tpu.memory_space<vmem>>, vector<1x16x32xf32>
    %70 = vector.shape_cast %69 : vector<1x16x32xf32> to vector<16x32xf32>
    %cst_71 = arith.constant dense<0.000000e+00> : vector<49x32xf32>
    %71 = tpu.matmul %68, %70, %cst_71 {dimension_numbers = #tpu.dot_dimension_numbers<[1], [0], [0], [1], [0, 0, 1, 1], [], []>} : vector<49x16xf32>, vector<16x32xf32>, vector<49x32xf32> -> vector<49x32xf32>
    %72 = arith.addf %65, %71 : vector<49x32xf32>
    %c0_72 = arith.constant 0 : index
    %c0_73 = arith.constant 0 : index
    %73 = vector.load %arg7[%c0_72, %c0_73] : memref<1x32xf32, #tpu.memory_space<vmem>>, vector<1x32xf32>
    %74 = vector.broadcast %73 : vector<1x32xf32> to vector<49x32xf32>
    %75 = arith.addf %72, %74 : vector<49x32xf32>
    %cst_74 = arith.constant 0.000000e+00 : f32
    %76 = vector.broadcast %cst_74 : f32 to vector<49x32xf32>
    %77 = arith.maximumf %75, %76 : vector<49x32xf32>
    %cst_75 = arith.constant 0.000000e+00 : f32
    %78 = vector.broadcast %cst_75 : f32 to vector<49x64xf32>
    %c0_76 = arith.constant 0 : index
    %c0_77 = arith.constant 0 : index
    %c0_78 = arith.constant 0 : index
    %79 = vector.load %arg8[%c0_76, %c0_77, %c0_78] : memref<9x49x49xf32, #tpu.memory_space<vmem>>, vector<1x49x49xf32>
    %80 = vector.shape_cast %79 : vector<1x49x49xf32> to vector<49x49xf32>
    %cst_79 = arith.constant dense<0.000000e+00> : vector<49x32xf32>
    %81 = tpu.matmul %80, %77, %cst_79 {dimension_numbers = #tpu.dot_dimension_numbers<[1], [0], [0], [1], [0, 0, 1, 1], [], []>} : vector<49x49xf32>, vector<49x32xf32>, vector<49x32xf32> -> vector<49x32xf32>
    %c0_80 = arith.constant 0 : index
    %c0_81 = arith.constant 0 : index
    %c0_82 = arith.constant 0 : index
    %82 = vector.load %arg9[%c0_80, %c0_81, %c0_82] : memref<9x32x64xf32, #tpu.memory_space<vmem>>, vector<1x32x64xf32>
    %83 = vector.shape_cast %82 : vector<1x32x64xf32> to vector<32x64xf32>
    %cst_83 = arith.constant dense<0.000000e+00> : vector<49x64xf32>
    %84 = tpu.matmul %81, %83, %cst_83 {dimension_numbers = #tpu.dot_dimension_numbers<[1], [0], [0], [1], [0, 0, 1, 1], [], []>} : vector<49x32xf32>, vector<32x64xf32>, vector<49x64xf32> -> vector<49x64xf32>
    %85 = arith.addf %78, %84 : vector<49x64xf32>
    %c1_84 = arith.constant 1 : index
    %c0_85 = arith.constant 0 : index
    %c0_86 = arith.constant 0 : index
    %86 = vector.load %arg8[%c1_84, %c0_85, %c0_86] : memref<9x49x49xf32, #tpu.memory_space<vmem>>, vector<1x49x49xf32>
    %87 = vector.shape_cast %86 : vector<1x49x49xf32> to vector<49x49xf32>
    %cst_87 = arith.constant dense<0.000000e+00> : vector<49x32xf32>
    %88 = tpu.matmul %87, %77, %cst_87 {dimension_numbers = #tpu.dot_dimension_numbers<[1], [0], [0], [1], [0, 0, 1, 1], [], []>} : vector<49x49xf32>, vector<49x32xf32>, vector<49x32xf32> -> vector<49x32xf32>
    %c1_88 = arith.constant 1 : index
    %c0_89 = arith.constant 0 : index
    %c0_90 = arith.constant 0 : index
    %89 = vector.load %arg9[%c1_88, %c0_89, %c0_90] : memref<9x32x64xf32, #tpu.memory_space<vmem>>, vector<1x32x64xf32>
    %90 = vector.shape_cast %89 : vector<1x32x64xf32> to vector<32x64xf32>
    %cst_91 = arith.constant dense<0.000000e+00> : vector<49x64xf32>
    %91 = tpu.matmul %88, %90, %cst_91 {dimension_numbers = #tpu.dot_dimension_numbers<[1], [0], [0], [1], [0, 0, 1, 1], [], []>} : vector<49x32xf32>, vector<32x64xf32>, vector<49x64xf32> -> vector<49x64xf32>
    %92 = arith.addf %85, %91 : vector<49x64xf32>
    %c2_92 = arith.constant 2 : index
    %c0_93 = arith.constant 0 : index
    %c0_94 = arith.constant 0 : index
    %93 = vector.load %arg8[%c2_92, %c0_93, %c0_94] : memref<9x49x49xf32, #tpu.memory_space<vmem>>, vector<1x49x49xf32>
    %94 = vector.shape_cast %93 : vector<1x49x49xf32> to vector<49x49xf32>
    %cst_95 = arith.constant dense<0.000000e+00> : vector<49x32xf32>
    %95 = tpu.matmul %94, %77, %cst_95 {dimension_numbers = #tpu.dot_dimension_numbers<[1], [0], [0], [1], [0, 0, 1, 1], [], []>} : vector<49x49xf32>, vector<49x32xf32>, vector<49x32xf32> -> vector<49x32xf32>
    %c2_96 = arith.constant 2 : index
    %c0_97 = arith.constant 0 : index
    %c0_98 = arith.constant 0 : index
    %96 = vector.load %arg9[%c2_96, %c0_97, %c0_98] : memref<9x32x64xf32, #tpu.memory_space<vmem>>, vector<1x32x64xf32>
    %97 = vector.shape_cast %96 : vector<1x32x64xf32> to vector<32x64xf32>
    %cst_99 = arith.constant dense<0.000000e+00> : vector<49x64xf32>
    %98 = tpu.matmul %95, %97, %cst_99 {dimension_numbers = #tpu.dot_dimension_numbers<[1], [0], [0], [1], [0, 0, 1, 1], [], []>} : vector<49x32xf32>, vector<32x64xf32>, vector<49x64xf32> -> vector<49x64xf32>
    %99 = arith.addf %92, %98 : vector<49x64xf32>
    %c3_100 = arith.constant 3 : index
    %c0_101 = arith.constant 0 : index
    %c0_102 = arith.constant 0 : index
    %100 = vector.load %arg8[%c3_100, %c0_101, %c0_102] : memref<9x49x49xf32, #tpu.memory_space<vmem>>, vector<1x49x49xf32>
    %101 = vector.shape_cast %100 : vector<1x49x49xf32> to vector<49x49xf32>
    %cst_103 = arith.constant dense<0.000000e+00> : vector<49x32xf32>
    %102 = tpu.matmul %101, %77, %cst_103 {dimension_numbers = #tpu.dot_dimension_numbers<[1], [0], [0], [1], [0, 0, 1, 1], [], []>} : vector<49x49xf32>, vector<49x32xf32>, vector<49x32xf32> -> vector<49x32xf32>
    %c3_104 = arith.constant 3 : index
    %c0_105 = arith.constant 0 : index
    %c0_106 = arith.constant 0 : index
    %103 = vector.load %arg9[%c3_104, %c0_105, %c0_106] : memref<9x32x64xf32, #tpu.memory_space<vmem>>, vector<1x32x64xf32>
    %104 = vector.shape_cast %103 : vector<1x32x64xf32> to vector<32x64xf32>
    %cst_107 = arith.constant dense<0.000000e+00> : vector<49x64xf32>
    %105 = tpu.matmul %102, %104, %cst_107 {dimension_numbers = #tpu.dot_dimension_numbers<[1], [0], [0], [1], [0, 0, 1, 1], [], []>} : vector<49x32xf32>, vector<32x64xf32>, vector<49x64xf32> -> vector<49x64xf32>
    %106 = arith.addf %99, %105 : vector<49x64xf32>
    %c4_108 = arith.constant 4 : index
    %c0_109 = arith.constant 0 : index
    %c0_110 = arith.constant 0 : index
    %107 = vector.load %arg8[%c4_108, %c0_109, %c0_110] : memref<9x49x49xf32, #tpu.memory_space<vmem>>, vector<1x49x49xf32>
    %108 = vector.shape_cast %107 : vector<1x49x49xf32> to vector<49x49xf32>
    %cst_111 = arith.constant dense<0.000000e+00> : vector<49x32xf32>
    %109 = tpu.matmul %108, %77, %cst_111 {dimension_numbers = #tpu.dot_dimension_numbers<[1], [0], [0], [1], [0, 0, 1, 1], [], []>} : vector<49x49xf32>, vector<49x32xf32>, vector<49x32xf32> -> vector<49x32xf32>
    %c4_112 = arith.constant 4 : index
    %c0_113 = arith.constant 0 : index
    %c0_114 = arith.constant 0 : index
    %110 = vector.load %arg9[%c4_112, %c0_113, %c0_114] : memref<9x32x64xf32, #tpu.memory_space<vmem>>, vector<1x32x64xf32>
    %111 = vector.shape_cast %110 : vector<1x32x64xf32> to vector<32x64xf32>
    %cst_115 = arith.constant dense<0.000000e+00> : vector<49x64xf32>
    %112 = tpu.matmul %109, %111, %cst_115 {dimension_numbers = #tpu.dot_dimension_numbers<[1], [0], [0], [1], [0, 0, 1, 1], [], []>} : vector<49x32xf32>, vector<32x64xf32>, vector<49x64xf32> -> vector<49x64xf32>
    %113 = arith.addf %106, %112 : vector<49x64xf32>
    %c5_116 = arith.constant 5 : index
    %c0_117 = arith.constant 0 : index
    %c0_118 = arith.constant 0 : index
    %114 = vector.load %arg8[%c5_116, %c0_117, %c0_118] : memref<9x49x49xf32, #tpu.memory_space<vmem>>, vector<1x49x49xf32>
    %115 = vector.shape_cast %114 : vector<1x49x49xf32> to vector<49x49xf32>
    %cst_119 = arith.constant dense<0.000000e+00> : vector<49x32xf32>
    %116 = tpu.matmul %115, %77, %cst_119 {dimension_numbers = #tpu.dot_dimension_numbers<[1], [0], [0], [1], [0, 0, 1, 1], [], []>} : vector<49x49xf32>, vector<49x32xf32>, vector<49x32xf32> -> vector<49x32xf32>
    %c5_120 = arith.constant 5 : index
    %c0_121 = arith.constant 0 : index
    %c0_122 = arith.constant 0 : index
    %117 = vector.load %arg9[%c5_120, %c0_121, %c0_122] : memref<9x32x64xf32, #tpu.memory_space<vmem>>, vector<1x32x64xf32>
    %118 = vector.shape_cast %117 : vector<1x32x64xf32> to vector<32x64xf32>
    %cst_123 = arith.constant dense<0.000000e+00> : vector<49x64xf32>
    %119 = tpu.matmul %116, %118, %cst_123 {dimension_numbers = #tpu.dot_dimension_numbers<[1], [0], [0], [1], [0, 0, 1, 1], [], []>} : vector<49x32xf32>, vector<32x64xf32>, vector<49x64xf32> -> vector<49x64xf32>
    %120 = arith.addf %113, %119 : vector<49x64xf32>
    %c6_124 = arith.constant 6 : index
    %c0_125 = arith.constant 0 : index
    %c0_126 = arith.constant 0 : index
    %121 = vector.load %arg8[%c6_124, %c0_125, %c0_126] : memref<9x49x49xf32, #tpu.memory_space<vmem>>, vector<1x49x49xf32>
    %122 = vector.shape_cast %121 : vector<1x49x49xf32> to vector<49x49xf32>
    %cst_127 = arith.constant dense<0.000000e+00> : vector<49x32xf32>
    %123 = tpu.matmul %122, %77, %cst_127 {dimension_numbers = #tpu.dot_dimension_numbers<[1], [0], [0], [1], [0, 0, 1, 1], [], []>} : vector<49x49xf32>, vector<49x32xf32>, vector<49x32xf32> -> vector<49x32xf32>
    %c6_128 = arith.constant 6 : index
    %c0_129 = arith.constant 0 : index
    %c0_130 = arith.constant 0 : index
    %124 = vector.load %arg9[%c6_128, %c0_129, %c0_130] : memref<9x32x64xf32, #tpu.memory_space<vmem>>, vector<1x32x64xf32>
    %125 = vector.shape_cast %124 : vector<1x32x64xf32> to vector<32x64xf32>
    %cst_131 = arith.constant dense<0.000000e+00> : vector<49x64xf32>
    %126 = tpu.matmul %123, %125, %cst_131 {dimension_numbers = #tpu.dot_dimension_numbers<[1], [0], [0], [1], [0, 0, 1, 1], [], []>} : vector<49x32xf32>, vector<32x64xf32>, vector<49x64xf32> -> vector<49x64xf32>
    %127 = arith.addf %120, %126 : vector<49x64xf32>
    %c7_132 = arith.constant 7 : index
    %c0_133 = arith.constant 0 : index
    %c0_134 = arith.constant 0 : index
    %128 = vector.load %arg8[%c7_132, %c0_133, %c0_134] : memref<9x49x49xf32, #tpu.memory_space<vmem>>, vector<1x49x49xf32>
    %129 = vector.shape_cast %128 : vector<1x49x49xf32> to vector<49x49xf32>
    %cst_135 = arith.constant dense<0.000000e+00> : vector<49x32xf32>
    %130 = tpu.matmul %129, %77, %cst_135 {dimension_numbers = #tpu.dot_dimension_numbers<[1], [0], [0], [1], [0, 0, 1, 1], [], []>} : vector<49x49xf32>, vector<49x32xf32>, vector<49x32xf32> -> vector<49x32xf32>
    %c7_136 = arith.constant 7 : index
    %c0_137 = arith.constant 0 : index
    %c0_138 = arith.constant 0 : index
    %131 = vector.load %arg9[%c7_136, %c0_137, %c0_138] : memref<9x32x64xf32, #tpu.memory_space<vmem>>, vector<1x32x64xf32>
    %132 = vector.shape_cast %131 : vector<1x32x64xf32> to vector<32x64xf32>
    %cst_139 = arith.constant dense<0.000000e+00> : vector<49x64xf32>
    %133 = tpu.matmul %130, %132, %cst_139 {dimension_numbers = #tpu.dot_dimension_numbers<[1], [0], [0], [1], [0, 0, 1, 1], [], []>} : vector<49x32xf32>, vector<32x64xf32>, vector<49x64xf32> -> vector<49x64xf32>
    %134 = arith.addf %127, %133 : vector<49x64xf32>
    %c8_140 = arith.constant 8 : index
    %c0_141 = arith.constant 0 : index
    %c0_142 = arith.constant 0 : index
    %135 = vector.load %arg8[%c8_140, %c0_141, %c0_142] : memref<9x49x49xf32, #tpu.memory_space<vmem>>, vector<1x49x49xf32>
    %136 = vector.shape_cast %135 : vector<1x49x49xf32> to vector<49x49xf32>
    %cst_143 = arith.constant dense<0.000000e+00> : vector<49x32xf32>
    %137 = tpu.matmul %136, %77, %cst_143 {dimension_numbers = #tpu.dot_dimension_numbers<[1], [0], [0], [1], [0, 0, 1, 1], [], []>} : vector<49x49xf32>, vector<49x32xf32>, vector<49x32xf32> -> vector<49x32xf32>
    %c8_144 = arith.constant 8 : index
    %c0_145 = arith.constant 0 : index
    %c0_146 = arith.constant 0 : index
    %138 = vector.load %arg9[%c8_144, %c0_145, %c0_146] : memref<9x32x64xf32, #tpu.memory_space<vmem>>, vector<1x32x64xf32>
    %139 = vector.shape_cast %138 : vector<1x32x64xf32> to vector<32x64xf32>
    %cst_147 = arith.constant dense<0.000000e+00> : vector<49x64xf32>
    %140 = tpu.matmul %137, %139, %cst_147 {dimension_numbers = #tpu.dot_dimension_numbers<[1], [0], [0], [1], [0, 0, 1, 1], [], []>} : vector<49x32xf32>, vector<32x64xf32>, vector<49x64xf32> -> vector<49x64xf32>
    %141 = arith.addf %134, %140 : vector<49x64xf32>
    %c0_148 = arith.constant 0 : index
    %c0_149 = arith.constant 0 : index
    %142 = vector.load %arg10[%c0_148, %c0_149] : memref<1x64xf32, #tpu.memory_space<vmem>>, vector<1x64xf32>
    %143 = vector.broadcast %142 : vector<1x64xf32> to vector<49x64xf32>
    %144 = arith.addf %141, %143 : vector<49x64xf32>
    %cst_150 = arith.constant 0.000000e+00 : f32
    %145 = vector.broadcast %cst_150 : f32 to vector<49x64xf32>
    %146 = arith.maximumf %144, %145 : vector<49x64xf32>
    %c0_151 = arith.constant 0 : index
    %c0_152 = arith.constant 0 : index
    %147 = vector.load %arg11[%c0_151, %c0_152] : memref<4x49xf32, #tpu.memory_space<vmem>>, vector<4x49xf32>
    %cst_153 = arith.constant dense<0.000000e+00> : vector<4x64xf32>
    %148 = tpu.matmul %147, %146, %cst_153 {dimension_numbers = #tpu.dot_dimension_numbers<[1], [0], [0], [1], [0, 0, 1, 1], [], []>} : vector<4x49xf32>, vector<49x64xf32>, vector<4x64xf32> -> vector<4x64xf32>
    %c0_154 = arith.constant 0 : index
    %c0_155 = arith.constant 0 : index
    %149 = vector.load %arg13[%c0_154, %c0_155] : memref<1x128xf32, #tpu.memory_space<vmem>>, vector<1x128xf32>
    %150 = vector.extract_strided_slice %148 {offsets = [0, 0], sizes = [1, 64], strides = [1, 1]} : vector<4x64xf32> to vector<1x64xf32>
    %c0_156 = arith.constant 0 : index
    %c0_157 = arith.constant 0 : index
    %151 = vector.load %arg12[%c0_156, %c0_157] : memref<256x128xf32, #tpu.memory_space<vmem>>, vector<64x128xf32>
    %cst_158 = arith.constant dense<0.000000e+00> : vector<1x128xf32>
    %152 = tpu.matmul %150, %151, %cst_158 {dimension_numbers = #tpu.dot_dimension_numbers<[1], [0], [0], [1], [0, 0, 1, 1], [], []>} : vector<1x64xf32>, vector<64x128xf32>, vector<1x128xf32> -> vector<1x128xf32>
    %153 = arith.addf %149, %152 : vector<1x128xf32>
    %154 = vector.extract_strided_slice %148 {offsets = [1, 0], sizes = [1, 64], strides = [1, 1]} : vector<4x64xf32> to vector<1x64xf32>
    %c64 = arith.constant 64 : index
    %c0_159 = arith.constant 0 : index
    %155 = vector.load %arg12[%c64, %c0_159] : memref<256x128xf32, #tpu.memory_space<vmem>>, vector<64x128xf32>
    %cst_160 = arith.constant dense<0.000000e+00> : vector<1x128xf32>
    %156 = tpu.matmul %154, %155, %cst_160 {dimension_numbers = #tpu.dot_dimension_numbers<[1], [0], [0], [1], [0, 0, 1, 1], [], []>} : vector<1x64xf32>, vector<64x128xf32>, vector<1x128xf32> -> vector<1x128xf32>
    %157 = arith.addf %153, %156 : vector<1x128xf32>
    %158 = vector.extract_strided_slice %148 {offsets = [2, 0], sizes = [1, 64], strides = [1, 1]} : vector<4x64xf32> to vector<1x64xf32>
    %c128 = arith.constant 128 : index
    %c0_161 = arith.constant 0 : index
    %159 = vector.load %arg12[%c128, %c0_161] : memref<256x128xf32, #tpu.memory_space<vmem>>, vector<64x128xf32>
    %cst_162 = arith.constant dense<0.000000e+00> : vector<1x128xf32>
    %160 = tpu.matmul %158, %159, %cst_162 {dimension_numbers = #tpu.dot_dimension_numbers<[1], [0], [0], [1], [0, 0, 1, 1], [], []>} : vector<1x64xf32>, vector<64x128xf32>, vector<1x128xf32> -> vector<1x128xf32>
    %161 = arith.addf %157, %160 : vector<1x128xf32>
    %162 = vector.extract_strided_slice %148 {offsets = [3, 0], sizes = [1, 64], strides = [1, 1]} : vector<4x64xf32> to vector<1x64xf32>
    %c192 = arith.constant 192 : index
    %c0_163 = arith.constant 0 : index
    %163 = vector.load %arg12[%c192, %c0_163] : memref<256x128xf32, #tpu.memory_space<vmem>>, vector<64x128xf32>
    %cst_164 = arith.constant dense<0.000000e+00> : vector<1x128xf32>
    %164 = tpu.matmul %162, %163, %cst_164 {dimension_numbers = #tpu.dot_dimension_numbers<[1], [0], [0], [1], [0, 0, 1, 1], [], []>} : vector<1x64xf32>, vector<64x128xf32>, vector<1x128xf32> -> vector<1x128xf32>
    %165 = arith.addf %161, %164 : vector<1x128xf32>
    %cst_165 = arith.constant 0.000000e+00 : f32
    %166 = vector.broadcast %cst_165 : f32 to vector<1x128xf32>
    %167 = arith.maximumf %165, %166 : vector<1x128xf32>
    %c0_166 = arith.constant 0 : index
    %c0_167 = arith.constant 0 : index
    %168 = vector.load %arg14[%c0_166, %c0_167] : memref<128x64xf32, #tpu.memory_space<vmem>>, vector<128x64xf32>
    %cst_168 = arith.constant dense<0.000000e+00> : vector<1x64xf32>
    %169 = tpu.matmul %167, %168, %cst_168 {dimension_numbers = #tpu.dot_dimension_numbers<[1], [0], [0], [1], [0, 0, 1, 1], [], []>} : vector<1x128xf32>, vector<128x64xf32>, vector<1x64xf32> -> vector<1x64xf32>
    %c0_169 = arith.constant 0 : index
    %c0_170 = arith.constant 0 : index
    %170 = vector.load %arg15[%c0_169, %c0_170] : memref<1x64xf32, #tpu.memory_space<vmem>>, vector<1x64xf32>
    %171 = arith.addf %169, %170 : vector<1x64xf32>
    %cst_171 = arith.constant 0.000000e+00 : f32
    %172 = vector.broadcast %cst_171 : f32 to vector<1x64xf32>
    %173 = arith.maximumf %171, %172 : vector<1x64xf32>
    %c0_172 = arith.constant 0 : index
    %c0_173 = arith.constant 0 : index
    %c0_174 = arith.constant 0 : index
    %174 = vector.load %arg2[%c0_172, %c0_173, %c0_174] : memref<1x1x784xf32, #tpu.memory_space<vmem>>, vector<1x1x784xf32>
    %175 = vector.shape_cast %174 : vector<1x1x784xf32> to vector<1x784xf32>
    %176 = arith.truncf %175 : vector<1x784xf32> to vector<1x784xbf16>
    %c0_175 = arith.constant 0 : index
    %c0_176 = arith.constant 0 : index
    %177 = vector.load %arg16[%c0_175, %c0_176] : memref<784x512xbf16, #tpu.memory_space<vmem>>, vector<784x512xbf16>
    %cst_177 = arith.constant dense<0.000000e+00> : vector<1x512xf32>
    %178 = tpu.matmul %176, %177, %cst_177 {dimension_numbers = #tpu.dot_dimension_numbers<[1], [0], [0], [1], [0, 0, 1, 1], [], []>} : vector<1x784xbf16>, vector<784x512xbf16>, vector<1x512xf32> -> vector<1x512xf32>
    %c0_178 = arith.constant 0 : index
    %c0_179 = arith.constant 0 : index
    %179 = vector.load %arg17[%c0_178, %c0_179] : memref<1x512xf32, #tpu.memory_space<vmem>>, vector<1x512xf32>
    %180 = arith.addf %178, %179 : vector<1x512xf32>
    %cst_180 = arith.constant 0.000000e+00 : f32
    %181 = vector.broadcast %cst_180 : f32 to vector<1x512xf32>
    %182 = arith.maximumf %180, %181 : vector<1x512xf32>
    %183 = arith.truncf %182 : vector<1x512xf32> to vector<1x512xbf16>
    %c0_181 = arith.constant 0 : index
    %c0_182 = arith.constant 0 : index
    %184 = vector.load %arg18[%c0_181, %c0_182] : memref<512x256xbf16, #tpu.memory_space<vmem>>, vector<512x256xbf16>
    %cst_183 = arith.constant dense<0.000000e+00> : vector<1x256xf32>
    %185 = tpu.matmul %183, %184, %cst_183 {dimension_numbers = #tpu.dot_dimension_numbers<[1], [0], [0], [1], [0, 0, 1, 1], [], []>} : vector<1x512xbf16>, vector<512x256xbf16>, vector<1x256xf32> -> vector<1x256xf32>
    %c0_184 = arith.constant 0 : index
    %c0_185 = arith.constant 0 : index
    %186 = vector.load %arg19[%c0_184, %c0_185] : memref<1x256xf32, #tpu.memory_space<vmem>>, vector<1x256xf32>
    %187 = arith.addf %185, %186 : vector<1x256xf32>
    %188 = math.tanh %187 : vector<1x256xf32>
    %189 = arith.mulf %188, %188 : vector<1x256xf32>
    %cst_186 = arith.constant dense<0.000000e+00> : vector<1xf32>
    %190 = vector.multi_reduction <add>, %189, %cst_186 [1] : vector<1x256xf32> to vector<1xf32>
    %191 = vector.shape_cast %190 : vector<1xf32> to vector<1x1xf32>
    %cst_187 = arith.constant 1.000000e-24 : f32
    %192 = vector.broadcast %cst_187 : f32 to vector<1x1xf32>
    %193 = arith.maximumf %191, %192 : vector<1x1xf32>
    %194 = math.rsqrt %193 : vector<1x1xf32>
    %195 = vector.broadcast %194 : vector<1x1xf32> to vector<1x256xf32>
    %196 = arith.mulf %188, %195 : vector<1x256xf32>
    %c0_188 = arith.constant 0 : index
    %c0_189 = arith.constant 0 : index
    %197 = vector.load %arg20[%c0_188, %c0_189] : memref<256x256xf32, #tpu.memory_space<vmem>>, vector<256x256xf32>
    %cst_190 = arith.constant dense<0.000000e+00> : vector<1x256xf32>
    %198 = tpu.matmul %196, %197, %cst_190 {dimension_numbers = #tpu.dot_dimension_numbers<[1], [0], [0], [1], [0, 0, 1, 1], [], []>, precision = #tpu.contract_precision<fp32>} : vector<1x256xf32>, vector<256x256xf32>, vector<1x256xf32> -> vector<1x256xf32>
    %199 = arith.mulf %198, %198 : vector<1x256xf32>
    %c0_191 = arith.constant 0 : index
    %c0_192 = arith.constant 0 : index
    %200 = vector.load %arg21[%c0_191, %c0_192] : memref<256x4xf32, #tpu.memory_space<vmem>>, vector<256x4xf32>
    %cst_193 = arith.constant dense<0.000000e+00> : vector<1x4xf32>
    %201 = tpu.matmul %199, %200, %cst_193 {dimension_numbers = #tpu.dot_dimension_numbers<[1], [0], [0], [1], [0, 0, 1, 1], [], []>} : vector<1x256xf32>, vector<256x4xf32>, vector<1x4xf32> -> vector<1x4xf32>
    %c0_194 = arith.constant 0 : index
    %c0_195 = arith.constant 0 : index
    %202 = vector.load %arg22[%c0_194, %c0_195] : memref<64x128xf32, #tpu.memory_space<vmem>>, vector<64x128xf32>
    %cst_196 = arith.constant dense<0.000000e+00> : vector<1x128xf32>
    %203 = tpu.matmul %173, %202, %cst_196 {dimension_numbers = #tpu.dot_dimension_numbers<[1], [0], [0], [1], [0, 0, 1, 1], [], []>} : vector<1x64xf32>, vector<64x128xf32>, vector<1x128xf32> -> vector<1x128xf32>
    %c0_197 = arith.constant 0 : index
    %c0_198 = arith.constant 0 : index
    %204 = vector.load %arg23[%c0_197, %c0_198] : memref<4x128xf32, #tpu.memory_space<vmem>>, vector<4x128xf32>
    %cst_199 = arith.constant dense<0.000000e+00> : vector<1x128xf32>
    %205 = tpu.matmul %201, %204, %cst_199 {dimension_numbers = #tpu.dot_dimension_numbers<[1], [0], [0], [1], [0, 0, 1, 1], [], []>} : vector<1x4xf32>, vector<4x128xf32>, vector<1x128xf32> -> vector<1x128xf32>
    %206 = arith.addf %203, %205 : vector<1x128xf32>
    %c0_200 = arith.constant 0 : index
    %c0_201 = arith.constant 0 : index
    %207 = vector.load %arg24[%c0_200, %c0_201] : memref<1x128xf32, #tpu.memory_space<vmem>>, vector<1x128xf32>
    %208 = arith.addf %206, %207 : vector<1x128xf32>
    %cst_202 = arith.constant 0.000000e+00 : f32
    %209 = vector.broadcast %cst_202 : f32 to vector<1x128xf32>
    %210 = arith.maximumf %208, %209 : vector<1x128xf32>
    %c0_203 = arith.constant 0 : index
    %c0_204 = arith.constant 0 : index
    %211 = vector.load %arg25[%c0_203, %c0_204] : memref<128x64xf32, #tpu.memory_space<vmem>>, vector<128x64xf32>
    %cst_205 = arith.constant dense<0.000000e+00> : vector<1x64xf32>
    %212 = tpu.matmul %210, %211, %cst_205 {dimension_numbers = #tpu.dot_dimension_numbers<[1], [0], [0], [1], [0, 0, 1, 1], [], []>} : vector<1x128xf32>, vector<128x64xf32>, vector<1x64xf32> -> vector<1x64xf32>
    %c0_206 = arith.constant 0 : index
    %c0_207 = arith.constant 0 : index
    %213 = vector.load %arg26[%c0_206, %c0_207] : memref<1x64xf32, #tpu.memory_space<vmem>>, vector<1x64xf32>
    %214 = arith.addf %212, %213 : vector<1x64xf32>
    %cst_208 = arith.constant 0.000000e+00 : f32
    %215 = vector.broadcast %cst_208 : f32 to vector<1x64xf32>
    %216 = arith.maximumf %214, %215 : vector<1x64xf32>
    %c0_209 = arith.constant 0 : index
    %c0_210 = arith.constant 0 : index
    %217 = vector.load %arg27[%c0_209, %c0_210] : memref<64x32xf32, #tpu.memory_space<vmem>>, vector<64x32xf32>
    %cst_211 = arith.constant dense<0.000000e+00> : vector<1x32xf32>
    %218 = tpu.matmul %216, %217, %cst_211 {dimension_numbers = #tpu.dot_dimension_numbers<[1], [0], [0], [1], [0, 0, 1, 1], [], []>} : vector<1x64xf32>, vector<64x32xf32>, vector<1x32xf32> -> vector<1x32xf32>
    %c0_212 = arith.constant 0 : index
    %c0_213 = arith.constant 0 : index
    %219 = vector.load %arg28[%c0_212, %c0_213] : memref<1x32xf32, #tpu.memory_space<vmem>>, vector<1x32xf32>
    %220 = arith.addf %218, %219 : vector<1x32xf32>
    %cst_214 = arith.constant 0.000000e+00 : f32
    %221 = vector.broadcast %cst_214 : f32 to vector<1x32xf32>
    %222 = arith.maximumf %220, %221 : vector<1x32xf32>
    %c0_215 = arith.constant 0 : index
    %c0_216 = arith.constant 0 : index
    %223 = vector.load %arg29[%c0_215, %c0_216] : memref<32x128xf32, #tpu.memory_space<vmem>>, vector<32x128xf32>
    %cst_217 = arith.constant dense<0.000000e+00> : vector<1x128xf32>
    %224 = tpu.matmul %222, %223, %cst_217 {dimension_numbers = #tpu.dot_dimension_numbers<[1], [0], [0], [1], [0, 0, 1, 1], [], []>} : vector<1x32xf32>, vector<32x128xf32>, vector<1x128xf32> -> vector<1x128xf32>
    %c0_218 = arith.constant 0 : index
    %c0_219 = arith.constant 0 : index
    %225 = vector.load %arg30[%c0_218, %c0_219] : memref<1x128xf32, #tpu.memory_space<vmem>>, vector<1x128xf32>
    %226 = arith.addf %224, %225 : vector<1x128xf32>
    %227 = arith.negf %226 : vector<1x128xf32>
    %228 = math.exp %227 : vector<1x128xf32>
    %cst_220 = arith.constant 1.000000e+00 : f32
    %229 = vector.broadcast %cst_220 : f32 to vector<1x128xf32>
    %230 = arith.addf %229, %228 : vector<1x128xf32>
    %231 = arith.divf %229, %230 : vector<1x128xf32>
    %c0_221 = arith.constant 0 : index
    %c0_222 = arith.constant 0 : index
    %c0_223 = arith.constant 0 : index
    %232 = vector.load %arg31[%c0_221, %c0_222, %c0_223] : memref<1x1x128xf32, #tpu.memory_space<vmem>>, vector<1x1x128xf32>
    %233 = vector.shape_cast %232 : vector<1x1x128xf32> to vector<1x128xf32>
    %234 = vector.shape_cast %231 : vector<1x128xf32> to vector<1x1x128xf32>
    tpu.vector_store %arg31[%c0_221, %c0_222, %c0_223], %234 {strides = array<i32>} : memref<1x1x128xf32, #tpu.memory_space<vmem>>, vector<1x1x128xf32>,
    return
  }
  func.func @transform_0(%arg0: i32) -> (i32, i32, i32) {
    %c0_i32 = arith.constant 0 : i32
    %c0_i32_0 = arith.constant 0 : i32
    %c0_i32_1 = arith.constant 0 : i32
    return %arg0, %c0_i32, %c0_i32_0 : i32, i32, i32
  }
  func.func @transform_1(%arg0: i32) -> (i32, i32, i32) {
    %c0_i32 = arith.constant 0 : i32
    %c0_i32_0 = arith.constant 0 : i32
    %c0_i32_1 = arith.constant 0 : i32
    return %arg0, %c0_i32, %c0_i32_0 : i32, i32, i32
  }
  func.func @transform_2(%arg0: i32) -> (i32, i32) {
    %c0_i32 = arith.constant 0 : i32
    %c0_i32_0 = arith.constant 0 : i32
    %c0_i32_1 = arith.constant 0 : i32
    return %c0_i32, %c0_i32_0 : i32, i32
  }
  func.func @transform_3(%arg0: i32) -> (i32, i32) {
    %c0_i32 = arith.constant 0 : i32
    %c0_i32_0 = arith.constant 0 : i32
    %c0_i32_1 = arith.constant 0 : i32
    return %c0_i32, %c0_i32_0 : i32, i32
  }
  func.func @transform_4(%arg0: i32) -> (i32, i32, i32) {
    %c0_i32 = arith.constant 0 : i32
    %c0_i32_0 = arith.constant 0 : i32
    %c0_i32_1 = arith.constant 0 : i32
    %c0_i32_2 = arith.constant 0 : i32
    return %c0_i32, %c0_i32_0, %c0_i32_1 : i32, i32, i32
  }
  func.func @transform_5(%arg0: i32) -> (i32, i32, i32) {
    %c0_i32 = arith.constant 0 : i32
    %c0_i32_0 = arith.constant 0 : i32
    %c0_i32_1 = arith.constant 0 : i32
    %c0_i32_2 = arith.constant 0 : i32
    return %c0_i32, %c0_i32_0, %c0_i32_1 : i32, i32, i32
  }
  func.func @transform_6(%arg0: i32) -> (i32, i32) {
    %c0_i32 = arith.constant 0 : i32
    %c0_i32_0 = arith.constant 0 : i32
    %c0_i32_1 = arith.constant 0 : i32
    return %c0_i32, %c0_i32_0 : i32, i32
  }
  func.func @transform_7(%arg0: i32) -> (i32, i32, i32) {
    %c0_i32 = arith.constant 0 : i32
    %c0_i32_0 = arith.constant 0 : i32
    %c0_i32_1 = arith.constant 0 : i32
    %c0_i32_2 = arith.constant 0 : i32
    return %c0_i32, %c0_i32_0, %c0_i32_1 : i32, i32, i32
  }
  func.func @transform_8(%arg0: i32) -> (i32, i32, i32) {
    %c0_i32 = arith.constant 0 : i32
    %c0_i32_0 = arith.constant 0 : i32
    %c0_i32_1 = arith.constant 0 : i32
    %c0_i32_2 = arith.constant 0 : i32
    return %c0_i32, %c0_i32_0, %c0_i32_1 : i32, i32, i32
  }
  func.func @transform_9(%arg0: i32) -> (i32, i32) {
    %c0_i32 = arith.constant 0 : i32
    %c0_i32_0 = arith.constant 0 : i32
    %c0_i32_1 = arith.constant 0 : i32
    return %c0_i32, %c0_i32_0 : i32, i32
  }
  func.func @transform_10(%arg0: i32) -> (i32, i32) {
    %c0_i32 = arith.constant 0 : i32
    %c0_i32_0 = arith.constant 0 : i32
    %c0_i32_1 = arith.constant 0 : i32
    return %c0_i32, %c0_i32_0 : i32, i32
  }
  func.func @transform_11(%arg0: i32) -> (i32, i32) {
    %c0_i32 = arith.constant 0 : i32
    %c0_i32_0 = arith.constant 0 : i32
    %c0_i32_1 = arith.constant 0 : i32
    return %c0_i32, %c0_i32_0 : i32, i32
  }
  func.func @transform_12(%arg0: i32) -> (i32, i32) {
    %c0_i32 = arith.constant 0 : i32
    %c0_i32_0 = arith.constant 0 : i32
    %c0_i32_1 = arith.constant 0 : i32
    return %c0_i32, %c0_i32_0 : i32, i32
  }
  func.func @transform_13(%arg0: i32) -> (i32, i32) {
    %c0_i32 = arith.constant 0 : i32
    %c0_i32_0 = arith.constant 0 : i32
    %c0_i32_1 = arith.constant 0 : i32
    return %c0_i32, %c0_i32_0 : i32, i32
  }
  func.func @transform_14(%arg0: i32) -> (i32, i32) {
    %c0_i32 = arith.constant 0 : i32
    %c0_i32_0 = arith.constant 0 : i32
    %c0_i32_1 = arith.constant 0 : i32
    return %c0_i32, %c0_i32_0 : i32, i32
  }
  func.func @transform_15(%arg0: i32) -> (i32, i32) {
    %c0_i32 = arith.constant 0 : i32
    %c0_i32_0 = arith.constant 0 : i32
    %c0_i32_1 = arith.constant 0 : i32
    return %c0_i32, %c0_i32_0 : i32, i32
  }
  func.func @transform_16(%arg0: i32) -> (i32, i32) {
    %c0_i32 = arith.constant 0 : i32
    %c0_i32_0 = arith.constant 0 : i32
    %c0_i32_1 = arith.constant 0 : i32
    return %c0_i32, %c0_i32_0 : i32, i32
  }
  func.func @transform_17(%arg0: i32) -> (i32, i32) {
    %c0_i32 = arith.constant 0 : i32
    %c0_i32_0 = arith.constant 0 : i32
    %c0_i32_1 = arith.constant 0 : i32
    return %c0_i32, %c0_i32_0 : i32, i32
  }
  func.func @transform_18(%arg0: i32) -> (i32, i32) {
    %c0_i32 = arith.constant 0 : i32
    %c0_i32_0 = arith.constant 0 : i32
    %c0_i32_1 = arith.constant 0 : i32
    return %c0_i32, %c0_i32_0 : i32, i32
  }
  func.func @transform_19(%arg0: i32) -> (i32, i32) {
    %c0_i32 = arith.constant 0 : i32
    %c0_i32_0 = arith.constant 0 : i32
    %c0_i32_1 = arith.constant 0 : i32
    return %c0_i32, %c0_i32_0 : i32, i32
  }
  func.func @transform_20(%arg0: i32) -> (i32, i32) {
    %c0_i32 = arith.constant 0 : i32
    %c0_i32_0 = arith.constant 0 : i32
    %c0_i32_1 = arith.constant 0 : i32
    return %c0_i32, %c0_i32_0 : i32, i32
  }
  func.func @transform_21(%arg0: i32) -> (i32, i32) {
    %c0_i32 = arith.constant 0 : i32
    %c0_i32_0 = arith.constant 0 : i32
    %c0_i32_1 = arith.constant 0 : i32
    return %c0_i32, %c0_i32_0 : i32, i32
  }
  func.func @transform_22(%arg0: i32) -> (i32, i32) {
    %c0_i32 = arith.constant 0 : i32
    %c0_i32_0 = arith.constant 0 : i32
    %c0_i32_1 = arith.constant 0 : i32
    return %c0_i32, %c0_i32_0 : i32, i32
  }
  func.func @transform_23(%arg0: i32) -> (i32, i32) {
    %c0_i32 = arith.constant 0 : i32
    %c0_i32_0 = arith.constant 0 : i32
    %c0_i32_1 = arith.constant 0 : i32
    return %c0_i32, %c0_i32_0 : i32, i32
  }
  func.func @transform_24(%arg0: i32) -> (i32, i32) {
    %c0_i32 = arith.constant 0 : i32
    %c0_i32_0 = arith.constant 0 : i32
    %c0_i32_1 = arith.constant 0 : i32
    return %c0_i32, %c0_i32_0 : i32, i32
  }
  func.func @transform_25(%arg0: i32) -> (i32, i32) {
    %c0_i32 = arith.constant 0 : i32
    %c0_i32_0 = arith.constant 0 : i32
    %c0_i32_1 = arith.constant 0 : i32
    return %c0_i32, %c0_i32_0 : i32, i32
  }
  func.func @transform_26(%arg0: i32) -> (i32, i32) {
    %c0_i32 = arith.constant 0 : i32
    %c0_i32_0 = arith.constant 0 : i32
    %c0_i32_1 = arith.constant 0 : i32
    return %c0_i32, %c0_i32_0 : i32, i32
  }
  func.func @transform_27(%arg0: i32) -> (i32, i32) {
    %c0_i32 = arith.constant 0 : i32
    %c0_i32_0 = arith.constant 0 : i32
    %c0_i32_1 = arith.constant 0 : i32
    return %c0_i32, %c0_i32_0 : i32, i32
  }
  func.func @transform_28(%arg0: i32) -> (i32, i32) {
    %c0_i32 = arith.constant 0 : i32
    %c0_i32_0 = arith.constant 0 : i32
    %c0_i32_1 = arith.constant 0 : i32
    return %c0_i32, %c0_i32_0 : i32, i32
  }
  func.func @transform_29(%arg0: i32) -> (i32, i32) {
    %c0_i32 = arith.constant 0 : i32
    %c0_i32_0 = arith.constant 0 : i32
    %c0_i32_1 = arith.constant 0 : i32
    return %c0_i32, %c0_i32_0 : i32, i32
  }
  func.func @transform_30(%arg0: i32) -> (i32, i32, i32) {
    %c0_i32 = arith.constant 0 : i32
    %c0_i32_0 = arith.constant 0 : i32
    %c0_i32_1 = arith.constant 0 : i32
    return %arg0, %c0_i32, %c0_i32_0 : i32, i32, i32
  }
}

</mosaic_0001>

<bundles_post_ra>
// kernel: hybrid_qnn_forward.1
= control target key start
LH: loop header
LB: loop body
LE: loop exit
PB: predicated region body
PF: predicated region fallthrough
CT: control target
= control target key end

     0   :  { %s14497_s6 = smov 1   ;;  %s14498_s10 = smov 2   ;;  %s17666_s0 = inlined_call_operand.smem [shape: u32[31], index: -1, kind: input, shape index: {}] }
   0x1   :  { %s14539_s5 = sld [smem:[%s17666_s0]]   ;;  %s14499_s14 = smov 3  }
   0x2   :  { %s14544_s9 = sld [smem:[%s17666_s0 + %s14497_s6]]   ;;  %s14500_s18 = smov 4  }
   0x3   :  { %s14549_s13 = sld [smem:[%s17666_s0 + %s14498_s10]]   ;;  %s14501_s22 = smov 5  }
   0x4   :  { %s14554_s17 = sld [smem:[%s17666_s0 + %s14499_s14]]   ;;  %s14502_s26 = smov 6  }
   0x5   :  { %s14559_s21 = sld [smem:[%s17666_s0 + %s14500_s18]]   ;;  %s14503_s30 = smov 7  }
   0x6   :  { %s14564_s25 = sld [smem:[%s17666_s0 + %s14501_s22]]   ;;  %s14504_s4 = smov 8  }
   0x7   :  { %s14569_s29 = sld [smem:[%s17666_s0 + %s14502_s26]]   ;;  %s14505_s10 = smov 9  }
   0x8   :  { %s14574_s3 = sld [smem:[%s17666_s0 + %s14503_s30]]   ;;  %s14506_s15 = smov 10  }
   0x9   :  { %s14579_s8 = sld [smem:[%s17666_s0 + %s14504_s4]]   ;;  %s14507_s20 = smov 11  }
   0xa   :  { %s14584_s14 = sld [smem:[%s17666_s0 + %s14505_s10]]   ;;  %s14508_s26 = smov 12  }
   0xb   :  { %s14589_s19 = sld [smem:[%s17666_s0 + %s14506_s15]]   ;;  %s14509_s1 = smov 13  }
   0xc   :  { %s14594_s24 = sld [smem:[%s17666_s0 + %s14507_s20]]   ;;  %s14510_s7 = smov 14  }
   0xd   :  { %s14599_s30 = sld [smem:[%s17666_s0 + %s14508_s26]]   ;;  %s14511_s15 = smov 15  }
   0xe   :  { %s14604_s6 = sld [smem:[%s17666_s0 + %s14509_s1]]   ;;  %s14512_s22 = smov 16  }
   0xf   :  { %s14609_s12 = sld [smem:[%s17666_s0 + %s14510_s7]]   ;;  %s14513_s28 = smov 17  }
  0x10   :  { %s14614_s20 = sld [smem:[%s17666_s0 + %s14511_s15]]   ;;  %s14514_s7 = smov 18  }
  0x11   :  { %s14619_s27 = sld [smem:[%s17666_s0 + %s14512_s22]]   ;;  %s14515_s15 = smov 19  }
  0x12   :  { %s14624_s4 = sld [smem:[%s17666_s0 + %s14513_s28]]   ;;  %s14516_s22 = smov 20  }
  0x13   :  { %17863 = sst [smem:[#allocation2_spill]] %s14599_s30  ;;  %s14517_s28 = smov 21  }
  0x14   :  { %s14634_s30 = sld [smem:[%s17666_s0 + %s14515_s15]]   ;;  %s14519_s15 = smov 23  }
  0x15   :  { %17864 = sst [smem:[#allocation3_spill]] %s14609_s12 }
  0x16   :  { %s14629_s12 = sld [smem:[%s17666_s0 + %s14514_s7]]   ;;  %s14518_s7 = smov 22  }
  0x17   :  { %17865 = sst [smem:[#allocation4_spill]] %s14619_s27 }
  0x18   :  { %17866 = sst [smem:[#allocation5_spill]] %s14624_s4 }
  0x19   :  { %s14639_s27 = sld [smem:[%s17666_s0 + %s14516_s22]]   ;;  %s14520_s22 = smov 24  }
  0x1a   :  { %17868 = sst [smem:[#allocation7_spill]] %s14634_s30 }
  0x1b   :  { %s14644_s4 = sld [smem:[%s17666_s0 + %s14517_s28]]   ;;  %s14521_s28 = smov 25  }
  0x1c   :  { %17867 = sst [smem:[#allocation6_spill]] %s14629_s12 }
  0x1d   :  { %s14649_s12 = sld [smem:[%s17666_s0 + %s14518_s7]]   ;;  %s14522_s7 = smov 26  }
  0x1e   :  { %s14654_s30 = sld [smem:[%s17666_s0 + %s14519_s15]]   ;;  %s14523_s15 = smov 27  }
  0x1f   :  { %17869 = sst [smem:[#allocation8_spill]] %s14639_s27 }
  0x20   :  { %s14659_s27 = sld [smem:[%s17666_s0 + %s14520_s22]]   ;;  %s14524_s22 = smov 28  }
  0x21   :  { %17870 = sst [smem:[#allocation9_spill]] %s14644_s4 }
  0x22   :  { %s14664_s4 = sld [smem:[%s17666_s0 + %s14521_s28]]   ;;  %s14525_s28 = smov 29  }
  0x23   :  { %17871 = sst [smem:[#allocation10_spill]] %s14649_s12 }
  0x24   :  { %17872 = sst [smem:[#allocation11_spill]] %s14654_s30 }
  0x25   :  { %s14669_s12 = sld [smem:[%s17666_s0 + %s14522_s7]]   ;;  %s14526_s7 = smov 30  }
  0x26   :  { %17873 = sst [smem:[#allocation12_spill]] %s14659_s27 }
  0x27   :  { %s14674_s30 = sld [smem:[%s17666_s0 + %s14523_s15]]   ;;  %s14691_s15 = smov 0  }
  0x28   :  { %17874 = sst [smem:[#allocation13_spill]] %s14664_s4 }
  0x29   :  { %s14679_s27 = sld [smem:[%s17666_s0 + %s14524_s22]]  }
  0x2a   :  { %s14684_s4 = sld [smem:[%s17666_s0 + %s14525_s28]]  }
  0x2b   :  { %17875 = sst [smem:[#allocation14_spill]] %s14669_s12 }
  0x2c   :  { %s14689_s12 = sld [smem:[%s17666_s0 + %s14526_s7]]  }
  0x2d LB: > { %s10581_s16 = sadd.s32 4294967295, %s14495_s15   ;;  %p10585_p0 = scmp.ge.s32.totalorder %s14495_s15, 1  ;;  %s14495_s15 = sphi %s14691_s15, %s71_s15  }
  0x2e   : > { %p852_p1 = scmp.lt.s32.totalorder %s14495_s15, 3 }
  0x30   : > { %p853_p2 = pnand %p10585_p0, %p852_p1 }
  0x32   : > { %856 = sbr.rel (%p853_p2) target bundleno = 6609 (0x19d1), region = 140 }
  0x39   : > { %v970_v0 = vld [vmem:[%s14549_s13] sm:$0xff]  ;;  %v971_v1 = vld [vmem:[%s14549_s13 + $0x8] sm:$0xff]  ;;  %v972_v2 = vld [vmem:[%s14549_s13 + $0x10] sm:$0xff]  ;;  %v17673_v3 = vmov 0.0|0.0   ;;  %vm14528_vm0 = vmmov 0   ;;  %v17675_v6 = vmov 0.0  }
  0x3a   : > { %12951 = vmatprep.subr.bf16.mxu1 %v17673_v3  ;;  %v12952_v4 = vpack.c.bf16 %v971_v1, %v970_v0  ;;  %v973_v5 = vld [vmem:[%s14549_s13 + $0x18] sm:$0xff]  ;;  %11858 = vmatprep.mubr.msk.f32.mxu1 %vm14528_vm0, %v17675_v6  ;;  %p932_p3 = scmp.lt.s32.totalorder %s10581_s16, 1  ;;  %vm981_vm1 = vcmask 261120   ;;  %v1273_v33 = vld [vmem:[%s14559_s21 + $0x8] sm:$0xff]  ;;  %vm1286_vm2 = vcmask 556032   ;;  %vm1308_vm3 = vcmask 1043456  }
  0x3b   : > { %13029 = vmatprep.subr.bf16.mxu0 %v17673_v3  ;;  %11937 = vmatprep.mubr.msk.f32.mxu0 %vm14528_vm0, %v17675_v6  ;;  %v12955_v7 = vpack.c.bf16 %v973_v5, %v972_v2  ;;  %v14818_v34 = vld [vmem:[%s14554_s17] ss:$0 sm:$0xff]  ;;  %vm1553_vm4 = vcmask 130048   ;;  %vm3715_vm5 = vcmask 1040384   ;;  %vm3693_vm6 = vcmask 400384   ;;  %s17876_s26 = sld [smem:[#allocation2_spill]] }
  0x3c   : > { %12953 = vmatpush3.bf16.msra.mxu1 %v12952_v4  ;;  %s18190_s16 = smov (!%p932_p3, %s10581_s16), 1  ;;  %vm6140_vm7 = vcmask 523264   ;;  %s17877_s28 = sld [smem:[#allocation5_spill]]  ;;  %vm10083_vm8 = vcmask 31744  }
  0x3d   : > { %12954 = vmatprep.subr.bf16.mxu1 %v17673_v3  ;;  %s14045_s0 = smul.u32 200, %s18190_s16  ;;  %s17879_s1 = sld [smem:[#allocation4_spill]] }
  0x3e   : > { %s14046_s22 = smul.u32 7, %s18190_s16  ;;  %s17880_s2 = sld [smem:[#allocation7_spill]] }
  0x3f   : > { %s14714_s18 = scalar_lea.vmem %s14539_s5, %s14045_s0  ;;  %s17927_s7 = sld [smem:[#allocation6_spill]] }
  0x40   : > { %12956 = vmatpush3.bf16.msra.mxu1 %v12955_v7  ;;  %v945_v8 = vld [vmem:[%s14714_s18] sm:$0xff]  ;;  %v946_v9 = vld [vmem:[%s14714_s18 + $0x8] sm:$0xff]  ;;  %v947_v10 = vld [vmem:[%s14714_s18 + $0x10] sm:$0xff]  ;;  %s940_s23 = scalar_lea.vmem %s14544_s9, %s14046_s22  ;;  %s18058_s10 = sld [smem:[#allocation8_spill]] }
  0x41   : > { %12957 = vmatprep.subr.bf16.mxu1 %v17673_v3  ;;  %v948_v11 = vld [vmem:[%s14714_s18 + $0x18] sm:$0xff]  ;;  %v949_v12 = vld [vmem:[%s14714_s18 + $0x20] sm:$0xff]  ;;  %v950_v13 = vld [vmem:[%s14714_s18 + $0x28] sm:$0xff]  ;;  %s18179_s11 = sld [smem:[#allocation10_spill]]  ;;  %s18180_s0 = sld [smem:[#allocation9_spill]] }
  0x42   : > { %v951_v14 = vld [vmem:[%s14714_s18 + $0x30] sm:$0xff]  ;;  %v952_v15 = vld [vmem:[%s14714_s18 + $0x38] sm:$0xff]  ;;  %v953_v16 = vld [vmem:[%s14714_s18 + $0x40] sm:$0xff]  ;;  %s18184_s22 = sld [smem:[#allocation12_spill]] }
  0x43   : > { %11859 = vmatmul.mubr.msk.f32.vlgmr.msra.gmra.mrb[0].mxu1 %vm981_vm1, %v945_v8  ;;  %v954_v17 = vld [vmem:[%s14714_s18 + $0x48] sm:$0xff]  ;;  %v955_v18 = vld [vmem:[%s14714_s18 + $0x50] sm:$0xff]  ;;  %v956_v19 = vld [vmem:[%s14714_s18 + $0x58] sm:$0xff] }
  0x44   : > { %11861 = vmatprep.mubr.msk.f32.mxu1 %vm14528_vm0, %v17675_v6  ;;  %v957_v20 = vld [vmem:[%s14714_s18 + $0x60] sm:$0xff]  ;;  %v958_v21 = vld [vmem:[%s14714_s18 + $0x68] sm:$0xff]  ;;  %v959_v22 = vld [vmem:[%s14714_s18 + $0x70] sm:$0xff] }
  0x45   : > { %v960_v23 = vld [vmem:[%s14714_s18 + $0x78] sm:$0xff]  ;;  %v961_v24 = vld [vmem:[%s14714_s18 + $0x80] sm:$0xff]  ;;  %v962_v25 = vld [vmem:[%s14714_s18 + $0x88] sm:$0xff] }
  0x46   : > { %v963_v26 = vld [vmem:[%s14714_s18 + $0x90] sm:$0xff]  ;;  %v964_v27 = vld [vmem:[%s14714_s18 + $0x98] sm:$0xff]  ;;  %v965_v28 = vld [vmem:[%s14714_s18 + $0xa0] sm:$0xff] }
  0x47   : > { %11862 = vmatmul.mubr.msk.f32.gmra.mrb[2].mxu1 %vm981_vm1, %v946_v9  ;;  %v966_v29 = vld [vmem:[%s14714_s18 + $0xa8] sm:$0xff]  ;;  %v967_v30 = vld [vmem:[%s14714_s18 + $0xb0] sm:$0xff]  ;;  %v968_v31 = vld [vmem:[%s14714_s18 + $0xb8] sm:$0xff] }
  0x48   : > { %11864 = vmatprep.mubr.msk.f32.mxu1 %vm14528_vm0, %v17675_v6  ;;  %v969_v32 = vld [vmem:[%s14714_s18 + $0xc0] sm:$0xf]  ;;  %s18183_s18 = sld [smem:[#allocation3_spill]] }
  0x4b   : > { %11865 = vmatmul.mubr.msk.f32.gmra.mrb[4].mxu1 %vm981_vm1, %v947_v10 }
  0x4c   : > { %11867 = vmatprep.mubr.msk.f32.mxu1 %vm14528_vm0, %v17675_v6 }
  0x4f   : > { %11868 = vmatmul.mubr.msk.f32.gmra.mrb[6].mxu1 %vm981_vm1, %v948_v11 }
  0x50   : > { %11870 = vmatprep.mubr.msk.f32.mxu1 %vm14528_vm0, %v17675_v6 }
  0x53   : > { %11871 = vmatmul.mubr.msk.f32.gmra.mrb[8].mxu1 %vm981_vm1, %v949_v12 }
  0x54   : > { %11873 = vmatprep.mubr.msk.f32.mxu1 %vm14528_vm0, %v17675_v6 }
  0x57   : > { %11874 = vmatmul.mubr.msk.f32.gmra.mrb[10].mxu1 %vm981_vm1, %v950_v13 }
  0x58   : > { %11876 = vmatprep.mubr.msk.f32.mxu1 %vm14528_vm0, %v17675_v6 }
  0x5b   : > { %11877 = vmatmul.mubr.msk.f32.gmra.mrb[12].mxu1 %vm981_vm1, %v951_v14 }
  0x5c   : > { %11879 = vmatprep.mubr.msk.f32.mxu1 %vm14528_vm0, %v17675_v6 }
  0x5f   : > { %11880 = vmatmul.mubr.msk.f32.gmra.mrb[14].mxu1 %vm981_vm1, %v952_v15 }
  0x60   : > { %11882 = vmatprep.mubr.msk.f32.mxu1 %vm14528_vm0, %v17675_v6 }
  0x63   : > { %11883 = vmatmul.mubr.msk.f32.gmra.mrb[16].mxu1 %vm981_vm1, %v953_v16 }
  0x64   : > { %11885 = vmatprep.mubr.msk.f32.mxu1 %vm14528_vm0, %v17675_v6 }
  0x67   : > { %11886 = vmatmul.mubr.msk.f32.gmra.mrb[18].mxu1 %vm981_vm1, %v954_v17 }
  0x68   : > { %11888 = vmatprep.mubr.msk.f32.mxu1 %vm14528_vm0, %v17675_v6 }
  0x6b   : > { %11889 = vmatmul.mubr.msk.f32.gmra.mrb[20].mxu1 %vm981_vm1, %v955_v18 }
  0x6c   : > { %11891 = vmatprep.mubr.msk.f32.mxu1 %vm14528_vm0, %v17675_v6 }
  0x6f   : > { %11892 = vmatmul.mubr.msk.f32.gmra.mrb[22].mxu1 %vm981_vm1, %v956_v19 }
  0x70   : > { %11894 = vmatprep.mubr.msk.f32.mxu1 %vm14528_vm0, %v17675_v6 }
  0x73   : > { %11895 = vmatmul.mubr.msk.f32.gmra.mrb[24].mxu1 %vm981_vm1, %v957_v20 }
  0x74   : > { %11897 = vmatprep.mubr.msk.f32.mxu1 %vm14528_vm0, %v17675_v6 }
  0x77   : > { %11898 = vmatmul.mubr.msk.f32.gmra.mrb[26].mxu1 %vm981_vm1, %v958_v21 }
  0x78   : > { %11900 = vmatprep.mubr.msk.f32.mxu1 %vm14528_vm0, %v17675_v6 }
  0x7b   : > { %11901 = vmatmul.mubr.msk.f32.gmra.mrb[28].mxu1 %vm981_vm1, %v959_v22 }
  0x7c   : > { %11903 = vmatprep.mubr.msk.f32.mxu1 %vm14528_vm0, %v17675_v6 }
  0x7f   : > { %11904 = vmatmul.mubr.msk.f32.gmra.mrb[30].mxu1 %vm981_vm1, %v960_v23 }
  0x80   : > { %11906 = vmatprep.mubr.msk.f32.mxu1 %vm14528_vm0, %v17675_v6 }
  0x83   : > { %11907 = vmatmul.mubr.msk.f32.gmra.mrb[32].mxu1 %vm981_vm1, %v961_v24 }
  0x84   : > { %11909 = vmatprep.mubr.msk.f32.mxu1 %vm14528_vm0, %v17675_v6 }
  0x87   : > { %11910 = vmatmul.mubr.msk.f32.gmra.mrb[34].mxu1 %vm981_vm1, %v962_v25 }
  0x88   : > { %11912 = vmatprep.mubr.msk.f32.mxu1 %vm14528_vm0, %v17675_v6 }
  0x8b   : > { %11913 = vmatmul.mubr.msk.f32.gmra.mrb[36].mxu1 %vm981_vm1, %v963_v26 }
  0x8c   : > { %11915 = vmatprep.mubr.msk.f32.mxu1 %vm14528_vm0, %v17675_v6 }
  0x8f   : > { %11916 = vmatmul.mubr.msk.f32.gmra.mrb[38].mxu1 %vm981_vm1, %v964_v27 }
  0x90   : > { %11918 = vmatprep.mubr.msk.f32.mxu1 %vm14528_vm0, %v17675_v6 }
  0x93   : > { %11919 = vmatmul.mubr.msk.f32.gmra.mrb[40].mxu1 %vm981_vm1, %v965_v28 }
  0x94   : > { %11921 = vmatprep.mubr.msk.f32.mxu1 %vm14528_vm0, %v17675_v6 }
  0x97   : > { %11922 = vmatmul.mubr.msk.f32.gmra.mrb[42].mxu1 %vm981_vm1, %v966_v29 }
  0x98   : > { %11924 = vmatprep.mubr.msk.f32.mxu1 %vm14528_vm0, %v17675_v6 }
  0x9b   : > { %11925 = vmatmul.mubr.msk.f32.gmra.mrb[44].mxu1 %vm981_vm1, %v967_v30 }
  0x9c   : > { %11927 = vmatprep.mubr.msk.f32.mxu1 %vm14528_vm0, %v17675_v6 }
  0x9f   : > { %11928 = vmatmul.mubr.msk.f32.gmra.mrb[46].mxu1 %vm981_vm1, %v968_v31 }
  0xa0   : > { %11930 = vmatprep.mubr.msk.f32.mxu1 %vm14528_vm0, %v17675_v6 }
  0xa3   : > { %11931 = vmatmul.mubr.msk.f32.gmra.mrb[48].mxu1 %vm981_vm1, %v969_v32 }
  0xa4   : > { %10614 = vmatprep.mubr.msk.f32.mxu1 %vm1286_vm2, %v1273_v33 }
 0x116   : > { %v1123_v35 = vpop.f32.mrb[0].mxu1 }
 0x117   : > { %v11860_v36 = vpop.f32.mrb[1].mxu1  ;;  %v1124_v37 = vadd.f32 %v14818_v34, %v1123_v35 }
 0x119   : > { %v1247_v41 = vmax.f32 %v1124_v37, 0.0 }
 0x11a   : > { %v1128_v38 = vpop.f32.mrb[2].mxu1 }
 0x11b   : > { %v1129_v39 = vadd.f32 %v14818_v34, %v1128_v38  ;;  %v11863_v40 = vpop.f32.mrb[3].mxu1 }
 0x11d   : > { %v1248_v42 = vmax.f32 %v1129_v39, 0.0 }
 0x11e   : > { %v1133_v43 = vpop.f32.mrb[4].mxu1 }
 0x11f   : > { %v14822_v44 = vpack.c.bf16 %v1248_v42, %v1247_v41  ;;  %v11866_v45 = vpop.f32.mrb[5].mxu1  ;;  %v1134_v46 = vadd.f32 %v14818_v34, %v1133_v43 }
 0x121   : > { %12959 = vmatpush1.bf16.msra.mxu1 %v14822_v44  ;;  %v1249_v50 = vmax.f32 %v1134_v46, 0.0 }
 0x122   : > { %v1138_v47 = vpop.f32.mrb[6].mxu1  ;;  %12960 = vmatprep.subr.bf16.mxu1 %v17673_v3 }
 0x123   : > { %v1139_v48 = vadd.f32 %v14818_v34, %v1138_v47  ;;  %v11869_v49 = vpop.f32.mrb[7].mxu1 }
 0x125   : > { %v1250_v51 = vmax.f32 %v1139_v48, 0.0 }
 0x126   : > { %v1143_v52 = vpop.f32.mrb[8].mxu1 }
 0x127   : > { %v14828_v53 = vpack.c.bf16 %v1250_v51, %v1249_v50  ;;  %v11872_v54 = vpop.f32.mrb[9].mxu1  ;;  %v1144_v55 = vadd.f32 %v14818_v34, %v1143_v52 }
 0x129   : > { %12962 = vmatpush1.bf16.msra.mxu1 %v14828_v53  ;;  %v1251_v59 = vmax.f32 %v1144_v55, 0.0 }
 0x12a   : > { %v1148_v56 = vpop.f32.mrb[10].mxu1  ;;  %12963 = vmatprep.subr.bf16.mxu1 %v17673_v3 }
 0x12b   : > { %v1149_v57 = vadd.f32 %v14818_v34, %v1148_v56  ;;  %v11875_v58 = vpop.f32.mrb[11].mxu1 }
 0x12d   : > { %v1252_v60 = vmax.f32 %v1149_v57, 0.0 }
 0x12e   : > { %v1153_v61 = vpop.f32.mrb[12].mxu1 }
 0x12f   : > { %v14834_v62 = vpack.c.bf16 %v1252_v60, %v1251_v59  ;;  %v11878_v63 = vpop.f32.mrb[13].mxu1  ;;  %v1154_v0 = vadd.f32 %v14818_v34, %v1153_v61 }
 0x131   : > { %12965 = vmatpush1.bf16.msra.mxu1 %v14834_v62  ;;  %v1253_v5 = vmax.f32 %v1154_v0, 0.0 }
 0x132   : > { %v1158_v1 = vpop.f32.mrb[14].mxu1  ;;  %12966 = vmatprep.subr.bf16.mxu1 %v17673_v3 }
 0x133   : > { %v1159_v2 = vadd.f32 %v14818_v34, %v1158_v1  ;;  %v11881_v4 = vpop.f32.mrb[15].mxu1 }
 0x135   : > { %v1254_v7 = vmax.f32 %v1159_v2, 0.0 }
 0x136   : > { %v1163_v8 = vpop.f32.mrb[16].mxu1 }
 0x137   : > { %v14840_v9 = vpack.c.bf16 %v1254_v7, %v1253_v5  ;;  %v11884_v10 = vpop.f32.mrb[17].mxu1  ;;  %v1164_v11 = vadd.f32 %v14818_v34, %v1163_v8 }
 0x139   : > { %12968 = vmatpush1.bf16.msra.mxu1 %v14840_v9  ;;  %v1255_v15 = vmax.f32 %v1164_v11, 0.0 }
 0x13a   : > { %v1168_v12 = vpop.f32.mrb[18].mxu1  ;;  %12969 = vmatprep.subr.bf16.mxu1 %v17673_v3 }
 0x13b   : > { %v1169_v13 = vadd.f32 %v14818_v34, %v1168_v12  ;;  %v11887_v14 = vpop.f32.mrb[19].mxu1 }
 0x13d   : > { %v1256_v16 = vmax.f32 %v1169_v13, 0.0 }
 0x13e   : > { %v1173_v17 = vpop.f32.mrb[20].mxu1 }
 0x13f   : > { %v14846_v18 = vpack.c.bf16 %v1256_v16, %v1255_v15  ;;  %v11890_v19 = vpop.f32.mrb[21].mxu1  ;;  %v1174_v20 = vadd.f32 %v14818_v34, %v1173_v17 }
 0x141   : > { %12971 = vmatpush1.bf16.msra.mxu1 %v14846_v18  ;;  %v1257_v24 = vmax.f32 %v1174_v20, 0.0 }
 0x142   : > { %v1178_v21 = vpop.f32.mrb[22].mxu1  ;;  %12972 = vmatprep.subr.bf16.mxu1 %v17673_v3 }
 0x143   : > { %v1179_v22 = vadd.f32 %v14818_v34, %v1178_v21  ;;  %v11893_v23 = vpop.f32.mrb[23].mxu1 }
 0x145   : > { %v1258_v25 = vmax.f32 %v1179_v22, 0.0 }
 0x146   : > { %v1183_v26 = vpop.f32.mrb[24].mxu1 }
 0x147   : > { %v14852_v27 = vpack.c.bf16 %v1258_v25, %v1257_v24  ;;  %v11896_v28 = vpop.f32.mrb[25].mxu1  ;;  %v1184_v29 = vadd.f32 %v14818_v34, %v1183_v26 }
 0x149   : > { %12974 = vmatpush1.bf16.msra.mxu1 %v14852_v27  ;;  %v1259_v33 = vmax.f32 %v1184_v29, 0.0 }
 0x14a   : > { %v1188_v30 = vpop.f32.mrb[26].mxu1  ;;  %12975 = vmatprep.subr.bf16.mxu1 %v17673_v3 }
 0x14b   : > { %v1189_v31 = vadd.f32 %v14818_v34, %v1188_v30  ;;  %v11899_v32 = vpop.f32.mrb[27].mxu1  ;;  %v1272_v30 = vld [vmem:[%s14559_s21] sm:$0xff] }
 0x14c   : > { %v1277_v32 = vld [vmem:[%s14559_s21 + $0x28] sm:$0xff] }
 0x14d   : > { %v1260_v35 = vmax.f32 %v1189_v31, 0.0  ;;  %v1275_v31 = vld [vmem:[%s14559_s21 + $0x18] sm:$0xff] }
 0x14e   : > { %v1193_v36 = vpop.f32.mrb[28].mxu1 }
 0x14f   : > { %v14858_v37 = vpack.c.bf16 %v1260_v35, %v1259_v33  ;;  %v11902_v38 = vpop.f32.mrb[29].mxu1  ;;  %v1194_v39 = vadd.f32 %v14818_v34, %v1193_v36  ;;  %v1276_v33 = vld [vmem:[%s14559_s21 + $0x20] sm:$0xff]  ;;  %v1279_v35 = vld [vmem:[%s14559_s21 + $0x38] sm:$0xff]  ;;  %v1278_v36 = vld [vmem:[%s14559_s21 + $0x30] sm:$0xff] }
 0x150   : > { %v1281_v38 = vld [vmem:[%s14559_s21 + $0x48] sm:$0xff] }
 0x151   : > { %12977 = vmatpush1.bf16.msra.mxu1 %v14858_v37  ;;  %v1261_v43 = vmax.f32 %v1194_v39, 0.0  ;;  %v1280_v39 = vld [vmem:[%s14559_s21 + $0x40] sm:$0xff] }
 0x152   : > { %v1198_v40 = vpop.f32.mrb[30].mxu1  ;;  %12978 = vmatprep.subr.bf16.mxu1 %v17673_v3 }
 0x153   : > { %v1199_v41 = vadd.f32 %v14818_v34, %v1198_v40  ;;  %v11905_v42 = vpop.f32.mrb[31].mxu1  ;;  %v1283_v40 = vld [vmem:[%s14559_s21 + $0x58] sm:$0xff] }
 0x154   : > { %v1285_v42 = vld [vmem:[%s14559_s21 + $0x68] sm:$0x1] }
 0x155   : > { %v1262_v45 = vmax.f32 %v1199_v41, 0.0  ;;  %v1282_v41 = vld [vmem:[%s14559_s21 + $0x50] sm:$0xff] }
 0x156   : > { %v1203_v46 = vpop.f32.mrb[32].mxu1 }
 0x157   : > { %v14864_v47 = vpack.c.bf16 %v1262_v45, %v1261_v43  ;;  %v11908_v48 = vpop.f32.mrb[33].mxu1  ;;  %v1204_v49 = vadd.f32 %v14818_v34, %v1203_v46  ;;  %v1284_v43 = vld [vmem:[%s14559_s21 + $0x60] sm:$0x1]  ;;  %v10622_v45 = vld [vmem:[%s14559_s21 + $0x78] sm:$0xff] }
 0x158   : > { %v1412_v46 = vld [vmem:[%s14564_s25] sm:$0xff]  ;;  %v1413_v48 = vld [vmem:[%s14564_s25 + $0x8] sm:$0xff] }
 0x159   : > { %12980 = vmatpush1.bf16.msra.mxu1 %v14864_v47  ;;  %v1263_v54 = vmax.f32 %v1204_v49, 0.0  ;;  %v10621_v49 = vld [vmem:[%s14559_s21 + $0x70] sm:$0xff] }
 0x15a   : > { %v1208_v50 = vpop.f32.mrb[34].mxu1  ;;  %12981 = vmatprep.subr.bf16.mxu1 %v17673_v3 }
 0x15b   : > { %v1209_v51 = vadd.f32 %v14818_v34, %v1208_v50  ;;  %v11911_v52 = vpop.f32.mrb[35].mxu1  ;;  %v13033_v50 = vpack.c.bf16 %v1413_v48, %v1412_v46  ;;  %v10662_v46 = vld [vmem:[%s14559_s21 + $0xf8] sm:$0xff]  ;;  %v10661_v48 = vld [vmem:[%s14559_s21 + $0xf0] sm:$0xff] }
 0x15c   : > { %v10623_v52 = vld [vmem:[%s14559_s21 + $0x80] sm:$0xff] }
 0x15d   : > { %v1264_v55 = vmax.f32 %v1209_v51, 0.0  ;;  %v10624_v51 = vld [vmem:[%s14559_s21 + $0x88] sm:$0xff] }
 0x15e   : > { %v1213_v56 = vpop.f32.mrb[36].mxu1 }
 0x15f   : > { %v14870_v57 = vpack.c.bf16 %v1264_v55, %v1263_v54  ;;  %v11914_v58 = vpop.f32.mrb[37].mxu1  ;;  %v1214_v59 = vadd.f32 %v14818_v34, %v1213_v56  ;;  %v10626_v54 = vld [vmem:[%s14559_s21 + $0x98] sm:$0xff]  ;;  %v10625_v55 = vld [vmem:[%s14559_s21 + $0x90] sm:$0xff]  ;;  %v10628_v56 = vld [vmem:[%s14559_s21 + $0xa8] sm:$0xff] }
 0x160   : > { %v10627_v58 = vld [vmem:[%s14559_s21 + $0xa0] sm:$0xff] }
 0x161   : > { %12983 = vmatpush1.bf16.msra.mxu1 %v14870_v57  ;;  %v1265_v0 = vmax.f32 %v1214_v59, 0.0  ;;  %v10630_v59 = vld [vmem:[%s14559_s21 + $0xb8] sm:$0xff] }
 0x162   : > { %v1218_v60 = vpop.f32.mrb[38].mxu1  ;;  %12984 = vmatprep.subr.bf16.mxu1 %v17673_v3 }
 0x163   : > { %v1219_v61 = vadd.f32 %v14818_v34, %v1218_v60  ;;  %v11917_v63 = vpop.f32.mrb[39].mxu1  ;;  %v10629_v60 = vld [vmem:[%s14559_s21 + $0xb0] sm:$0xff] }
 0x164   : > { %v10631_v63 = vld [vmem:[%s14559_s21 + $0xc0] sm:$0xff] }
 0x165   : > { %v1266_v1 = vmax.f32 %v1219_v61, 0.0  ;;  %v10632_v61 = vld [vmem:[%s14559_s21 + $0xc8] sm:$0xff] }
 0x166   : > { %v1223_v2 = vpop.f32.mrb[40].mxu1 }
 0x167   : > { %v14876_v4 = vpack.c.bf16 %v1266_v1, %v1265_v0  ;;  %v11920_v5 = vpop.f32.mrb[41].mxu1  ;;  %v1224_v7 = vadd.f32 %v14818_v34, %v1223_v2  ;;  %v10634_v0 = vld [vmem:[%s14559_s21 + $0xd8] sm:$0x1]  ;;  %v10633_v1 = vld [vmem:[%s14559_s21 + $0xd0] sm:$0x1] }
 0x168   : > { %v10643_v2 = vld [vmem:[%s14564_s25 + $0x10] sm:$0xff]  ;;  %v10644_v5 = vld [vmem:[%s14564_s25 + $0x18] sm:$0xff] }
 0x169   : > { %12986 = vmatpush1.bf16.msra.mxu1 %v14876_v4  ;;  %v1267_v12 = vmax.f32 %v1224_v7, 0.0  ;;  %v13030_v7 = vpack.c.bf16 %v10644_v5, %v10643_v2 }
 0x16a   : > { %v1228_v8 = vpop.f32.mrb[42].mxu1  ;;  %12987 = vmatprep.subr.bf16.mxu1 %v17673_v3 }
 0x16b   : > { %v1229_v10 = vadd.f32 %v14818_v34, %v1228_v8  ;;  %v11923_v11 = vpop.f32.mrb[43].mxu1  ;;  %13031 = vmatpush3.bf16.msra.mxu0 %v13030_v7 }
 0x16c   : > { %13035 = vmatprep.subr.bf16.mxu0 %v17673_v3 }
 0x16d   : > { %v1268_v13 = vmax.f32 %v1229_v10, 0.0 }
 0x16e   : > { %v1233_v14 = vpop.f32.mrb[44].mxu1 }
 0x16f   : > { %v14882_v15 = vpack.c.bf16 %v1268_v13, %v1267_v12  ;;  %v11926_v16 = vpop.f32.mrb[45].mxu1  ;;  %v1234_v17 = vadd.f32 %v14818_v34, %v1233_v14 }
 0x171   : > { %12989 = vmatpush1.bf16.msra.mxu1 %v14882_v15  ;;  %v1269_v22 = vmax.f32 %v1234_v17, 0.0 }
 0x172   : > { %v1238_v19 = vpop.f32.mrb[46].mxu1  ;;  %12990 = vmatprep.subr.bf16.mxu1 %v17673_v3 }
 0x173   : > { %v1239_v20 = vadd.f32 %v14818_v34, %v1238_v19  ;;  %v11929_v21 = vpop.f32.mrb[47].mxu1 }
 0x175   : > { %v1270_v23 = vmax.f32 %v1239_v20, 0.0 }
 0x176   : > { %v1243_v24 = vpop.f32.mrb[48].mxu1 }
 0x177   : > { %v14888_v25 = vpack.c.bf16 %v1270_v23, %v1269_v22  ;;  %v1244_v26 = vadd.f32 %v14818_v34, %v1243_v24  ;;  %v11932_v28 = vpop.f32.mrb[49].mxu1  ;;  %v1274_v34 = vld [vmem:[%s14559_s21 + $0x10] sm:$0xff] }
 0x179   : > { %v14891_v29 = vmax.f32 %v1244_v26, 0.0  ;;  %12992 = vmatpush1.bf16.msra.mxu1 %v14888_v25 }
 0x17a   : > { %1360 = vmatprep.subr.mxu1 %v17675_v6 }
 0x17d   : > { %10613 = vmatpush1.msk.msra.mxu1 %vm1308_vm3, %v14891_v29 }
 0x17e   : > { %1377 = vmatmul.mubr.f32.vlgmr.msra.gmra.mrb[50].mxu1 %v1272_v30  ;;  %12993 = vmatprep.subr.bf16.mxu1 %v17673_v3 }
 0x17f   : > { %12995 = vmatpush1.bf16.msra.mxu1 %v14822_v44  ;;  %10615 = vmatprep.mubr.msk.f32.mxu1 %vm1286_vm2, %v1275_v31 }
 0x180   : > { %12996 = vmatprep.subr.bf16.mxu1 %v17673_v3 }
 0x182   : > { %1382 = vmatmul.mubr.f32.gmra.mrb[52].mxu1 %v1274_v34 }
 0x183   : > { %12998 = vmatpush1.bf16.msra.mxu1 %v14828_v53  ;;  %10616 = vmatprep.mubr.msk.f32.mxu1 %vm1286_vm2, %v1277_v32 }
 0x184   : > { %12999 = vmatprep.subr.bf16.mxu1 %v17673_v3 }
 0x186   : > { %1387 = vmatmul.mubr.f32.gmra.mrb[54].mxu1 %v1276_v33 }
 0x187   : > { %13001 = vmatpush1.bf16.msra.mxu1 %v14834_v62  ;;  %10617 = vmatprep.mubr.msk.f32.mxu1 %vm1286_vm2, %v1279_v35 }
 0x188   : > { %13002 = vmatprep.subr.bf16.mxu1 %v17673_v3 }
 0x18a   : > { %1392 = vmatmul.mubr.f32.gmra.mrb[56].mxu1 %v1278_v36 }
 0x18b   : > { %13004 = vmatpush1.bf16.msra.mxu1 %v14840_v9  ;;  %10618 = vmatprep.mubr.msk.f32.mxu1 %vm1286_vm2, %v1281_v38 }
 0x18c   : > { %13005 = vmatprep.subr.bf16.mxu1 %v17673_v3 }
 0x18e   : > { %1397 = vmatmul.mubr.f32.gmra.mrb[58].mxu1 %v1280_v39 }
 0x18f   : > { %13007 = vmatpush1.bf16.msra.mxu1 %v14846_v18  ;;  %10619 = vmatprep.mubr.msk.f32.mxu1 %vm1286_vm2, %v1283_v40 }
 0x190   : > { %13008 = vmatprep.subr.bf16.mxu1 %v17673_v3 }
 0x192   : > { %1402 = vmatmul.mubr.f32.gmra.mrb[60].mxu1 %v1282_v41  ;;  %v10660_v41 = vld [vmem:[%s14559_s21 + $0xe8] sm:$0xff] }
 0x193   : > { %13010 = vmatpush1.bf16.msra.mxu1 %v14852_v27  ;;  %10620 = vmatprep.mubr.msk.f32.mxu1 %vm1286_vm2, %v1285_v42 }
 0x194   : > { %13011 = vmatprep.subr.bf16.mxu1 %v17673_v3 }
 0x196   : > { %1407 = vmatmul.mubr.f32.gmra.mrb[62].mxu1 %v1284_v43 }
 0x197   : > { %13013 = vmatpush1.bf16.msra.mxu1 %v14858_v37  ;;  %10636 = vmatprep.mubr.msk.f32.mxu1 %vm1286_vm2, %v10622_v45  ;;  %v10659_v45 = vld [vmem:[%s14559_s21 + $0xe0] sm:$0xff] }
 0x198   : > { %13014 = vmatprep.subr.bf16.mxu1 %v17673_v3 }
 0x19b   : > { %13016 = vmatpush1.bf16.msra.mxu1 %v14864_v47 }
 0x19c   : > { %13017 = vmatprep.subr.bf16.mxu1 %v17673_v3 }
 0x19f   : > { %13019 = vmatpush1.bf16.msra.mxu1 %v14870_v57 }
 0x1a0   : > { %13020 = vmatprep.subr.bf16.mxu1 %v17673_v3 }
 0x1a3   : > { %13022 = vmatpush1.bf16.msra.mxu1 %v14876_v4 }
 0x1a4   : > { %13023 = vmatprep.subr.bf16.mxu1 %v17673_v3 }
 0x1a7   : > { %13025 = vmatpush1.bf16.msra.mxu1 %v14882_v15 }
 0x1a8   : > { %13026 = vmatprep.subr.bf16.mxu1 %v17673_v3 }
 0x1ab   : > { %13028 = vmatpush1.bf16.msra.mxu1 %v14888_v25 }
 0x1ac   : > { %1498 = vmatprep.subr.mxu1 %v17675_v6 }
 0x1af   : > { %10635 = vmatpush1.msk.msra.mxu1 %vm1308_vm3, %v14891_v29 }
 0x1b0   : > { %1515 = vmatmul.mubr.f32.vlgmr.msra.gmra.mrb[64].mxu1 %v10621_v49  ;;  %13032 = vmatprep.subr.bf16.mxu1 %v17673_v3  ;;  %v10664_v49 = vld [vmem:[%s14559_s21 + $0x108] sm:$0xff] }
 0x1b1   : > { %10637 = vmatprep.mubr.msk.f32.mxu1 %vm1286_vm2, %v10624_v51  ;;  %13034 = vmatpush3.bf16.msra.mxu1 %v13033_v50  ;;  %v10663_v50 = vld [vmem:[%s14559_s21 + $0x100] sm:$0xff]  ;;  %v10666_v51 = vld [vmem:[%s14559_s21 + $0x118] sm:$0xff] }
 0x1b2   : > { %13071 = vmatprep.subr.bf16.mxu1 %v17673_v3 }
 0x1b4   : > { %1520 = vmatmul.mubr.f32.gmra.mrb[66].mxu1 %v10623_v52  ;;  %v10665_v52 = vld [vmem:[%s14559_s21 + $0x110] sm:$0xff] }
 0x1b5   : > { %10638 = vmatprep.mubr.msk.f32.mxu1 %vm1286_vm2, %v10626_v54  ;;  %v10668_v54 = vld [vmem:[%s14559_s21 + $0x128] sm:$0xff] }
 0x1b8   : > { %1525 = vmatmul.mubr.f32.gmra.mrb[68].mxu1 %v10625_v55  ;;  %v10667_v55 = vld [vmem:[%s14559_s21 + $0x120] sm:$0xff] }
 0x1b9   : > { %10639 = vmatprep.mubr.msk.f32.mxu1 %vm1286_vm2, %v10628_v56  ;;  %v10670_v56 = vld [vmem:[%s14559_s21 + $0x138] sm:$0xff] }
 0x1bc   : > { %1530 = vmatmul.mubr.f32.gmra.mrb[70].mxu1 %v10627_v58  ;;  %v10669_v58 = vld [vmem:[%s14559_s21 + $0x130] sm:$0xff] }
 0x1bd   : > { %10640 = vmatprep.mubr.msk.f32.mxu1 %vm1286_vm2, %v10630_v59  ;;  %v10672_v59 = vld [vmem:[%s14559_s21 + $0x148] sm:$0x1] }
 0x1c0   : > { %1535 = vmatmul.mubr.f32.gmra.mrb[72].mxu1 %v10629_v60  ;;  %v10671_v60 = vld [vmem:[%s14559_s21 + $0x140] sm:$0x1] }
 0x1c1   : > { %10641 = vmatprep.mubr.msk.f32.mxu1 %vm1286_vm2, %v10632_v61  ;;  %v10681_v61 = vld [vmem:[%s14564_s25 + $0x20] sm:$0xff] }
 0x1c4   : > { %1540 = vmatmul.mubr.f32.gmra.mrb[74].mxu1 %v10631_v63  ;;  %v10682_v63 = vld [vmem:[%s14564_s25 + $0x28] sm:$0xff] }
 0x1c5   : > { %10642 = vmatprep.mubr.msk.f32.mxu1 %vm1286_vm2, %v10634_v0  ;;  %v13072_v0 = vpack.c.bf16 %v10682_v63, %v10681_v61  ;;  %v10691_v63 = vld [vmem:[%s14559_s21 + $0x158] sm:$0xff] }
 0x1c8   : > { %1545 = vmatmul.mubr.f32.gmra.mrb[76].mxu1 %v10633_v1 }
 0x1c9   : > { %11962 = vmatprep.mubr.msk.f32.mxu1 %vm14528_vm0, %v17675_v6 }
 0x251   : > { %v1378_v8 = vpop.f32.mrb[50].mxu1 }
 0x252   : > { %v1380_v10 = vpop.f32.mrb[51].mxu1  ;;  %11963 = vmatmul.mubr.msk.f32.vlgmr.msra.gmra.mrb[78].mxu1 %vm1553_vm4, %v1378_v8 }
 0x253   : > { %11965 = vmatprep.mubr.msk.f32.mxu1 %vm14528_vm0, %v17675_v6  ;;  %13073 = vmatpush3.bf16.msra.mxu1 %v13072_v0 }
 0x254   : > { %13074 = vmatprep.subr.bf16.mxu1 %v17673_v3 }
 0x255   : > { %v1383_v11 = vpop.f32.mrb[52].mxu1 }
 0x256   : > { %v1385_v12 = vpop.f32.mrb[53].mxu1  ;;  %11966 = vmatmul.mubr.msk.f32.gmra.mrb[80].mxu1 %vm1553_vm4, %v1383_v11 }
 0x257   : > { %11968 = vmatprep.mubr.msk.f32.mxu1 %vm14528_vm0, %v17675_v6 }
 0x259   : > { %v1388_v13 = vpop.f32.mrb[54].mxu1 }
 0x25a   : > { %v1390_v14 = vpop.f32.mrb[55].mxu1  ;;  %11969 = vmatmul.mubr.msk.f32.gmra.mrb[82].mxu1 %vm1553_vm4, %v1388_v13 }
 0x25b   : > { %11971 = vmatprep.mubr.msk.f32.mxu1 %vm14528_vm0, %v17675_v6 }
 0x25d   : > { %v1393_v16 = vpop.f32.mrb[56].mxu1 }
 0x25e   : > { %v1395_v17 = vpop.f32.mrb[57].mxu1  ;;  %11972 = vmatmul.mubr.msk.f32.gmra.mrb[84].mxu1 %vm1553_vm4, %v1393_v16 }
 0x25f   : > { %11974 = vmatprep.mubr.msk.f32.mxu1 %vm14528_vm0, %v17675_v6 }
 0x261   : > { %v1398_v19 = vpop.f32.mrb[58].mxu1 }
 0x262   : > { %v1400_v20 = vpop.f32.mrb[59].mxu1  ;;  %11975 = vmatmul.mubr.msk.f32.gmra.mrb[86].mxu1 %vm1553_vm4, %v1398_v19 }
 0x263   : > { %11977 = vmatprep.mubr.msk.f32.mxu1 %vm14528_vm0, %v17675_v6 }
 0x265   : > { %v1403_v21 = vpop.f32.mrb[60].mxu1 }
 0x266   : > { %v1405_v22 = vpop.f32.mrb[61].mxu1  ;;  %11978 = vmatmul.mubr.msk.f32.gmra.mrb[88].mxu1 %vm1553_vm4, %v1403_v21 }
 0x267   : > { %11980 = vmatprep.mubr.msk.f32.mxu1 %vm14528_vm0, %v17675_v6 }
 0x269   : > { %v1408_v23 = vpop.f32.mrb[62].mxu1 }
 0x26a   : > { %v1410_v24 = vpop.f32.mrb[63].mxu1  ;;  %11981 = vmatmul.mubr.msk.f32.gmra.mrb[90].mxu1 %vm1553_vm4, %v1408_v23 }
 0x26b   : > { %11987 = vmatprep.mubr.msk.f32.mxu1 %vm14528_vm0, %v17675_v6 }
 0x283   : > { %v1516_v26 = vpop.f32.mrb[64].mxu1 }
 0x284   : > { %v1518_v28 = vpop.f32.mrb[65].mxu1  ;;  %11938 = vmatmul.mubr.msk.f32.vlgmr.msra.gmra.mrb[0].mxu0 %vm1553_vm4, %v1516_v26 }
 0x285   : > { %13037 = vmatpush1.bf16.msra.mxu0 %v14822_v44  ;;  %11940 = vmatprep.mubr.msk.f32.mxu0 %vm14528_vm0, %v17675_v6 }
 0x286   : > { %13038 = vmatprep.subr.bf16.mxu0 %v17673_v3 }
 0x287   : > { %v1521_v30 = vpop.f32.mrb[66].mxu1 }
 0x288   : > { %11941 = vmatmul.mubr.msk.f32.gmra.mrb[2].mxu0 %vm1553_vm4, %v1521_v30  ;;  %v1523_v31 = vpop.f32.mrb[67].mxu1 }
 0x289   : > { %13040 = vmatpush1.bf16.msra.mxu0 %v14828_v53  ;;  %11943 = vmatprep.mubr.msk.f32.mxu0 %vm14528_vm0, %v17675_v6 }
 0x28a   : > { %13041 = vmatprep.subr.bf16.mxu0 %v17673_v3 }
 0x28b   : > { %v1526_v34 = vpop.f32.mrb[68].mxu1 }
 0x28c   : > { %11944 = vmatmul.mubr.msk.f32.gmra.mrb[4].mxu0 %vm1553_vm4, %v1526_v34  ;;  %v1528_v32 = vpop.f32.mrb[69].mxu1 }
 0x28d   : > { %13043 = vmatpush1.bf16.msra.mxu0 %v14834_v62  ;;  %11946 = vmatprep.mubr.msk.f32.mxu0 %vm14528_vm0, %v17675_v6 }
 0x28e   : > { %13044 = vmatprep.subr.bf16.mxu0 %v17673_v3 }
 0x28f   : > { %v1531_v33 = vpop.f32.mrb[70].mxu1 }
 0x290   : > { %11947 = vmatmul.mubr.msk.f32.gmra.mrb[6].mxu0 %vm1553_vm4, %v1531_v33  ;;  %v1533_v35 = vpop.f32.mrb[71].mxu1 }
 0x291   : > { %13046 = vmatpush1.bf16.msra.mxu0 %v14840_v9  ;;  %11949 = vmatprep.mubr.msk.f32.mxu0 %vm14528_vm0, %v17675_v6 }
 0x292   : > { %13047 = vmatprep.subr.bf16.mxu0 %v17673_v3 }
 0x293   : > { %v1536_v36 = vpop.f32.mrb[72].mxu1 }
 0x294   : > { %11950 = vmatmul.mubr.msk.f32.gmra.mrb[8].mxu0 %vm1553_vm4, %v1536_v36  ;;  %v1538_v38 = vpop.f32.mrb[73].mxu1 }
 0x295   : > { %13049 = vmatpush1.bf16.msra.mxu0 %v14846_v18  ;;  %11952 = vmatprep.mubr.msk.f32.mxu0 %vm14528_vm0, %v17675_v6 }
 0x296   : > { %13050 = vmatprep.subr.bf16.mxu0 %v17673_v3 }
 0x297   : > { %v1541_v39 = vpop.f32.mrb[74].mxu1 }
 0x298   : > { %11953 = vmatmul.mubr.msk.f32.gmra.mrb[10].mxu0 %vm1553_vm4, %v1541_v39  ;;  %v1543_v40 = vpop.f32.mrb[75].mxu1 }
 0x299   : > { %13052 = vmatpush1.bf16.msra.mxu0 %v14852_v27  ;;  %11955 = vmatprep.mubr.msk.f32.mxu0 %vm14528_vm0, %v17675_v6 }
 0x29a   : > { %13053 = vmatprep.subr.bf16.mxu0 %v17673_v3 }
 0x29b   : > { %v1546_v42 = vpop.f32.mrb[76].mxu1 }
 0x29c   : > { %11956 = vmatmul.mubr.msk.f32.gmra.mrb[12].mxu0 %vm1553_vm4, %v1546_v42  ;;  %v1548_v43 = vpop.f32.mrb[77].mxu1 }
 0x29d   : > { %13055 = vmatpush1.bf16.msra.mxu0 %v14858_v37  ;;  %10674 = vmatprep.mubr.msk.f32.mxu0 %vm1286_vm2, %v10660_v41 }
 0x29e   : > { %13056 = vmatprep.subr.bf16.mxu0 %v17673_v3 }
 0x2a1   : > { %13058 = vmatpush1.bf16.msra.mxu0 %v14864_v47 }
 0x2a2   : > { %13059 = vmatprep.subr.bf16.mxu0 %v17673_v3 }
 0x2a5   : > { %13061 = vmatpush1.bf16.msra.mxu0 %v14870_v57 }
 0x2a6   : > { %13062 = vmatprep.subr.bf16.mxu0 %v17673_v3 }
 0x2a9   : > { %13064 = vmatpush1.bf16.msra.mxu0 %v14876_v4 }
 0x2aa   : > { %13065 = vmatprep.subr.bf16.mxu0 %v17673_v3 }
 0x2ad   : > { %13067 = vmatpush1.bf16.msra.mxu0 %v14882_v15 }
 0x2ae   : > { %13068 = vmatprep.subr.bf16.mxu0 %v17673_v3 }
 0x2b1   : > { %13070 = vmatpush1.bf16.msra.mxu0 %v14888_v25 }
 0x2b2   : > { %1880 = vmatprep.subr.mxu0 %v17675_v6 }
 0x2b5   : > { %10673 = vmatpush1.msk.msra.mxu0 %vm1308_vm3, %v14891_v29 }
 0x2b6   : > { %1897 = vmatmul.mubr.f32.vlgmr.msra.gmra.mrb[14].mxu0 %v10659_v45  ;;  %13110 = vmatprep.subr.bf16.mxu0 %v17673_v3 }
 0x2b7   : > { %10675 = vmatprep.mubr.msk.f32.mxu0 %vm1286_vm2, %v10662_v46 }
 0x2ba   : > { %1902 = vmatmul.mubr.f32.gmra.mrb[16].mxu0 %v10661_v48 }
 0x2bb   : > { %10676 = vmatprep.mubr.msk.f32.mxu0 %vm1286_vm2, %v10664_v49 }
 0x2be   : > { %1907 = vmatmul.mubr.f32.gmra.mrb[18].mxu0 %v10663_v50 }
 0x2bf   : > { %10677 = vmatprep.mubr.msk.f32.mxu0 %vm1286_vm2, %v10666_v51 }
 0x2c2   : > { %1912 = vmatmul.mubr.f32.gmra.mrb[20].mxu0 %v10665_v52 }
 0x2c3   : > { %10678 = vmatprep.mubr.msk.f32.mxu0 %vm1286_vm2, %v10668_v54 }
 0x2c6   : > { %1917 = vmatmul.mubr.f32.gmra.mrb[22].mxu0 %v10667_v55 }
 0x2c7   : > { %10679 = vmatprep.mubr.msk.f32.mxu0 %vm1286_vm2, %v10670_v56 }
 0x2ca   : > { %1922 = vmatmul.mubr.f32.gmra.mrb[24].mxu0 %v10669_v58 }
 0x2cb   : > { %10680 = vmatprep.mubr.msk.f32.mxu0 %vm1286_vm2, %v10672_v59 }
 0x2ce   : > { %1927 = vmatmul.mubr.f32.gmra.mrb[26].mxu0 %v10671_v60 }
 0x2cf   : > { %12012 = vmatprep.mubr.msk.f32.mxu0 %vm14528_vm0, %v17675_v6 }
 0x325   : > { %v1762_v1 = vpop.f32.mrb[78].mxu1 }
 0x326   : > { %v11964_v2 = vpop.f32.mrb[79].mxu1 }
 0x327   : > { %v10690_v2 = vld [vmem:[%s14559_s21 + $0x150] sm:$0xff] }
 0x329   : > { %v1767_v5 = vpop.f32.mrb[80].mxu1 }
 0x32a   : > { %v11967_v7 = vpop.f32.mrb[81].mxu1 }
 0x32b   : > { %v10692_v7 = vld [vmem:[%s14559_s21 + $0x160] sm:$0xff] }
 0x32d   : > { %v1772_v8 = vpop.f32.mrb[82].mxu1 }
 0x32e   : > { %v11970_v10 = vpop.f32.mrb[83].mxu1 }
 0x32f   : > { %v10694_v10 = vld [vmem:[%s14559_s21 + $0x170] sm:$0xff] }
 0x331   : > { %v1777_v11 = vpop.f32.mrb[84].mxu1 }
 0x332   : > { %v11973_v12 = vpop.f32.mrb[85].mxu1 }
 0x333   : > { %v10696_v12 = vld [vmem:[%s14559_s21 + $0x180] sm:$0xff] }
 0x335   : > { %v1782_v13 = vpop.f32.mrb[86].mxu1 }
 0x336   : > { %v11976_v14 = vpop.f32.mrb[87].mxu1 }
 0x337   : > { %v10698_v14 = vld [vmem:[%s14559_s21 + $0x190] sm:$0xff] }
 0x339   : > { %v1787_v16 = vpop.f32.mrb[88].mxu1 }
 0x33a   : > { %v11979_v17 = vpop.f32.mrb[89].mxu1 }
 0x33b   : > { %v10700_v17 = vld [vmem:[%s14559_s21 + $0x1a0] sm:$0xff] }
 0x33d   : > { %v1792_v19 = vpop.f32.mrb[90].mxu1 }
 0x33e   : > { %v11982_v20 = vpop.f32.mrb[91].mxu1 }
 0x33f   : > { %v10702_v20 = vld [vmem:[%s14559_s21 + $0x1b0] sm:$0x1] }
 0x357   : > { %v1641_v21 = vpop.f32.mrb[0].mxu0 }
 0x358   : > { %v15066_v22 = vadd.f32 %v1762_v1, %v1641_v21  ;;  %v11939_v23 = vpop.f32.mrb[1].mxu0  ;;  %v10712_v21 = vld [vmem:[%s14564_s25 + $0x30] sm:$0xff] }
 0x359   : > { %v10713_v23 = vld [vmem:[%s14564_s25 + $0x38] sm:$0xff] }
 0x35b   : > { %v1646_v24 = vpop.f32.mrb[2].mxu0 }
 0x35c   : > { %v15068_v26 = vadd.f32 %v1767_v5, %v1646_v24  ;;  %v11942_v28 = vpop.f32.mrb[3].mxu0  ;;  %v10693_v5 = vld [vmem:[%s14559_s21 + $0x168] sm:$0xff]  ;;  %v13111_v24 = vpack.c.bf16 %v10713_v23, %v10712_v21  ;;  %v10731_v21 = vld [vmem:[%s14559_s21 + $0x210] sm:$0xff] }
 0x35d   : > { %v10734_v23 = vld [vmem:[%s14559_s21 + $0x228] sm:$0x1] }
 0x35e   : > { %13112 = vmatpush3.bf16.msra.mxu0 %v13111_v24  ;;  %v10733_v24 = vld [vmem:[%s14559_s21 + $0x220] sm:$0x1] }
 0x35f   : > { %v1651_v30 = vpop.f32.mrb[4].mxu0  ;;  %13113 = vmatprep.subr.bf16.mxu0 %v17673_v3 }
 0x360   : > { %v15070_v31 = vadd.f32 %v1772_v8, %v1651_v30  ;;  %v11945_v34 = vpop.f32.mrb[5].mxu0  ;;  %v10695_v8 = vld [vmem:[%s14559_s21 + $0x178] sm:$0xff] }
 0x363   : > { %v1656_v32 = vpop.f32.mrb[6].mxu0 }
 0x364   : > { %v15072_v33 = vadd.f32 %v1777_v11, %v1656_v32  ;;  %v11948_v35 = vpop.f32.mrb[7].mxu0  ;;  %v10697_v11 = vld [vmem:[%s14559_s21 + $0x188] sm:$0xff] }
 0x367   : > { %v1661_v36 = vpop.f32.mrb[8].mxu0 }
 0x368   : > { %v15074_v38 = vadd.f32 %v1782_v13, %v1661_v36  ;;  %v11951_v39 = vpop.f32.mrb[9].mxu0  ;;  %v10699_v13 = vld [vmem:[%s14559_s21 + $0x198] sm:$0xff] }
 0x36b   : > { %v1666_v40 = vpop.f32.mrb[10].mxu0 }
 0x36c   : > { %v15076_v41 = vadd.f32 %v1787_v16, %v1666_v40  ;;  %v11954_v42 = vpop.f32.mrb[11].mxu0  ;;  %v10701_v16 = vld [vmem:[%s14559_s21 + $0x1a8] sm:$0xff] }
 0x36f   : > { %v1671_v43 = vpop.f32.mrb[12].mxu0 }
 0x370   : > { %v15078_v45 = vadd.f32 %v1792_v19, %v1671_v43  ;;  %v11957_v46 = vpop.f32.mrb[13].mxu0  ;;  %v10703_v19 = vld [vmem:[%s14559_s21 + $0x1b8] sm:$0x1] }
 0x389   : > { %v1898_v48 = vpop.f32.mrb[14].mxu0 }
 0x38a   : > { %v1900_v49 = vpop.f32.mrb[15].mxu0  ;;  %11988 = vmatmul.mubr.msk.f32.vlgmr.msra.gmra.mrb[92].mxu1 %vm1553_vm4, %v1898_v48 }
 0x38b   : > { %13076 = vmatpush1.bf16.msra.mxu1 %v14822_v44  ;;  %11990 = vmatprep.mubr.msk.f32.mxu1 %vm14528_vm0, %v17675_v6 }
 0x38c   : > { %13077 = vmatprep.subr.bf16.mxu1 %v17673_v3 }
 0x38d   : > { %v1903_v50 = vpop.f32.mrb[16].mxu0 }
 0x38e   : > { %11991 = vmatmul.mubr.msk.f32.gmra.mrb[94].mxu1 %vm1553_vm4, %v1903_v50  ;;  %v1905_v51 = vpop.f32.mrb[17].mxu0 }
 0x38f   : > { %13079 = vmatpush1.bf16.msra.mxu1 %v14828_v53  ;;  %11993 = vmatprep.mubr.msk.f32.mxu1 %vm14528_vm0, %v17675_v6 }
 0x390   : > { %13080 = vmatprep.subr.bf16.mxu1 %v17673_v3 }
 0x391   : > { %v1908_v52 = vpop.f32.mrb[18].mxu0 }
 0x392   : > { %11994 = vmatmul.mubr.msk.f32.gmra.mrb[96].mxu1 %vm1553_vm4, %v1908_v52  ;;  %v1910_v54 = vpop.f32.mrb[19].mxu0 }
 0x393   : > { %13082 = vmatpush1.bf16.msra.mxu1 %v14834_v62  ;;  %11996 = vmatprep.mubr.msk.f32.mxu1 %vm14528_vm0, %v17675_v6 }
 0x394   : > { %13083 = vmatprep.subr.bf16.mxu1 %v17673_v3 }
 0x395   : > { %v1913_v55 = vpop.f32.mrb[20].mxu0 }
 0x396   : > { %11997 = vmatmul.mubr.msk.f32.gmra.mrb[98].mxu1 %vm1553_vm4, %v1913_v55  ;;  %v1915_v56 = vpop.f32.mrb[21].mxu0 }
 0x397   : > { %13085 = vmatpush1.bf16.msra.mxu1 %v14840_v9  ;;  %11999 = vmatprep.mubr.msk.f32.mxu1 %vm14528_vm0, %v17675_v6 }
 0x398   : > { %13086 = vmatprep.subr.bf16.mxu1 %v17673_v3 }
 0x399   : > { %v1918_v58 = vpop.f32.mrb[22].mxu0 }
 0x39a   : > { %12000 = vmatmul.mubr.msk.f32.gmra.mrb[100].mxu1 %vm1553_vm4, %v1918_v58  ;;  %v1920_v59 = vpop.f32.mrb[23].mxu0 }
 0x39b   : > { %13088 = vmatpush1.bf16.msra.mxu1 %v14846_v18  ;;  %12002 = vmatprep.mubr.msk.f32.mxu1 %vm14528_vm0, %v17675_v6 }
 0x39c   : > { %13089 = vmatprep.subr.bf16.mxu1 %v17673_v3 }
 0x39d   : > { %v1923_v60 = vpop.f32.mrb[24].mxu0 }
 0x39e   : > { %12003 = vmatmul.mubr.msk.f32.gmra.mrb[102].mxu1 %vm1553_vm4, %v1923_v60  ;;  %v1925_v61 = vpop.f32.mrb[25].mxu0 }
 0x39f   : > { %13091 = vmatpush1.bf16.msra.mxu1 %v14852_v27  ;;  %12005 = vmatprep.mubr.msk.f32.mxu1 %vm14528_vm0, %v17675_v6 }
 0x3a0   : > { %13092 = vmatprep.subr.bf16.mxu1 %v17673_v3 }
 0x3a1   : > { %v1928_v0 = vpop.f32.mrb[26].mxu0 }
 0x3a2   : > { %12006 = vmatmul.mubr.msk.f32.gmra.mrb[104].mxu1 %vm1553_vm4, %v1928_v0  ;;  %v1930_v1 = vpop.f32.mrb[27].mxu0 }
 0x3a3   : > { %13094 = vmatpush1.bf16.msra.mxu1 %v14858_v37  ;;  %10705 = vmatprep.mubr.msk.f32.mxu1 %vm1286_vm2, %v10691_v63 }
 0x3a4   : > { %13095 = vmatprep.subr.bf16.mxu1 %v17673_v3 }
 0x3a7   : > { %13097 = vmatpush1.bf16.msra.mxu1 %v14864_v47 }
 0x3a8   : > { %13098 = vmatprep.subr.bf16.mxu1 %v17673_v3 }
 0x3ab   : > { %13100 = vmatpush1.bf16.msra.mxu1 %v14870_v57 }
 0x3ac   : > { %13101 = vmatprep.subr.bf16.mxu1 %v17673_v3 }
 0x3af   : > { %13103 = vmatpush1.bf16.msra.mxu1 %v14876_v4 }
 0x3b0   : > { %13104 = vmatprep.subr.bf16.mxu1 %v17673_v3 }
 0x3b3   : > { %13106 = vmatpush1.bf16.msra.mxu1 %v14882_v15 }
 0x3b4   : > { %13107 = vmatprep.subr.bf16.mxu1 %v17673_v3 }
 0x3b7   : > { %13109 = vmatpush1.bf16.msra.mxu1 %v14888_v25 }
 0x3b8   : > { %2147 = vmatprep.subr.mxu1 %v17675_v6 }
 0x3bb   : > { %10704 = vmatpush1.msk.msra.mxu1 %vm1308_vm3, %v14891_v29 }
 0x3bc   : > { %2164 = vmatmul.mubr.f32.vlgmr.msra.gmra.mrb[106].mxu1 %v10690_v2  ;;  %13149 = vmatprep.subr.bf16.mxu1 %v17673_v3  ;;  %v10722_v2 = vld [vmem:[%s14559_s21 + $0x1c8] sm:$0xff] }
 0x3bd   : > { %10706 = vmatprep.mubr.msk.f32.mxu1 %vm1286_vm2, %v10693_v5 }
 0x3c0   : > { %2169 = vmatmul.mubr.f32.gmra.mrb[108].mxu1 %v10692_v7 }
 0x3c1   : > { %10707 = vmatprep.mubr.msk.f32.mxu1 %vm1286_vm2, %v10695_v8  ;;  %v10721_v8 = vld [vmem:[%s14559_s21 + $0x1c0] sm:$0xff] }
 0x3c4   : > { %2174 = vmatmul.mubr.f32.gmra.mrb[110].mxu1 %v10694_v10  ;;  %v10724_v10 = vld [vmem:[%s14559_s21 + $0x1d8] sm:$0xff] }
 0x3c5   : > { %10708 = vmatprep.mubr.msk.f32.mxu1 %vm1286_vm2, %v10697_v11  ;;  %v10723_v11 = vld [vmem:[%s14559_s21 + $0x1d0] sm:$0xff] }
 0x3c8   : > { %2179 = vmatmul.mubr.f32.gmra.mrb[112].mxu1 %v10696_v12  ;;  %v10726_v12 = vld [vmem:[%s14559_s21 + $0x1e8] sm:$0xff] }
 0x3c9   : > { %10709 = vmatprep.mubr.msk.f32.mxu1 %vm1286_vm2, %v10699_v13  ;;  %v10725_v13 = vld [vmem:[%s14559_s21 + $0x1e0] sm:$0xff] }
 0x3cc   : > { %2184 = vmatmul.mubr.f32.gmra.mrb[114].mxu1 %v10698_v14  ;;  %v10728_v14 = vld [vmem:[%s14559_s21 + $0x1f8] sm:$0xff] }
 0x3cd   : > { %10710 = vmatprep.mubr.msk.f32.mxu1 %vm1286_vm2, %v10701_v16  ;;  %v10727_v16 = vld [vmem:[%s14559_s21 + $0x1f0] sm:$0xff] }
 0x3d0   : > { %2189 = vmatmul.mubr.f32.gmra.mrb[116].mxu1 %v10700_v17  ;;  %v10730_v17 = vld [vmem:[%s14559_s21 + $0x208] sm:$0xff] }
 0x3d1   : > { %10711 = vmatprep.mubr.msk.f32.mxu1 %vm1286_vm2, %v10703_v19  ;;  %v10729_v19 = vld [vmem:[%s14559_s21 + $0x200] sm:$0xff] }
 0x3d4   : > { %2194 = vmatmul.mubr.f32.gmra.mrb[118].mxu1 %v10702_v20  ;;  %v10732_v20 = vld [vmem:[%s14559_s21 + $0x218] sm:$0xff] }
 0x3d5   : > { %12037 = vmatprep.mubr.msk.f32.mxu1 %vm14528_vm0, %v17675_v6 }
 0x45d   : > { %v2022_v28 = vpop.f32.mrb[92].mxu1 }
 0x45e   : > { %v15153_v30 = vadd.f32 %v2022_v28, %v15066_v22  ;;  %v11989_v34 = vpop.f32.mrb[93].mxu1  ;;  %v10743_v28 = vld [vmem:[%s14564_s25 + $0x40] sm:$0xff] }
 0x45f   : > { %v10744_v34 = vld [vmem:[%s14564_s25 + $0x48] sm:$0xff] }
 0x461   : > { %v2027_v32 = vpop.f32.mrb[94].mxu1 }
 0x462   : > { %v15156_v35 = vadd.f32 %v2027_v32, %v15068_v26  ;;  %v11992_v36 = vpop.f32.mrb[95].mxu1  ;;  %v13150_v32 = vpack.c.bf16 %v10744_v34, %v10743_v28  ;;  %v10762_v28 = vld [vmem:[%s14559_s21 + $0x280] sm:$0xff]  ;;  %v10765_v34 = vld [vmem:[%s14559_s21 + $0x298] sm:$0x1] }
 0x464   : > { %13151 = vmatpush3.bf16.msra.mxu1 %v13150_v32  ;;  %v10764_v32 = vld [vmem:[%s14559_s21 + $0x290] sm:$0x1] }
 0x465   : > { %v2032_v39 = vpop.f32.mrb[96].mxu1  ;;  %13152 = vmatprep.subr.bf16.mxu1 %v17673_v3 }
 0x466   : > { %v15159_v40 = vadd.f32 %v2032_v39, %v15070_v31  ;;  %v11995_v42 = vpop.f32.mrb[97].mxu1 }
 0x469   : > { %v2037_v43 = vpop.f32.mrb[98].mxu1 }
 0x46a   : > { %v15162_v46 = vadd.f32 %v2037_v43, %v15072_v33  ;;  %v11998_v48 = vpop.f32.mrb[99].mxu1 }
 0x46d   : > { %v2042_v49 = vpop.f32.mrb[100].mxu1 }
 0x46e   : > { %v15165_v22 = vadd.f32 %v2042_v49, %v15074_v38  ;;  %v12001_v50 = vpop.f32.mrb[101].mxu1 }
 0x471   : > { %v2047_v51 = vpop.f32.mrb[102].mxu1 }
 0x472   : > { %v15168_v26 = vadd.f32 %v2047_v51, %v15076_v41  ;;  %v12004_v52 = vpop.f32.mrb[103].mxu1 }
 0x475   : > { %v2052_v54 = vpop.f32.mrb[104].mxu1 }
 0x476   : > { %v15171_v31 = vadd.f32 %v2052_v54, %v15078_v45  ;;  %v12007_v55 = vpop.f32.mrb[105].mxu1 }
 0x48f   : > { %v2165_v56 = vpop.f32.mrb[106].mxu1 }
 0x490   : > { %v2167_v58 = vpop.f32.mrb[107].mxu1  ;;  %12013 = vmatmul.mubr.msk.f32.vlgmr.msra.gmra.mrb[28].mxu0 %vm1553_vm4, %v2165_v56 }
 0x491   : > { %13115 = vmatpush1.bf16.msra.mxu0 %v14822_v44  ;;  %12015 = vmatprep.mubr.msk.f32.mxu0 %vm14528_vm0, %v17675_v6 }
 0x492   : > { %13116 = vmatprep.subr.bf16.mxu0 %v17673_v3 }
 0x493   : > { %v2170_v33 = vpop.f32.mrb[108].mxu1 }
 0x494   : > { %12016 = vmatmul.mubr.msk.f32.gmra.mrb[30].mxu0 %vm1553_vm4, %v2170_v33  ;;  %v2172_v38 = vpop.f32.mrb[109].mxu1 }
 0x495   : > { %13118 = vmatpush1.bf16.msra.mxu0 %v14828_v53  ;;  %12018 = vmatprep.mubr.msk.f32.mxu0 %vm14528_vm0, %v17675_v6 }
 0x496   : > { %13119 = vmatprep.subr.bf16.mxu0 %v17673_v3 }
 0x497   : > { %v2175_v41 = vpop.f32.mrb[110].mxu1 }
 0x498   : > { %12019 = vmatmul.mubr.msk.f32.gmra.mrb[32].mxu0 %vm1553_vm4, %v2175_v41  ;;  %v2177_v45 = vpop.f32.mrb[111].mxu1 }
 0x499   : > { %13121 = vmatpush1.bf16.msra.mxu0 %v14834_v62  ;;  %12021 = vmatprep.mubr.msk.f32.mxu0 %vm14528_vm0, %v17675_v6 }
 0x49a   : > { %13122 = vmatprep.subr.bf16.mxu0 %v17673_v3 }
 0x49b   : > { %v2180_v59 = vpop.f32.mrb[112].mxu1 }
 0x49c   : > { %12022 = vmatmul.mubr.msk.f32.gmra.mrb[34].mxu0 %vm1553_vm4, %v2180_v59  ;;  %v2182_v60 = vpop.f32.mrb[113].mxu1 }
 0x49d   : > { %13124 = vmatpush1.bf16.msra.mxu0 %v14840_v9  ;;  %12024 = vmatprep.mubr.msk.f32.mxu0 %vm14528_vm0, %v17675_v6 }
 0x49e   : > { %13125 = vmatprep.subr.bf16.mxu0 %v17673_v3 }
 0x49f   : > { %v2185_v61 = vpop.f32.mrb[114].mxu1 }
 0x4a0   : > { %12025 = vmatmul.mubr.msk.f32.gmra.mrb[36].mxu0 %vm1553_vm4, %v2185_v61  ;;  %v2187_v63 = vpop.f32.mrb[115].mxu1 }
 0x4a1   : > { %13127 = vmatpush1.bf16.msra.mxu0 %v14846_v18  ;;  %12027 = vmatprep.mubr.msk.f32.mxu0 %vm14528_vm0, %v17675_v6 }
 0x4a2   : > { %13128 = vmatprep.subr.bf16.mxu0 %v17673_v3 }
 0x4a3   : > { %v2190_v0 = vpop.f32.mrb[116].mxu1 }
 0x4a4   : > { %12028 = vmatmul.mubr.msk.f32.gmra.mrb[38].mxu0 %vm1553_vm4, %v2190_v0  ;;  %v2192_v1 = vpop.f32.mrb[117].mxu1 }
 0x4a5   : > { %13130 = vmatpush1.bf16.msra.mxu0 %v14852_v27  ;;  %12030 = vmatprep.mubr.msk.f32.mxu0 %vm14528_vm0, %v17675_v6 }
 0x4a6   : > { %13131 = vmatprep.subr.bf16.mxu0 %v17673_v3 }
 0x4a7   : > { %v2195_v5 = vpop.f32.mrb[118].mxu1 }
 0x4a8   : > { %12031 = vmatmul.mubr.msk.f32.gmra.mrb[40].mxu0 %vm1553_vm4, %v2195_v5  ;;  %v2197_v7 = vpop.f32.mrb[119].mxu1 }
 0x4a9   : > { %13133 = vmatpush1.bf16.msra.mxu0 %v14858_v37  ;;  %10736 = vmatprep.mubr.msk.f32.mxu0 %vm1286_vm2, %v10722_v2 }
 0x4aa   : > { %13134 = vmatprep.subr.bf16.mxu0 %v17673_v3 }
 0x4ad   : > { %13136 = vmatpush1.bf16.msra.mxu0 %v14864_v47 }
 0x4ae   : > { %13137 = vmatprep.subr.bf16.mxu0 %v17673_v3 }
 0x4b1   : > { %13139 = vmatpush1.bf16.msra.mxu0 %v14870_v57 }
 0x4b2   : > { %13140 = vmatprep.subr.bf16.mxu0 %v17673_v3 }
 0x4b5   : > { %13142 = vmatpush1.bf16.msra.mxu0 %v14876_v4 }
 0x4b6   : > { %13143 = vmatprep.subr.bf16.mxu0 %v17673_v3 }
 0x4b9   : > { %13145 = vmatpush1.bf16.msra.mxu0 %v14882_v15 }
 0x4ba   : > { %13146 = vmatprep.subr.bf16.mxu0 %v17673_v3 }
 0x4bd   : > { %13148 = vmatpush1.bf16.msra.mxu0 %v14888_v25 }
 0x4be   : > { %2414 = vmatprep.subr.mxu0 %v17675_v6 }
 0x4c1   : > { %10735 = vmatpush1.msk.msra.mxu0 %vm1308_vm3, %v14891_v29 }
 0x4c2   : > { %2431 = vmatmul.mubr.f32.vlgmr.msra.gmra.mrb[42].mxu0 %v10721_v8  ;;  %13188 = vmatprep.subr.bf16.mxu0 %v17673_v3  ;;  %v10753_v8 = vld [vmem:[%s14559_s21 + $0x238] sm:$0xff] }
 0x4c3   : > { %10737 = vmatprep.mubr.msk.f32.mxu0 %vm1286_vm2, %v10724_v10 }
 0x4c6   : > { %2436 = vmatmul.mubr.f32.gmra.mrb[44].mxu0 %v10723_v11 }
 0x4c7   : > { %10738 = vmatprep.mubr.msk.f32.mxu0 %vm1286_vm2, %v10726_v12  ;;  %v10752_v12 = vld [vmem:[%s14559_s21 + $0x230] sm:$0xff] }
 0x4ca   : > { %2441 = vmatmul.mubr.f32.gmra.mrb[46].mxu0 %v10725_v13  ;;  %v10755_v13 = vld [vmem:[%s14559_s21 + $0x248] sm:$0xff] }
 0x4cb   : > { %10739 = vmatprep.mubr.msk.f32.mxu0 %vm1286_vm2, %v10728_v14  ;;  %v10754_v14 = vld [vmem:[%s14559_s21 + $0x240] sm:$0xff] }
 0x4ce   : > { %2446 = vmatmul.mubr.f32.gmra.mrb[48].mxu0 %v10727_v16  ;;  %v10757_v16 = vld [vmem:[%s14559_s21 + $0x258] sm:$0xff] }
 0x4cf   : > { %10740 = vmatprep.mubr.msk.f32.mxu0 %vm1286_vm2, %v10730_v17  ;;  %v10756_v17 = vld [vmem:[%s14559_s21 + $0x250] sm:$0xff] }
 0x4d2   : > { %2451 = vmatmul.mubr.f32.gmra.mrb[50].mxu0 %v10729_v19  ;;  %v10759_v19 = vld [vmem:[%s14559_s21 + $0x268] sm:$0xff] }
 0x4d3   : > { %10741 = vmatprep.mubr.msk.f32.mxu0 %vm1286_vm2, %v10732_v20  ;;  %v10758_v20 = vld [vmem:[%s14559_s21 + $0x260] sm:$0xff] }
 0x4d6   : > { %2456 = vmatmul.mubr.f32.gmra.mrb[52].mxu0 %v10731_v21  ;;  %v10761_v21 = vld [vmem:[%s14559_s21 + $0x278] sm:$0xff] }
 0x4d7   : > { %10742 = vmatprep.mubr.msk.f32.mxu0 %vm1286_vm2, %v10734_v23  ;;  %v10760_v23 = vld [vmem:[%s14559_s21 + $0x270] sm:$0xff] }
 0x4da   : > { %2461 = vmatmul.mubr.f32.gmra.mrb[54].mxu0 %v10733_v24  ;;  %v10763_v24 = vld [vmem:[%s14559_s21 + $0x288] sm:$0xff] }
 0x4db   : > { %12062 = vmatprep.mubr.msk.f32.mxu0 %vm14528_vm0, %v17675_v6 }
 0x563   : > { %v2289_v36 = vpop.f32.mrb[28].mxu0 }
 0x564   : > { %v15246_v39 = vadd.f32 %v2289_v36, %v15153_v30  ;;  %v12014_v42 = vpop.f32.mrb[29].mxu0  ;;  %v10774_v36 = vld [vmem:[%s14564_s25 + $0x50] sm:$0xff] }
 0x565   : > { %v10775_v42 = vld [vmem:[%s14564_s25 + $0x58] sm:$0xff] }
 0x567   : > { %v2294_v43 = vpop.f32.mrb[30].mxu0 }
 0x568   : > { %v15249_v48 = vadd.f32 %v2294_v43, %v15156_v35  ;;  %v12017_v49 = vpop.f32.mrb[31].mxu0  ;;  %v13189_v43 = vpack.c.bf16 %v10775_v42, %v10774_v36  ;;  %v10793_v36 = vld [vmem:[%s14559_s21 + $0x2f0] sm:$0xff]  ;;  %v10796_v42 = vld [vmem:[%s14559_s21 + $0x308] sm:$0x1] }
 0x56a   : > { %13190 = vmatpush3.bf16.msra.mxu0 %v13189_v43  ;;  %v10795_v43 = vld [vmem:[%s14559_s21 + $0x300] sm:$0x1] }
 0x56b   : > { %v2299_v50 = vpop.f32.mrb[32].mxu0  ;;  %13191 = vmatprep.subr.bf16.mxu0 %v17673_v3 }
 0x56c   : > { %v15252_v51 = vadd.f32 %v2299_v50, %v15159_v40  ;;  %v12020_v52 = vpop.f32.mrb[33].mxu0 }
 0x56f   : > { %v2304_v54 = vpop.f32.mrb[34].mxu0 }
 0x570   : > { %v15255_v55 = vadd.f32 %v2304_v54, %v15162_v46  ;;  %v12023_v56 = vpop.f32.mrb[35].mxu0 }
 0x573   : > { %v2309_v58 = vpop.f32.mrb[36].mxu0 }
 0x574   : > { %v15258_v30 = vadd.f32 %v2309_v58, %v15165_v22  ;;  %v12026_v33 = vpop.f32.mrb[37].mxu0 }
 0x577   : > { %v2314_v38 = vpop.f32.mrb[38].mxu0 }
 0x578   : > { %v15261_v35 = vadd.f32 %v2314_v38, %v15168_v26  ;;  %v12029_v41 = vpop.f32.mrb[39].mxu0 }
 0x57b   : > { %v2319_v45 = vpop.f32.mrb[40].mxu0 }
 0x57c   : > { %v15264_v40 = vadd.f32 %v2319_v45, %v15171_v31  ;;  %v12032_v59 = vpop.f32.mrb[41].mxu0 }
 0x595   : > { %v2432_v60 = vpop.f32.mrb[42].mxu0 }
 0x596   : > { %v2434_v61 = vpop.f32.mrb[43].mxu0  ;;  %12038 = vmatmul.mubr.msk.f32.vlgmr.msra.gmra.mrb[120].mxu1 %vm1553_vm4, %v2432_v60 }
 0x597   : > { %13154 = vmatpush1.bf16.msra.mxu1 %v14822_v44  ;;  %12040 = vmatprep.mubr.msk.f32.mxu1 %vm14528_vm0, %v17675_v6 }
 0x598   : > { %13155 = vmatprep.subr.bf16.mxu1 %v17673_v3 }
 0x599   : > { %v2437_v46 = vpop.f32.mrb[44].mxu0 }
 0x59a   : > { %12041 = vmatmul.mubr.msk.f32.gmra.mrb[122].mxu1 %vm1553_vm4, %v2437_v46  ;;  %v2439_v22 = vpop.f32.mrb[45].mxu0 }
 0x59b   : > { %13157 = vmatpush1.bf16.msra.mxu1 %v14828_v53  ;;  %12043 = vmatprep.mubr.msk.f32.mxu1 %vm14528_vm0, %v17675_v6 }
 0x59c   : > { %13158 = vmatprep.subr.bf16.mxu1 %v17673_v3 }
 0x59d   : > { %v2442_v26 = vpop.f32.mrb[46].mxu0 }
 0x59e   : > { %12044 = vmatmul.mubr.msk.f32.gmra.mrb[124].mxu1 %vm1553_vm4, %v2442_v26  ;;  %v2444_v31 = vpop.f32.mrb[47].mxu0 }
 0x59f   : > { %13160 = vmatpush1.bf16.msra.mxu1 %v14834_v62  ;;  %12046 = vmatprep.mubr.msk.f32.mxu1 %vm14528_vm0, %v17675_v6 }
 0x5a0   : > { %13161 = vmatprep.subr.bf16.mxu1 %v17673_v3 }
 0x5a1   : > { %v2447_v63 = vpop.f32.mrb[48].mxu0 }
 0x5a2   : > { %12047 = vmatmul.mubr.msk.f32.gmra.mrb[126].mxu1 %vm1553_vm4, %v2447_v63  ;;  %v2449_v0 = vpop.f32.mrb[49].mxu0 }
 0x5a3   : > { %13163 = vmatpush1.bf16.msra.mxu1 %v14840_v9  ;;  %12049 = vmatprep.mubr.msk.f32.mxu1 %vm14528_vm0, %v17675_v6 }
 0x5a4   : > { %13164 = vmatprep.subr.bf16.mxu1 %v17673_v3 }
 0x5a5   : > { %v2452_v1 = vpop.f32.mrb[50].mxu0 }
 0x5a6   : > { %12050 = vmatmul.mubr.msk.f32.gmra.mrb[128].mxu1 %vm1553_vm4, %v2452_v1  ;;  %v2454_v2 = vpop.f32.mrb[51].mxu0 }
 0x5a7   : > { %13166 = vmatpush1.bf16.msra.mxu1 %v14846_v18  ;;  %12052 = vmatprep.mubr.msk.f32.mxu1 %vm14528_vm0, %v17675_v6 }
 0x5a8   : > { %13167 = vmatprep.subr.bf16.mxu1 %v17673_v3 }
 0x5a9   : > { %v2457_v5 = vpop.f32.mrb[52].mxu0 }
 0x5aa   : > { %12053 = vmatmul.mubr.msk.f32.gmra.mrb[130].mxu1 %vm1553_vm4, %v2457_v5  ;;  %v2459_v7 = vpop.f32.mrb[53].mxu0 }
 0x5ab   : > { %13169 = vmatpush1.bf16.msra.mxu1 %v14852_v27  ;;  %12055 = vmatprep.mubr.msk.f32.mxu1 %vm14528_vm0, %v17675_v6 }
 0x5ac   : > { %13170 = vmatprep.subr.bf16.mxu1 %v17673_v3 }
 0x5ad   : > { %v2462_v10 = vpop.f32.mrb[54].mxu0 }
 0x5ae   : > { %12056 = vmatmul.mubr.msk.f32.gmra.mrb[132].mxu1 %vm1553_vm4, %v2462_v10  ;;  %v2464_v11 = vpop.f32.mrb[55].mxu0 }
 0x5af   : > { %13172 = vmatpush1.bf16.msra.mxu1 %v14858_v37  ;;  %10767 = vmatprep.mubr.msk.f32.mxu1 %vm1286_vm2, %v10753_v8 }
 0x5b0   : > { %13173 = vmatprep.subr.bf16.mxu1 %v17673_v3 }
 0x5b3   : > { %13175 = vmatpush1.bf16.msra.mxu1 %v14864_v47 }
 0x5b4   : > { %13176 = vmatprep.subr.bf16.mxu1 %v17673_v3 }
 0x5b7   : > { %13178 = vmatpush1.bf16.msra.mxu1 %v14870_v57 }
 0x5b8   : > { %13179 = vmatprep.subr.bf16.mxu1 %v17673_v3 }
 0x5bb   : > { %13181 = vmatpush1.bf16.msra.mxu1 %v14876_v4 }
 0x5bc   : > { %13182 = vmatprep.subr.bf16.mxu1 %v17673_v3 }
 0x5bf   : > { %13184 = vmatpush1.bf16.msra.mxu1 %v14882_v15 }
 0x5c0   : > { %13185 = vmatprep.subr.bf16.mxu1 %v17673_v3 }
 0x5c3   : > { %13187 = vmatpush1.bf16.msra.mxu1 %v14888_v25 }
 0x5c4   : > { %2681 = vmatprep.subr.mxu1 %v17675_v6 }
 0x5c7   : > { %10766 = vmatpush1.msk.msra.mxu1 %vm1308_vm3, %v14891_v29 }
 0x5c8   : > { %2698 = vmatmul.mubr.f32.vlgmr.msra.gmra.mrb[134].mxu1 %v10752_v12  ;;  %13227 = vmatprep.subr.bf16.mxu1 %v17673_v3  ;;  %v10784_v12 = vld [vmem:[%s14559_s21 + $0x2a8] sm:$0xff] }
 0x5c9   : > { %10768 = vmatprep.mubr.msk.f32.mxu1 %vm1286_vm2, %v10755_v13 }
 0x5cc   : > { %2703 = vmatmul.mubr.f32.gmra.mrb[136].mxu1 %v10754_v14 }
 0x5cd   : > { %10769 = vmatprep.mubr.msk.f32.mxu1 %vm1286_vm2, %v10757_v16  ;;  %v10783_v16 = vld [vmem:[%s14559_s21 + $0x2a0] sm:$0xff] }
 0x5d0   : > { %2708 = vmatmul.mubr.f32.gmra.mrb[138].mxu1 %v10756_v17  ;;  %v10786_v17 = vld [vmem:[%s14559_s21 + $0x2b8] sm:$0xff] }
 0x5d1   : > { %10770 = vmatprep.mubr.msk.f32.mxu1 %vm1286_vm2, %v10759_v19  ;;  %v10785_v19 = vld [vmem:[%s14559_s21 + $0x2b0] sm:$0xff] }
 0x5d4   : > { %2713 = vmatmul.mubr.f32.gmra.mrb[140].mxu1 %v10758_v20  ;;  %v10788_v20 = vld [vmem:[%s14559_s21 + $0x2c8] sm:$0xff] }
 0x5d5   : > { %10771 = vmatprep.mubr.msk.f32.mxu1 %vm1286_vm2, %v10761_v21  ;;  %v10787_v21 = vld [vmem:[%s14559_s21 + $0x2c0] sm:$0xff] }
 0x5d8   : > { %2718 = vmatmul.mubr.f32.gmra.mrb[142].mxu1 %v10760_v23  ;;  %v10790_v23 = vld [vmem:[%s14559_s21 + $0x2d8] sm:$0xff] }
 0x5d9   : > { %10772 = vmatprep.mubr.msk.f32.mxu1 %vm1286_vm2, %v10763_v24  ;;  %v10789_v24 = vld [vmem:[%s14559_s21 + $0x2d0] sm:$0xff] }
 0x5dc   : > { %2723 = vmatmul.mubr.f32.gmra.mrb[144].mxu1 %v10762_v28  ;;  %v10792_v28 = vld [vmem:[%s14559_s21 + $0x2e8] sm:$0xff] }
 0x5dd   : > { %10773 = vmatprep.mubr.msk.f32.mxu1 %vm1286_vm2, %v10765_v34  ;;  %v10791_v34 = vld [vmem:[%s14559_s21 + $0x2e0] sm:$0xff] }
 0x5e0   : > { %2728 = vmatmul.mubr.f32.gmra.mrb[146].mxu1 %v10764_v32  ;;  %v10794_v32 = vld [vmem:[%s14559_s21 + $0x2f8] sm:$0xff] }
 0x5e1   : > { %12087 = vmatprep.mubr.msk.f32.mxu1 %vm14528_vm0, %v17675_v6 }
 0x669   : > { %v2556_v49 = vpop.f32.mrb[120].mxu1 }
 0x66a   : > { %v15339_v50 = vadd.f32 %v2556_v49, %v15246_v39  ;;  %v12039_v52 = vpop.f32.mrb[121].mxu1  ;;  %v10805_v49 = vld [vmem:[%s14564_s25 + $0x60] sm:$0xff] }
 0x66b   : > { %v10806_v52 = vld [vmem:[%s14564_s25 + $0x68] sm:$0xff] }
 0x66d   : > { %v2561_v54 = vpop.f32.mrb[122].mxu1 }
 0x66e   : > { %v15342_v56 = vadd.f32 %v2561_v54, %v15249_v48  ;;  %v12042_v58 = vpop.f32.mrb[123].mxu1  ;;  %v13228_v54 = vpack.c.bf16 %v10806_v52, %v10805_v49  ;;  %v10824_v49 = vld [vmem:[%s14559_s21 + $0x360] sm:$0xff]  ;;  %v10827_v52 = vld [vmem:[%s14559_s21 + $0x378] sm:$0x1] }
 0x670   : > { %13229 = vmatpush3.bf16.msra.mxu1 %v13228_v54  ;;  %v10826_v54 = vld [vmem:[%s14559_s21 + $0x370] sm:$0x1] }
 0x671   : > { %v2566_v33 = vpop.f32.mrb[124].mxu1  ;;  %13230 = vmatprep.subr.bf16.mxu1 %v17673_v3 }
 0x672   : > { %v15345_v38 = vadd.f32 %v2566_v33, %v15252_v51  ;;  %v12045_v41 = vpop.f32.mrb[125].mxu1 }
 0x675   : > { %v2571_v45 = vpop.f32.mrb[126].mxu1 }
 0x676   : > { %v15348_v59 = vadd.f32 %v2571_v45, %v15255_v55  ;;  %v12048_v60 = vpop.f32.mrb[127].mxu1 }
 0x679   : > { %v2576_v61 = vpop.f32.mrb[128].mxu1 }
 0x67a   : > { %v15351_v39 = vadd.f32 %v2576_v61, %v15258_v30  ;;  %v12051_v46 = vpop.f32.mrb[129].mxu1 }
 0x67d   : > { %v2581_v22 = vpop.f32.mrb[130].mxu1 }
 0x67e   : > { %v15354_v48 = vadd.f32 %v2581_v22, %v15261_v35  ;;  %v12054_v26 = vpop.f32.mrb[131].mxu1 }
 0x681   : > { %v2586_v31 = vpop.f32.mrb[132].mxu1 }
 0x682   : > { %v15357_v51 = vadd.f32 %v2586_v31, %v15264_v40  ;;  %v12057_v63 = vpop.f32.mrb[133].mxu1 }
 0x69b   : > { %v2699_v0 = vpop.f32.mrb[134].mxu1 }
 0x69c   : > { %v2701_v1 = vpop.f32.mrb[135].mxu1  ;;  %12063 = vmatmul.mubr.msk.f32.vlgmr.msra.gmra.mrb[56].mxu0 %vm1553_vm4, %v2699_v0 }
 0x69d   : > { %13193 = vmatpush1.bf16.msra.mxu0 %v14822_v44  ;;  %12065 = vmatprep.mubr.msk.f32.mxu0 %vm14528_vm0, %v17675_v6 }
 0x69e   : > { %13194 = vmatprep.subr.bf16.mxu0 %v17673_v3 }
 0x69f   : > { %v2704_v55 = vpop.f32.mrb[136].mxu1 }
 0x6a0   : > { %12066 = vmatmul.mubr.msk.f32.gmra.mrb[58].mxu0 %vm1553_vm4, %v2704_v55  ;;  %v2706_v30 = vpop.f32.mrb[137].mxu1 }
 0x6a1   : > { %13196 = vmatpush1.bf16.msra.mxu0 %v14828_v53  ;;  %12068 = vmatprep.mubr.msk.f32.mxu0 %vm14528_vm0, %v17675_v6 }
 0x6a2   : > { %13197 = vmatprep.subr.bf16.mxu0 %v17673_v3 }
 0x6a3   : > { %v2709_v35 = vpop.f32.mrb[138].mxu1 }
 0x6a4   : > { %12069 = vmatmul.mubr.msk.f32.gmra.mrb[60].mxu0 %vm1553_vm4, %v2709_v35  ;;  %v2711_v40 = vpop.f32.mrb[139].mxu1 }
 0x6a5   : > { %13199 = vmatpush1.bf16.msra.mxu0 %v14834_v62  ;;  %12071 = vmatprep.mubr.msk.f32.mxu0 %vm14528_vm0, %v17675_v6 }
 0x6a6   : > { %13200 = vmatprep.subr.bf16.mxu0 %v17673_v3 }
 0x6a7   : > { %v2714_v2 = vpop.f32.mrb[140].mxu1 }
 0x6a8   : > { %12072 = vmatmul.mubr.msk.f32.gmra.mrb[62].mxu0 %vm1553_vm4, %v2714_v2  ;;  %v2716_v5 = vpop.f32.mrb[141].mxu1 }
 0x6a9   : > { %13202 = vmatpush1.bf16.msra.mxu0 %v14840_v9  ;;  %12074 = vmatprep.mubr.msk.f32.mxu0 %vm14528_vm0, %v17675_v6 }
 0x6aa   : > { %13203 = vmatprep.subr.bf16.mxu0 %v17673_v3 }
 0x6ab   : > { %v2719_v7 = vpop.f32.mrb[142].mxu1 }
 0x6ac   : > { %12075 = vmatmul.mubr.msk.f32.gmra.mrb[64].mxu0 %vm1553_vm4, %v2719_v7  ;;  %v2721_v8 = vpop.f32.mrb[143].mxu1 }
 0x6ad   : > { %13205 = vmatpush1.bf16.msra.mxu0 %v14846_v18  ;;  %12077 = vmatprep.mubr.msk.f32.mxu0 %vm14528_vm0, %v17675_v6 }
 0x6ae   : > { %13206 = vmatprep.subr.bf16.mxu0 %v17673_v3 }
 0x6af   : > { %v2724_v10 = vpop.f32.mrb[144].mxu1 }
 0x6b0   : > { %12078 = vmatmul.mubr.msk.f32.gmra.mrb[66].mxu0 %vm1553_vm4, %v2724_v10  ;;  %v2726_v11 = vpop.f32.mrb[145].mxu1 }
 0x6b1   : > { %13208 = vmatpush1.bf16.msra.mxu0 %v14852_v27  ;;  %12080 = vmatprep.mubr.msk.f32.mxu0 %vm14528_vm0, %v17675_v6 }
 0x6b2   : > { %13209 = vmatprep.subr.bf16.mxu0 %v17673_v3 }
 0x6b3   : > { %v2729_v13 = vpop.f32.mrb[146].mxu1 }
 0x6b4   : > { %12081 = vmatmul.mubr.msk.f32.gmra.mrb[68].mxu0 %vm1553_vm4, %v2729_v13  ;;  %v2731_v14 = vpop.f32.mrb[147].mxu1 }
 0x6b5   : > { %13211 = vmatpush1.bf16.msra.mxu0 %v14858_v37  ;;  %10798 = vmatprep.mubr.msk.f32.mxu0 %vm1286_vm2, %v10784_v12 }
 0x6b6   : > { %13212 = vmatprep.subr.bf16.mxu0 %v17673_v3 }
 0x6b9   : > { %13214 = vmatpush1.bf16.msra.mxu0 %v14864_v47 }
 0x6ba   : > { %13215 = vmatprep.subr.bf16.mxu0 %v17673_v3 }
 0x6bd   : > { %13217 = vmatpush1.bf16.msra.mxu0 %v14870_v57 }
 0x6be   : > { %13218 = vmatprep.subr.bf16.mxu0 %v17673_v3 }
 0x6c1   : > { %13220 = vmatpush1.bf16.msra.mxu0 %v14876_v4 }
 0x6c2   : > { %13221 = vmatprep.subr.bf16.mxu0 %v17673_v3 }
 0x6c5   : > { %13223 = vmatpush1.bf16.msra.mxu0 %v14882_v15 }
 0x6c6   : > { %13224 = vmatprep.subr.bf16.mxu0 %v17673_v3 }
 0x6c9   : > { %13226 = vmatpush1.bf16.msra.mxu0 %v14888_v25 }
 0x6ca   : > { %2948 = vmatprep.subr.mxu0 %v17675_v6 }
 0x6cd   : > { %10797 = vmatpush1.msk.msra.mxu0 %vm1308_vm3, %v14891_v29 }
 0x6ce   : > { %2965 = vmatmul.mubr.f32.vlgmr.msra.gmra.mrb[70].mxu0 %v10783_v16  ;;  %13266 = vmatprep.subr.bf16.mxu0 %v17673_v3  ;;  %v10815_v16 = vld [vmem:[%s14559_s21 + $0x318] sm:$0xff] }
 0x6cf   : > { %10799 = vmatprep.mubr.msk.f32.mxu0 %vm1286_vm2, %v10786_v17 }
 0x6d2   : > { %2970 = vmatmul.mubr.f32.gmra.mrb[72].mxu0 %v10785_v19 }
 0x6d3   : > { %10800 = vmatprep.mubr.msk.f32.mxu0 %vm1286_vm2, %v10788_v20  ;;  %v10814_v20 = vld [vmem:[%s14559_s21 + $0x310] sm:$0xff] }
 0x6d6   : > { %2975 = vmatmul.mubr.f32.gmra.mrb[74].mxu0 %v10787_v21  ;;  %v10817_v21 = vld [vmem:[%s14559_s21 + $0x328] sm:$0xff] }
 0x6d7   : > { %10801 = vmatprep.mubr.msk.f32.mxu0 %vm1286_vm2, %v10790_v23  ;;  %v10816_v23 = vld [vmem:[%s14559_s21 + $0x320] sm:$0xff] }
 0x6da   : > { %2980 = vmatmul.mubr.f32.gmra.mrb[76].mxu0 %v10789_v24  ;;  %v10819_v24 = vld [vmem:[%s14559_s21 + $0x338] sm:$0xff] }
 0x6db   : > { %10802 = vmatprep.mubr.msk.f32.mxu0 %vm1286_vm2, %v10792_v28  ;;  %v10818_v28 = vld [vmem:[%s14559_s21 + $0x330] sm:$0xff] }
 0x6de   : > { %2985 = vmatmul.mubr.f32.gmra.mrb[78].mxu0 %v10791_v34  ;;  %v10821_v34 = vld [vmem:[%s14559_s21 + $0x348] sm:$0xff] }
 0x6df   : > { %10803 = vmatprep.mubr.msk.f32.mxu0 %vm1286_vm2, %v10794_v32  ;;  %v10820_v32 = vld [vmem:[%s14559_s21 + $0x340] sm:$0xff] }
 0x6e2   : > { %2990 = vmatmul.mubr.f32.gmra.mrb[80].mxu0 %v10793_v36  ;;  %v10823_v36 = vld [vmem:[%s14559_s21 + $0x358] sm:$0xff] }
 0x6e3   : > { %10804 = vmatprep.mubr.msk.f32.mxu0 %vm1286_vm2, %v10796_v42  ;;  %v10822_v42 = vld [vmem:[%s14559_s21 + $0x350] sm:$0xff] }
 0x6e6   : > { %2995 = vmatmul.mubr.f32.gmra.mrb[82].mxu0 %v10795_v43  ;;  %v10825_v43 = vld [vmem:[%s14559_s21 + $0x368] sm:$0xff] }
 0x6e7   : > { %12112 = vmatprep.mubr.msk.f32.mxu0 %vm14528_vm0, %v17675_v6 }
 0x76f   : > { %v2823_v58 = vpop.f32.mrb[56].mxu0 }
 0x770   : > { %v15432_v33 = vadd.f32 %v2823_v58, %v15339_v50  ;;  %v12064_v41 = vpop.f32.mrb[57].mxu0  ;;  %v10836_v58 = vld [vmem:[%s14564_s25 + $0x70] sm:$0xff] }
 0x771   : > { %v10837_v41 = vld [vmem:[%s14564_s25 + $0x78] sm:$0xff] }
 0x773   : > { %v2828_v45 = vpop.f32.mrb[58].mxu0 }
 0x774   : > { %v15435_v60 = vadd.f32 %v2828_v45, %v15342_v56  ;;  %v12067_v61 = vpop.f32.mrb[59].mxu0  ;;  %v13267_v45 = vpack.c.bf16 %v10837_v41, %v10836_v58 }
 0x776   : > { %13268 = vmatpush3.bf16.msra.mxu0 %v13267_v45 }
 0x777   : > { %v2833_v46 = vpop.f32.mrb[60].mxu0  ;;  %13269 = vmatprep.subr.bf16.mxu0 %v17673_v3 }
 0x778   : > { %v15438_v22 = vadd.f32 %v2833_v46, %v15345_v38  ;;  %v12070_v26 = vpop.f32.mrb[61].mxu0 }
 0x77b   : > { %v2838_v31 = vpop.f32.mrb[62].mxu0 }
 0x77c   : > { %v15441_v63 = vadd.f32 %v2838_v31, %v15348_v59  ;;  %v12073_v0 = vpop.f32.mrb[63].mxu0 }
 0x77f   : > { %v2843_v1 = vpop.f32.mrb[64].mxu0 }
 0x780   : > { %v15444_v50 = vadd.f32 %v2843_v1, %v15351_v39  ;;  %v12076_v55 = vpop.f32.mrb[65].mxu0 }
 0x783   : > { %v2848_v30 = vpop.f32.mrb[66].mxu0 }
 0x784   : > { %v15447_v56 = vadd.f32 %v2848_v30, %v15354_v48  ;;  %v12079_v35 = vpop.f32.mrb[67].mxu0 }
 0x787   : > { %v2853_v40 = vpop.f32.mrb[68].mxu0 }
 0x788   : > { %v15450_v38 = vadd.f32 %v2853_v40, %v15357_v51  ;;  %v12082_v2 = vpop.f32.mrb[69].mxu0 }
 0x7a1   : > { %v2966_v5 = vpop.f32.mrb[70].mxu0 }
 0x7a2   : > { %v2968_v7 = vpop.f32.mrb[71].mxu0  ;;  %12088 = vmatmul.mubr.msk.f32.vlgmr.msra.gmra.mrb[148].mxu1 %vm1553_vm4, %v2966_v5 }
 0x7a3   : > { %13232 = vmatpush1.bf16.msra.mxu1 %v14822_v44  ;;  %12090 = vmatprep.mubr.msk.f32.mxu1 %vm14528_vm0, %v17675_v6 }
 0x7a4   : > { %13233 = vmatprep.subr.bf16.mxu1 %v17673_v3 }
 0x7a5   : > { %v2971_v59 = vpop.f32.mrb[72].mxu0 }
 0x7a6   : > { %12091 = vmatmul.mubr.msk.f32.gmra.mrb[150].mxu1 %vm1553_vm4, %v2971_v59  ;;  %v2973_v39 = vpop.f32.mrb[73].mxu0 }
 0x7a7   : > { %13235 = vmatpush1.bf16.msra.mxu1 %v14828_v53  ;;  %12093 = vmatprep.mubr.msk.f32.mxu1 %vm14528_vm0, %v17675_v6 }
 0x7a8   : > { %13236 = vmatprep.subr.bf16.mxu1 %v17673_v3 }
 0x7a9   : > { %v2976_v48 = vpop.f32.mrb[74].mxu0 }
 0x7aa   : > { %12094 = vmatmul.mubr.msk.f32.gmra.mrb[152].mxu1 %vm1553_vm4, %v2976_v48  ;;  %v2978_v51 = vpop.f32.mrb[75].mxu0 }
 0x7ab   : > { %13238 = vmatpush1.bf16.msra.mxu1 %v14834_v62  ;;  %12096 = vmatprep.mubr.msk.f32.mxu1 %vm14528_vm0, %v17675_v6 }
 0x7ac   : > { %13239 = vmatprep.subr.bf16.mxu1 %v17673_v3 }
 0x7ad   : > { %v2981_v8 = vpop.f32.mrb[76].mxu0 }
 0x7ae   : > { %12097 = vmatmul.mubr.msk.f32.gmra.mrb[154].mxu1 %vm1553_vm4, %v2981_v8  ;;  %v2983_v10 = vpop.f32.mrb[77].mxu0 }
 0x7af   : > { %13241 = vmatpush1.bf16.msra.mxu1 %v14840_v9  ;;  %12099 = vmatprep.mubr.msk.f32.mxu1 %vm14528_vm0, %v17675_v6 }
 0x7b0   : > { %13242 = vmatprep.subr.bf16.mxu1 %v17673_v3 }
 0x7b1   : > { %v2986_v11 = vpop.f32.mrb[78].mxu0 }
 0x7b2   : > { %12100 = vmatmul.mubr.msk.f32.gmra.mrb[156].mxu1 %vm1553_vm4, %v2986_v11  ;;  %v2988_v12 = vpop.f32.mrb[79].mxu0 }
 0x7b3   : > { %13244 = vmatpush1.bf16.msra.mxu1 %v14846_v18  ;;  %12102 = vmatprep.mubr.msk.f32.mxu1 %vm14528_vm0, %v17675_v6 }
 0x7b4   : > { %13245 = vmatprep.subr.bf16.mxu1 %v17673_v3 }
 0x7b5   : > { %v2991_v13 = vpop.f32.mrb[80].mxu0 }
 0x7b6   : > { %12103 = vmatmul.mubr.msk.f32.gmra.mrb[158].mxu1 %vm1553_vm4, %v2991_v13  ;;  %v2993_v14 = vpop.f32.mrb[81].mxu0 }
 0x7b7   : > { %13247 = vmatpush1.bf16.msra.mxu1 %v14852_v27  ;;  %12105 = vmatprep.mubr.msk.f32.mxu1 %vm14528_vm0, %v17675_v6  ;;  %v10846_v14 = vld [vmem:[%s14559_s21 + $0x388] sm:$0xff] }
 0x7b8   : > { %13248 = vmatprep.subr.bf16.mxu1 %v17673_v3 }
 0x7b9   : > { %v2996_v17 = vpop.f32.mrb[82].mxu0 }
 0x7ba   : > { %12106 = vmatmul.mubr.msk.f32.gmra.mrb[160].mxu1 %vm1553_vm4, %v2996_v17  ;;  %v2998_v19 = vpop.f32.mrb[83].mxu0  ;;  %v10853_v17 = vld [vmem:[%s14559_s21 + $0x3c0] sm:$0xff] }
 0x7bb   : > { %13250 = vmatpush1.bf16.msra.mxu1 %v14858_v37  ;;  %10829 = vmatprep.mubr.msk.f32.mxu1 %vm1286_vm2, %v10815_v16  ;;  %v10856_v19 = vld [vmem:[%s14559_s21 + $0x3d8] sm:$0xff] }
 0x7bc   : > { %13251 = vmatprep.subr.bf16.mxu1 %v17673_v3 }
 0x7bf   : > { %13253 = vmatpush1.bf16.msra.mxu1 %v14864_v47 }
 0x7c0   : > { %13254 = vmatprep.subr.bf16.mxu1 %v17673_v3 }
 0x7c3   : > { %13256 = vmatpush1.bf16.msra.mxu1 %v14870_v57 }
 0x7c4   : > { %13257 = vmatprep.subr.bf16.mxu1 %v17673_v3 }
 0x7c7   : > { %13259 = vmatpush1.bf16.msra.mxu1 %v14876_v4 }
 0x7c8   : > { %13260 = vmatprep.subr.bf16.mxu1 %v17673_v3 }
 0x7cb   : > { %13262 = vmatpush1.bf16.msra.mxu1 %v14882_v15 }
 0x7cc   : > { %13263 = vmatprep.subr.bf16.mxu1 %v17673_v3 }
 0x7cf   : > { %13265 = vmatpush1.bf16.msra.mxu1 %v14888_v25 }
 0x7d0   : > { %3215 = vmatprep.subr.mxu1 %v17675_v6 }
 0x7d3   : > { %10828 = vmatpush1.msk.msra.mxu1 %vm1308_vm3, %v14891_v29 }
 0x7d4   : > { %3232 = vmatmul.mubr.f32.vlgmr.msra.gmra.mrb[162].mxu1 %v10814_v20  ;;  %13305 = vmatprep.subr.bf16.mxu1 %v17673_v3  ;;  %v10855_v20 = vld [vmem:[%s14559_s21 + $0x3d0] sm:$0xff] }
 0x7d5   : > { %10830 = vmatprep.mubr.msk.f32.mxu1 %vm1286_vm2, %v10817_v21  ;;  %v10858_v21 = vld [vmem:[%s14559_s21 + $0x3e8] sm:$0x1] }
 0x7d8   : > { %3237 = vmatmul.mubr.f32.gmra.mrb[164].mxu1 %v10816_v23  ;;  %v10857_v23 = vld [vmem:[%s14559_s21 + $0x3e0] sm:$0x1] }
 0x7d9   : > { %10831 = vmatprep.mubr.msk.f32.mxu1 %vm1286_vm2, %v10819_v24  ;;  %v10867_v24 = vld [vmem:[%s14564_s25 + $0x80] sm:$0xff] }
 0x7dc   : > { %3242 = vmatmul.mubr.f32.gmra.mrb[166].mxu1 %v10818_v28  ;;  %v10868_v28 = vld [vmem:[%s14564_s25 + $0x88] sm:$0xff] }
 0x7dd   : > { %10832 = vmatprep.mubr.msk.f32.mxu1 %vm1286_vm2, %v10821_v34  ;;  %v13306_v34 = vpack.c.bf16 %v10868_v28, %v10867_v24 }
 0x7df   : > { %13307 = vmatpush3.bf16.msra.mxu1 %v13306_v34 }
 0x7e0   : > { %3247 = vmatmul.mubr.f32.gmra.mrb[168].mxu1 %v10820_v32  ;;  %13308 = vmatprep.subr.bf16.mxu1 %v17673_v3 }
 0x7e1   : > { %10833 = vmatprep.mubr.msk.f32.mxu1 %vm1286_vm2, %v10823_v36 }
 0x7e4   : > { %3252 = vmatmul.mubr.f32.gmra.mrb[170].mxu1 %v10822_v42 }
 0x7e5   : > { %10834 = vmatprep.mubr.msk.f32.mxu1 %vm1286_vm2, %v10825_v43 }
 0x7e8   : > { %3257 = vmatmul.mubr.f32.gmra.mrb[172].mxu1 %v10824_v49 }
 0x7e9   : > { %10835 = vmatprep.mubr.msk.f32.mxu1 %vm1286_vm2, %v10827_v52 }
 0x7ec   : > { %3262 = vmatmul.mubr.f32.gmra.mrb[174].mxu1 %v10826_v54 }
 0x7ed   : > { %12137 = vmatprep.mubr.msk.f32.mxu1 %vm14528_vm0, %v17675_v6 }
 0x875   : > { %v3090_v61 = vpop.f32.mrb[148].mxu1 }
 0x876   : > { %v15525_v46 = vadd.f32 %v3090_v61, %v15432_v33  ;;  %v12089_v26 = vpop.f32.mrb[149].mxu1 }
 0x879   : > { %v3095_v31 = vpop.f32.mrb[150].mxu1 }
 0x87a   : > { %v15528_v0 = vadd.f32 %v3095_v31, %v15435_v60  ;;  %v12092_v1 = vpop.f32.mrb[151].mxu1 }
 0x87d   : > { %v3100_v55 = vpop.f32.mrb[152].mxu1 }
 0x87e   : > { %v15531_v30 = vadd.f32 %v3100_v55, %v15438_v22  ;;  %v12095_v35 = vpop.f32.mrb[153].mxu1 }
 0x881   : > { %v3105_v40 = vpop.f32.mrb[154].mxu1 }
 0x882   : > { %v15534_v2 = vadd.f32 %v3105_v40, %v15441_v63  ;;  %v12098_v5 = vpop.f32.mrb[155].mxu1 }
 0x885   : > { %v3110_v7 = vpop.f32.mrb[156].mxu1 }
 0x886   : > { %v15537_v33 = vadd.f32 %v3110_v7, %v15444_v50  ;;  %v12101_v59 = vpop.f32.mrb[157].mxu1 }
 0x889   : > { %v3115_v39 = vpop.f32.mrb[158].mxu1 }
 0x88a   : > { %v15540_v60 = vadd.f32 %v3115_v39, %v15447_v56  ;;  %v12104_v48 = vpop.f32.mrb[159].mxu1 }
 0x88d   : > { %v3120_v51 = vpop.f32.mrb[160].mxu1 }
 0x88e   : > { %v15543_v22 = vadd.f32 %v3120_v51, %v15450_v38  ;;  %v12107_v8 = vpop.f32.mrb[161].mxu1 }
 0x8a7   : > { %v3233_v10 = vpop.f32.mrb[162].mxu1 }
 0x8a8   : > { %v3235_v11 = vpop.f32.mrb[163].mxu1  ;;  %12113 = vmatmul.mubr.msk.f32.vlgmr.msra.gmra.mrb[84].mxu0 %vm1553_vm4, %v3233_v10 }
 0x8a9   : > { %13271 = vmatpush1.bf16.msra.mxu0 %v14822_v44  ;;  %12115 = vmatprep.mubr.msk.f32.mxu0 %vm14528_vm0, %v17675_v6 }
 0x8aa   : > { %13272 = vmatprep.subr.bf16.mxu0 %v17673_v3 }
 0x8ab   : > { %v3238_v63 = vpop.f32.mrb[164].mxu1 }
 0x8ac   : > { %12116 = vmatmul.mubr.msk.f32.gmra.mrb[86].mxu0 %vm1553_vm4, %v3238_v63  ;;  %v3240_v50 = vpop.f32.mrb[165].mxu1 }
 0x8ad   : > { %13274 = vmatpush1.bf16.msra.mxu0 %v14828_v53  ;;  %12118 = vmatprep.mubr.msk.f32.mxu0 %vm14528_vm0, %v17675_v6 }
 0x8ae   : > { %13275 = vmatprep.subr.bf16.mxu0 %v17673_v3 }
 0x8af   : > { %v3243_v56 = vpop.f32.mrb[166].mxu1 }
 0x8b0   : > { %12119 = vmatmul.mubr.msk.f32.gmra.mrb[88].mxu0 %vm1553_vm4, %v3243_v56  ;;  %v3245_v44 = vpop.f32.mrb[167].mxu1 }
 0x8b1   : > { %13277 = vmatpush1.bf16.msra.mxu0 %v14834_v62  ;;  %12121 = vmatprep.mubr.msk.f32.mxu0 %vm14528_vm0, %v17675_v6 }
 0x8b2   : > { %13278 = vmatprep.subr.bf16.mxu0 %v17673_v3 }
 0x8b3   : > { %v3248_v38 = vpop.f32.mrb[168].mxu1 }
 0x8b4   : > { %12122 = vmatmul.mubr.msk.f32.gmra.mrb[90].mxu0 %vm1553_vm4, %v3248_v38  ;;  %v3250_v53 = vpop.f32.mrb[169].mxu1 }
 0x8b5   : > { %13280 = vmatpush1.bf16.msra.mxu0 %v14840_v9  ;;  %12124 = vmatprep.mubr.msk.f32.mxu0 %vm14528_vm0, %v17675_v6  ;;  %v10876_v53 = vld [vmem:[%s14569_s29] ss:$0 sm:$0xff] }
 0x8b6   : > { %13281 = vmatprep.subr.bf16.mxu0 %v17673_v3 }
 0x8b7   : > { %v3253_v12 = vpop.f32.mrb[170].mxu1 }
 0x8b8   : > { %12125 = vmatmul.mubr.msk.f32.gmra.mrb[92].mxu0 %vm1553_vm4, %v3253_v12  ;;  %v3255_v62 = vpop.f32.mrb[171].mxu1 }
 0x8b9   : > { %13283 = vmatpush1.bf16.msra.mxu0 %v14846_v18  ;;  %12127 = vmatprep.mubr.msk.f32.mxu0 %vm14528_vm0, %v17675_v6 }
 0x8ba   : > { %13284 = vmatprep.subr.bf16.mxu0 %v17673_v3 }
 0x8bb   : > { %v3258_v13 = vpop.f32.mrb[172].mxu1 }
 0x8bc   : > { %12128 = vmatmul.mubr.msk.f32.gmra.mrb[94].mxu0 %vm1553_vm4, %v3258_v13  ;;  %v3260_v9 = vpop.f32.mrb[173].mxu1 }
 0x8bd   : > { %13286 = vmatpush1.bf16.msra.mxu0 %v14852_v27  ;;  %12130 = vmatprep.mubr.msk.f32.mxu0 %vm14528_vm0, %v17675_v6  ;;  %v10845_v27 = vld [vmem:[%s14559_s21 + $0x380] sm:$0xff] }
 0x8be   : > { %13287 = vmatprep.subr.bf16.mxu0 %v17673_v3 }
 0x8bf   : > { %v3263_v16 = vpop.f32.mrb[174].mxu1 }
 0x8c0   : > { %12131 = vmatmul.mubr.msk.f32.gmra.mrb[96].mxu0 %vm1553_vm4, %v3263_v16  ;;  %v3265_v18 = vpop.f32.mrb[175].mxu1 }
 0x8c1   : > { %13289 = vmatpush1.bf16.msra.mxu0 %v14858_v37  ;;  %10860 = vmatprep.mubr.msk.f32.mxu0 %vm1286_vm2, %v10846_v14  ;;  %v10848_v37 = vld [vmem:[%s14559_s21 + $0x398] sm:$0xff] }
 0x8c2   : > { %13290 = vmatprep.subr.bf16.mxu0 %v17673_v3 }
 0x8c5   : > { %13292 = vmatpush1.bf16.msra.mxu0 %v14864_v47  ;;  %v10847_v47 = vld [vmem:[%s14559_s21 + $0x390] sm:$0xff] }
 0x8c6   : > { %13293 = vmatprep.subr.bf16.mxu0 %v17673_v3 }
 0x8c9   : > { %13295 = vmatpush1.bf16.msra.mxu0 %v14870_v57  ;;  %v10850_v57 = vld [vmem:[%s14559_s21 + $0x3a8] sm:$0xff] }
 0x8ca   : > { %13296 = vmatprep.subr.bf16.mxu0 %v17673_v3 }
 0x8cd   : > { %13298 = vmatpush1.bf16.msra.mxu0 %v14876_v4  ;;  %v10849_v4 = vld [vmem:[%s14559_s21 + $0x3a0] sm:$0xff] }
 0x8ce   : > { %13299 = vmatprep.subr.bf16.mxu0 %v17673_v3 }
 0x8d1   : > { %13301 = vmatpush1.bf16.msra.mxu0 %v14882_v15  ;;  %v10852_v15 = vld [vmem:[%s14559_s21 + $0x3b8] sm:$0xff] }
 0x8d2   : > { %13302 = vmatprep.subr.bf16.mxu0 %v17673_v3 }
 0x8d5   : > { %13304 = vmatpush1.bf16.msra.mxu0 %v14888_v25  ;;  %v10851_v25 = vld [vmem:[%s14559_s21 + $0x3b0] sm:$0xff] }
 0x8d6   : > { %3482 = vmatprep.subr.mxu0 %v17675_v6 }
 0x8d9   : > { %10859 = vmatpush1.msk.msra.mxu0 %vm1308_vm3, %v14891_v29  ;;  %v10854_v29 = vld [vmem:[%s14559_s21 + $0x3c8] sm:$0xff] }
 0x8da   : > { %3499 = vmatmul.mubr.f32.vlgmr.msra.gmra.mrb[98].mxu0 %v10845_v27  ;;  %13317 = vmatprep.subr.bf16.mxu0 %v17673_v3 }
 0x8db   : > { %10861 = vmatprep.mubr.msk.f32.mxu0 %vm1286_vm2, %v10848_v37 }
 0x8de   : > { %3504 = vmatmul.mubr.f32.gmra.mrb[100].mxu0 %v10847_v47 }
 0x8df   : > { %10862 = vmatprep.mubr.msk.f32.mxu0 %vm1286_vm2, %v10850_v57 }
 0x8e2   : > { %3509 = vmatmul.mubr.f32.gmra.mrb[102].mxu0 %v10849_v4 }
 0x8e3   : > { %10863 = vmatprep.mubr.msk.f32.mxu0 %vm1286_vm2, %v10852_v15 }
 0x8e6   : > { %3514 = vmatmul.mubr.f32.gmra.mrb[104].mxu0 %v10851_v25 }
 0x8e7   : > { %10864 = vmatprep.mubr.msk.f32.mxu0 %vm1286_vm2, %v10854_v29 }
 0x8ea   : > { %3519 = vmatmul.mubr.f32.gmra.mrb[106].mxu0 %v10853_v17 }
 0x8eb   : > { %10865 = vmatprep.mubr.msk.f32.mxu0 %vm1286_vm2, %v10856_v19 }
 0x8ee   : > { %3524 = vmatmul.mubr.f32.gmra.mrb[108].mxu0 %v10855_v20 }
 0x8ef   : > { %10866 = vmatprep.mubr.msk.f32.mxu0 %vm1286_vm2, %v10858_v21 }
 0x8f2   : > { %3529 = vmatmul.mubr.f32.gmra.mrb[110].mxu0 %v10857_v23 }
 0x8f3   : > { %12207 = vmatprep.mubr.msk.f32.mxu0 %vm14528_vm0, %v17675_v6 }
 0x97b   : > { %v3357_v32 = vpop.f32.mrb[84].mxu0 }
 0x97c   : > { %v3391_v36 = vadd.f32 %v3357_v32, %v15525_v46  ;;  %v12114_v42 = vpop.f32.mrb[85].mxu0 }
 0x97f   : > { %v3362_v43 = vpop.f32.mrb[86].mxu0 }
 0x980   : > { %v3392_v49 = vadd.f32 %v3362_v43, %v15528_v0  ;;  %v12117_v52 = vpop.f32.mrb[87].mxu0 }
 0x983   : > { %v3367_v54 = vpop.f32.mrb[88].mxu0 }
 0x984   : > { %v3393_v58 = vadd.f32 %v3367_v54, %v15531_v30  ;;  %v12120_v41 = vpop.f32.mrb[89].mxu0 }
 0x987   : > { %v3372_v45 = vpop.f32.mrb[90].mxu0 }
 0x988   : > { %v3394_v61 = vadd.f32 %v3372_v45, %v15534_v2  ;;  %v12123_v26 = vpop.f32.mrb[91].mxu0 }
 0x989   : > { %v10900_v26 = vld [vmem:[%s14579_s8 + $0x20] sm:$0xff] }
 0x98b   : > { %v3377_v31 = vpop.f32.mrb[92].mxu0 }
 0x98c   : > { %v15622_v1 = vadd.f32 %v3377_v31, %v15537_v33  ;;  %v12126_v55 = vpop.f32.mrb[93].mxu0  ;;  %v10901_v31 = vld [vmem:[%s14579_s8 + $0x28] sm:$0xff] }
 0x98d   : > { %v3820_v55 = vld [vmem:[%s14579_s8 + $0x8] sm:$0xff] }
 0x98f   : > { %v3382_v35 = vpop.f32.mrb[94].mxu0 }
 0x990   : > { %v15625_v46 = vadd.f32 %v3382_v35, %v15540_v60  ;;  %v12129_v40 = vpop.f32.mrb[95].mxu0 }
 0x991   : > { %v10885_v40 = vld [vmem:[%s14574_s3 + $0x38] sm:$0xff] }
 0x993   : > { %v3387_v0 = vpop.f32.mrb[96].mxu0 }
 0x994   : > { %v15628_v5 = vadd.f32 %v3387_v0, %v15543_v22  ;;  %v12132_v30 = vpop.f32.mrb[97].mxu0  ;;  %v13327_v0 = vpack.c.bf16 %v10901_v31, %v10900_v26  ;;  %v10922_v26 = vld [vmem:[%s14574_s3 + $0x90] sm:$0xff]  ;;  %v10923_v31 = vld [vmem:[%s14574_s3 + $0x98] sm:$0xff] }
 0x995   : > { %v10902_v30 = vld [vmem:[%s14579_s8 + $0x30] sm:$0xff] }
 0x9ad   : > { %v3500_v7 = vpop.f32.mrb[98].mxu0 }
 0x9ae   : > { %v3502_v59 = vpop.f32.mrb[99].mxu0  ;;  %12138 = vmatmul.mubr.msk.f32.vlgmr.msra.gmra.mrb[176].mxu1 %vm1553_vm4, %v3500_v7  ;;  %v10903_v7 = vld [vmem:[%s14579_s8 + $0x38] sm:$0xff] }
 0x9af   : > { %12140 = vmatprep.mubr.msk.f32.mxu1 %vm14528_vm0, %v17675_v6  ;;  %v3821_v59 = vld [vmem:[%s14579_s8 + $0x10] sm:$0xff] }
 0x9b1   : > { %v3505_v2 = vpop.f32.mrb[100].mxu0 }
 0x9b2   : > { %v3507_v33 = vpop.f32.mrb[101].mxu0  ;;  %12141 = vmatmul.mubr.msk.f32.gmra.mrb[178].mxu1 %vm1553_vm4, %v3505_v2  ;;  %v3822_v2 = vld [vmem:[%s14579_s8 + $0x18] sm:$0xff] }
 0x9b3   : > { %12143 = vmatprep.mubr.msk.f32.mxu1 %vm14528_vm0, %v17675_v6  ;;  %v3687_v33 = vld [vmem:[%s14574_s3 + $0x8] sm:$0xff] }
 0x9b5   : > { %v3510_v39 = vpop.f32.mrb[102].mxu0 }
 0x9b6   : > { %v3512_v60 = vpop.f32.mrb[103].mxu0  ;;  %12144 = vmatmul.mubr.msk.f32.gmra.mrb[180].mxu1 %vm1553_vm4, %v3510_v39  ;;  %v10886_v39 = vld [vmem:[%s14574_s3 + $0x40] sm:$0xff] }
 0x9b7   : > { %12146 = vmatprep.mubr.msk.f32.mxu1 %vm14528_vm0, %v17675_v6  ;;  %v13330_v60 = vpack.c.bf16 %v10903_v7, %v10902_v30  ;;  %v10949_v30 = vld [vmem:[%s14574_s3 + $0xd0] sm:$0xff]  ;;  %v10950_v7 = vld [vmem:[%s14574_s3 + $0xd8] sm:$0x1] }
 0x9b9   : > { %v3515_v48 = vpop.f32.mrb[104].mxu0 }
 0x9ba   : > { %v3517_v51 = vpop.f32.mrb[105].mxu0  ;;  %12147 = vmatmul.mubr.msk.f32.gmra.mrb[182].mxu1 %vm1553_vm4, %v3515_v48  ;;  %v13336_v48 = vpack.c.bf16 %v3822_v2, %v3821_v59  ;;  %v10970_v59 = vld [vmem:[%s14574_s3 + $0xe0] sm:$0xff]  ;;  %v10971_v2 = vld [vmem:[%s14574_s3 + $0xe8] sm:$0xff] }
 0x9bb   : > { %12149 = vmatprep.mubr.msk.f32.mxu1 %vm14528_vm0, %v17675_v6  ;;  %v3688_v51 = vld [vmem:[%s14574_s3 + $0x10] sm:$0xff] }
 0x9bd   : > { %v3520_v22 = vpop.f32.mrb[106].mxu0 }
 0x9be   : > { %v3522_v8 = vpop.f32.mrb[107].mxu0  ;;  %12150 = vmatmul.mubr.msk.f32.gmra.mrb[184].mxu1 %vm1553_vm4, %v3520_v22  ;;  %v10887_v22 = vld [vmem:[%s14574_s3 + $0x48] sm:$0xff] }
 0x9bf   : > { %12152 = vmatprep.mubr.msk.f32.mxu1 %vm14528_vm0, %v17675_v6  ;;  %v3689_v8 = vld [vmem:[%s14574_s3 + $0x18] sm:$0xff] }
 0x9c1   : > { %v3525_v10 = vpop.f32.mrb[108].mxu0 }
 0x9c2   : > { %v3527_v11 = vpop.f32.mrb[109].mxu0  ;;  %12153 = vmatmul.mubr.msk.f32.gmra.mrb[186].mxu1 %vm1553_vm4, %v3525_v10  ;;  %v10888_v10 = vld [vmem:[%s14574_s3 + $0x50] sm:$0xff] }
 0x9c3   : > { %12155 = vmatprep.mubr.msk.f32.mxu1 %vm14528_vm0, %v17675_v6  ;;  %v3690_v11 = vld [vmem:[%s14574_s3 + $0x20] sm:$0xff] }
 0x9c5   : > { %v3530_v63 = vpop.f32.mrb[110].mxu0 }
 0x9c6   : > { %12156 = vmatmul.mubr.msk.f32.gmra.mrb[188].mxu1 %vm1553_vm4, %v3530_v63  ;;  %v3532_v50 = vpop.f32.mrb[111].mxu0  ;;  %v10889_v63 = vld [vmem:[%s14574_s3 + $0x58] sm:$0xff] }
 0x9c7   : > { %12172 = vmatprep.mubr.msk.f32.mxu1 %vm14528_vm0, %v17675_v6  ;;  %v3691_v50 = vld [vmem:[%s14574_s3 + $0x28] sm:$0xff] }
 0xa81   : > { %v3624_v56 = vpop.f32.mrb[176].mxu1 }
 0xa82   : > { %v3658_v44 = vadd.f32 %v3624_v56, %v3391_v36  ;;  %v12139_v38 = vpop.f32.mrb[177].mxu1  ;;  %v10890_v56 = vld [vmem:[%s14574_s3 + $0x60] sm:$0xff] }
 0xa83   : > { %v10891_v38 = vld [vmem:[%s14574_s3 + $0x68] sm:$0x1] }
 0xa84   : > { %v3672_v62 = vadd.f32 %v10876_v53, %v3658_v44  ;;  %v3692_v44 = vld [vmem:[%s14574_s3 + $0x30] sm:$0x1] }
 0xa85   : > { %v3629_v12 = vpop.f32.mrb[178].mxu1 }
 0xa86   : > { %v3659_v13 = vadd.f32 %v3629_v12, %v3392_v49  ;;  %v12142_v9 = vpop.f32.mrb[179].mxu1  ;;  %v3679_v18 = vmax.f32 %v3672_v62, 0.0 }
 0xa88   : > { %v3673_v14 = vadd.f32 %v10876_v53, %v3659_v13 }
 0xa89   : > { %v3634_v16 = vpop.f32.mrb[180].mxu1 }
 0xa8a   : > { %v3680_v27 = vmax.f32 %v3673_v14, 0.0  ;;  %v3660_v37 = vadd.f32 %v3634_v16, %v3393_v58  ;;  %v12145_v47 = vpop.f32.mrb[181].mxu1 }
 0xa8c   : > { %v15652_v57 = vpack.c.bf16 %v3680_v27, %v3679_v18  ;;  %v3674_v15 = vadd.f32 %v10876_v53, %v3660_v37 }
 0xa8d   : > { %v3639_v4 = vpop.f32.mrb[182].mxu1 }
 0xa8e   : > { %v3661_v25 = vadd.f32 %v3639_v4, %v3394_v61  ;;  %v12148_v29 = vpop.f32.mrb[183].mxu1  ;;  %13310 = vmatpush3.bf16.msra.mxu1 %v15652_v57  ;;  %13319 = vmatpush3.bf16.msra.mxu0 %v15652_v57  ;;  %v3681_v20 = vmax.f32 %v3674_v15, 0.0 }
 0xa8f   : > { %13311 = vmatprep.subr.bf16.mxu1 %v17673_v3  ;;  %13320 = vmatprep.subr.bf16.mxu0 %v17673_v3 }
 0xa90   : > { %v3675_v17 = vadd.f32 %v10876_v53, %v3661_v25 }
 0xa91   : > { %v3644_v19 = vpop.f32.mrb[184].mxu1 }
 0xa92   : > { %v3682_v21 = vmax.f32 %v3675_v17, 0.0  ;;  %v3662_v23 = vadd.f32 %v3644_v19, %v15622_v1  ;;  %v12151_v24 = vpop.f32.mrb[185].mxu1  ;;  %v3819_v1 = vld [vmem:[%s14579_s8] sm:$0xff] }
 0xa94   : > { %v15659_v28 = vpack.c.bf16 %v3682_v21, %v3681_v20  ;;  %v3676_v32 = vadd.f32 %v10876_v53, %v3662_v23 }
 0xa95   : > { %v3649_v34 = vpop.f32.mrb[186].mxu1 }
 0xa96   : > { %v3663_v36 = vadd.f32 %v3649_v34, %v15625_v46  ;;  %v12154_v42 = vpop.f32.mrb[187].mxu1  ;;  %13313 = vmatpush3.bf16.msra.mxu1 %v15659_v28  ;;  %13322 = vmatpush3.bf16.msra.mxu0 %v15659_v28  ;;  %v3683_v52 = vmax.f32 %v3676_v32, 0.0  ;;  %v3686_v46 = vld [vmem:[%s14574_s3] sm:$0xff] }
 0xa97   : > { %13314 = vmatprep.subr.bf16.mxu1 %v17673_v3  ;;  %13323 = vmatprep.subr.bf16.mxu0 %v17673_v3 }
 0xa98   : > { %v3677_v43 = vadd.f32 %v10876_v53, %v3663_v36 }
 0xa99   : > { %v3654_v49 = vpop.f32.mrb[188].mxu1 }
 0xa9a   : > { %v3684_v54 = vmax.f32 %v3677_v43, 0.0  ;;  %v3664_v58 = vadd.f32 %v3654_v49, %v15628_v5  ;;  %v12157_v41 = vpop.f32.mrb[189].mxu1  ;;  %v13333_v5 = vpack.c.bf16 %v3820_v55, %v3819_v1  ;;  %v10924_v1 = vld [vmem:[%s14574_s3 + $0xa0] sm:$0x1]  ;;  %v10944_v55 = vld [vmem:[%s14574_s3 + $0xa8] sm:$0xff] }
 0xa9b   : > { %v10920_v41 = vld [vmem:[%s14574_s3 + $0x80] sm:$0xff] }
 0xa9c   : > { %v15667_v45 = vpack.c.bf16 %v3684_v54, %v3683_v52  ;;  %v3678_v61 = vadd.f32 %v10876_v53, %v3664_v58  ;;  %v10918_v54 = vld [vmem:[%s14574_s3 + $0x70] sm:$0xff]  ;;  %v10919_v58 = vld [vmem:[%s14574_s3 + $0x78] sm:$0xff] }
 0xa9e   : > { %13316 = vmatpush3.bf16.msra.mxu1 %v15667_v45  ;;  %13325 = vmatpush3.bf16.msra.mxu0 %v15667_v45  ;;  %v15677_v35 = vmax.f32 %v3678_v61, 0.0  ;;  %v10921_v61 = vld [vmem:[%s14574_s3 + $0x88] sm:$0xff] }
 0xa9f   : > { %12170 = vmatprep.subr.mxu1 %v17675_v6  ;;  %12205 = vmatprep.subr.mxu0 %v17675_v6 }
 0xaa2   : > { %12171 = vmatpush3.msk.msra.mxu1 %vm3715_vm5, %v15677_v35  ;;  %12206 = vmatpush3.msk.msra.mxu0 %vm3715_vm5, %v15677_v35 }
 0xaa3   : > { %12173 = vmatmul.mubr.msk.f32.vlgmr.msra.gmra.mrb[190].mxu1 %vm3693_vm6, %v3686_v46  ;;  %12208 = vmatmul.mubr.msk.f32.vlgmr.msra.gmra.mrb[112].mxu0 %vm3693_vm6, %v10885_v40  ;;  %v10945_v46 = vld [vmem:[%s14574_s3 + $0xb0] sm:$0xff]  ;;  %v10946_v40 = vld [vmem:[%s14574_s3 + $0xb8] sm:$0xff] }
 0xaa4   : > { %12175 = vmatprep.mubr.msk.f32.mxu1 %vm14528_vm0, %v17675_v6  ;;  %12210 = vmatprep.mubr.msk.f32.mxu0 %vm14528_vm0, %v17675_v6 }
 0xaa5   : > { %13326 = vmatprep.subr.bf16.mxu1 %v17673_v3  ;;  %13332 = vmatprep.subr.bf16.mxu0 %v17673_v3 }
 0xaa6   : > { %13328 = vmatpush3.bf16.msra.mxu1 %v13327_v0  ;;  %13334 = vmatpush3.bf16.msra.mxu0 %v13333_v5  ;;  %v10947_v0 = vld [vmem:[%s14574_s3 + $0xc0] sm:$0xff]  ;;  %v10948_v5 = vld [vmem:[%s14574_s3 + $0xc8] sm:$0xff] }
 0xaa7   : > { %12176 = vmatmul.mubr.msk.f32.gmra.mrb[192].mxu1 %vm3693_vm6, %v3687_v33  ;;  %12211 = vmatmul.mubr.msk.f32.gmra.mrb[114].mxu0 %vm3693_vm6, %v10886_v39  ;;  %v10972_v33 = vld [vmem:[%s14574_s3 + $0xf0] sm:$0xff]  ;;  %v10933_v39 = vld [vmem:[%s14579_s8 + $0x40] sm:$0xff] }
 0xaa8   : > { %12178 = vmatprep.mubr.msk.f32.mxu1 %vm14528_vm0, %v17675_v6  ;;  %12213 = vmatprep.mubr.msk.f32.mxu0 %vm14528_vm0, %v17675_v6 }
 0xaa9   : > { %13329 = vmatprep.subr.bf16.mxu1 %v17673_v3  ;;  %13335 = vmatprep.subr.bf16.mxu0 %v17673_v3 }
 0xaaa   : > { %13331 = vmatpush3.bf16.msra.mxu1 %v13330_v60  ;;  %13337 = vmatpush3.bf16.msra.mxu0 %v13336_v48  ;;  %v10934_v60 = vld [vmem:[%s14579_s8 + $0x48] sm:$0xff]  ;;  %v10973_v48 = vld [vmem:[%s14574_s3 + $0xf8] sm:$0xff] }
 0xaab   : > { %12179 = vmatmul.mubr.msk.f32.gmra.mrb[194].mxu1 %vm3693_vm6, %v3688_v51  ;;  %12214 = vmatmul.mubr.msk.f32.gmra.mrb[116].mxu0 %vm3693_vm6, %v10887_v22  ;;  %v13348_v51 = vpack.c.bf16 %v10934_v60, %v10933_v39  ;;  %v10974_v22 = vld [vmem:[%s14574_s3 + $0x100] sm:$0xff] }
 0xaac   : > { %12181 = vmatprep.mubr.msk.f32.mxu1 %vm14528_vm0, %v17675_v6  ;;  %12216 = vmatprep.mubr.msk.f32.mxu0 %vm14528_vm0, %v17675_v6 }
 0xaad   : > { %13338 = vmatprep.subr.bf16.mxu1 %v17673_v3  ;;  %13347 = vmatprep.subr.bf16.mxu0 %v17673_v3 }
 0xaaf   : > { %12182 = vmatmul.mubr.msk.f32.gmra.mrb[196].mxu1 %vm3693_vm6, %v3689_v8  ;;  %12217 = vmatmul.mubr.msk.f32.gmra.mrb[118].mxu0 %vm3693_vm6, %v10888_v10  ;;  %v10975_v8 = vld [vmem:[%s14574_s3 + $0x108] sm:$0xff]  ;;  %v10976_v10 = vld [vmem:[%s14574_s3 + $0x110] sm:$0x1] }
 0xab0   : > { %12184 = vmatprep.mubr.msk.f32.mxu1 %vm14528_vm0, %v17675_v6  ;;  %12219 = vmatprep.mubr.msk.f32.mxu0 %vm14528_vm0, %v17675_v6 }
 0xab3   : > { %12185 = vmatmul.mubr.msk.f32.gmra.mrb[198].mxu1 %vm3693_vm6, %v3690_v11  ;;  %12220 = vmatmul.mubr.msk.f32.gmra.mrb[120].mxu0 %vm3693_vm6, %v10889_v63  ;;  %v10935_v11 = vld [vmem:[%s14579_s8 + $0x50] sm:$0xff]  ;;  %v10936_v63 = vld [vmem:[%s14579_s8 + $0x58] sm:$0xff] }
 0xab4   : > { %12187 = vmatprep.mubr.msk.f32.mxu1 %vm14528_vm0, %v17675_v6  ;;  %12222 = vmatprep.mubr.msk.f32.mxu0 %vm14528_vm0, %v17675_v6 }
 0xab7   : > { %12188 = vmatmul.mubr.msk.f32.gmra.mrb[200].mxu1 %vm3693_vm6, %v3691_v50  ;;  %12223 = vmatmul.mubr.msk.f32.gmra.mrb[122].mxu0 %vm3693_vm6, %v10890_v56  ;;  %v13351_v50 = vpack.c.bf16 %v10936_v63, %v10935_v11  ;;  %v10996_v56 = vld [vmem:[%s14574_s3 + $0x118] sm:$0xff]  ;;  %v10960_v11 = vld [vmem:[%s14579_s8 + $0x68] sm:$0xff] }
 0xab8   : > { %12190 = vmatprep.mubr.msk.f32.mxu1 %vm14528_vm0, %v17675_v6  ;;  %12225 = vmatprep.mubr.msk.f32.mxu0 %vm14528_vm0, %v17675_v6 }
 0xabb   : > { %12191 = vmatmul.mubr.msk.f32.gmra.mrb[202].mxu1 %vm3693_vm6, %v3692_v44  ;;  %12226 = vmatmul.mubr.msk.f32.gmra.mrb[124].mxu0 %vm3693_vm6, %v10891_v38  ;;  %v10997_v44 = vld [vmem:[%s14574_s3 + $0x120] sm:$0xff]  ;;  %v10998_v38 = vld [vmem:[%s14574_s3 + $0x128] sm:$0xff] }
 0xabc   : > { %12236 = vmatprep.mubr.msk.f32.mxu1 %vm14528_vm0, %v17675_v6  ;;  %12265 = vmatprep.mubr.msk.f32.mxu0 %vm14528_vm0, %v17675_v6 }
 0xb76   : > { %v3785_v53 = vpop.f32.mrb[190].mxu1  ;;  %v3918_v12 = vpop.f32.mrb[112].mxu0 }
 0xb77   : > { %v12209_v62 = vpop.f32.mrb[113].mxu0  ;;  %12237 = vmatmul.mubr.msk.f32.vlgmr.msra.gmra.mrb[204].mxu1 %vm981_vm1, %v3918_v12  ;;  %12266 = vmatmul.mubr.msk.f32.vlgmr.msra.gmra.mrb[126].mxu0 %vm981_vm1, %v3785_v53  ;;  %v12174_v13 = vpop.f32.mrb[191].mxu1  ;;  %v10999_v53 = vld [vmem:[%s14574_s3 + $0x130] sm:$0xff]  ;;  %v11000_v12 = vld [vmem:[%s14574_s3 + $0x138] sm:$0xff] }
 0xb78   : > { %13340 = vmatpush3.bf16.msra.mxu1 %v15652_v57  ;;  %12239 = vmatprep.mubr.msk.f32.mxu1 %vm14528_vm0, %v17675_v6  ;;  %v11001_v62 = vld [vmem:[%s14574_s3 + $0x140] sm:$0xff]  ;;  %v11002_v13 = vld [vmem:[%s14574_s3 + $0x148] sm:$0x1] }
 0xb79   : > { %12268 = vmatprep.mubr.msk.f32.mxu0 %vm14528_vm0, %v17675_v6  ;;  %13341 = vmatprep.subr.bf16.mxu1 %v17673_v3 }
 0xb7a   : > { %v3790_v9 = vpop.f32.mrb[192].mxu1  ;;  %v3923_v14 = vpop.f32.mrb[114].mxu0  ;;  %13349 = vmatpush3.bf16.msra.mxu0 %v13348_v51 }
 0xb7b   : > { %v12212_v16 = vpop.f32.mrb[115].mxu0  ;;  %12240 = vmatmul.mubr.msk.f32.gmra.mrb[206].mxu1 %vm981_vm1, %v3923_v14  ;;  %12269 = vmatmul.mubr.msk.f32.gmra.mrb[128].mxu0 %vm981_vm1, %v3790_v9  ;;  %v12177_v18 = vpop.f32.mrb[193].mxu1  ;;  %v11022_v9 = vld [vmem:[%s14574_s3 + $0x150] sm:$0xff]  ;;  %v11023_v14 = vld [vmem:[%s14574_s3 + $0x158] sm:$0xff] }
 0xb7c   : > { %13343 = vmatpush3.bf16.msra.mxu1 %v15659_v28  ;;  %12242 = vmatprep.mubr.msk.f32.mxu1 %vm14528_vm0, %v17675_v6  ;;  %v11024_v16 = vld [vmem:[%s14574_s3 + $0x160] sm:$0xff]  ;;  %v11025_v18 = vld [vmem:[%s14574_s3 + $0x168] sm:$0xff] }
 0xb7d   : > { %12271 = vmatprep.mubr.msk.f32.mxu0 %vm14528_vm0, %v17675_v6  ;;  %13344 = vmatprep.subr.bf16.mxu1 %v17673_v3 }
 0xb7e   : > { %v3795_v27 = vpop.f32.mrb[194].mxu1  ;;  %v3928_v37 = vpop.f32.mrb[116].mxu0  ;;  %13350 = vmatprep.subr.bf16.mxu0 %v17673_v3 }
 0xb7f   : > { %v12215_v47 = vpop.f32.mrb[117].mxu0  ;;  %12243 = vmatmul.mubr.msk.f32.gmra.mrb[208].mxu1 %vm981_vm1, %v3928_v37  ;;  %12272 = vmatmul.mubr.msk.f32.gmra.mrb[130].mxu0 %vm981_vm1, %v3795_v27  ;;  %v12180_v4 = vpop.f32.mrb[195].mxu1  ;;  %v11026_v27 = vld [vmem:[%s14574_s3 + $0x170] sm:$0xff]  ;;  %v11027_v37 = vld [vmem:[%s14574_s3 + $0x178] sm:$0xff] }
 0xb80   : > { %13346 = vmatpush3.bf16.msra.mxu1 %v15667_v45  ;;  %12245 = vmatprep.mubr.msk.f32.mxu1 %vm14528_vm0, %v17675_v6  ;;  %v11028_v47 = vld [vmem:[%s14574_s3 + $0x180] sm:$0x1]  ;;  %v11048_v4 = vld [vmem:[%s14574_s3 + $0x188] sm:$0xff] }
 0xb81   : > { %12274 = vmatprep.mubr.msk.f32.mxu0 %vm14528_vm0, %v17675_v6  ;;  %12298 = vmatprep.subr.mxu1 %v17675_v6 }
 0xb82   : > { %v3800_v15 = vpop.f32.mrb[196].mxu1  ;;  %v3933_v25 = vpop.f32.mrb[118].mxu0  ;;  %13352 = vmatpush3.bf16.msra.mxu0 %v13351_v50 }
 0xb83   : > { %v12218_v29 = vpop.f32.mrb[119].mxu0  ;;  %12246 = vmatmul.mubr.msk.f32.gmra.mrb[210].mxu1 %vm981_vm1, %v3933_v25  ;;  %12275 = vmatmul.mubr.msk.f32.gmra.mrb[132].mxu0 %vm981_vm1, %v3800_v15  ;;  %v12183_v17 = vpop.f32.mrb[197].mxu1  ;;  %v11049_v15 = vld [vmem:[%s14574_s3 + $0x190] sm:$0xff]  ;;  %v11050_v25 = vld [vmem:[%s14574_s3 + $0x198] sm:$0xff] }
 0xb84   : > { %12299 = vmatpush3.msk.msra.mxu1 %vm3715_vm5, %v15677_v35  ;;  %12248 = vmatprep.mubr.msk.f32.mxu1 %vm14528_vm0, %v17675_v6  ;;  %v11074_v29 = vld [vmem:[%s14574_s3 + $0x1c0] sm:$0xff]  ;;  %v11075_v17 = vld [vmem:[%s14574_s3 + $0x1c8] sm:$0xff] }
 0xb85   : > { %12277 = vmatprep.mubr.msk.f32.mxu0 %vm14528_vm0, %v17675_v6  ;;  %13353 = vmatprep.subr.bf16.mxu1 %v17673_v3 }
 0xb86   : > { %v3805_v19 = vpop.f32.mrb[198].mxu1  ;;  %v3938_v20 = vpop.f32.mrb[120].mxu0  ;;  %13362 = vmatprep.subr.bf16.mxu0 %v17673_v3 }
 0xb87   : > { %v12221_v21 = vpop.f32.mrb[121].mxu0  ;;  %12249 = vmatmul.mubr.msk.f32.gmra.mrb[212].mxu1 %vm981_vm1, %v3938_v20  ;;  %12278 = vmatmul.mubr.msk.f32.gmra.mrb[134].mxu0 %vm981_vm1, %v3805_v19  ;;  %v12186_v23 = vpop.f32.mrb[199].mxu1  ;;  %v11076_v19 = vld [vmem:[%s14574_s3 + $0x1d0] sm:$0xff]  ;;  %v11077_v20 = vld [vmem:[%s14574_s3 + $0x1d8] sm:$0xff] }
 0xb88   : > { %12251 = vmatprep.mubr.msk.f32.mxu1 %vm14528_vm0, %v17675_v6  ;;  %12280 = vmatprep.mubr.msk.f32.mxu0 %vm14528_vm0, %v17675_v6  ;;  %v11078_v21 = vld [vmem:[%s14574_s3 + $0x1e0] sm:$0xff] }
 0xb8a   : > { %v3810_v24 = vpop.f32.mrb[200].mxu1  ;;  %v3943_v34 = vpop.f32.mrb[122].mxu0 }
 0xb8b   : > { %v12224_v32 = vpop.f32.mrb[123].mxu0  ;;  %12252 = vmatmul.mubr.msk.f32.gmra.mrb[214].mxu1 %vm981_vm1, %v3943_v34  ;;  %12281 = vmatmul.mubr.msk.f32.gmra.mrb[136].mxu0 %vm981_vm1, %v3810_v24  ;;  %v12189_v36 = vpop.f32.mrb[201].mxu1 }
 0xb8c   : > { %12254 = vmatprep.mubr.msk.f32.mxu1 %vm14528_vm0, %v17675_v6  ;;  %12283 = vmatprep.mubr.msk.f32.mxu0 %vm14528_vm0, %v17675_v6 }
 0xb8e   : > { %v3815_v42 = vpop.f32.mrb[202].mxu1  ;;  %v3948_v43 = vpop.f32.mrb[124].mxu0 }
 0xb8f   : > { %v12227_v49 = vpop.f32.mrb[125].mxu0  ;;  %12255 = vmatmul.mubr.msk.f32.gmra.mrb[216].mxu1 %vm981_vm1, %v3948_v43  ;;  %12284 = vmatmul.mubr.msk.f32.gmra.mrb[138].mxu0 %vm981_vm1, %v3815_v42  ;;  %v12192_v52 = vpop.f32.mrb[203].mxu1  ;;  %v11079_v42 = vld [vmem:[%s14574_s3 + $0x1e8] sm:$0xff] }
 0xb90   : > { %12300 = vmatprep.mubr.msk.f32.mxu1 %vm14528_vm0, %v17675_v6  ;;  %12329 = vmatprep.mubr.msk.f32.mxu0 %vm14528_vm0, %v17675_v6 }
 0xb93   : > { %12301 = vmatmul.mubr.msk.f32.vlgmr.msra.gmra.mrb[218].mxu1 %vm3693_vm6, %v10918_v54 }
 0xb94   : > { %13355 = vmatpush3.bf16.msra.mxu1 %v15652_v57  ;;  %12303 = vmatprep.mubr.msk.f32.mxu1 %vm14528_vm0, %v17675_v6 }
 0xb95   : > { %13356 = vmatprep.subr.bf16.mxu1 %v17673_v3 }
 0xb97   : > { %12304 = vmatmul.mubr.msk.f32.gmra.mrb[220].mxu1 %vm3693_vm6, %v10919_v58 }
 0xb98   : > { %13358 = vmatpush3.bf16.msra.mxu1 %v15659_v28  ;;  %12306 = vmatprep.mubr.msk.f32.mxu1 %vm14528_vm0, %v17675_v6 }
 0xb99   : > { %13359 = vmatprep.subr.bf16.mxu1 %v17673_v3 }
 0xb9b   : > { %12307 = vmatmul.mubr.msk.f32.gmra.mrb[222].mxu1 %vm3693_vm6, %v10920_v41  ;;  %v11080_v41 = vld [vmem:[%s14574_s3 + $0x1f0] sm:$0x1] }
 0xb9c   : > { %13361 = vmatpush3.bf16.msra.mxu1 %v15667_v45  ;;  %12309 = vmatprep.mubr.msk.f32.mxu1 %vm14528_vm0, %v17675_v6 }
 0xb9d   : > { %12362 = vmatprep.subr.mxu1 %v17675_v6 }
 0xb9f   : > { %12310 = vmatmul.mubr.msk.f32.gmra.mrb[224].mxu1 %vm3693_vm6, %v10921_v61 }
 0xba0   : > { %12363 = vmatpush3.msk.msra.mxu1 %vm3715_vm5, %v15677_v35  ;;  %12312 = vmatprep.mubr.msk.f32.mxu1 %vm14528_vm0, %v17675_v6 }
 0xba1   : > { %13368 = vmatprep.subr.bf16.mxu1 %v17673_v3 }
 0xba3   : > { %12313 = vmatmul.mubr.msk.f32.gmra.mrb[226].mxu1 %vm3693_vm6, %v10922_v26 }
 0xba4   : > { %12315 = vmatprep.mubr.msk.f32.mxu1 %vm14528_vm0, %v17675_v6 }
 0xba7   : > { %12316 = vmatmul.mubr.msk.f32.gmra.mrb[228].mxu1 %vm3693_vm6, %v10923_v31 }
 0xba8   : > { %12318 = vmatprep.mubr.msk.f32.mxu1 %vm14528_vm0, %v17675_v6 }
 0xbab   : > { %12319 = vmatmul.mubr.msk.f32.gmra.mrb[230].mxu1 %vm3693_vm6, %v10924_v1 }
 0xbac   : > { %12364 = vmatprep.mubr.msk.f32.mxu1 %vm14528_vm0, %v17675_v6 }
 0xbaf   : > { %12365 = vmatmul.mubr.msk.f32.vlgmr.msra.gmra.mrb[232].mxu1 %vm3693_vm6, %v10944_v55 }
 0xbb0   : > { %13370 = vmatpush3.bf16.msra.mxu1 %v15652_v57  ;;  %12367 = vmatprep.mubr.msk.f32.mxu1 %vm14528_vm0, %v17675_v6 }
 0xbb1   : > { %13371 = vmatprep.subr.bf16.mxu1 %v17673_v3 }
 0xbb3   : > { %12368 = vmatmul.mubr.msk.f32.gmra.mrb[234].mxu1 %vm3693_vm6, %v10945_v46 }
 0xbb4   : > { %13373 = vmatpush3.bf16.msra.mxu1 %v15659_v28  ;;  %12370 = vmatprep.mubr.msk.f32.mxu1 %vm14528_vm0, %v17675_v6 }
 0xbb5   : > { %13374 = vmatprep.subr.bf16.mxu1 %v17673_v3 }
 0xbb7   : > { %12371 = vmatmul.mubr.msk.f32.gmra.mrb[236].mxu1 %vm3693_vm6, %v10946_v40 }
 0xbb8   : > { %13376 = vmatpush3.bf16.msra.mxu1 %v15667_v45  ;;  %12373 = vmatprep.mubr.msk.f32.mxu1 %vm14528_vm0, %v17675_v6 }
 0xbb9   : > { %12426 = vmatprep.subr.mxu1 %v17675_v6 }
 0xbbb   : > { %12374 = vmatmul.mubr.msk.f32.gmra.mrb[238].mxu1 %vm3693_vm6, %v10947_v0 }
 0xbbc   : > { %12427 = vmatpush3.msk.msra.mxu1 %vm3715_vm5, %v15677_v35  ;;  %12376 = vmatprep.mubr.msk.f32.mxu1 %vm14528_vm0, %v17675_v6 }
 0xbbd   : > { %13383 = vmatprep.subr.bf16.mxu1 %v17673_v3 }
 0xbbf   : > { %12377 = vmatmul.mubr.msk.f32.gmra.mrb[240].mxu1 %vm3693_vm6, %v10948_v5 }
 0xbc0   : > { %12379 = vmatprep.mubr.msk.f32.mxu1 %vm14528_vm0, %v17675_v6 }
 0xbc3   : > { %12380 = vmatmul.mubr.msk.f32.gmra.mrb[242].mxu1 %vm3693_vm6, %v10949_v30 }
 0xbc4   : > { %12382 = vmatprep.mubr.msk.f32.mxu1 %vm14528_vm0, %v17675_v6 }
 0xbc7   : > { %12383 = vmatmul.mubr.msk.f32.gmra.mrb[244].mxu1 %vm3693_vm6, %v10950_v7 }
 0xbc8   : > { %12428 = vmatprep.mubr.msk.f32.mxu1 %vm14528_vm0, %v17675_v6 }
 0xbcb   : > { %12429 = vmatmul.mubr.msk.f32.vlgmr.msra.gmra.mrb[246].mxu1 %vm3693_vm6, %v10970_v59 }
 0xbcc   : > { %13385 = vmatpush3.bf16.msra.mxu1 %v15652_v57  ;;  %12431 = vmatprep.mubr.msk.f32.mxu1 %vm14528_vm0, %v17675_v6 }
 0xbcd   : > { %13386 = vmatprep.subr.bf16.mxu1 %v17673_v3 }
 0xbcf   : > { %12432 = vmatmul.mubr.msk.f32.gmra.mrb[248].mxu1 %vm3693_vm6, %v10971_v2 }
 0xbd0   : > { %13388 = vmatpush3.bf16.msra.mxu1 %v15659_v28  ;;  %12434 = vmatprep.mubr.msk.f32.mxu1 %vm14528_vm0, %v17675_v6 }
 0xbd1   : > { %13389 = vmatprep.subr.bf16.mxu1 %v17673_v3 }
 0xbd3   : > { %12435 = vmatmul.mubr.msk.f32.gmra.mrb[250].mxu1 %vm3693_vm6, %v10972_v33 }
 0xbd4   : > { %13391 = vmatpush3.bf16.msra.mxu1 %v15667_v45  ;;  %12437 = vmatprep.mubr.msk.f32.mxu1 %vm14528_vm0, %v17675_v6 }
 0xbd5   : > { %12490 = vmatprep.subr.mxu1 %v17675_v6 }
 0xbd7   : > { %12438 = vmatmul.mubr.msk.f32.gmra.mrb[252].mxu1 %vm3693_vm6, %v10973_v48 }
 0xbd8   : > { %12491 = vmatpush3.msk.msra.mxu1 %vm3715_vm5, %v15677_v35  ;;  %12440 = vmatprep.mubr.msk.f32.mxu1 %vm14528_vm0, %v17675_v6 }
 0xbd9   : > { %13398 = vmatprep.subr.bf16.mxu1 %v17673_v3 }
 0xbdb   : > { %12441 = vmatmul.mubr.msk.f32.gmra.mrb[254].mxu1 %vm3693_vm6, %v10974_v22 }
 0xbdc   : > { %12443 = vmatprep.mubr.msk.f32.mxu1 %vm14528_vm0, %v17675_v6 }
 0xbdf   : > { %12444 = vmatmul.mubr.msk.f32.gmra.mrb[0].mxu1 %vm3693_vm6, %v10975_v8 }
 0xbe0   : > { %12446 = vmatprep.mubr.msk.f32.mxu1 %vm14528_vm0, %v17675_v6 }
 0xbe3   : > { %12447 = vmatmul.mubr.msk.f32.gmra.mrb[2].mxu1 %vm3693_vm6, %v10976_v10  ;;  %v10959_v10 = vld [vmem:[%s14579_s8 + $0x60] sm:$0xff] }
 0xbe4   : > { %12492 = vmatprep.mubr.msk.f32.mxu1 %vm14528_vm0, %v17675_v6 }
 0xbe7   : > { %12493 = vmatmul.mubr.msk.f32.vlgmr.msra.gmra.mrb[4].mxu1 %vm3693_vm6, %v10996_v56 }
 0xbe8   : > { %13400 = vmatpush3.bf16.msra.mxu1 %v15652_v57  ;;  %12495 = vmatprep.mubr.msk.f32.mxu1 %vm14528_vm0, %v17675_v6 }
 0xbe9   : > { %13401 = vmatprep.subr.bf16.mxu1 %v17673_v3 }
 0xbeb   : > { %12496 = vmatmul.mubr.msk.f32.gmra.mrb[6].mxu1 %vm3693_vm6, %v10997_v44 }
 0xbec   : > { %13403 = vmatpush3.bf16.msra.mxu1 %v15659_v28  ;;  %12498 = vmatprep.mubr.msk.f32.mxu1 %vm14528_vm0, %v17675_v6 }
 0xbed   : > { %13404 = vmatprep.subr.bf16.mxu1 %v17673_v3 }
 0xbef   : > { %12499 = vmatmul.mubr.msk.f32.gmra.mrb[8].mxu1 %vm3693_vm6, %v10998_v38 }
 0xbf0   : > { %13406 = vmatpush3.bf16.msra.mxu1 %v15667_v45  ;;  %12501 = vmatprep.mubr.msk.f32.mxu1 %vm14528_vm0, %v17675_v6 }
 0xbf1   : > { %12554 = vmatprep.subr.mxu1 %v17675_v6 }
 0xbf3   : > { %12502 = vmatmul.mubr.msk.f32.gmra.mrb[10].mxu1 %vm3693_vm6, %v10999_v53  ;;  %v13363_v53 = vpack.c.bf16 %v10960_v11, %v10959_v10 }
 0xbf4   : > { %12555 = vmatpush3.msk.msra.mxu1 %vm3715_vm5, %v15677_v35  ;;  %12504 = vmatprep.mubr.msk.f32.mxu1 %vm14528_vm0, %v17675_v6 }
 0xbf5   : > { %13413 = vmatprep.subr.bf16.mxu1 %v17673_v3 }
 0xbf7   : > { %12505 = vmatmul.mubr.msk.f32.gmra.mrb[12].mxu1 %vm3693_vm6, %v11000_v12  ;;  %v10961_v12 = vld [vmem:[%s14579_s8 + $0x70] sm:$0xff] }
 0xbf8   : > { %12507 = vmatprep.mubr.msk.f32.mxu1 %vm14528_vm0, %v17675_v6 }
 0xbfb   : > { %12508 = vmatmul.mubr.msk.f32.gmra.mrb[14].mxu1 %vm3693_vm6, %v11001_v62  ;;  %v10962_v62 = vld [vmem:[%s14579_s8 + $0x78] sm:$0xff] }
 0xbfc   : > { %12510 = vmatprep.mubr.msk.f32.mxu1 %vm14528_vm0, %v17675_v6 }
 0xbff   : > { %12511 = vmatmul.mubr.msk.f32.gmra.mrb[16].mxu1 %vm3693_vm6, %v11002_v13 }
 0xc00   : > { %12556 = vmatprep.mubr.msk.f32.mxu1 %vm14528_vm0, %v17675_v6 }
 0xc03   : > { %12557 = vmatmul.mubr.msk.f32.vlgmr.msra.gmra.mrb[18].mxu1 %vm3693_vm6, %v11022_v9 }
 0xc04   : > { %13415 = vmatpush3.bf16.msra.mxu1 %v15652_v57  ;;  %12559 = vmatprep.mubr.msk.f32.mxu1 %vm14528_vm0, %v17675_v6 }
 0xc05   : > { %13416 = vmatprep.subr.bf16.mxu1 %v17673_v3 }
 0xc07   : > { %12560 = vmatmul.mubr.msk.f32.gmra.mrb[20].mxu1 %vm3693_vm6, %v11023_v14  ;;  %v13366_v14 = vpack.c.bf16 %v10962_v62, %v10961_v12  ;;  %v11037_v12 = vld [vmem:[%s14579_s8 + $0xc0] sm:$0xff]  ;;  %v11038_v62 = vld [vmem:[%s14579_s8 + $0xc8] sm:$0xff] }
 0xc08   : > { %13418 = vmatpush3.bf16.msra.mxu1 %v15659_v28  ;;  %12562 = vmatprep.mubr.msk.f32.mxu1 %vm14528_vm0, %v17675_v6 }
 0xc09   : > { %13419 = vmatprep.subr.bf16.mxu1 %v17673_v3 }
 0xc0b   : > { %12563 = vmatmul.mubr.msk.f32.gmra.mrb[22].mxu1 %vm3693_vm6, %v11024_v16 }
 0xc0c   : > { %13421 = vmatpush3.bf16.msra.mxu1 %v15667_v45  ;;  %12565 = vmatprep.mubr.msk.f32.mxu1 %vm14528_vm0, %v17675_v6 }
 0xc0d   : > { %12618 = vmatprep.subr.mxu1 %v17675_v6 }
 0xc0f   : > { %12566 = vmatmul.mubr.msk.f32.gmra.mrb[24].mxu1 %vm3693_vm6, %v11025_v18 }
 0xc10   : > { %12619 = vmatpush3.msk.msra.mxu1 %vm3715_vm5, %v15677_v35  ;;  %12568 = vmatprep.mubr.msk.f32.mxu1 %vm14528_vm0, %v17675_v6 }
 0xc11   : > { %13428 = vmatprep.subr.bf16.mxu1 %v17673_v3 }
 0xc13   : > { %12569 = vmatmul.mubr.msk.f32.gmra.mrb[26].mxu1 %vm3693_vm6, %v11026_v27 }
 0xc14   : > { %12571 = vmatprep.mubr.msk.f32.mxu1 %vm14528_vm0, %v17675_v6 }
 0xc17   : > { %12572 = vmatmul.mubr.msk.f32.gmra.mrb[28].mxu1 %vm3693_vm6, %v11027_v37 }
 0xc18   : > { %12574 = vmatprep.mubr.msk.f32.mxu1 %vm14528_vm0, %v17675_v6 }
 0xc1b   : > { %12575 = vmatmul.mubr.msk.f32.gmra.mrb[30].mxu1 %vm3693_vm6, %v11028_v47 }
 0xc1c   : > { %12620 = vmatprep.mubr.msk.f32.mxu1 %vm14528_vm0, %v17675_v6 }
 0xc1f   : > { %12621 = vmatmul.mubr.msk.f32.vlgmr.msra.gmra.mrb[32].mxu1 %vm3693_vm6, %v11048_v4 }
 0xc20   : > { %13430 = vmatpush3.bf16.msra.mxu1 %v15652_v57  ;;  %12623 = vmatprep.mubr.msk.f32.mxu1 %vm14528_vm0, %v17675_v6  ;;  %v11051_v57 = vld [vmem:[%s14574_s3 + $0x1a0] sm:$0xff] }
 0xc21   : > { %13431 = vmatprep.subr.bf16.mxu1 %v17673_v3 }
 0xc23   : > { %12624 = vmatmul.mubr.msk.f32.gmra.mrb[34].mxu1 %vm3693_vm6, %v11049_v15 }
 0xc24   : > { %13433 = vmatpush3.bf16.msra.mxu1 %v15659_v28  ;;  %12626 = vmatprep.mubr.msk.f32.mxu1 %vm14528_vm0, %v17675_v6  ;;  %v11052_v28 = vld [vmem:[%s14574_s3 + $0x1a8] sm:$0xff] }
 0xc25   : > { %13434 = vmatprep.subr.bf16.mxu1 %v17673_v3 }
 0xc27   : > { %12627 = vmatmul.mubr.msk.f32.gmra.mrb[36].mxu1 %vm3693_vm6, %v11050_v25 }
 0xc28   : > { %13436 = vmatpush3.bf16.msra.mxu1 %v15667_v45  ;;  %12629 = vmatprep.mubr.msk.f32.mxu1 %vm14528_vm0, %v17675_v6  ;;  %v11053_v45 = vld [vmem:[%s14574_s3 + $0x1b0] sm:$0xff] }
 0xc29   : > { %12682 = vmatprep.subr.mxu1 %v17675_v6 }
 0xc2b   : > { %12630 = vmatmul.mubr.msk.f32.gmra.mrb[38].mxu1 %vm3693_vm6, %v11051_v57 }
 0xc2c   : > { %12683 = vmatpush3.msk.msra.mxu1 %vm3715_vm5, %v15677_v35  ;;  %12632 = vmatprep.mubr.msk.f32.mxu1 %vm14528_vm0, %v17675_v6  ;;  %v11054_v35 = vld [vmem:[%s14574_s3 + $0x1b8] sm:$0x1] }
 0xc2d   : > { %13443 = vmatprep.subr.bf16.mxu1 %v17673_v3 }
 0xc2f   : > { %12633 = vmatmul.mubr.msk.f32.gmra.mrb[40].mxu1 %vm3693_vm6, %v11052_v28 }
 0xc30   : > { %12635 = vmatprep.mubr.msk.f32.mxu1 %vm14528_vm0, %v17675_v6 }
 0xc33   : > { %12636 = vmatmul.mubr.msk.f32.gmra.mrb[42].mxu1 %vm3693_vm6, %v11053_v45  ;;  %v10985_v45 = vld [vmem:[%s14579_s8 + $0x80] sm:$0xff] }
 0xc34   : > { %12638 = vmatprep.mubr.msk.f32.mxu1 %vm14528_vm0, %v17675_v6 }
 0xc37   : > { %12639 = vmatmul.mubr.msk.f32.gmra.mrb[44].mxu1 %vm3693_vm6, %v11054_v35  ;;  %v10986_v35 = vld [vmem:[%s14579_s8 + $0x88] sm:$0xff] }
 0xc38   : > { %12684 = vmatprep.mubr.msk.f32.mxu1 %vm14528_vm0, %v17675_v6 }
 0xc3b   : > { %12685 = vmatmul.mubr.msk.f32.vlgmr.msra.gmra.mrb[46].mxu1 %vm3693_vm6, %v11074_v29 }
 0xc3c   : > { %12687 = vmatprep.mubr.msk.f32.mxu1 %vm14528_vm0, %v17675_v6 }
 0xc3f   : > { %12688 = vmatmul.mubr.msk.f32.gmra.mrb[48].mxu1 %vm3693_vm6, %v11075_v17 }
 0xc40   : > { %12690 = vmatprep.mubr.msk.f32.mxu1 %vm14528_vm0, %v17675_v6 }
 0xc43   : > { %12691 = vmatmul.mubr.msk.f32.gmra.mrb[50].mxu1 %vm3693_vm6, %v11076_v19  ;;  %v13378_v19 = vpack.c.bf16 %v10986_v35, %v10985_v45 }
 0xc44   : > { %12693 = vmatprep.mubr.msk.f32.mxu1 %vm14528_vm0, %v17675_v6 }
 0xc47   : > { %12694 = vmatmul.mubr.msk.f32.gmra.mrb[52].mxu1 %vm3693_vm6, %v11077_v20  ;;  %v10987_v20 = vld [vmem:[%s14579_s8 + $0x90] sm:$0xff] }
 0xc48   : > { %12696 = vmatprep.mubr.msk.f32.mxu1 %vm14528_vm0, %v17675_v6 }
 0xc4a   : > { %v4044_v23 = vpop.f32.mrb[204].mxu1  ;;  %v4165_v24 = vpop.f32.mrb[126].mxu0 }
 0xc4b   : > { %v16045_v34 = vadd.f32 %v4165_v24, %v4044_v23  ;;  %v12238_v32 = vpop.f32.mrb[205].mxu1  ;;  %12697 = vmatmul.mubr.msk.f32.gmra.mrb[54].mxu1 %vm3693_vm6, %v11078_v21  ;;  %v12267_v36 = vpop.f32.mrb[127].mxu0  ;;  %v10988_v21 = vld [vmem:[%s14579_s8 + $0x98] sm:$0xff] }
 0xc4c   : > { %12699 = vmatprep.mubr.msk.f32.mxu1 %vm14528_vm0, %v17675_v6  ;;  %v13381_v32 = vpack.c.bf16 %v10988_v21, %v10987_v20  ;;  %v11063_v20 = vld [vmem:[%s14579_s8 + $0xe0] sm:$0xff]  ;;  %v11064_v21 = vld [vmem:[%s14579_s8 + $0xe8] sm:$0xff] }
 0xc4e   : > { %v4049_v43 = vpop.f32.mrb[206].mxu1  ;;  %v4170_v49 = vpop.f32.mrb[128].mxu0 }
 0xc4f   : > { %v16051_v52 = vadd.f32 %v4170_v49, %v4049_v43  ;;  %v12241_v54 = vpop.f32.mrb[207].mxu1  ;;  %12700 = vmatmul.mubr.msk.f32.gmra.mrb[56].mxu1 %vm3693_vm6, %v11079_v42  ;;  %v12270_v58 = vpop.f32.mrb[129].mxu0 }
 0xc50   : > { %12702 = vmatprep.mubr.msk.f32.mxu1 %vm14528_vm0, %v17675_v6 }
 0xc52   : > { %v4054_v61 = vpop.f32.mrb[208].mxu1  ;;  %v4175_v26 = vpop.f32.mrb[130].mxu0 }
 0xc53   : > { %v16057_v31 = vadd.f32 %v4175_v26, %v4054_v61  ;;  %v12244_v1 = vpop.f32.mrb[209].mxu1  ;;  %12703 = vmatmul.mubr.msk.f32.gmra.mrb[58].mxu1 %vm3693_vm6, %v11080_v41  ;;  %v12273_v55 = vpop.f32.mrb[131].mxu0 }
 0xc54   : > { %12748 = vmatprep.mubr.msk.f32.mxu1 %vm14528_vm0, %v17675_v6  ;;  %v11011_v55 = vld [vmem:[%s14579_s8 + $0xa0] sm:$0xff] }
 0xc56   : > { %v4059_v46 = vpop.f32.mrb[210].mxu1  ;;  %v4180_v40 = vpop.f32.mrb[132].mxu0 }
 0xc57   : > { %v16062_v0 = vadd.f32 %v4180_v40, %v4059_v46  ;;  %v12247_v5 = vpop.f32.mrb[211].mxu1  ;;  %v12276_v30 = vpop.f32.mrb[133].mxu0  ;;  %v11012_v46 = vld [vmem:[%s14579_s8 + $0xa8] sm:$0xff] }
 0xc58   : > { %v13393_v30 = vpack.c.bf16 %v11012_v46, %v11011_v55 }
 0xc5a   : > { %v4064_v7 = vpop.f32.mrb[212].mxu1  ;;  %v4185_v59 = vpop.f32.mrb[134].mxu0 }
 0xc5b   : > { %v16064_v2 = vadd.f32 %v4185_v59, %v4064_v7  ;;  %v12250_v33 = vpop.f32.mrb[213].mxu1  ;;  %v12279_v39 = vpop.f32.mrb[135].mxu0  ;;  %v11013_v7 = vld [vmem:[%s14579_s8 + $0xb0] sm:$0xff]  ;;  %v11014_v59 = vld [vmem:[%s14579_s8 + $0xb8] sm:$0xff] }
 0xc5e   : > { %v4069_v60 = vpop.f32.mrb[214].mxu1  ;;  %v4190_v48 = vpop.f32.mrb[136].mxu0 }
 0xc5f   : > { %v16066_v51 = vadd.f32 %v4190_v48, %v4069_v60  ;;  %v12253_v22 = vpop.f32.mrb[215].mxu1  ;;  %v12282_v8 = vpop.f32.mrb[137].mxu0  ;;  %v13396_v60 = vpack.c.bf16 %v11014_v59, %v11013_v7  ;;  %v11089_v7 = vld [vmem:[%s14579_s8 + $0x100] sm:$0xff]  ;;  %v11090_v59 = vld [vmem:[%s14579_s8 + $0x108] sm:$0xff] }
 0xc62   : > { %v4074_v63 = vpop.f32.mrb[216].mxu1  ;;  %v4195_v50 = vpop.f32.mrb[138].mxu0 }
 0xc63   : > { %v16070_v56 = vadd.f32 %v4195_v50, %v4074_v63  ;;  %v12256_v44 = vpop.f32.mrb[217].mxu1  ;;  %v12285_v38 = vpop.f32.mrb[139].mxu0 }
 0xc66   : > { %v4294_v13 = vpop.f32.mrb[218].mxu1 }
 0xc67   : > { %v12302_v9 = vpop.f32.mrb[219].mxu1  ;;  %12330 = vmatmul.mubr.msk.f32.vlgmr.msra.gmra.mrb[140].mxu0 %vm981_vm1, %v4294_v13 }
 0xc68   : > { %12332 = vmatprep.mubr.msk.f32.mxu0 %vm14528_vm0, %v17675_v6  ;;  %13364 = vmatpush3.bf16.msra.mxu0 %v13363_v53 }
 0xc69   : > { %13365 = vmatprep.subr.bf16.mxu0 %v17673_v3 }
 0xc6a   : > { %v4299_v16 = vpop.f32.mrb[220].mxu1 }
 0xc6b   : > { %v12305_v18 = vpop.f32.mrb[221].mxu1  ;;  %12333 = vmatmul.mubr.msk.f32.gmra.mrb[142].mxu0 %vm981_vm1, %v4299_v16  ;;  %v11039_v16 = vld [vmem:[%s14579_s8 + $0xd0] sm:$0xff] }
 0xc6c   : > { %12335 = vmatprep.mubr.msk.f32.mxu0 %vm14528_vm0, %v17675_v6  ;;  %13367 = vmatpush3.bf16.msra.mxu0 %v13366_v14  ;;  %v13408_v14 = vpack.c.bf16 %v11038_v62, %v11037_v12  ;;  %v11040_v18 = vld [vmem:[%s14579_s8 + $0xd8] sm:$0xff] }
 0xc6d   : > { %13377 = vmatprep.subr.bf16.mxu0 %v17673_v3 }
 0xc6e   : > { %v4304_v27 = vpop.f32.mrb[222].mxu1 }
 0xc6f   : > { %v12308_v37 = vpop.f32.mrb[223].mxu1  ;;  %12336 = vmatmul.mubr.msk.f32.gmra.mrb[144].mxu0 %vm981_vm1, %v4304_v27 }
 0xc70   : > { %12338 = vmatprep.mubr.msk.f32.mxu0 %vm14528_vm0, %v17675_v6 }
 0xc72   : > { %v4309_v47 = vpop.f32.mrb[224].mxu1 }
 0xc73   : > { %v12311_v4 = vpop.f32.mrb[225].mxu1  ;;  %12339 = vmatmul.mubr.msk.f32.gmra.mrb[146].mxu0 %vm981_vm1, %v4309_v47  ;;  %v13411_v47 = vpack.c.bf16 %v11040_v18, %v11039_v16 }
 0xc74   : > { %12341 = vmatprep.mubr.msk.f32.mxu0 %vm14528_vm0, %v17675_v6 }
 0xc76   : > { %v4314_v15 = vpop.f32.mrb[226].mxu1 }
 0xc77   : > { %v12314_v25 = vpop.f32.mrb[227].mxu1  ;;  %12342 = vmatmul.mubr.msk.f32.gmra.mrb[148].mxu0 %vm981_vm1, %v4314_v15 }
 0xc78   : > { %12344 = vmatprep.mubr.msk.f32.mxu0 %vm14528_vm0, %v17675_v6 }
 0xc7a   : > { %v4319_v57 = vpop.f32.mrb[228].mxu1 }
 0xc7b   : > { %v12317_v28 = vpop.f32.mrb[229].mxu1  ;;  %12345 = vmatmul.mubr.msk.f32.gmra.mrb[150].mxu0 %vm981_vm1, %v4319_v57 }
 0xc7c   : > { %12347 = vmatprep.mubr.msk.f32.mxu0 %vm14528_vm0, %v17675_v6 }
 0xc7e   : > { %v4324_v29 = vpop.f32.mrb[230].mxu1 }
 0xc7f   : > { %v12320_v17 = vpop.f32.mrb[231].mxu1  ;;  %12348 = vmatmul.mubr.msk.f32.gmra.mrb[152].mxu0 %vm981_vm1, %v4324_v29 }
 0xc80   : > { %12393 = vmatprep.mubr.msk.f32.mxu0 %vm14528_vm0, %v17675_v6 }
 0xc82   : > { %v4556_v23 = vpop.f32.mrb[232].mxu1 }
 0xc83   : > { %v12366_v24 = vpop.f32.mrb[233].mxu1  ;;  %12394 = vmatmul.mubr.msk.f32.vlgmr.msra.gmra.mrb[154].mxu0 %vm981_vm1, %v4556_v23 }
 0xc84   : > { %12396 = vmatprep.mubr.msk.f32.mxu0 %vm14528_vm0, %v17675_v6  ;;  %13379 = vmatpush3.bf16.msra.mxu0 %v13378_v19 }
 0xc85   : > { %13380 = vmatprep.subr.bf16.mxu0 %v17673_v3 }
 0xc86   : > { %v4561_v36 = vpop.f32.mrb[234].mxu1 }
 0xc87   : > { %v12369_v42 = vpop.f32.mrb[235].mxu1  ;;  %12397 = vmatmul.mubr.msk.f32.gmra.mrb[156].mxu0 %vm981_vm1, %v4561_v36  ;;  %v11065_v36 = vld [vmem:[%s14579_s8 + $0xf0] sm:$0xff] }
 0xc88   : > { %12399 = vmatprep.mubr.msk.f32.mxu0 %vm14528_vm0, %v17675_v6  ;;  %13382 = vmatpush3.bf16.msra.mxu0 %v13381_v32  ;;  %v13423_v32 = vpack.c.bf16 %v11064_v21, %v11063_v20  ;;  %v11066_v42 = vld [vmem:[%s14579_s8 + $0xf8] sm:$0xff] }
 0xc89   : > { %13392 = vmatprep.subr.bf16.mxu0 %v17673_v3 }
 0xc8a   : > { %v4566_v43 = vpop.f32.mrb[236].mxu1 }
 0xc8b   : > { %v12372_v49 = vpop.f32.mrb[237].mxu1  ;;  %12400 = vmatmul.mubr.msk.f32.gmra.mrb[158].mxu0 %vm981_vm1, %v4566_v43 }
 0xc8c   : > { %12402 = vmatprep.mubr.msk.f32.mxu0 %vm14528_vm0, %v17675_v6 }
 0xc8e   : > { %v4571_v54 = vpop.f32.mrb[238].mxu1 }
 0xc8f   : > { %v12375_v58 = vpop.f32.mrb[239].mxu1  ;;  %12403 = vmatmul.mubr.msk.f32.gmra.mrb[160].mxu0 %vm981_vm1, %v4571_v54  ;;  %v13426_v54 = vpack.c.bf16 %v11066_v42, %v11065_v36 }
 0xc90   : > { %12405 = vmatprep.mubr.msk.f32.mxu0 %vm14528_vm0, %v17675_v6 }
 0xc92   : > { %v4576_v41 = vpop.f32.mrb[240].mxu1 }
 0xc93   : > { %v12378_v61 = vpop.f32.mrb[241].mxu1  ;;  %12406 = vmatmul.mubr.msk.f32.gmra.mrb[162].mxu0 %vm981_vm1, %v4576_v41 }
 0xc94   : > { %12408 = vmatprep.mubr.msk.f32.mxu0 %vm14528_vm0, %v17675_v6 }
 0xc96   : > { %v4581_v26 = vpop.f32.mrb[242].mxu1 }
 0xc97   : > { %v12381_v1 = vpop.f32.mrb[243].mxu1  ;;  %12409 = vmatmul.mubr.msk.f32.gmra.mrb[164].mxu0 %vm981_vm1, %v4581_v26 }
 0xc98   : > { %12411 = vmatprep.mubr.msk.f32.mxu0 %vm14528_vm0, %v17675_v6 }
 0xc9a   : > { %v4586_v40 = vpop.f32.mrb[244].mxu1 }
 0xc9b   : > { %v12384_v5 = vpop.f32.mrb[245].mxu1  ;;  %12412 = vmatmul.mubr.msk.f32.gmra.mrb[166].mxu0 %vm981_vm1, %v4586_v40 }
 0xc9c   : > { %12457 = vmatprep.mubr.msk.f32.mxu0 %vm14528_vm0, %v17675_v6 }
 0xc9e   : > { %v4818_v33 = vpop.f32.mrb[246].mxu1 }
 0xc9f   : > { %v12430_v39 = vpop.f32.mrb[247].mxu1  ;;  %12458 = vmatmul.mubr.msk.f32.vlgmr.msra.gmra.mrb[168].mxu0 %vm981_vm1, %v4818_v33 }
 0xca0   : > { %12460 = vmatprep.mubr.msk.f32.mxu0 %vm14528_vm0, %v17675_v6  ;;  %13394 = vmatpush3.bf16.msra.mxu0 %v13393_v30 }
 0xca1   : > { %13395 = vmatprep.subr.bf16.mxu0 %v17673_v3 }
 0xca2   : > { %v4823_v48 = vpop.f32.mrb[248].mxu1 }
 0xca3   : > { %v12433_v22 = vpop.f32.mrb[249].mxu1  ;;  %12461 = vmatmul.mubr.msk.f32.gmra.mrb[170].mxu0 %vm981_vm1, %v4823_v48  ;;  %v11091_v48 = vld [vmem:[%s14579_s8 + $0x110] sm:$0xff] }
 0xca4   : > { %12463 = vmatprep.mubr.msk.f32.mxu0 %vm14528_vm0, %v17675_v6  ;;  %13397 = vmatpush3.bf16.msra.mxu0 %v13396_v60  ;;  %v13438_v60 = vpack.c.bf16 %v11090_v59, %v11089_v7  ;;  %v11092_v22 = vld [vmem:[%s14579_s8 + $0x118] sm:$0xff] }
 0xca5   : > { %13407 = vmatprep.subr.bf16.mxu0 %v17673_v3 }
 0xca6   : > { %v4828_v8 = vpop.f32.mrb[250].mxu1 }
 0xca7   : > { %v12436_v10 = vpop.f32.mrb[251].mxu1  ;;  %12464 = vmatmul.mubr.msk.f32.gmra.mrb[172].mxu0 %vm981_vm1, %v4828_v8 }
 0xca8   : > { %12466 = vmatprep.mubr.msk.f32.mxu0 %vm14528_vm0, %v17675_v6 }
 0xcaa   : > { %v4833_v11 = vpop.f32.mrb[252].mxu1 }
 0xcab   : > { %v12439_v63 = vpop.f32.mrb[253].mxu1  ;;  %12467 = vmatmul.mubr.msk.f32.gmra.mrb[174].mxu0 %vm981_vm1, %v4833_v11  ;;  %v13441_v11 = vpack.c.bf16 %v11092_v22, %v11091_v48 }
 0xcac   : > { %12469 = vmatprep.mubr.msk.f32.mxu0 %vm14528_vm0, %v17675_v6 }
 0xcae   : > { %v4838_v50 = vpop.f32.mrb[254].mxu1 }
 0xcaf   : > { %v12442_v44 = vpop.f32.mrb[255].mxu1  ;;  %12470 = vmatmul.mubr.msk.f32.gmra.mrb[176].mxu0 %vm981_vm1, %v4838_v50 }
 0xcb0   : > { %12472 = vmatprep.mubr.msk.f32.mxu0 %vm14528_vm0, %v17675_v6 }
 0xcb2   : > { %v4843_v38 = vpop.f32.mrb[0].mxu1 }
 0xcb3   : > { %v12445_v53 = vpop.f32.mrb[1].mxu1  ;;  %12473 = vmatmul.mubr.msk.f32.gmra.mrb[178].mxu0 %vm981_vm1, %v4843_v38 }
 0xcb4   : > { %12475 = vmatprep.mubr.msk.f32.mxu0 %vm14528_vm0, %v17675_v6 }
 0xcb6   : > { %v4848_v13 = vpop.f32.mrb[2].mxu1 }
 0xcb7   : > { %v12448_v9 = vpop.f32.mrb[3].mxu1  ;;  %12476 = vmatmul.mubr.msk.f32.gmra.mrb[180].mxu0 %vm981_vm1, %v4848_v13 }
 0xcb8   : > { %12521 = vmatprep.mubr.msk.f32.mxu0 %vm14528_vm0, %v17675_v6 }
 0xcba   : > { %v5080_v27 = vpop.f32.mrb[4].mxu1 }
 0xcbb   : > { %v12494_v37 = vpop.f32.mrb[5].mxu1  ;;  %12522 = vmatmul.mubr.msk.f32.vlgmr.msra.gmra.mrb[182].mxu0 %vm981_vm1, %v5080_v27 }
 0xcbc   : > { %12524 = vmatprep.mubr.msk.f32.mxu0 %vm14528_vm0, %v17675_v6  ;;  %13409 = vmatpush3.bf16.msra.mxu0 %v13408_v14 }
 0xcbd   : > { %13410 = vmatprep.subr.bf16.mxu0 %v17673_v3 }
 0xcbe   : > { %v5085_v4 = vpop.f32.mrb[6].mxu1 }
 0xcbf   : > { %v12497_v15 = vpop.f32.mrb[7].mxu1  ;;  %12525 = vmatmul.mubr.msk.f32.gmra.mrb[184].mxu0 %vm981_vm1, %v5085_v4 }
 0xcc0   : > { %12527 = vmatprep.mubr.msk.f32.mxu0 %vm14528_vm0, %v17675_v6  ;;  %13412 = vmatpush3.bf16.msra.mxu0 %v13411_v47 }
 0xcc1   : > { %13422 = vmatprep.subr.bf16.mxu0 %v17673_v3 }
 0xcc2   : > { %v5090_v25 = vpop.f32.mrb[8].mxu1 }
 0xcc3   : > { %v12500_v57 = vpop.f32.mrb[9].mxu1  ;;  %12528 = vmatmul.mubr.msk.f32.gmra.mrb[186].mxu0 %vm981_vm1, %v5090_v25 }
 0xcc4   : > { %12530 = vmatprep.mubr.msk.f32.mxu0 %vm14528_vm0, %v17675_v6 }
 0xcc6   : > { %v5095_v28 = vpop.f32.mrb[10].mxu1 }
 0xcc7   : > { %v12503_v45 = vpop.f32.mrb[11].mxu1  ;;  %12531 = vmatmul.mubr.msk.f32.gmra.mrb[188].mxu0 %vm981_vm1, %v5095_v28 }
 0xcc8   : > { %12533 = vmatprep.mubr.msk.f32.mxu0 %vm14528_vm0, %v17675_v6 }
 0xcca   : > { %v5100_v35 = vpop.f32.mrb[12].mxu1 }
 0xccb   : > { %v12506_v29 = vpop.f32.mrb[13].mxu1  ;;  %12534 = vmatmul.mubr.msk.f32.gmra.mrb[190].mxu0 %vm981_vm1, %v5100_v35 }
 0xccc   : > { %12536 = vmatprep.mubr.msk.f32.mxu0 %vm14528_vm0, %v17675_v6 }
 0xcce   : > { %v5105_v17 = vpop.f32.mrb[14].mxu1 }
 0xccf   : > { %v12509_v19 = vpop.f32.mrb[15].mxu1  ;;  %12537 = vmatmul.mubr.msk.f32.gmra.mrb[192].mxu0 %vm981_vm1, %v5105_v17 }
 0xcd0   : > { %12539 = vmatprep.mubr.msk.f32.mxu0 %vm14528_vm0, %v17675_v6 }
 0xcd2   : > { %v5110_v23 = vpop.f32.mrb[16].mxu1 }
 0xcd3   : > { %v12512_v24 = vpop.f32.mrb[17].mxu1  ;;  %12540 = vmatmul.mubr.msk.f32.gmra.mrb[194].mxu0 %vm981_vm1, %v5110_v23 }
 0xcd4   : > { %12585 = vmatprep.mubr.msk.f32.mxu0 %vm14528_vm0, %v17675_v6 }
 0xcd6   : > { %v5342_v43 = vpop.f32.mrb[18].mxu1 }
 0xcd7   : > { %v12558_v49 = vpop.f32.mrb[19].mxu1  ;;  %12586 = vmatmul.mubr.msk.f32.vlgmr.msra.gmra.mrb[196].mxu0 %vm981_vm1, %v5342_v43 }
 0xcd8   : > { %12588 = vmatprep.mubr.msk.f32.mxu0 %vm14528_vm0, %v17675_v6  ;;  %13424 = vmatpush3.bf16.msra.mxu0 %v13423_v32 }
 0xcd9   : > { %13425 = vmatprep.subr.bf16.mxu0 %v17673_v3 }
 0xcda   : > { %v5347_v58 = vpop.f32.mrb[20].mxu1 }
 0xcdb   : > { %v12561_v41 = vpop.f32.mrb[21].mxu1  ;;  %12589 = vmatmul.mubr.msk.f32.gmra.mrb[198].mxu0 %vm981_vm1, %v5347_v58 }
 0xcdc   : > { %12591 = vmatprep.mubr.msk.f32.mxu0 %vm14528_vm0, %v17675_v6  ;;  %13427 = vmatpush3.bf16.msra.mxu0 %v13426_v54 }
 0xcdd   : > { %13437 = vmatprep.subr.bf16.mxu0 %v17673_v3 }
 0xcde   : > { %v5352_v61 = vpop.f32.mrb[22].mxu1 }
 0xcdf   : > { %v12564_v26 = vpop.f32.mrb[23].mxu1  ;;  %12592 = vmatmul.mubr.msk.f32.gmra.mrb[200].mxu0 %vm981_vm1, %v5352_v61 }
 0xce0   : > { %12594 = vmatprep.mubr.msk.f32.mxu0 %vm14528_vm0, %v17675_v6 }
 0xce2   : > { %v5357_v1 = vpop.f32.mrb[24].mxu1 }
 0xce3   : > { %v12567_v55 = vpop.f32.mrb[25].mxu1  ;;  %12595 = vmatmul.mubr.msk.f32.gmra.mrb[202].mxu0 %vm981_vm1, %v5357_v1 }
 0xce4   : > { %12597 = vmatprep.mubr.msk.f32.mxu0 %vm14528_vm0, %v17675_v6 }
 0xce6   : > { %v5362_v46 = vpop.f32.mrb[26].mxu1 }
 0xce7   : > { %v12570_v40 = vpop.f32.mrb[27].mxu1  ;;  %12598 = vmatmul.mubr.msk.f32.gmra.mrb[204].mxu0 %vm981_vm1, %v5362_v46 }
 0xce8   : > { %12600 = vmatprep.mubr.msk.f32.mxu0 %vm14528_vm0, %v17675_v6 }
 0xcea   : > { %v5367_v5 = vpop.f32.mrb[28].mxu1 }
 0xceb   : > { %v12573_v30 = vpop.f32.mrb[29].mxu1  ;;  %12601 = vmatmul.mubr.msk.f32.gmra.mrb[206].mxu0 %vm981_vm1, %v5367_v5 }
 0xcec   : > { %12603 = vmatprep.mubr.msk.f32.mxu0 %vm14528_vm0, %v17675_v6 }
 0xcee   : > { %v5372_v33 = vpop.f32.mrb[30].mxu1 }
 0xcef   : > { %v12576_v39 = vpop.f32.mrb[31].mxu1  ;;  %12604 = vmatmul.mubr.msk.f32.gmra.mrb[208].mxu0 %vm981_vm1, %v5372_v33 }
 0xcf0   : > { %12649 = vmatprep.mubr.msk.f32.mxu0 %vm14528_vm0, %v17675_v6 }
 0xcf2   : > { %v5604_v8 = vpop.f32.mrb[32].mxu1 }
 0xcf3   : > { %v12622_v10 = vpop.f32.mrb[33].mxu1  ;;  %12650 = vmatmul.mubr.msk.f32.vlgmr.msra.gmra.mrb[210].mxu0 %vm981_vm1, %v5604_v8 }
 0xcf4   : > { %12652 = vmatprep.mubr.msk.f32.mxu0 %vm14528_vm0, %v17675_v6  ;;  %13439 = vmatpush3.bf16.msra.mxu0 %v13438_v60 }
 0xcf5   : > { %13440 = vmatprep.subr.bf16.mxu0 %v17673_v3 }
 0xcf6   : > { %v5609_v63 = vpop.f32.mrb[34].mxu1 }
 0xcf7   : > { %v12625_v50 = vpop.f32.mrb[35].mxu1  ;;  %12653 = vmatmul.mubr.msk.f32.gmra.mrb[212].mxu0 %vm981_vm1, %v5609_v63 }
 0xcf8   : > { %12655 = vmatprep.mubr.msk.f32.mxu0 %vm14528_vm0, %v17675_v6  ;;  %13442 = vmatpush3.bf16.msra.mxu0 %v13441_v11 }
 0xcf9   : > { %13452 = vmatprep.subr.bf16.mxu0 %v17673_v3 }
 0xcfa   : > { %v5614_v44 = vpop.f32.mrb[36].mxu1 }
 0xcfb   : > { %v12628_v38 = vpop.f32.mrb[37].mxu1  ;;  %12656 = vmatmul.mubr.msk.f32.gmra.mrb[214].mxu0 %vm981_vm1, %v5614_v44 }
 0xcfc   : > { %12658 = vmatprep.mubr.msk.f32.mxu0 %vm14528_vm0, %v17675_v6 }
 0xcfe   : > { %v5619_v53 = vpop.f32.mrb[38].mxu1 }
 0xcff   : > { %v12631_v12 = vpop.f32.mrb[39].mxu1  ;;  %12659 = vmatmul.mubr.msk.f32.gmra.mrb[216].mxu0 %vm981_vm1, %v5619_v53 }
 0xd00   : > { %12661 = vmatprep.mubr.msk.f32.mxu0 %vm14528_vm0, %v17675_v6 }
 0xd02   : > { %v5624_v62 = vpop.f32.mrb[40].mxu1 }
 0xd03   : > { %v12634_v13 = vpop.f32.mrb[41].mxu1  ;;  %12662 = vmatmul.mubr.msk.f32.gmra.mrb[218].mxu0 %vm981_vm1, %v5624_v62 }
 0xd04   : > { %12664 = vmatprep.mubr.msk.f32.mxu0 %vm14528_vm0, %v17675_v6 }
 0xd06   : > { %v5629_v9 = vpop.f32.mrb[42].mxu1 }
 0xd07   : > { %v12637_v14 = vpop.f32.mrb[43].mxu1  ;;  %12665 = vmatmul.mubr.msk.f32.gmra.mrb[220].mxu0 %vm981_vm1, %v5629_v9 }
 0xd08   : > { %12667 = vmatprep.mubr.msk.f32.mxu0 %vm14528_vm0, %v17675_v6 }
 0xd0a   : > { %v5634_v16 = vpop.f32.mrb[44].mxu1 }
 0xd0b   : > { %v12640_v18 = vpop.f32.mrb[45].mxu1  ;;  %12668 = vmatmul.mubr.msk.f32.gmra.mrb[222].mxu0 %vm981_vm1, %v5634_v16 }
 0xd0c   : > { %12713 = vmatprep.mubr.msk.f32.mxu0 %vm14528_vm0, %v17675_v6 }
 0xd0e   : > { %v5866_v27 = vpop.f32.mrb[46].mxu1 }
 0xd0f   : > { %v12686_v37 = vpop.f32.mrb[47].mxu1  ;;  %12714 = vmatmul.mubr.msk.f32.vlgmr.msra.gmra.mrb[224].mxu0 %vm981_vm1, %v5866_v27 }
 0xd10   : > { %12716 = vmatprep.mubr.msk.f32.mxu0 %vm14528_vm0, %v17675_v6 }
 0xd12   : > { %v5871_v47 = vpop.f32.mrb[48].mxu1 }
 0xd13   : > { %v12689_v4 = vpop.f32.mrb[49].mxu1  ;;  %12717 = vmatmul.mubr.msk.f32.gmra.mrb[226].mxu0 %vm981_vm1, %v5871_v47 }
 0xd14   : > { %12719 = vmatprep.mubr.msk.f32.mxu0 %vm14528_vm0, %v17675_v6 }
 0xd16   : > { %v5876_v15 = vpop.f32.mrb[50].mxu1 }
 0xd17   : > { %v12692_v25 = vpop.f32.mrb[51].mxu1  ;;  %12720 = vmatmul.mubr.msk.f32.gmra.mrb[228].mxu0 %vm981_vm1, %v5876_v15 }
 0xd18   : > { %12722 = vmatprep.mubr.msk.f32.mxu0 %vm14528_vm0, %v17675_v6 }
 0xd1a   : > { %v5881_v57 = vpop.f32.mrb[52].mxu1 }
 0xd1b   : > { %v12695_v28 = vpop.f32.mrb[53].mxu1  ;;  %12723 = vmatmul.mubr.msk.f32.gmra.mrb[230].mxu0 %vm981_vm1, %v5881_v57 }
 0xd1c   : > { %12725 = vmatprep.mubr.msk.f32.mxu0 %vm14528_vm0, %v17675_v6 }
 0xd1e   : > { %v5886_v45 = vpop.f32.mrb[54].mxu1 }
 0xd1f   : > { %v12698_v35 = vpop.f32.mrb[55].mxu1  ;;  %12726 = vmatmul.mubr.msk.f32.gmra.mrb[232].mxu0 %vm981_vm1, %v5886_v45 }
 0xd20   : > { %12728 = vmatprep.mubr.msk.f32.mxu0 %vm14528_vm0, %v17675_v6  ;;  %v6132_v35 = vld [vmem:[%s14594_s24] sm:$0xff] }
 0xd22   : > { %v5891_v29 = vpop.f32.mrb[56].mxu1 }
 0xd23   : > { %v12701_v17 = vpop.f32.mrb[57].mxu1  ;;  %12729 = vmatmul.mubr.msk.f32.gmra.mrb[234].mxu0 %vm981_vm1, %v5891_v29  ;;  %v6133_v29 = vld [vmem:[%s14594_s24 + $0x8] sm:$0xff] }
 0xd24   : > { %12731 = vmatprep.mubr.msk.f32.mxu0 %vm14528_vm0, %v17675_v6  ;;  %v6134_v17 = vld [vmem:[%s14594_s24 + $0x10] sm:$0xff] }
 0xd26   : > { %v5896_v19 = vpop.f32.mrb[58].mxu1 }
 0xd27   : > { %12732 = vmatmul.mubr.msk.f32.gmra.mrb[236].mxu0 %vm981_vm1, %v5896_v19  ;;  %v12704_v20 = vpop.f32.mrb[59].mxu1  ;;  %v13453_v19 = vpack.c.bf16 %v6133_v29, %v6132_v35 }
 0xd28   : > { %12767 = vmatprep.mubr.msk.f32.mxu0 %vm14528_vm0, %v17675_v6  ;;  %v6135_v20 = vld [vmem:[%s14594_s24 + $0x18] sm:$0xff] }
 0xd29   : > { %13454 = vmatpush3.bf16.msra.mxu0 %v13453_v19 }
 0xd2a   : > { %13455 = vmatprep.subr.bf16.mxu0 %v17673_v3 }
 0xd3a   : > { %v4420_v21 = vpop.f32.mrb[140].mxu0 }
 0xd3b   : > { %v4454_v23 = vadd.f32 %v4420_v21, %v16045_v34  ;;  %v12331_v24 = vpop.f32.mrb[141].mxu0 }
 0xd3e   : > { %v4425_v32 = vpop.f32.mrb[142].mxu0 }
 0xd3f   : > { %v4455_v36 = vadd.f32 %v4425_v32, %v16051_v52  ;;  %v12334_v42 = vpop.f32.mrb[143].mxu0  ;;  %v13456_v32 = vpack.c.bf16 %v6135_v20, %v6134_v17 }
 0xd40   : > { %v6137_v42 = vld [vmem:[%s14594_s24 + $0x28] sm:$0xff] }
 0xd41   : > { %13457 = vmatpush3.bf16.msra.mxu0 %v13456_v32 }
 0xd42   : > { %v4430_v43 = vpop.f32.mrb[144].mxu0  ;;  %13458 = vmatprep.subr.bf16.mxu0 %v17673_v3 }
 0xd43   : > { %v4456_v49 = vadd.f32 %v4430_v43, %v16057_v31  ;;  %v12337_v54 = vpop.f32.mrb[145].mxu0 }
 0xd46   : > { %v4435_v58 = vpop.f32.mrb[146].mxu0 }
 0xd47   : > { %v4457_v41 = vadd.f32 %v4435_v58, %v16062_v0  ;;  %v12340_v61 = vpop.f32.mrb[147].mxu0 }
 0xd48   : > { %v6139_v61 = vld [vmem:[%s14594_s24 + $0x38] sm:$0xff] }
 0xd4a   : > { %v4440_v26 = vpop.f32.mrb[148].mxu0 }
 0xd4b   : > { %v4458_v1 = vadd.f32 %v4440_v26, %v16064_v2  ;;  %v12343_v55 = vpop.f32.mrb[149].mxu0 }
 0xd4e   : > { %v4445_v46 = vpop.f32.mrb[150].mxu0 }
 0xd4f   : > { %v4459_v34 = vadd.f32 %v4445_v46, %v16066_v51  ;;  %v12346_v40 = vpop.f32.mrb[151].mxu0 }
 0xd52   : > { %v4450_v5 = vpop.f32.mrb[152].mxu0 }
 0xd53   : > { %v4460_v52 = vadd.f32 %v4450_v5, %v16070_v56  ;;  %v12349_v30 = vpop.f32.mrb[153].mxu0 }
 0xd56   : > { %v4682_v7 = vpop.f32.mrb[154].mxu0 }
 0xd57   : > { %v4716_v59 = vadd.f32 %v4682_v7, %v4454_v23  ;;  %v12395_v31 = vpop.f32.mrb[155].mxu0 }
 0xd5a   : > { %v4687_v33 = vpop.f32.mrb[156].mxu0 }
 0xd5b   : > { %v4717_v39 = vadd.f32 %v4687_v33, %v4455_v36  ;;  %v12398_v60 = vpop.f32.mrb[157].mxu0  ;;  %v6136_v36 = vld [vmem:[%s14594_s24 + $0x20] sm:$0xff] }
 0xd5c   : > { %v13459_v58 = vpack.c.bf16 %v6137_v42, %v6136_v36 }
 0xd5e   : > { %v4692_v0 = vpop.f32.mrb[158].mxu0  ;;  %13460 = vmatpush3.bf16.msra.mxu0 %v13459_v58 }
 0xd5f   : > { %v4718_v48 = vadd.f32 %v4692_v0, %v4456_v49  ;;  %v12401_v22 = vpop.f32.mrb[159].mxu0  ;;  %13461 = vmatprep.subr.bf16.mxu0 %v17673_v3 }
 0xd62   : > { %v4697_v8 = vpop.f32.mrb[160].mxu0 }
 0xd63   : > { %v4719_v2 = vadd.f32 %v4697_v8, %v4457_v41  ;;  %v12404_v10 = vpop.f32.mrb[161].mxu0  ;;  %v6138_v41 = vld [vmem:[%s14594_s24 + $0x30] sm:$0xff] }
 0xd64   : > { %v13462_v46 = vpack.c.bf16 %v6139_v61, %v6138_v41 }
 0xd66   : > { %v4702_v11 = vpop.f32.mrb[162].mxu0  ;;  %13463 = vmatpush3.bf16.msra.mxu0 %v13462_v46 }
 0xd67   : > { %v4720_v63 = vadd.f32 %v4702_v11, %v4458_v1  ;;  %v12407_v51 = vpop.f32.mrb[163].mxu0  ;;  %13464 = vmatprep.subr.bf16.mxu0 %v17673_v3 }
 0xd6a   : > { %v4707_v50 = vpop.f32.mrb[164].mxu0 }
 0xd6b   : > { %v4721_v44 = vadd.f32 %v4707_v50, %v4459_v34  ;;  %v12410_v38 = vpop.f32.mrb[165].mxu0 }
 0xd6e   : > { %v4712_v56 = vpop.f32.mrb[166].mxu0 }
 0xd6f   : > { %v4722_v53 = vadd.f32 %v4712_v56, %v4460_v52  ;;  %v12413_v12 = vpop.f32.mrb[167].mxu0 }
 0xd72   : > { %v4944_v62 = vpop.f32.mrb[168].mxu0 }
 0xd73   : > { %v4978_v13 = vadd.f32 %v4944_v62, %v4716_v59  ;;  %v12459_v9 = vpop.f32.mrb[169].mxu0 }
 0xd76   : > { %v4949_v14 = vpop.f32.mrb[170].mxu0 }
 0xd77   : > { %v4979_v16 = vadd.f32 %v4949_v14, %v4717_v39  ;;  %v12462_v18 = vpop.f32.mrb[171].mxu0 }
 0xd7a   : > { %v4954_v27 = vpop.f32.mrb[172].mxu0 }
 0xd7b   : > { %v4980_v37 = vadd.f32 %v4954_v27, %v4718_v48  ;;  %v12465_v47 = vpop.f32.mrb[173].mxu0 }
 0xd7e   : > { %v4959_v4 = vpop.f32.mrb[174].mxu0 }
 0xd7f   : > { %v4981_v15 = vadd.f32 %v4959_v4, %v4719_v2  ;;  %v12468_v25 = vpop.f32.mrb[175].mxu0 }
 0xd82   : > { %v4964_v57 = vpop.f32.mrb[176].mxu0 }
 0xd83   : > { %v4982_v28 = vadd.f32 %v4964_v57, %v4720_v63  ;;  %v12471_v45 = vpop.f32.mrb[177].mxu0 }
 0xd86   : > { %v4969_v21 = vpop.f32.mrb[178].mxu0 }
 0xd87   : > { %v4983_v23 = vadd.f32 %v4969_v21, %v4721_v44  ;;  %v12474_v24 = vpop.f32.mrb[179].mxu0 }
 0xd8a   : > { %v4974_v43 = vpop.f32.mrb[180].mxu0 }
 0xd8b   : > { %v4984_v49 = vadd.f32 %v4974_v43, %v4722_v53  ;;  %v12477_v54 = vpop.f32.mrb[181].mxu0 }
 0xd8e   : > { %v5206_v26 = vpop.f32.mrb[182].mxu0 }
 0xd8f   : > { %v5240_v1 = vadd.f32 %v5206_v26, %v4978_v13  ;;  %v12523_v55 = vpop.f32.mrb[183].mxu0 }
 0xd92   : > { %v5211_v34 = vpop.f32.mrb[184].mxu0 }
 0xd93   : > { %v5241_v40 = vadd.f32 %v5211_v34, %v4979_v16  ;;  %v12526_v5 = vpop.f32.mrb[185].mxu0 }
 0xd96   : > { %v5216_v52 = vpop.f32.mrb[186].mxu0 }
 0xd97   : > { %v5242_v30 = vadd.f32 %v5216_v52, %v4980_v37  ;;  %v12529_v7 = vpop.f32.mrb[187].mxu0 }
 0xd9a   : > { %v5221_v59 = vpop.f32.mrb[188].mxu0 }
 0xd9b   : > { %v5243_v31 = vadd.f32 %v5221_v59, %v4981_v15  ;;  %v12532_v33 = vpop.f32.mrb[189].mxu0 }
 0xd9e   : > { %v5226_v39 = vpop.f32.mrb[190].mxu0 }
 0xd9f   : > { %v5244_v60 = vadd.f32 %v5226_v39, %v4982_v28  ;;  %v12535_v0 = vpop.f32.mrb[191].mxu0 }
 0xda2   : > { %v5231_v48 = vpop.f32.mrb[192].mxu0 }
 0xda3   : > { %v5245_v22 = vadd.f32 %v5231_v48, %v4983_v23  ;;  %v12538_v8 = vpop.f32.mrb[193].mxu0 }
 0xda6   : > { %v5236_v2 = vpop.f32.mrb[194].mxu0 }
 0xda7   : > { %v5246_v10 = vadd.f32 %v5236_v2, %v4984_v49  ;;  %v12541_v11 = vpop.f32.mrb[195].mxu0 }
 0xdaa   : > { %v5468_v63 = vpop.f32.mrb[196].mxu0 }
 0xdab   : > { %v5502_v51 = vadd.f32 %v5468_v63, %v5240_v1  ;;  %v12587_v50 = vpop.f32.mrb[197].mxu0 }
 0xdae   : > { %v5473_v44 = vpop.f32.mrb[198].mxu0 }
 0xdaf   : > { %v5503_v38 = vadd.f32 %v5473_v44, %v5241_v40  ;;  %v12590_v56 = vpop.f32.mrb[199].mxu0  ;;  %v11100_v40 = vld [vmem:[%s14584_s14] ss:$0 sm:$0xff] }
 0xdb2   : > { %v5478_v53 = vpop.f32.mrb[200].mxu0 }
 0xdb3   : > { %v5504_v12 = vadd.f32 %v5478_v53, %v5242_v30  ;;  %v12593_v62 = vpop.f32.mrb[201].mxu0 }
 0xdb6   : > { %v5483_v13 = vpop.f32.mrb[202].mxu0 }
 0xdb7   : > { %v5505_v9 = vadd.f32 %v5483_v13, %v5243_v31  ;;  %v12596_v14 = vpop.f32.mrb[203].mxu0 }
 0xdba   : > { %v5488_v16 = vpop.f32.mrb[204].mxu0 }
 0xdbb   : > { %v5506_v18 = vadd.f32 %v5488_v16, %v5244_v60  ;;  %v12599_v27 = vpop.f32.mrb[205].mxu0 }
 0xdbe   : > { %v5493_v37 = vpop.f32.mrb[206].mxu0 }
 0xdbf   : > { %v5507_v47 = vadd.f32 %v5493_v37, %v5245_v22  ;;  %v12602_v4 = vpop.f32.mrb[207].mxu0 }
 0xdc2   : > { %v5498_v15 = vpop.f32.mrb[208].mxu0 }
 0xdc3   : > { %v5508_v25 = vadd.f32 %v5498_v15, %v5246_v10  ;;  %v12605_v57 = vpop.f32.mrb[209].mxu0 }
 0xdc4   : > { %v6462_v57 = vld [vmem:[%s14604_s6] sm:$0xff] }
 0xdc6   : > { %v5730_v28 = vpop.f32.mrb[210].mxu0 }
 0xdc7   : > { %v5764_v45 = vadd.f32 %v5730_v28, %v5502_v51  ;;  %v12651_v35 = vpop.f32.mrb[211].mxu0  ;;  %v6463_v28 = vld [vmem:[%s14604_s6 + $0x8] sm:$0xff] }
 0xdc8   : > { %v6464_v35 = vld [vmem:[%s14604_s6 + $0x10] sm:$0xff] }
 0xdca   : > { %v5735_v29 = vpop.f32.mrb[212].mxu0 }
 0xdcb   : > { %v5765_v17 = vadd.f32 %v5735_v29, %v5503_v38  ;;  %v12654_v19 = vpop.f32.mrb[213].mxu0  ;;  %v6465_v29 = vld [vmem:[%s14604_s6 + $0x18] sm:$0xff] }
 0xdcc   : > { %v6466_v19 = vld [vmem:[%s14604_s6 + $0x20] sm:$0xff] }
 0xdce   : > { %v5740_v20 = vpop.f32.mrb[214].mxu0 }
 0xdcf   : > { %v5766_v21 = vadd.f32 %v5740_v20, %v5504_v12  ;;  %v12657_v23 = vpop.f32.mrb[215].mxu0  ;;  %v6467_v20 = vld [vmem:[%s14604_s6 + $0x28] sm:$0xff] }
 0xdd0   : > { %v6468_v23 = vld [vmem:[%s14604_s6 + $0x30] sm:$0xff] }
 0xdd2   : > { %v5745_v24 = vpop.f32.mrb[216].mxu0 }
 0xdd3   : > { %v5767_v32 = vadd.f32 %v5745_v24, %v5505_v9  ;;  %v12660_v36 = vpop.f32.mrb[217].mxu0  ;;  %v6469_v24 = vld [vmem:[%s14604_s6 + $0x38] sm:$0xff] }
 0xdd4   : > { %v6470_v36 = vld [vmem:[%s14604_s6 + $0x40] sm:$0xff] }
 0xdd6   : > { %v5750_v42 = vpop.f32.mrb[218].mxu0 }
 0xdd7   : > { %v5768_v43 = vadd.f32 %v5750_v42, %v5506_v18  ;;  %v12663_v49 = vpop.f32.mrb[219].mxu0  ;;  %v6471_v42 = vld [vmem:[%s14604_s6 + $0x48] sm:$0xff] }
 0xdd8   : > { %v6472_v49 = vld [vmem:[%s14604_s6 + $0x50] sm:$0xff] }
 0xdda   : > { %v5755_v54 = vpop.f32.mrb[220].mxu0 }
 0xddb   : > { %v5769_v58 = vadd.f32 %v5755_v54, %v5507_v47  ;;  %v12666_v41 = vpop.f32.mrb[221].mxu0  ;;  %v6473_v54 = vld [vmem:[%s14604_s6 + $0x58] sm:$0xff] }
 0xddc   : > { %v6474_v41 = vld [vmem:[%s14604_s6 + $0x60] sm:$0xff] }
 0xdde   : > { %v5760_v61 = vpop.f32.mrb[222].mxu0 }
 0xddf   : > { %v5770_v26 = vadd.f32 %v5760_v61, %v5508_v25  ;;  %v12669_v1 = vpop.f32.mrb[223].mxu0  ;;  %v6054_v25 = vld [vmem:[%s14589_s19] sm:$0xf]  ;;  %v6475_v61 = vld [vmem:[%s14604_s6 + $0x68] sm:$0xff] }
 0xde0   : > { %v6215_v1 = vld [vmem:[%s14594_s24 + $0x40] sm:$0xff] }
 0xde2   : > { %v5992_v55 = vpop.f32.mrb[224].mxu0 }
 0xde3   : > { %v6026_v46 = vadd.f32 %v5992_v55, %v5764_v45  ;;  %v12715_v34 = vpop.f32.mrb[225].mxu0  ;;  %v13501_v45 = vpack.c.bf16 %v6463_v28, %v6462_v57  ;;  %v6216_v55 = vld [vmem:[%s14594_s24 + $0x48] sm:$0xff]  ;;  %v6386_v57 = vld [vmem:[%s14594_s24 + $0xf8] sm:$0xff]  ;;  %v16358_v28 = vld [vmem:[%s940_s23] sm:$0x7f]  ;;  %s18186_s23 = sld [smem:[#allocation11_spill]] }
 0xde4   : > { %v6217_v34 = vld [vmem:[%s14594_s24 + $0x50] sm:$0xff] }
 0xde5   : > { %v6040_v52 = vadd.f32 %v11100_v40, %v6026_v46  ;;  %v13465_v46 = vpack.c.bf16 %v6216_v55, %v6215_v1  ;;  %v14110_v1 = vld [vmem:[%s14614_s20 + $0xe8] ss:$16 sps:$4 sm:$0xff]   ;;  %v14115_v55 = vld [vmem:[%s14614_s20 + $0x10c] ss:$16 sps:$4 sm:$0xff]  }
 0xde6   : > { %v5997_v5 = vpop.f32.mrb[226].mxu0 }
 0xde7   : > { %v6027_v30 = vadd.f32 %v5997_v5, %v5765_v17  ;;  %v12718_v7 = vpop.f32.mrb[227].mxu0  ;;  %v6047_v33 = vmax.f32 %v6040_v52, 0.0  ;;  %v13504_v17 = vpack.c.bf16 %v6465_v29, %v6464_v35  ;;  %v14091_v29 = vld [vmem:[%s14614_s20 + $0xc] ss:$16 sps:$4 sm:$0xff]  }
 0xde8   : > { %v6219_v7 = vld [vmem:[%s14594_s24 + $0x60] sm:$0xff] }
 0xde9   : > { %v6041_v59 = vadd.f32 %v11100_v40, %v6027_v30 }
 0xdea   : > { %v6002_v31 = vpop.f32.mrb[228].mxu0 }
 0xdeb   : > { %v6048_v39 = vmax.f32 %v6041_v59, 0.0  ;;  %v6028_v60 = vadd.f32 %v6002_v31, %v5766_v21  ;;  %v12721_v0 = vpop.f32.mrb[229].mxu0  ;;  %v13507_v21 = vpack.c.bf16 %v6467_v20, %v6466_v19  ;;  %v6220_v59 = vld [vmem:[%s14594_s24 + $0x68] sm:$0xff] }
 0xdec   : > { %v13471_v31 = vpack.c.bf16 %v6220_v59, %v6219_v7  ;;  %v6297_v0 = vld [vmem:[%s14594_s24 + $0x80] sm:$0xff]  ;;  %v14122_v7 = vld [vmem:[%s14614_s20 + $0x168] ss:$16 sps:$4 sm:$0xff]   ;;  %v14127_v59 = vld [vmem:[%s14614_s20 + $0x18c] ss:$16 sps:$4 sm:$0xff]  }
 0xded   : > { %v13444_v48 = vpack.c.bf16 %v6048_v39, %v6047_v33  ;;  %v6042_v8 = vadd.f32 %v11100_v40, %v6028_v60  ;;  %v6221_v33 = vld [vmem:[%s14594_s24 + $0x70] sm:$0xff]  ;;  %v6222_v39 = vld [vmem:[%s14594_s24 + $0x78] sm:$0xff] }
 0xdee   : > { %v6007_v22 = vpop.f32.mrb[230].mxu0  ;;  %v13474_v60 = vpack.c.bf16 %v6222_v39, %v6221_v33  ;;  %v14130_v33 = vld [vmem:[%s14614_s20 + $0x1ac] ss:$16 sps:$4 sm:$0xff]   ;;  %v14128_v39 = vld [vmem:[%s14614_s20 + $0x1a8] ss:$16 sps:$4 sm:$0xff]  }
 0xdef   : > { %v6029_v2 = vadd.f32 %v6007_v22, %v5767_v32  ;;  %v12724_v10 = vpop.f32.mrb[231].mxu0  ;;  %13445 = vmatpush3.bf16.msra.mxu1 %v13444_v48  ;;  %v6049_v51 = vmax.f32 %v6042_v8, 0.0  ;;  %v13510_v32 = vpack.c.bf16 %v6469_v24, %v6468_v23  ;;  %v6298_v48 = vld [vmem:[%s14594_s24 + $0x88] sm:$0xff] }
 0xdf0   : > { %13446 = vmatprep.subr.bf16.mxu1 %v17673_v3  ;;  %v13477_v22 = vpack.c.bf16 %v6298_v48, %v6297_v0  ;;  %v6300_v10 = vld [vmem:[%s14594_s24 + $0x98] sm:$0xff] }
 0xdf1   : > { %v6043_v11 = vadd.f32 %v11100_v40, %v6029_v2  ;;  %v6299_v2 = vld [vmem:[%s14594_s24 + $0x90] sm:$0xff]  ;;  %v14092_v23 = vld [vmem:[%s14614_s20 + $0x28] ss:$16 sps:$4 sm:$0xff]   ;;  %v14097_v24 = vld [vmem:[%s14614_s20 + $0x4c] ss:$16 sps:$4 sm:$0xff]  }
 0xdf2   : > { %v6012_v63 = vpop.f32.mrb[232].mxu0  ;;  %v14131_v48 = vld [vmem:[%s14614_s20 + $0x1c8] ss:$16 sps:$4 sm:$0xff]  }
 0xdf3   : > { %v6050_v50 = vmax.f32 %v6043_v11, 0.0  ;;  %v6030_v44 = vadd.f32 %v6012_v63, %v5768_v43  ;;  %v12727_v38 = vpop.f32.mrb[233].mxu0  ;;  %v13513_v43 = vpack.c.bf16 %v6471_v42, %v6470_v36  ;;  %v13480_v11 = vpack.c.bf16 %v6300_v10, %v6299_v2  ;;  %v6301_v63 = vld [vmem:[%s14594_s24 + $0xa0] sm:$0xff]  ;;  %v14100_v36 = vld [vmem:[%s14614_s20 + $0x6c] ss:$16 sps:$4 sm:$0xff]  }
 0xdf4   : > { %v6304_v38 = vld [vmem:[%s14594_s24 + $0xb8] sm:$0xff] }
 0xdf5   : > { %v13447_v56 = vpack.c.bf16 %v6050_v50, %v6049_v51  ;;  %v6044_v12 = vadd.f32 %v11100_v40, %v6030_v44  ;;  %v6302_v51 = vld [vmem:[%s14594_s24 + $0xa8] sm:$0xff]  ;;  %v6303_v44 = vld [vmem:[%s14594_s24 + $0xb0] sm:$0xff] }
 0xdf6   : > { %v6017_v53 = vpop.f32.mrb[234].mxu0  ;;  %v13483_v50 = vpack.c.bf16 %v6302_v51, %v6301_v63  ;;  %v14098_v42 = vld [vmem:[%s14614_s20 + $0x68] ss:$16 sps:$4 sm:$0xff]   ;;  %v14139_v10 = vld [vmem:[%s14614_s20 + $0x20c] ss:$16 sps:$4 sm:$0xff]  }
 0xdf7   : > { %v6031_v62 = vadd.f32 %v6017_v53, %v5769_v58  ;;  %v12730_v13 = vpop.f32.mrb[235].mxu0  ;;  %13448 = vmatpush3.bf16.msra.mxu1 %v13447_v56  ;;  %v6051_v16 = vmax.f32 %v6044_v12, 0.0  ;;  %v13516_v58 = vpack.c.bf16 %v6473_v54, %v6472_v49  ;;  %v13486_v56 = vpack.c.bf16 %v6304_v38, %v6303_v44  ;;  %v6379_v53 = vld [vmem:[%s14594_s24 + $0xc0] sm:$0xff]  ;;  %v6380_v12 = vld [vmem:[%s14594_s24 + $0xc8] sm:$0xff] }
 0xdf8   : > { %13449 = vmatprep.subr.bf16.mxu1 %v17673_v3  ;;  %v6552_v13 = vlaneseq  ;;  %v14101_v49 = vld [vmem:[%s14614_s20 + $0x88] ss:$16 sps:$4 sm:$0xff]   ;;  %v14106_v54 = vld [vmem:[%s14614_s20 + $0xac] ss:$16 sps:$4 sm:$0xff]  }
 0xdf9   : > { %v6045_v9 = vadd.f32 %v11100_v40, %v6031_v62  ;;  %v13489_v62 = vpack.c.bf16 %v6380_v12, %v6379_v53  ;;  %v14134_v2 = vld [vmem:[%s14614_s20 + $0x1e8] ss:$16 sps:$4 sm:$0xff]   ;;  %v14142_v51 = vld [vmem:[%s14614_s20 + $0x22c] ss:$16 sps:$4 sm:$0xff]  }
 0xdfa   : > { %v6022_v14 = vpop.f32.mrb[236].mxu0  ;;  %v14137_v63 = vld [vmem:[%s14614_s20 + $0x208] ss:$16 sps:$4 sm:$0xff]   ;;  %v14148_v44 = vld [vmem:[%s14614_s20 + $0x24c] ss:$16 sps:$4 sm:$0xff]  }
 0xdfb   : > { %v6052_v18 = vmax.f32 %v6045_v9, 0.0  ;;  %v6032_v27 = vadd.f32 %v6022_v14, %v5770_v26  ;;  %v12733_v37 = vpop.f32.mrb[237].mxu0  ;;  %v13519_v26 = vpack.c.bf16 %v6475_v61, %v6474_v41  ;;  %v6381_v14 = vld [vmem:[%s14594_s24 + $0xd0] sm:$0xff]  ;;  %v14109_v41 = vld [vmem:[%s14614_s20 + $0xcc] ss:$16 sps:$4 sm:$0xff]  }
 0xdfc   : > { %v6383_v37 = vld [vmem:[%s14594_s24 + $0xe0] sm:$0xff]  ;;  %v14107_v61 = vld [vmem:[%s14614_s20 + $0xc8] ss:$16 sps:$4 sm:$0xff]  }
 0xdfd   : > { %v13450_v47 = vpack.c.bf16 %v6052_v18, %v6051_v16  ;;  %v6046_v4 = vadd.f32 %v11100_v40, %v6032_v27  ;;  %v6218_v40 = vld [vmem:[%s14594_s24 + $0x58] sm:$0xff]  ;;  %v16346_v27 = vshrl.u32 %v6552_v13, 7 }
 0xdfe   : > { %v13468_v30 = vpack.c.bf16 %v6218_v40, %v6217_v34  ;;  %v6382_v16 = vld [vmem:[%s14594_s24 + $0xd8] sm:$0xff] }
 0xdff   : > { %13451 = vmatpush3.bf16.msra.mxu1 %v13450_v47  ;;  %v6053_v15 = vmax.f32 %v6046_v4, 0.0  ;;  %v13492_v18 = vpack.c.bf16 %v6382_v16, %v6381_v14  ;;  %v6384_v47 = vld [vmem:[%s14594_s24 + $0xe8] sm:$0xff]  ;;  %v16398_v0 = vsub.s32 0, %v16346_v27  ;;  %v6477_v53 = vld [vmem:[%s14604_s6 + $0x78] sm:$0xff] }
 0xe00   : > { %12746 = vmatprep.subr.mxu1 %v17675_v6  ;;  %v13495_v4 = vpack.c.bf16 %v6384_v47, %v6383_v37  ;;  %v14118_v34 = vld [vmem:[%s14614_s20 + $0x12c] ss:$16 sps:$4 sm:$0xff]   ;;  %v14116_v40 = vld [vmem:[%s14614_s20 + $0x128] ss:$16 sps:$4 sm:$0xff]  }
 0xe01   : > { %v14146_v38 = vld [vmem:[%s14614_s20 + $0x248] ss:$16 sps:$4 sm:$0xff]   ;;  %v14160_v14 = vld [vmem:[%s14614_s20 + $0x28c] ss:$16 sps:$4 sm:$0xff]  }
 0xe02   : > { %v14152_v13 = vld [vmem:[%s14614_s20 + $0x268] ss:$16 sps:$4 sm:$0xff]   ;;  %v14172_v47 = vld [vmem:[%s14614_s20 + $0x2cc] ss:$16 sps:$4 sm:$0xff]  }
 0xe03   : > { %12747 = vmatpush3.msk.msra.mxu1 %vm3715_vm5, %v6053_v15  ;;  %v16353_v15 = vsub.s32 1, %v16346_v27  ;;  %v14158_v16 = vld [vmem:[%s14614_s20 + $0x288] ss:$16 sps:$4 sm:$0xff]  }
 0xe04   : > { %12749 = vmatmul.mubr.msk.f32.vlgmr.msra.gmra.mrb[60].mxu1 %vm3693_vm6, %v6054_v25  ;;  %13500 = vmatprep.subr.bf16.mxu1 %v17673_v3  ;;  %v6385_v25 = vld [vmem:[%s14594_s24 + $0xf0] sm:$0xff]  ;;  %v14164_v37 = vld [vmem:[%s14614_s20 + $0x2a8] ss:$16 sps:$4 sm:$0xff]  }
 0xe05   : > { %12859 = vmatprep.mubr.msk.f32.mxu1 %vm14528_vm0, %v17675_v6  ;;  %13502 = vmatpush3.bf16.msra.mxu1 %v13501_v45  ;;  %v13498_v45 = vpack.c.bf16 %v6386_v57, %v6385_v25  ;;  %v6559_v35 = vrot.slane %v16358_v28, %v16353_v15  ;;  %v14178_v25 = vld [vmem:[%s14614_s20 + $0x2ec] ss:$16 sps:$4 sm:$0xff]   ;;  %v14176_v57 = vld [vmem:[%s14614_s20 + $0x2e8] ss:$16 sps:$4 sm:$0xff]  }
 0xe06   : > { %13503 = vmatprep.subr.bf16.mxu1 %v17673_v3 }
 0xe07   : > { %v16365_v19 = vpack.c.bf16 %v6559_v35, %v6559_v35  ;;  %v14182_v35 = vld [vmem:[%s14614_s20 + $0x308] ss:$16 sps:$4 sm:$0xff]  }
 0xe09   : > { %13505 = vmatpush3.bf16.msra.mxu1 %v13504_v17  ;;  %v14089_v17 = vld [vmem:[%s14614_s20 + $0x8] ss:$16 sps:$4 sm:$0xff]  }
 0xe0a   : > { %13506 = vmatprep.subr.bf16.mxu1 %v17673_v3 }
 0xe0d   : > { %13508 = vmatpush3.bf16.msra.mxu1 %v13507_v21  ;;  %v14094_v21 = vld [vmem:[%s14614_s20 + $0x2c] ss:$16 sps:$4 sm:$0xff]  }
 0xe0e   : > { %13509 = vmatprep.subr.bf16.mxu1 %v17673_v3 }
 0xe11   : > { %13511 = vmatpush3.bf16.msra.mxu1 %v13510_v32  ;;  %v14095_v32 = vld [vmem:[%s14614_s20 + $0x48] ss:$16 sps:$4 sm:$0xff]  }
 0xe12   : > { %13512 = vmatprep.subr.bf16.mxu1 %v17673_v3 }
 0xe15   : > { %13514 = vmatpush3.bf16.msra.mxu1 %v13513_v43  ;;  %v14103_v43 = vld [vmem:[%s14614_s20 + $0x8c] ss:$16 sps:$4 sm:$0xff]  }
 0xe16   : > { %13515 = vmatprep.subr.bf16.mxu1 %v17673_v3 }
 0xe19   : > { %13517 = vmatpush3.bf16.msra.mxu1 %v13516_v58  ;;  %v14104_v58 = vld [vmem:[%s14614_s20 + $0xa8] ss:$16 sps:$4 sm:$0xff]  }
 0xe1a   : > { %13518 = vmatprep.subr.bf16.mxu1 %v17673_v3 }
 0xe1d   : > { %13520 = vmatpush3.bf16.msra.mxu1 %v13519_v26  ;;  %v14112_v26 = vld [vmem:[%s14614_s20 + $0xec] ss:$16 sps:$4 sm:$0xff]  }
 0xe1e   : > { %13521 = vmatprep.subr.bf16.mxu1 %v17673_v3 }
 0xed7   : > { %v16307_v5 = vpop.f32.mrb[60].mxu1 }
 0xed8   : > { %12768 = vmatmul.mubr.msk.f32.vlgmr.msra.gmra.mrb[238].mxu0 %vm6140_vm7, %v16307_v5  ;;  %v12750_v52 = vpop.f32.mrb[61].mxu1  ;;  %v6223_v8 = vrot.slane %v16307_v5, 1  ;;  %v6305_v9 = vrot.slane %v16307_v5, 2  ;;  %v6387_v20 = vrot.slane %v16307_v5, 3  ;;  %v14121_v5 = vld [vmem:[%s14614_s20 + $0x14c] ss:$16 sps:$4 sm:$0xff]  }
 0xed9   : > { %13466 = vmatpush3.bf16.msra.mxu0 %v13465_v46  ;;  %12786 = vmatprep.mubr.msk.f32.mxu0 %vm14528_vm0, %v17675_v6  ;;  %v14113_v46 = vld [vmem:[%s14614_s20 + $0x108] ss:$16 sps:$4 sm:$0xff]  }
 0xeda   : > { %13467 = vmatprep.subr.bf16.mxu0 %v17673_v3  ;;  %v14119_v52 = vld [vmem:[%s14614_s20 + $0x148] ss:$16 sps:$4 sm:$0xff]  }
 0xedd   : > { %13469 = vmatpush3.bf16.msra.mxu0 %v13468_v30  ;;  %v14124_v30 = vld [vmem:[%s14614_s20 + $0x16c] ss:$16 sps:$4 sm:$0xff]  }
 0xede   : > { %13470 = vmatprep.subr.bf16.mxu0 %v17673_v3 }
 0xee1   : > { %13472 = vmatpush3.bf16.msra.mxu0 %v13471_v31  ;;  %v14125_v31 = vld [vmem:[%s14614_s20 + $0x188] ss:$16 sps:$4 sm:$0xff]  }
 0xee2   : > { %13473 = vmatprep.subr.bf16.mxu0 %v17673_v3 }
 0xee5   : > { %13475 = vmatpush3.bf16.msra.mxu0 %v13474_v60  ;;  %v14133_v60 = vld [vmem:[%s14614_s20 + $0x1cc] ss:$16 sps:$4 sm:$0xff]  }
 0xee6   : > { %13476 = vmatprep.subr.bf16.mxu0 %v17673_v3 }
 0xee8   : > { %12787 = vmatmul.mubr.msk.f32.vlgmr.msra.gmra.mrb[238].mxu0 %vm6140_vm7, %v6223_v8  ;;  %v6555_v8 = vrot.slane %v16358_v28, %v16398_v0 }
 0xee9   : > { %13478 = vmatpush3.bf16.msra.mxu0 %v13477_v22  ;;  %12805 = vmatprep.mubr.msk.f32.mxu0 %vm14528_vm0, %v17675_v6  ;;  %v14136_v22 = vld [vmem:[%s14614_s20 + $0x1ec] ss:$16 sps:$4 sm:$0xff]  }
 0xeea   : > { %13479 = vmatprep.subr.bf16.mxu0 %v17673_v3 }
 0xeed   : > { %13481 = vmatpush3.bf16.msra.mxu0 %v13480_v11  ;;  %v16406_v11 = vpack.c.bf16 %v6555_v8, %v6555_v8  ;;  %v14268_v8 = vld [vmem:[%s14614_s20 + $0x4cc] ss:$16 sps:$4 sm:$0xff]  }
 0xeee   : > { %13482 = vmatprep.subr.bf16.mxu0 %v17673_v3 }
 0xef1   : > { %13484 = vmatpush3.bf16.msra.mxu0 %v13483_v50  ;;  %v14140_v50 = vld [vmem:[%s14614_s20 + $0x228] ss:$16 sps:$4 sm:$0xff]  }
 0xef2   : > { %13485 = vmatprep.subr.bf16.mxu0 %v17673_v3 }
 0xef5   : > { %13487 = vmatpush3.bf16.msra.mxu0 %v13486_v56  ;;  %v6476_v56 = vld [vmem:[%s14604_s6 + $0x70] sm:$0xff] }
 0xef6   : > { %13488 = vmatprep.subr.bf16.mxu0 %v17673_v3  ;;  %v13522_v12 = vpack.c.bf16 %v6477_v53, %v6476_v56  ;;  %v14292_v56 = vld [vmem:[%s14614_s20 + $0x54c] ss:$16 sps:$4 sm:$0xff]   ;;  %v14290_v53 = vld [vmem:[%s14614_s20 + $0x548] ss:$16 sps:$4 sm:$0xff]  }
 0xef8   : > { %12806 = vmatmul.mubr.msk.f32.vlgmr.msra.gmra.mrb[238].mxu0 %vm6140_vm7, %v6305_v9  ;;  %13523 = vmatpush3.bf16.msra.mxu1 %v13522_v12  ;;  %v14145_v9 = vld [vmem:[%s14614_s20 + $0x4] ss:$16 sps:$4 sm:$0xff]   ;;  %v14298_v12 = vld [vmem:[%s14614_s20 + $0x56c] ss:$16 sps:$4 sm:$0xff]  }
 0xef9   : > { %13490 = vmatpush3.bf16.msra.mxu0 %v13489_v62  ;;  %12824 = vmatprep.mubr.msk.f32.mxu0 %vm14528_vm0, %v17675_v6  ;;  %v14154_v62 = vld [vmem:[%s14614_s20 + $0x26c] ss:$16 sps:$4 sm:$0xff]  }
 0xefa   : > { %13491 = vmatprep.subr.bf16.mxu0 %v17673_v3  ;;  %7795 = vmatprep.subr.bf16.mxu1 %v14145_v9  ;;  %v14302_v9 = vld [vmem:[%s14614_s20 + $0x588] ss:$16 sps:$4 sm:$0xff]  }
 0xefd   : > { %13493 = vmatpush3.bf16.msra.mxu0 %v13492_v18  ;;  %v14166_v18 = vld [vmem:[%s14614_s20 + $0x2ac] ss:$16 sps:$4 sm:$0xff]  }
 0xefe   : > { %13494 = vmatprep.subr.bf16.mxu0 %v17673_v3 }
 0xf01   : > { %13496 = vmatpush3.bf16.msra.mxu0 %v13495_v4  ;;  %v14170_v4 = vld [vmem:[%s14614_s20 + $0x2c8] ss:$16 sps:$4 sm:$0xff]  }
 0xf02   : > { %13497 = vmatprep.subr.bf16.mxu0 %v17673_v3 }
 0xf05   : > { %13499 = vmatpush3.bf16.msra.mxu0 %v13498_v45  ;;  %v14184_v45 = vld [vmem:[%s14614_s20 + $0x30c] ss:$16 sps:$4 sm:$0xff]  }
 0xf06   : > { %7959 = vmatprep.subr.bf16.mxu0 %v14091_v29  ;;  %v14190_v29 = vld [vmem:[%s14614_s20 + $0x32c] ss:$16 sps:$4 sm:$0xff]  }
 0xf08   : > { %12825 = vmatmul.mubr.msk.f32.vlgmr.msra.gmra.mrb[238].mxu0 %vm6140_vm7, %v6387_v20  ;;  %v14196_v20 = vld [vmem:[%s14614_s20 + $0x34c] ss:$16 sps:$4 sm:$0xff]  }
 0xf09   : > { %7960 = vmatpush1.bf16.msra.mxu0 %v14089_v17  ;;  %7991 = vmatprep.mubr.bf16.mxu0 %v16365_v19  ;;  %v14188_v17 = vld [vmem:[%s14614_s20 + $0x328] ss:$16 sps:$4 sm:$0xff]  }
 0xf0a   : > { %7961 = vmatprep.subr.bf16.mxu0 %v14094_v21  ;;  %v14194_v21 = vld [vmem:[%s14614_s20 + $0x348] ss:$16 sps:$4 sm:$0xff]  }
 0xf0d   : > { %7962 = vmatpush1.bf16.msra.mxu0 %v14092_v23  ;;  %v14202_v23 = vld [vmem:[%s14614_s20 + $0x36c] ss:$16 sps:$4 sm:$0xff]  }
 0xf0e   : > { %7963 = vmatprep.subr.bf16.mxu0 %v14097_v24  ;;  %v14200_v24 = vld [vmem:[%s14614_s20 + $0x368] ss:$16 sps:$4 sm:$0xff]  }
 0xf11   : > { %7964 = vmatpush1.bf16.msra.mxu0 %v14095_v32  ;;  %v14208_v32 = vld [vmem:[%s14614_s20 + $0x38c] ss:$16 sps:$4 sm:$0xff]  }
 0xf12   : > { %7965 = vmatprep.subr.bf16.mxu0 %v14100_v36  ;;  %v14206_v36 = vld [vmem:[%s14614_s20 + $0x388] ss:$16 sps:$4 sm:$0xff]  }
 0xf15   : > { %7966 = vmatpush1.bf16.msra.mxu0 %v14098_v42  ;;  %v14214_v42 = vld [vmem:[%s14614_s20 + $0x3ac] ss:$16 sps:$4 sm:$0xff]  }
 0xf16   : > { %7967 = vmatprep.subr.bf16.mxu0 %v14103_v43  ;;  %v14212_v43 = vld [vmem:[%s14614_s20 + $0x3a8] ss:$16 sps:$4 sm:$0xff]  }
 0xf19   : > { %7968 = vmatpush1.bf16.msra.mxu0 %v14101_v49  ;;  %v14220_v49 = vld [vmem:[%s14614_s20 + $0x3cc] ss:$16 sps:$4 sm:$0xff]  }
 0xf1a   : > { %7969 = vmatprep.subr.bf16.mxu0 %v14106_v54  ;;  %v14218_v54 = vld [vmem:[%s14614_s20 + $0x3c8] ss:$16 sps:$4 sm:$0xff]  }
 0xf1d   : > { %7970 = vmatpush1.bf16.msra.mxu0 %v14104_v58  ;;  %v14226_v58 = vld [vmem:[%s14614_s20 + $0x3ec] ss:$16 sps:$4 sm:$0xff]  }
 0xf1e   : > { %7971 = vmatprep.subr.bf16.mxu0 %v14109_v41  ;;  %v6566_v41 = vsub.s32 3, %v16346_v27 }
 0xf21   : > { %7972 = vmatpush1.bf16.msra.mxu0 %v14107_v61  ;;  %v14224_v61 = vld [vmem:[%s14614_s20 + $0x3e8] ss:$16 sps:$4 sm:$0xff]  }
 0xf22   : > { %7973 = vmatprep.subr.bf16.mxu0 %v14112_v26  ;;  %v6562_v26 = vsub.s32 2, %v16346_v27 }
 0xf25   : > { %7974 = vmatpush1.bf16.msra.mxu0 %v14110_v1  ;;  %v6567_v1 = vrot.slane %v16358_v28, %v6566_v41 }
 0xf26   : > { %7975 = vmatprep.subr.bf16.mxu0 %v14115_v55  ;;  %v6563_v55 = vrot.slane %v16358_v28, %v6562_v26 }
 0xf29   : > { %7976 = vmatpush1.bf16.msra.mxu0 %v14113_v46  ;;  %v16451_v46 = vpack.c.bf16 %v6567_v1, %v6567_v1  ;;  %v14151_v1 = vld [vmem:[%s14614_s20 + $0x24] ss:$16 sps:$4 sm:$0xff]  }
 0xf2a   : > { %7977 = vmatprep.subr.bf16.mxu0 %v14118_v34  ;;  %v14232_v34 = vld [vmem:[%s14614_s20 + $0x40c] ss:$16 sps:$4 sm:$0xff]  }
 0xf2d   : > { %7978 = vmatpush1.bf16.msra.mxu0 %v14116_v40  ;;  %v14230_v40 = vld [vmem:[%s14614_s20 + $0x408] ss:$16 sps:$4 sm:$0xff]  }
 0xf2e   : > { %7979 = vmatprep.subr.bf16.mxu0 %v14121_v5  ;;  %v16455_v5 = vpack.c.bf16 %v6563_v55, %v6563_v55  ;;  %v14157_v55 = vld [vmem:[%s14614_s20 + $0x44] ss:$16 sps:$4 sm:$0xff]  }
 0xf31   : > { %7980 = vmatpush1.bf16.msra.mxu0 %v14119_v52  ;;  %v14238_v52 = vld [vmem:[%s14614_s20 + $0x42c] ss:$16 sps:$4 sm:$0xff]  }
 0xf32   : > { %7981 = vmatprep.subr.bf16.mxu0 %v14124_v30  ;;  %v14236_v30 = vld [vmem:[%s14614_s20 + $0x428] ss:$16 sps:$4 sm:$0xff]  }
 0xf35   : > { %7982 = vmatpush1.bf16.msra.mxu0 %v14122_v7  ;;  %v14244_v7 = vld [vmem:[%s14614_s20 + $0x44c] ss:$16 sps:$4 sm:$0xff]  }
 0xf36   : > { %7983 = vmatprep.subr.bf16.mxu0 %v14127_v59  ;;  %v14242_v59 = vld [vmem:[%s14614_s20 + $0x448] ss:$16 sps:$4 sm:$0xff]  }
 0xf39   : > { %7984 = vmatpush1.bf16.msra.mxu0 %v14125_v31  ;;  %v14250_v31 = vld [vmem:[%s14614_s20 + $0x46c] ss:$16 sps:$4 sm:$0xff]  }
 0xf3a   : > { %7985 = vmatprep.subr.bf16.mxu0 %v14130_v33  ;;  %v14248_v33 = vld [vmem:[%s14614_s20 + $0x468] ss:$16 sps:$4 sm:$0xff]  }
 0xf3d   : > { %7986 = vmatpush1.bf16.msra.mxu0 %v14128_v39  ;;  %v14256_v39 = vld [vmem:[%s14614_s20 + $0x48c] ss:$16 sps:$4 sm:$0xff]  }
 0xf3e   : > { %7987 = vmatprep.subr.bf16.mxu0 %v14133_v60  ;;  %v14254_v60 = vld [vmem:[%s14614_s20 + $0x488] ss:$16 sps:$4 sm:$0xff]  }
 0xf41   : > { %7988 = vmatpush1.bf16.msra.mxu0 %v14131_v48  ;;  %v14262_v48 = vld [vmem:[%s14614_s20 + $0x4ac] ss:$16 sps:$4 sm:$0xff]  }
 0xf42   : > { %7989 = vmatprep.subr.bf16.mxu0 %v14136_v22  ;;  %v14260_v22 = vld [vmem:[%s14614_s20 + $0x4a8] ss:$16 sps:$4 sm:$0xff]  }
 0xf45   : > { %7990 = vmatpush1.bf16.msra.mxu0 %v14134_v2  ;;  %v14266_v2 = vld [vmem:[%s14614_s20 + $0x4c8] ss:$16 sps:$4 sm:$0xff]  }
 0xf46   : > { %8000 = vmatprep.subr.bf16.mxu0 %v14139_v10  ;;  %v14274_v10 = vld [vmem:[%s14614_s20 + $0x4ec] ss:$16 sps:$4 sm:$0xff]  }
 0xf48   : > { %7992 = vmatmul.mubr.bf16.vlgmr.msra.gmra.mrb[240].mxu0 %v16406_v11 }
 0xf49   : > { %8001 = vmatpush1.bf16.msra.mxu0 %v14137_v63  ;;  %8032 = vmatprep.mubr.bf16.mxu0 %v16451_v46  ;;  %v14272_v63 = vld [vmem:[%s14614_s20 + $0x4e8] ss:$16 sps:$4 sm:$0xff]  }
 0xf4a   : > { %8002 = vmatprep.subr.bf16.mxu0 %v14142_v51  ;;  %v14280_v51 = vld [vmem:[%s14614_s20 + $0x50c] ss:$16 sps:$4 sm:$0xff]  }
 0xf4d   : > { %8003 = vmatpush1.bf16.msra.mxu0 %v14140_v50  ;;  %v14278_v50 = vld [vmem:[%s14614_s20 + $0x508] ss:$16 sps:$4 sm:$0xff]  }
 0xf4e   : > { %8004 = vmatprep.subr.bf16.mxu0 %v14148_v44  ;;  %v14286_v44 = vld [vmem:[%s14614_s20 + $0x52c] ss:$16 sps:$4 sm:$0xff]  }
 0xf51   : > { %8005 = vmatpush1.bf16.msra.mxu0 %v14146_v38  ;;  %v14284_v38 = vld [vmem:[%s14614_s20 + $0x528] ss:$16 sps:$4 sm:$0xff]  }
 0xf52   : > { %8006 = vmatprep.subr.bf16.mxu0 %v14154_v62  ;;  %v14296_v62 = vld [vmem:[%s14614_s20 + $0x568] ss:$16 sps:$4 sm:$0xff]  }
 0xf55   : > { %8007 = vmatpush1.bf16.msra.mxu0 %v14152_v13  ;;  %v14304_v13 = vld [vmem:[%s14614_s20 + $0x58c] ss:$16 sps:$4 sm:$0xff]  }
 0xf56   : > { %8008 = vmatprep.subr.bf16.mxu0 %v14160_v14  ;;  %v14310_v14 = vld [vmem:[%s14614_s20 + $0x5ac] ss:$16 sps:$4 sm:$0xff]  }
 0xf59   : > { %8009 = vmatpush1.bf16.msra.mxu0 %v14158_v16  ;;  %v14308_v16 = vld [vmem:[%s14614_s20 + $0x5a8] ss:$16 sps:$4 sm:$0xff]  }
 0xf5a   : > { %8010 = vmatprep.subr.bf16.mxu0 %v14166_v18  ;;  %v14316_v18 = vld [vmem:[%s14614_s20 + $0x5cc] ss:$16 sps:$4 sm:$0xff]  }
 0xf5d   : > { %8011 = vmatpush1.bf16.msra.mxu0 %v14164_v37  ;;  %v14314_v37 = vld [vmem:[%s14614_s20 + $0x5c8] ss:$16 sps:$4 sm:$0xff]  }
 0xf5e   : > { %8012 = vmatprep.subr.bf16.mxu0 %v14172_v47  ;;  %v6574_v47 = vsub.s32 5, %v16346_v27 }
 0xf61   : > { %8013 = vmatpush1.bf16.msra.mxu0 %v14170_v4  ;;  %v14322_v4 = vld [vmem:[%s14614_s20 + $0x5ec] ss:$16 sps:$4 sm:$0xff]  }
 0xf62   : > { %8014 = vmatprep.subr.bf16.mxu0 %v14178_v25  ;;  %v6570_v25 = vsub.s32 4, %v16346_v27 }
 0xf65   : > { %8015 = vmatpush1.bf16.msra.mxu0 %v14176_v57  ;;  %v14320_v57 = vld [vmem:[%s14614_s20 + $0x5e8] ss:$16 sps:$4 sm:$0xff]  }
 0xf66   : > { %8016 = vmatprep.subr.bf16.mxu0 %v14184_v45  ;;  %v6575_v45 = vrot.slane %v16358_v28, %v6574_v47  ;;  %v14253_v47 = vld [vmem:[%s14614_s20 + $0x244] ss:$16 sps:$4 sm:$0xff]  }
 0xf69   : > { %8017 = vmatpush1.bf16.msra.mxu0 %v14182_v35  ;;  %v6571_v35 = vrot.slane %v16358_v28, %v6570_v25  ;;  %v14259_v25 = vld [vmem:[%s14614_s20 + $0x264] ss:$16 sps:$4 sm:$0xff]  }
 0xf6a   : > { %8018 = vmatprep.subr.bf16.mxu0 %v14190_v29  ;;  %v16493_v29 = vpack.c.bf16 %v6575_v45, %v6575_v45  ;;  %v14263_v45 = vld [vmem:[%s14614_s20 + $0x280] ss:$16 sps:$4 sm:$0xff]  }
 0xf6d   : > { %8019 = vmatpush1.bf16.msra.mxu0 %v14188_v17  ;;  %v16495_v17 = vpack.c.bf16 %v6571_v35, %v6571_v35  ;;  %v14269_v35 = vld [vmem:[%s14614_s20 + $0x2a0] ss:$16 sps:$4 sm:$0xff]  }
 0xf6e   : > { %8020 = vmatprep.subr.bf16.mxu0 %v14196_v20  ;;  %v14334_v20 = vld [vmem:[%s14614_s20 + $0x60c] ss:$16 sps:$4 sm:$0xff]  }
 0xf71   : > { %8021 = vmatpush1.bf16.msra.mxu0 %v14194_v21  ;;  %v6578_v21 = vsub.s32 6, %v16346_v27 }
 0xf72   : > { %8022 = vmatprep.subr.bf16.mxu0 %v14202_v23  ;;  %v14332_v23 = vld [vmem:[%s14614_s20 + $0x608] ss:$16 sps:$4 sm:$0xff]  }
 0xf75   : > { %8023 = vmatpush1.bf16.msra.mxu0 %v14200_v24  ;;  %v6131_v24 = vld [vmem:[%s17876_s26] sm:$0x1]  ;;  %s18187_s26 = sld [smem:[#allocation14_spill]] }
 0xf76   : > { %8024 = vmatprep.subr.bf16.mxu0 %v14208_v32  ;;  %v6579_v32 = vrot.slane %v16358_v28, %v6578_v21  ;;  %v14149_v28 = vld [vmem:[%s14614_s20 + $0x20] ss:$16 sps:$4 sm:$0xff]  }
 0xf77   : > { %v14275_v21 = vld [vmem:[%s14614_s20 + $0x2c0] ss:$16 sps:$4 sm:$0xff]  }
 0xf79   : > { %8025 = vmatpush1.bf16.msra.mxu0 %v14206_v36 }
 0xf7a   : > { %8026 = vmatprep.subr.bf16.mxu0 %v14214_v42  ;;  %v16504_v42 = vpack.c.bf16 %v6579_v32, %v6579_v32  ;;  %v14289_v32 = vld [vmem:[%s14614_s20 + $0x304] ss:$16 sps:$4 sm:$0xff]  }
 0xf7d   : > { %8027 = vmatpush1.bf16.msra.mxu0 %v14212_v43 }
 0xf7e   : > { %8028 = vmatprep.subr.bf16.mxu0 %v14220_v49 }
 0xf81   : > { %8029 = vmatpush1.bf16.msra.mxu0 %v14218_v54  ;;  %v14530_v54 = vmov 0  }
 0xf82   : > { %8030 = vmatprep.subr.bf16.mxu0 %v14226_v58  ;;  %v14143_v58 = vld [vmem:[%s14614_s20] ss:$16 sps:$4 sm:$0xff]  }
 0xf85   : > { %8031 = vmatpush1.bf16.msra.mxu0 %v14224_v61 }
 0xf86   : > { %8041 = vmatprep.subr.bf16.mxu0 %v14232_v34  ;;  %v14155_v34 = vld [vmem:[%s14614_s20 + $0x40] ss:$16 sps:$4 sm:$0xff]  }
 0xf88   : > { %8033 = vmatmul.mubr.bf16.vlgmr.msra.gmra.mrb[240].mxu0 %v16455_v5 }
 0xf89   : > { %8042 = vmatpush1.bf16.msra.mxu0 %v14230_v40  ;;  %8073 = vmatprep.mubr.bf16.mxu0 %v16493_v29  ;;  %v14163_v40 = vld [vmem:[%s14614_s20 + $0x64] ss:$16 sps:$4 sm:$0xff]  }
 0xf8a   : > { %8043 = vmatprep.subr.bf16.mxu0 %v14238_v52  ;;  %v14161_v52 = vld [vmem:[%s14614_s20 + $0x60] ss:$16 sps:$4 sm:$0xff]  }
 0xf8d   : > { %8044 = vmatpush1.bf16.msra.mxu0 %v14236_v30  ;;  %v14169_v30 = vld [vmem:[%s14614_s20 + $0x84] ss:$16 sps:$4 sm:$0xff]  }
 0xf8e   : > { %8045 = vmatprep.subr.bf16.mxu0 %v14244_v7  ;;  %v14167_v7 = vld [vmem:[%s14614_s20 + $0x80] ss:$16 sps:$4 sm:$0xff]  }
 0xf91   : > { %8046 = vmatpush1.bf16.msra.mxu0 %v14242_v59  ;;  %v14173_v59 = vld [vmem:[%s14614_s20 + $0xa0] ss:$16 sps:$4 sm:$0xff]  }
 0xf92   : > { %8047 = vmatprep.subr.bf16.mxu0 %v14250_v31  ;;  %v14181_v31 = vld [vmem:[%s14614_s20 + $0xc4] ss:$16 sps:$4 sm:$0xff]  }
 0xf95   : > { %8048 = vmatpush1.bf16.msra.mxu0 %v14248_v33  ;;  %v14179_v33 = vld [vmem:[%s14614_s20 + $0xc0] ss:$16 sps:$4 sm:$0xff]  }
 0xf96   : > { %8049 = vmatprep.subr.bf16.mxu0 %v14256_v39  ;;  %v14187_v39 = vld [vmem:[%s14614_s20 + $0xe4] ss:$16 sps:$4 sm:$0xff]  }
 0xf99   : > { %8050 = vmatpush1.bf16.msra.mxu0 %v14254_v60  ;;  %v14185_v60 = vld [vmem:[%s14614_s20 + $0xe0] ss:$16 sps:$4 sm:$0xff]  }
 0xf9a   : > { %8051 = vmatprep.subr.bf16.mxu0 %v14262_v48  ;;  %v14193_v48 = vld [vmem:[%s14614_s20 + $0x104] ss:$16 sps:$4 sm:$0xff]  }
 0xf9d   : > { %8052 = vmatpush1.bf16.msra.mxu0 %v14260_v22  ;;  %v14191_v22 = vld [vmem:[%s14614_s20 + $0x100] ss:$16 sps:$4 sm:$0xff]  }
 0xf9e   : > { %8053 = vmatprep.subr.bf16.mxu0 %v14268_v8  ;;  %v14199_v8 = vld [vmem:[%s14614_s20 + $0x124] ss:$16 sps:$4 sm:$0xff]  }
 0xfa1   : > { %8054 = vmatpush1.bf16.msra.mxu0 %v14266_v2  ;;  %v14197_v2 = vld [vmem:[%s14614_s20 + $0x120] ss:$16 sps:$4 sm:$0xff]  }
 0xfa2   : > { %8055 = vmatprep.subr.bf16.mxu0 %v14274_v10  ;;  %v14205_v10 = vld [vmem:[%s14614_s20 + $0x144] ss:$16 sps:$4 sm:$0xff]  }
 0xfa5   : > { %8056 = vmatpush1.bf16.msra.mxu0 %v14272_v63  ;;  %v14203_v63 = vld [vmem:[%s14614_s20 + $0x140] ss:$16 sps:$4 sm:$0xff]  }
 0xfa6   : > { %8057 = vmatprep.subr.bf16.mxu0 %v14280_v51  ;;  %v14211_v51 = vld [vmem:[%s14614_s20 + $0x164] ss:$16 sps:$4 sm:$0xff]  }
 0xfa9   : > { %8058 = vmatpush1.bf16.msra.mxu0 %v14278_v50  ;;  %v14209_v50 = vld [vmem:[%s14614_s20 + $0x160] ss:$16 sps:$4 sm:$0xff]  }
 0xfaa   : > { %8059 = vmatprep.subr.bf16.mxu0 %v14286_v44  ;;  %v14217_v44 = vld [vmem:[%s14614_s20 + $0x184] ss:$16 sps:$4 sm:$0xff]  }
 0xfad   : > { %8060 = vmatpush1.bf16.msra.mxu0 %v14284_v38  ;;  %v14215_v38 = vld [vmem:[%s14614_s20 + $0x180] ss:$16 sps:$4 sm:$0xff]  }
 0xfae   : > { %8061 = vmatprep.subr.bf16.mxu0 %v14292_v56  ;;  %v14223_v56 = vld [vmem:[%s14614_s20 + $0x1a4] ss:$16 sps:$4 sm:$0xff]  }
 0xfb1   : > { %8062 = vmatpush1.bf16.msra.mxu0 %v14290_v53  ;;  %v14221_v53 = vld [vmem:[%s14614_s20 + $0x1a0] ss:$16 sps:$4 sm:$0xff]  }
 0xfb2   : > { %8063 = vmatprep.subr.bf16.mxu0 %v14298_v12  ;;  %v14229_v12 = vld [vmem:[%s14614_s20 + $0x1c4] ss:$16 sps:$4 sm:$0xff]  }
 0xfb5   : > { %8064 = vmatpush1.bf16.msra.mxu0 %v14296_v62  ;;  %v14227_v62 = vld [vmem:[%s14614_s20 + $0x1c0] ss:$16 sps:$4 sm:$0xff]  }
 0xfb6   : > { %8065 = vmatprep.subr.bf16.mxu0 %v14304_v13  ;;  %v14235_v13 = vld [vmem:[%s14614_s20 + $0x1e4] ss:$16 sps:$4 sm:$0xff]  }
 0xfb9   : > { %8066 = vmatpush1.bf16.msra.mxu0 %v14302_v9  ;;  %v14233_v9 = vld [vmem:[%s14614_s20 + $0x1e0] ss:$16 sps:$4 sm:$0xff]  }
 0xfba   : > { %8067 = vmatprep.subr.bf16.mxu0 %v14310_v14  ;;  %v14241_v14 = vld [vmem:[%s14614_s20 + $0x204] ss:$16 sps:$4 sm:$0xff]  }
 0xfbd   : > { %8068 = vmatpush1.bf16.msra.mxu0 %v14308_v16  ;;  %v14239_v16 = vld [vmem:[%s14614_s20 + $0x200] ss:$16 sps:$4 sm:$0xff]  }
 0xfbe   : > { %8069 = vmatprep.subr.bf16.mxu0 %v14316_v18  ;;  %v14247_v18 = vld [vmem:[%s14614_s20 + $0x224] ss:$16 sps:$4 sm:$0xff]  }
 0xfc1   : > { %8070 = vmatpush1.bf16.msra.mxu0 %v14314_v37  ;;  %v14245_v37 = vld [vmem:[%s14614_s20 + $0x220] ss:$16 sps:$4 sm:$0xff]  }
 0xfc2   : > { %8071 = vmatprep.subr.bf16.mxu0 %v14322_v4  ;;  %v14251_v4 = vld [vmem:[%s14614_s20 + $0x240] ss:$16 sps:$4 sm:$0xff]  }
 0xfc5   : > { %8072 = vmatpush1.bf16.msra.mxu0 %v14320_v57  ;;  %v14257_v57 = vld [vmem:[%s14614_s20 + $0x260] ss:$16 sps:$4 sm:$0xff]  }
 0xfc6   : > { %8082 = vmatprep.subr.bf16.mxu0 %v14334_v20  ;;  %v14277_v20 = vld [vmem:[%s14614_s20 + $0x2c4] ss:$16 sps:$4 sm:$0xff]  }
 0xfc8   : > { %8074 = vmatmul.mubr.bf16.vlgmr.msra.gmra.mrb[240].mxu0 %v16495_v17 }
 0xfc9   : > { %8083 = vmatpush1.bf16.msra.mxu0 %v14332_v23  ;;  %8114 = vmatprep.mubr.bf16.mxu0 %v14530_v54  ;;  %v14283_v23 = vld [vmem:[%s14614_s20 + $0x2e4] ss:$16 sps:$4 sm:$0xff]  }
 0xfd4   : > { %11304 = vmatmul.mubr.msk.bf16.vlgmr.msra.gmra.mrb[240].mxu0 %vm1553_vm4, %v16504_v42 }
 0xfdb   : > { %v6456_v36 = vpop.f32.mrb[238].mxu0 }
 0xfdc   : > { %v13994_v43 = vadd.f32 %v6456_v36, %v6131_v24  ;;  %v12826_v49 = vpop.f32.mrb[239].mxu0  ;;  %v14281_v24 = vld [vmem:[%s14614_s20 + $0x2e0] ss:$16 sps:$4 sm:$0xff]  }
 0xfdd   : > { %v14287_v36 = vld [vmem:[%s14614_s20 + $0x300] ss:$16 sps:$4 sm:$0xff]  }
 0xfde   : > { %v6461_v61 = vmax.f32 %v13994_v43, 0.0  ;;  %v14295_v43 = vld [vmem:[%s14614_s20 + $0x324] ss:$16 sps:$4 sm:$0xff]   ;;  %v14293_v49 = vld [vmem:[%s14614_s20 + $0x320] ss:$16 sps:$4 sm:$0xff]  }
 0xfe0   : > { %12860 = vmatmul.mubr.f32.vlgmr.msra.gmra.mrb[62].mxu1 %v6461_v61  ;;  %v14299_v61 = vld [vmem:[%s14614_s20 + $0x340] ss:$16 sps:$4 sm:$0xff]  }
 0xfe1   : > { %7796 = vmatpush1.bf16.msra.mxu1 %v14143_v58  ;;  %7827 = vmatprep.mubr.bf16.mxu1 %v16365_v19  ;;  %v14175_v19 = vld [vmem:[%s14614_s20 + $0xa4] ss:$16 sps:$4 sm:$0xff]  }
 0xfe2   : > { %7797 = vmatprep.subr.bf16.mxu1 %v14151_v1  ;;  %v14301_v58 = vld [vmem:[%s14614_s20 + $0x344] ss:$16 sps:$4 sm:$0xff]  }
 0xfe3   : > { %v14307_v1 = vld [vmem:[%s14614_s20 + $0x364] ss:$16 sps:$4 sm:$0xff]  }
 0xfe5   : > { %7798 = vmatpush1.bf16.msra.mxu1 %v14149_v28  ;;  %v14305_v28 = vld [vmem:[%s14614_s20 + $0x360] ss:$16 sps:$4 sm:$0xff]  }
 0xfe6   : > { %7799 = vmatprep.subr.bf16.mxu1 %v14157_v55  ;;  %v14313_v55 = vld [vmem:[%s14614_s20 + $0x384] ss:$16 sps:$4 sm:$0xff]  }
 0xfe9   : > { %7800 = vmatpush1.bf16.msra.mxu1 %v14155_v34  ;;  %v14311_v34 = vld [vmem:[%s14614_s20 + $0x380] ss:$16 sps:$4 sm:$0xff]  }
 0xfea   : > { %7801 = vmatprep.subr.bf16.mxu1 %v14163_v40  ;;  %v14319_v40 = vld [vmem:[%s14614_s20 + $0x3a4] ss:$16 sps:$4 sm:$0xff]  }
 0xfed   : > { %7802 = vmatpush1.bf16.msra.mxu1 %v14161_v52  ;;  %v14317_v52 = vld [vmem:[%s14614_s20 + $0x3a0] ss:$16 sps:$4 sm:$0xff]  }
 0xfee   : > { %7803 = vmatprep.subr.bf16.mxu1 %v14169_v30  ;;  %v14325_v30 = vld [vmem:[%s14614_s20 + $0x3c4] ss:$16 sps:$4 sm:$0xff]  }
 0xff1   : > { %7804 = vmatpush1.bf16.msra.mxu1 %v14167_v7  ;;  %v14323_v7 = vld [vmem:[%s14614_s20 + $0x3c0] ss:$16 sps:$4 sm:$0xff]  }
 0xff2   : > { %7805 = vmatprep.subr.bf16.mxu1 %v14175_v19  ;;  %v14328_v19 = vld [vmem:[%s14614_s20 + $0x3e4] ss:$16 sps:$4 sm:$0xff]  }
 0xff5   : > { %7806 = vmatpush1.bf16.msra.mxu1 %v14173_v59  ;;  %v14326_v59 = vld [vmem:[%s14614_s20 + $0x3e0] ss:$16 sps:$4 sm:$0xff]  }
 0xff6   : > { %7807 = vmatprep.subr.bf16.mxu1 %v14181_v31  ;;  %v14331_v31 = vld [vmem:[%s14614_s20 + $0x404] ss:$16 sps:$4 sm:$0xff]  }
 0xff9   : > { %7808 = vmatpush1.bf16.msra.mxu1 %v14179_v33  ;;  %v14329_v33 = vld [vmem:[%s14614_s20 + $0x400] ss:$16 sps:$4 sm:$0xff]  }
 0xffa   : > { %7809 = vmatprep.subr.bf16.mxu1 %v14187_v39  ;;  %v14337_v39 = vld [vmem:[%s14614_s20 + $0x424] ss:$16 sps:$4 sm:$0xff]  }
 0xffd   : > { %7810 = vmatpush1.bf16.msra.mxu1 %v14185_v60  ;;  %v14335_v60 = vld [vmem:[%s14614_s20 + $0x420] ss:$16 sps:$4 sm:$0xff]  }
 0xffe   : > { %7811 = vmatprep.subr.bf16.mxu1 %v14193_v48  ;;  %v14340_v48 = vld [vmem:[%s14614_s20 + $0x444] ss:$16 sps:$4 sm:$0xff]  }
0x1001   : > { %7812 = vmatpush1.bf16.msra.mxu1 %v14191_v22  ;;  %v14338_v22 = vld [vmem:[%s14614_s20 + $0x440] ss:$16 sps:$4 sm:$0xff]  }
0x1002   : > { %7813 = vmatprep.subr.bf16.mxu1 %v14199_v8  ;;  %v14343_v8 = vld [vmem:[%s14614_s20 + $0x464] ss:$16 sps:$4 sm:$0xff]  }
0x1005   : > { %7814 = vmatpush1.bf16.msra.mxu1 %v14197_v2  ;;  %v14341_v2 = vld [vmem:[%s14614_s20 + $0x460] ss:$16 sps:$4 sm:$0xff]  }
0x1006   : > { %7815 = vmatprep.subr.bf16.mxu1 %v14205_v10  ;;  %v14344_v10 = vld [vmem:[%s14614_s20 + $0x480] ss:$16 sps:$4 sm:$0xff]  }
0x1009   : > { %7816 = vmatpush1.bf16.msra.mxu1 %v14203_v63  ;;  %v14347_v63 = vld [vmem:[%s14614_s20 + $0x4a0] ss:$16 sps:$4 sm:$0xff]  }
0x100a   : > { %7817 = vmatprep.subr.bf16.mxu1 %v14211_v51  ;;  %v14352_v51 = vld [vmem:[%s14614_s20 + $0x4c4] ss:$16 sps:$4 sm:$0xff]  }
0x100d   : > { %7818 = vmatpush1.bf16.msra.mxu1 %v14209_v50  ;;  %v14350_v50 = vld [vmem:[%s14614_s20 + $0x4c0] ss:$16 sps:$4 sm:$0xff]  }
0x100e   : > { %7819 = vmatprep.subr.bf16.mxu1 %v14217_v44  ;;  %v14355_v44 = vld [vmem:[%s14614_s20 + $0x4e4] ss:$16 sps:$4 sm:$0xff]  }
0x1011   : > { %7820 = vmatpush1.bf16.msra.mxu1 %v14215_v38  ;;  %v14353_v38 = vld [vmem:[%s14614_s20 + $0x4e0] ss:$16 sps:$4 sm:$0xff]  }
0x1012   : > { %7821 = vmatprep.subr.bf16.mxu1 %v14223_v56  ;;  %v14358_v56 = vld [vmem:[%s14614_s20 + $0x504] ss:$16 sps:$4 sm:$0xff]  }
0x1015   : > { %7822 = vmatpush1.bf16.msra.mxu1 %v14221_v53  ;;  %v14356_v53 = vld [vmem:[%s14614_s20 + $0x500] ss:$16 sps:$4 sm:$0xff]  }
0x1016   : > { %7823 = vmatprep.subr.bf16.mxu1 %v14229_v12  ;;  %v14361_v12 = vld [vmem:[%s14614_s20 + $0x524] ss:$16 sps:$4 sm:$0xff]  }
0x1019   : > { %7824 = vmatpush1.bf16.msra.mxu1 %v14227_v62  ;;  %v14359_v62 = vld [vmem:[%s14614_s20 + $0x520] ss:$16 sps:$4 sm:$0xff]  }
0x101a   : > { %7825 = vmatprep.subr.bf16.mxu1 %v14235_v13  ;;  %v14364_v13 = vld [vmem:[%s14614_s20 + $0x544] ss:$16 sps:$4 sm:$0xff]  }
0x101d   : > { %7826 = vmatpush1.bf16.msra.mxu1 %v14233_v9  ;;  %v14362_v9 = vld [vmem:[%s14614_s20 + $0x540] ss:$16 sps:$4 sm:$0xff]  }
0x101e   : > { %7836 = vmatprep.subr.bf16.mxu1 %v14241_v14  ;;  %v14367_v14 = vld [vmem:[%s14614_s20 + $0x564] ss:$16 sps:$4 sm:$0xff]  }
0x1020   : > { %7828 = vmatmul.mubr.bf16.vlgmr.msra.gmra.mrb[64].mxu1 %v16406_v11  ;;  %v14265_v11 = vld [vmem:[%s14614_s20 + $0x284] ss:$16 sps:$4 sm:$0xff]  }
0x1021   : > { %7837 = vmatpush1.bf16.msra.mxu1 %v14239_v16  ;;  %7868 = vmatprep.mubr.bf16.mxu1 %v16451_v46  ;;  %v14271_v46 = vld [vmem:[%s14614_s20 + $0x2a4] ss:$16 sps:$4 sm:$0xff]   ;;  %v14365_v16 = vld [vmem:[%s14614_s20 + $0x560] ss:$16 sps:$4 sm:$0xff]  }
0x1022   : > { %7838 = vmatprep.subr.bf16.mxu1 %v14247_v18  ;;  %v14370_v18 = vld [vmem:[%s14614_s20 + $0x584] ss:$16 sps:$4 sm:$0xff]  }
0x1025   : > { %7839 = vmatpush1.bf16.msra.mxu1 %v14245_v37  ;;  %v14368_v37 = vld [vmem:[%s14614_s20 + $0x580] ss:$16 sps:$4 sm:$0xff]  }
0x1026   : > { %7840 = vmatprep.subr.bf16.mxu1 %v14253_v47  ;;  %v14373_v47 = vld [vmem:[%s14614_s20 + $0x5a4] ss:$16 sps:$4 sm:$0xff]  }
0x1029   : > { %7841 = vmatpush1.bf16.msra.mxu1 %v14251_v4  ;;  %v14371_v4 = vld [vmem:[%s14614_s20 + $0x5a0] ss:$16 sps:$4 sm:$0xff]  }
0x102a   : > { %7842 = vmatprep.subr.bf16.mxu1 %v14259_v25  ;;  %v14376_v25 = vld [vmem:[%s14614_s20 + $0x5c4] ss:$16 sps:$4 sm:$0xff]  }
0x102d   : > { %7843 = vmatpush1.bf16.msra.mxu1 %v14257_v57  ;;  %v14374_v57 = vld [vmem:[%s14614_s20 + $0x5c0] ss:$16 sps:$4 sm:$0xff]  }
0x102e   : > { %7844 = vmatprep.subr.bf16.mxu1 %v14265_v11  ;;  %v14379_v11 = vld [vmem:[%s14614_s20 + $0x5e4] ss:$16 sps:$4 sm:$0xff]  }
0x1031   : > { %7845 = vmatpush1.bf16.msra.mxu1 %v14263_v45  ;;  %v14377_v45 = vld [vmem:[%s14614_s20 + $0x5e0] ss:$16 sps:$4 sm:$0xff]  }
0x1032   : > { %7846 = vmatprep.subr.bf16.mxu1 %v14271_v46  ;;  %v14382_v46 = vld [vmem:[%s14614_s20 + $0x604] ss:$16 sps:$4 sm:$0xff]  }
0x1035   : > { %7847 = vmatpush1.bf16.msra.mxu1 %v14269_v35  ;;  %v14380_v35 = vld [vmem:[%s14614_s20 + $0x600] ss:$16 sps:$4 sm:$0xff]  }
0x1036   : > { %7848 = vmatprep.subr.bf16.mxu1 %v14277_v20  ;;  %v14385_v20 = vld [vmem:[%s17877_s28 + $0x4] ss:$8 sps:$4 sm:$0xff]  }
0x1039   : > { %7849 = vmatpush1.bf16.msra.mxu1 %v14275_v21  ;;  %v14383_v21 = vld [vmem:[%s17877_s28] ss:$8 sps:$4 sm:$0xff]  }
0x103a   : > { %7850 = vmatprep.subr.bf16.mxu1 %v14283_v23  ;;  %v14388_v23 = vld [vmem:[%s17877_s28 + $0x14] ss:$8 sps:$4 sm:$0xff]  }
0x103d   : > { %7851 = vmatpush1.bf16.msra.mxu1 %v14281_v24  ;;  %v14386_v24 = vld [vmem:[%s17877_s28 + $0x10] ss:$8 sps:$4 sm:$0xff]  }
0x103e   : > { %7852 = vmatprep.subr.bf16.mxu1 %v14289_v32  ;;  %v14391_v32 = vld [vmem:[%s17877_s28 + $0x24] ss:$8 sps:$4 sm:$0xff]  }
0x1041   : > { %7853 = vmatpush1.bf16.msra.mxu1 %v14287_v36 }
0x1042   : > { %7854 = vmatprep.subr.bf16.mxu1 %v14295_v43 }
0x1045   : > { %7855 = vmatpush1.bf16.msra.mxu1 %v14293_v49 }
0x1046   : > { %7856 = vmatprep.subr.bf16.mxu1 %v14301_v58 }
0x1049   : > { %7857 = vmatpush1.bf16.msra.mxu1 %v14299_v61 }
0x104a   : > { %7858 = vmatprep.subr.bf16.mxu1 %v14307_v1  ;;  %v14392_v1 = vld [vmem:[%s17877_s28 + $0x30] ss:$8 sps:$4 sm:$0xff]  }
0x104d   : > { %7859 = vmatpush1.bf16.msra.mxu1 %v14305_v28  ;;  %v14397_v28 = vld [vmem:[%s17877_s28 + $0x44] ss:$8 sps:$4 sm:$0xff]  }
0x104e   : > { %7860 = vmatprep.subr.bf16.mxu1 %v14313_v55  ;;  %v14395_v55 = vld [vmem:[%s17877_s28 + $0x40] ss:$8 sps:$4 sm:$0xff]  }
0x1051   : > { %7861 = vmatpush1.bf16.msra.mxu1 %v14311_v34  ;;  %v14400_v34 = vld [vmem:[%s17877_s28 + $0x54] ss:$8 sps:$4 sm:$0xff]  }
0x1052   : > { %7862 = vmatprep.subr.bf16.mxu1 %v14319_v40  ;;  %v14398_v40 = vld [vmem:[%s17877_s28 + $0x50] ss:$8 sps:$4 sm:$0xff]  }
0x1055   : > { %7863 = vmatpush1.bf16.msra.mxu1 %v14317_v52  ;;  %v14403_v52 = vld [vmem:[%s17877_s28 + $0x64] ss:$8 sps:$4 sm:$0xff]  }
0x1056   : > { %7864 = vmatprep.subr.bf16.mxu1 %v14325_v30  ;;  %v14401_v30 = vld [vmem:[%s17877_s28 + $0x60] ss:$8 sps:$4 sm:$0xff]  }
0x1059   : > { %7865 = vmatpush1.bf16.msra.mxu1 %v14323_v7  ;;  %v14406_v7 = vld [vmem:[%s17877_s28 + $0x74] ss:$8 sps:$4 sm:$0xff]  }
0x105a   : > { %7866 = vmatprep.subr.bf16.mxu1 %v14328_v19  ;;  %v14404_v19 = vld [vmem:[%s17877_s28 + $0x70] ss:$8 sps:$4 sm:$0xff]  }
0x105d   : > { %7867 = vmatpush1.bf16.msra.mxu1 %v14326_v59  ;;  %v14409_v59 = vld [vmem:[%s17877_s28 + $0x84] ss:$8 sps:$4 sm:$0xff]  }
0x105e   : > { %7877 = vmatprep.subr.bf16.mxu1 %v14331_v31  ;;  %v14407_v31 = vld [vmem:[%s17877_s28 + $0x80] ss:$8 sps:$4 sm:$0xff]  }
0x1060   : > { %7869 = vmatmul.mubr.bf16.vlgmr.msra.gmra.mrb[64].mxu1 %v16455_v5  ;;  %v14346_v5 = vld [vmem:[%s14614_s20 + $0x484] ss:$16 sps:$4 sm:$0xff]  }
0x1061   : > { %7878 = vmatpush1.bf16.msra.mxu1 %v14329_v33  ;;  %7909 = vmatprep.mubr.bf16.mxu1 %v16493_v29  ;;  %v14349_v29 = vld [vmem:[%s14614_s20 + $0x4a4] ss:$16 sps:$4 sm:$0xff]  }
0x1062   : > { %7879 = vmatprep.subr.bf16.mxu1 %v14337_v39  ;;  %v14412_v33 = vld [vmem:[%s17877_s28 + $0x94] ss:$8 sps:$4 sm:$0xff]   ;;  %v14410_v39 = vld [vmem:[%s17877_s28 + $0x90] ss:$8 sps:$4 sm:$0xff]  }
0x1065   : > { %7880 = vmatpush1.bf16.msra.mxu1 %v14335_v60  ;;  %v14415_v60 = vld [vmem:[%s17877_s28 + $0xa4] ss:$8 sps:$4 sm:$0xff]  }
0x1066   : > { %7881 = vmatprep.subr.bf16.mxu1 %v14340_v48  ;;  %v14413_v48 = vld [vmem:[%s17877_s28 + $0xa0] ss:$8 sps:$4 sm:$0xff]  }
0x1069   : > { %7882 = vmatpush1.bf16.msra.mxu1 %v14338_v22  ;;  %v14418_v22 = vld [vmem:[%s17877_s28 + $0xb4] ss:$8 sps:$4 sm:$0xff]  }
0x106a   : > { %7883 = vmatprep.subr.bf16.mxu1 %v14343_v8  ;;  %v14416_v8 = vld [vmem:[%s17877_s28 + $0xb0] ss:$8 sps:$4 sm:$0xff]  }
0x106d   : > { %7884 = vmatpush1.bf16.msra.mxu1 %v14341_v2  ;;  %v14421_v2 = vld [vmem:[%s17877_s28 + $0xc4] ss:$8 sps:$4 sm:$0xff]  }
0x106e   : > { %7885 = vmatprep.subr.bf16.mxu1 %v14346_v5  ;;  %v14419_v5 = vld [vmem:[%s17877_s28 + $0xc0] ss:$8 sps:$4 sm:$0xff]  }
0x1071   : > { %7886 = vmatpush1.bf16.msra.mxu1 %v14344_v10  ;;  %v14424_v10 = vld [vmem:[%s17877_s28 + $0xd4] ss:$8 sps:$4 sm:$0xff]  }
0x1072   : > { %7887 = vmatprep.subr.bf16.mxu1 %v14349_v29  ;;  %v14422_v29 = vld [vmem:[%s17877_s28 + $0xd0] ss:$8 sps:$4 sm:$0xff]  }
0x1075   : > { %7888 = vmatpush1.bf16.msra.mxu1 %v14347_v63  ;;  %v14427_v63 = vld [vmem:[%s17877_s28 + $0xe4] ss:$8 sps:$4 sm:$0xff]  }
0x1076   : > { %7889 = vmatprep.subr.bf16.mxu1 %v14352_v51  ;;  %v14425_v51 = vld [vmem:[%s17877_s28 + $0xe0] ss:$8 sps:$4 sm:$0xff]  }
0x1079   : > { %7890 = vmatpush1.bf16.msra.mxu1 %v14350_v50  ;;  %v14430_v50 = vld [vmem:[%s17877_s28 + $0xf4] ss:$8 sps:$4 sm:$0xff]  }
0x107a   : > { %7891 = vmatprep.subr.bf16.mxu1 %v14355_v44  ;;  %v14428_v44 = vld [vmem:[%s17877_s28 + $0xf0] ss:$8 sps:$4 sm:$0xff]  }
0x107d   : > { %7892 = vmatpush1.bf16.msra.mxu1 %v14353_v38  ;;  %v14433_v38 = vld [vmem:[%s17877_s28 + $0x104] ss:$8 sps:$4 sm:$0xff]  }
0x107e   : > { %7893 = vmatprep.subr.bf16.mxu1 %v14358_v56  ;;  %v16655_v56 = vld [vmem:[%s17879_s1] sm:$0xf]  ;;  %s18188_s1 = sld [smem:[#allocation13_spill]] }
0x1081   : > { %7894 = vmatpush1.bf16.msra.mxu1 %v14356_v53  ;;  %v7787_v53 = vrot.slane %v16655_v56, %v6566_v41 }
0x1082   : > { %7895 = vmatprep.subr.bf16.mxu1 %v14361_v12  ;;  %v7775_v12 = vrot.slane %v16655_v56, %v16398_v0 }
0x1085   : > { %7896 = vmatpush1.bf16.msra.mxu1 %v14359_v62  ;;  %v7779_v62 = vrot.slane %v16655_v56, %v16353_v15 }
0x1086   : > { %7897 = vmatprep.subr.bf16.mxu1 %v14364_v13 }
0x1089   : > { %7898 = vmatpush1.bf16.msra.mxu1 %v14362_v9 }
0x108a   : > { %7899 = vmatprep.subr.bf16.mxu1 %v14367_v14 }
0x108d   : > { %7900 = vmatpush1.bf16.msra.mxu1 %v14365_v16 }
0x108e   : > { %7901 = vmatprep.subr.bf16.mxu1 %v14370_v18 }
0x1091   : > { %7902 = vmatpush1.bf16.msra.mxu1 %v14368_v37 }
0x1092   : > { %7903 = vmatprep.subr.bf16.mxu1 %v14373_v47 }
0x1095   : > { %7904 = vmatpush1.bf16.msra.mxu1 %v14371_v4 }
0x1096   : > { %7905 = vmatprep.subr.bf16.mxu1 %v14376_v25 }
0x1099   : > { %7906 = vmatpush1.bf16.msra.mxu1 %v14374_v57 }
0x109a   : > { %7907 = vmatprep.subr.bf16.mxu1 %v14379_v11  ;;  %v14431_v11 = vld [vmem:[%s17877_s28 + $0x100] ss:$8 sps:$4 sm:$0xff]  }
0x109d   : > { %7908 = vmatpush1.bf16.msra.mxu1 %v14377_v45 }
0x109e   : > { %7918 = vmatprep.subr.bf16.mxu1 %v14382_v46  ;;  %v14436_v46 = vld [vmem:[%s17877_s28 + $0x114] ss:$8 sps:$4 sm:$0xff]  }
0x10a0   : > { %7910 = vmatmul.mubr.bf16.vlgmr.msra.gmra.mrb[64].mxu1 %v16495_v17  ;;  %v14389_v17 = vld [vmem:[%s17877_s28 + $0x20] ss:$8 sps:$4 sm:$0xff]  }
0x10a1   : > { %7919 = vmatpush1.bf16.msra.mxu1 %v14380_v35  ;;  %7950 = vmatprep.mubr.bf16.mxu1 %v14530_v54  ;;  %v14394_v54 = vld [vmem:[%s17877_s28 + $0x34] ss:$8 sps:$4 sm:$0xff]  }
0x10a2   : > { %8527 = vmatprep.subr.bf16.mxu1 %v14385_v20  ;;  %v14434_v20 = vld [vmem:[%s17877_s28 + $0x110] ss:$8 sps:$4 sm:$0xff]  }
0x10a7   : > { %v16620_v36 = vpop.f32.mrb[240].mxu0 }
0x10a8   : > { %v16623_v43 = vpop.f32.mrb[241].mxu0 }
0x10a9   : > { %v13998_v13 = vadd.f32 %v16623_v43, %v7787_v53  ;;  %v14443_v43 = vld [vmem:[%s17877_s28 + $0x140] ss:$8 sps:$4 sm:$0xff]   ;;  %v8629_v53 = vld [vmem:[%s17880_s2 + $0x38] sm:$0xff] }
0x10ab   : > { %v8126_v41 = vmax.f32 %v13998_v13, 0.0  ;;  %v8698_v13 = vand.u32 4294901760, %v8629_v53 }
0x10ac   : > { %11303 = vmatmul.mubr.msk.bf16.vlgmr.msra.gmra.mrb[64].mxu1 %vm1553_vm4, %v16504_v42  ;;  %v8120_v42 = vpop.f32.mrb[242].mxu0 }
0x10ad   : > { %8528 = vmatpush1.bf16.msra.mxu1 %v14383_v21  ;;  %v8121_v61 = vpop.f32.mrb[243].mxu0  ;;  %v8130_v35 = vpack.c.bf16 %v8126_v41, %v8126_v41  ;;  %v14439_v21 = vld [vmem:[%s17877_s28 + $0x124] ss:$8 sps:$4 sm:$0xff]   ;;  %v14446_v42 = vld [vmem:[%s17877_s28 + $0x150] ss:$8 sps:$4 sm:$0xff]  }
0x10ae   : > { %8529 = vmatprep.subr.bf16.mxu1 %v14388_v23  ;;  %v14437_v23 = vld [vmem:[%s17877_s28 + $0x120] ss:$8 sps:$4 sm:$0xff]   ;;  %v8633_v41 = vld [vmem:[%s17880_s2 + $0x58] sm:$0xff] }
0x10af   : > { %v14449_v61 = vld [vmem:[%s17877_s28 + $0x160] ss:$8 sps:$4 sm:$0xff]  }
0x10b1   : > { %8530 = vmatpush1.bf16.msra.mxu1 %v14386_v24  ;;  %v14442_v24 = vld [vmem:[%s17877_s28 + $0x134] ss:$8 sps:$4 sm:$0xff]  }
0x10b2   : > { %8531 = vmatprep.subr.bf16.mxu1 %v14391_v32  ;;  %v14440_v32 = vld [vmem:[%s17877_s28 + $0x130] ss:$8 sps:$4 sm:$0xff]  }
0x10b3   : > { %v16626_v49 = vpop.f32.mrb[62].mxu1 }
0x10b4   : > { %17878 = vst [vmem:[#allocation15_spill] sm:$0xff] %v16626_v49  ;;  %v12861_v58 = vpop.f32.mrb[63].mxu1 }
0x10b5   : > { %8532 = vmatpush1.bf16.msra.mxu1 %v14389_v17  ;;  %v14445_v17 = vld [vmem:[%s17877_s28 + $0x144] ss:$8 sps:$4 sm:$0xff]  }
0x10b6   : > { %8533 = vmatprep.subr.bf16.mxu1 %v14394_v54  ;;  %v14448_v54 = vld [vmem:[%s17877_s28 + $0x154] ss:$8 sps:$4 sm:$0xff]   ;;  %v14451_v58 = vld [vmem:[%s17877_s28 + $0x164] ss:$8 sps:$4 sm:$0xff]  }
0x10b9   : > { %8534 = vmatpush1.bf16.msra.mxu1 %v14392_v1  ;;  %v14454_v1 = vld [vmem:[%s17877_s28 + $0x174] ss:$8 sps:$4 sm:$0xff]  }
0x10ba   : > { %8535 = vmatprep.subr.bf16.mxu1 %v14397_v28  ;;  %v14452_v28 = vld [vmem:[%s17877_s28 + $0x170] ss:$8 sps:$4 sm:$0xff]  }
0x10bd   : > { %8536 = vmatpush1.bf16.msra.mxu1 %v14395_v55  ;;  %v14457_v55 = vld [vmem:[%s17877_s28 + $0x184] ss:$8 sps:$4 sm:$0xff]  }
0x10be   : > { %8537 = vmatprep.subr.bf16.mxu1 %v14400_v34  ;;  %v14455_v34 = vld [vmem:[%s17877_s28 + $0x180] ss:$8 sps:$4 sm:$0xff]  }
0x10c1   : > { %8538 = vmatpush1.bf16.msra.mxu1 %v14398_v40  ;;  %v14460_v40 = vld [vmem:[%s17877_s28 + $0x194] ss:$8 sps:$4 sm:$0xff]  }
0x10c2   : > { %8539 = vmatprep.subr.bf16.mxu1 %v14403_v52  ;;  %v14458_v52 = vld [vmem:[%s17877_s28 + $0x190] ss:$8 sps:$4 sm:$0xff]  }
0x10c5   : > { %8540 = vmatpush1.bf16.msra.mxu1 %v14401_v30  ;;  %v14463_v30 = vld [vmem:[%s17877_s28 + $0x1a4] ss:$8 sps:$4 sm:$0xff]  }
0x10c6   : > { %8541 = vmatprep.subr.bf16.mxu1 %v14406_v7  ;;  %v14461_v7 = vld [vmem:[%s17877_s28 + $0x1a0] ss:$8 sps:$4 sm:$0xff]  }
0x10c9   : > { %8542 = vmatpush1.bf16.msra.mxu1 %v14404_v19  ;;  %v14466_v19 = vld [vmem:[%s17877_s28 + $0x1b4] ss:$8 sps:$4 sm:$0xff]  }
0x10ca   : > { %8543 = vmatprep.subr.bf16.mxu1 %v14409_v59  ;;  %v14464_v59 = vld [vmem:[%s17877_s28 + $0x1b0] ss:$8 sps:$4 sm:$0xff]  }
0x10cd   : > { %8544 = vmatpush1.bf16.msra.mxu1 %v14407_v31  ;;  %v14469_v31 = vld [vmem:[%s17877_s28 + $0x1c4] ss:$8 sps:$4 sm:$0xff]  }
0x10ce   : > { %8545 = vmatprep.subr.bf16.mxu1 %v14412_v33  ;;  %v14467_v33 = vld [vmem:[%s17877_s28 + $0x1c0] ss:$8 sps:$4 sm:$0xff]  }
0x10d1   : > { %8546 = vmatpush1.bf16.msra.mxu1 %v14410_v39  ;;  %v14472_v39 = vld [vmem:[%s17877_s28 + $0x1d4] ss:$8 sps:$4 sm:$0xff]  }
0x10d2   : > { %8547 = vmatprep.subr.bf16.mxu1 %v14415_v60  ;;  %v14470_v60 = vld [vmem:[%s17877_s28 + $0x1d0] ss:$8 sps:$4 sm:$0xff]  }
0x10d5   : > { %8548 = vmatpush1.bf16.msra.mxu1 %v14413_v48  ;;  %v7783_v48 = vrot.slane %v16655_v56, %v6562_v26  ;;  %v8623_v26 = vld [vmem:[%s17880_s2 + $0x8] sm:$0xff] }
0x10d6   : > { %8549 = vmatprep.subr.bf16.mxu1 %v14418_v22  ;;  %v14475_v22 = vld [vmem:[%s17877_s28 + $0x1e4] ss:$8 sps:$4 sm:$0xff]  }
0x10d7   : > { %v8627_v56 = vld [vmem:[%s17880_s2 + $0x28] sm:$0xff] }
0x10d9   : > { %8550 = vmatpush1.bf16.msra.mxu1 %v14416_v8  ;;  %v14473_v8 = vld [vmem:[%s17877_s28 + $0x1e0] ss:$8 sps:$4 sm:$0xff]  }
0x10da   : > { %8551 = vmatprep.subr.bf16.mxu1 %v14421_v2  ;;  %v13997_v2 = vadd.f32 %v16620_v36, %v7783_v48 }
0x10dd   : > { %8552 = vmatpush1.bf16.msra.mxu1 %v14419_v5  ;;  %v14478_v5 = vld [vmem:[%s17877_s28 + $0x1f4] ss:$8 sps:$4 sm:$0xff]  }
0x10de   : > { %8553 = vmatprep.subr.bf16.mxu1 %v14424_v10  ;;  %v14476_v10 = vld [vmem:[%s17877_s28 + $0x1f0] ss:$8 sps:$4 sm:$0xff]  }
0x10e1   : > { %8554 = vmatpush1.bf16.msra.mxu1 %v14422_v29  ;;  %v8125_v29 = vmax.f32 %v13997_v2, 0.0 }
0x10e2   : > { %8555 = vmatprep.subr.bf16.mxu1 %v14427_v63  ;;  %v8625_v63 = vld [vmem:[%s17880_s2 + $0x18] sm:$0xff] }
0x10e3   : > { %v8129_v27 = vpack.c.bf16 %v8125_v29, %v8125_v29  ;;  %v8690_v36 = vand.u32 4294901760, %v8625_v63 }
0x10e5   : > { %8556 = vmatpush1.bf16.msra.mxu1 %v14425_v51  ;;  %v8622_v51 = vld [vmem:[%s17880_s2] sm:$0xff] }
0x10e6   : > { %8557 = vmatprep.subr.bf16.mxu1 %v14430_v50  ;;  %v8686_v50 = vand.u32 4294901760, %v8623_v26 }
0x10e9   : > { %8558 = vmatpush1.bf16.msra.mxu1 %v14428_v44  ;;  %v8624_v44 = vld [vmem:[%s17880_s2 + $0x10] sm:$0xff] }
0x10ea   : > { %8568 = vmatprep.subr.bf16.mxu1 %v14433_v38  ;;  %v8688_v38 = vand.u32 4294901760, %v8622_v51 }
0x117f   : > { %v7952_v9 = vpop.f32.mrb[64].mxu1 }
0x1180   : > { %v13995_v14 = vadd.f32 %v7952_v9, %v7775_v12  ;;  %v7954_v16 = vpop.f32.mrb[65].mxu1  ;;  %v8692_v12 = vand.u32 4294901760, %v8624_v44  ;;  %v8626_v9 = vld [vmem:[%s17880_s2 + $0x20] sm:$0xff] }
0x1181   : > { %v13996_v18 = vadd.f32 %v7954_v16, %v7779_v62  ;;  %v7956_v37 = vpop.f32.mrb[66].mxu1  ;;  %v8694_v62 = vand.u32 4294901760, %v8627_v56  ;;  %v8631_v16 = vld [vmem:[%s17880_s2 + $0x48] sm:$0xff] }
0x1182   : > { %v8123_v47 = vmax.f32 %v13995_v14, 0.0  ;;  %v7957_v4 = vpop.f32.mrb[67].mxu1  ;;  %v8628_v14 = vld [vmem:[%s17880_s2 + $0x30] sm:$0xff]  ;;  %v16711_v37 = vsub.f32 %v8623_v26, %v8686_v50 }
0x1183   : > { %v8124_v25 = vmax.f32 %v13996_v18, 0.0  ;;  %v16709_v18 = vpack.c.bf16 %v8690_v36, %v8686_v50  ;;  %v16715_v4 = vsub.f32 %v8622_v51, %v8688_v38  ;;  %v8643_v50 = vld [vmem:[%s17880_s2 + $0xa8] sm:$0xff] }
0x1184   : > { %v8127_v45 = vpack.c.bf16 %v8123_v47, %v8123_v47  ;;  %v16713_v47 = vsub.f32 %v8625_v63, %v8690_v36  ;;  %v8645_v36 = vld [vmem:[%s17880_s2 + $0xb8] sm:$0xff] }
0x1185   : > { %v8128_v57 = vpack.c.bf16 %v8124_v25, %v8124_v25  ;;  %17881 = vst [vmem:[#allocation16_spill] sm:$0xff] %v16709_v18  ;;  %v8630_v25 = vld [vmem:[%s17880_s2 + $0x40] sm:$0xff]  ;;  %13525 = vmatprep.subr.bf16.mxu0 %v16709_v18  ;;  %v8660_v18 = vld [vmem:[%s17880_s2 + $0x130] sm:$0xff] }
0x1187   : > { %8559 = vmatprep.mubr.bf16.mxu1 %v8128_v57  ;;  %v8632_v57 = vld [vmem:[%s17880_s2 + $0x50] sm:$0xff] }
0x1188   : > { %8560 = vmatmul.mubr.bf16.vlgmr.msra.gmra.mrb[68].mxu1 %v8127_v45  ;;  %v16722_v45 = vsub.f32 %v8624_v44, %v8692_v12  ;;  %v8642_v44 = vld [vmem:[%s17880_s2 + $0xa0] sm:$0xff] }
0x1189   : > { %8569 = vmatpush1.bf16.msra.mxu1 %v14431_v11  ;;  %8600 = vmatprep.mubr.bf16.mxu1 %v8130_v35  ;;  %v16720_v11 = vpack.c.bf16 %v8692_v12, %v8688_v38  ;;  %v16726_v35 = vsub.f32 %v8627_v56, %v8694_v62  ;;  %v8647_v12 = vld [vmem:[%s17880_s2 + $0xc8] sm:$0xff] }
0x118a   : > { %8570 = vmatprep.subr.bf16.mxu1 %v14436_v46  ;;  %v16724_v46 = vpack.c.bf16 %v8698_v13, %v8694_v62  ;;  %v8649_v62 = vld [vmem:[%s17880_s2 + $0xd8] sm:$0xff] }
0x118b   : > { %17882 = vst [vmem:[#allocation17_spill] sm:$0xff] %v16720_v11  ;;  %13527 = vmatpush1.bf16.msra.mxu0 %v16720_v11  ;;  %v8658_v11 = vld [vmem:[%s17880_s2 + $0x120] sm:$0xff] }
0x118c   : > { %17883 = vst [vmem:[#allocation18_spill] sm:$0xff] %v16724_v46  ;;  %13529 = vmatprep.subr.bf16.mxu0 %v16724_v46 }
0x118d   : > { %8571 = vmatpush1.bf16.msra.mxu1 %v14434_v20  ;;  %v8635_v20 = vld [vmem:[%s17880_s2 + $0x68] sm:$0xff] }
0x118e   : > { %8572 = vmatprep.subr.bf16.mxu1 %v14439_v21  ;;  %v16730_v21 = vsub.f32 %v8629_v53, %v8698_v13  ;;  %v8644_v53 = vld [vmem:[%s17880_s2 + $0xb0] sm:$0xff] }
0x1191   : > { %8573 = vmatpush1.bf16.msra.mxu1 %v14437_v23  ;;  %v8696_v23 = vand.u32 4294901760, %v8626_v9 }
0x1192   : > { %8574 = vmatprep.subr.bf16.mxu1 %v14442_v24  ;;  %v8700_v24 = vand.u32 4294901760, %v8628_v14 }
0x1195   : > { %8575 = vmatpush1.bf16.msra.mxu1 %v14440_v32  ;;  %v8702_v32 = vand.u32 4294901760, %v8631_v16 }
0x1196   : > { %8576 = vmatprep.subr.bf16.mxu1 %v14445_v17  ;;  %v8637_v17 = vld [vmem:[%s17880_s2 + $0x78] sm:$0xff] }
0x1197   : > { %v8714_v48 = vand.u32 4294901760, %v8637_v17 }
0x1199   : > { %8577 = vmatpush1.bf16.msra.mxu1 %v14443_v43  ;;  %v8706_v43 = vand.u32 4294901760, %v8633_v41  ;;  %v16765_v26 = vsub.f32 %v8637_v17, %v8714_v48  ;;  %v8734_v17 = vand.u32 4294901760, %v8647_v12 }
0x119a   : > { %8578 = vmatprep.subr.bf16.mxu1 %v14448_v54  ;;  %v8704_v54 = vand.u32 4294901760, %v8630_v25 }
0x119b   : > { %17895 = vst [vmem:[#allocation30_spill] sm:$0xff] %v16765_v26 }
0x119d   : > { %8579 = vmatpush1.bf16.msra.mxu1 %v14446_v42  ;;  %v8708_v42 = vand.u32 4294901760, %v8632_v57 }
0x119e   : > { %8580 = vmatprep.subr.bf16.mxu1 %v14451_v58  ;;  %v8710_v58 = vand.u32 4294901760, %v8635_v20 }
0x11a1   : > { %8581 = vmatpush1.bf16.msra.mxu1 %v14449_v61  ;;  %v8634_v61 = vld [vmem:[%s17880_s2 + $0x60] sm:$0xff] }
0x11a2   : > { %8582 = vmatprep.subr.bf16.mxu1 %v14454_v1  ;;  %v8636_v1 = vld [vmem:[%s17880_s2 + $0x70] sm:$0xff] }
0x11a3   : > { %v8716_v2 = vand.u32 4294901760, %v8636_v1 }
0x11a5   : > { %8583 = vmatpush1.bf16.msra.mxu1 %v14452_v28  ;;  %v16737_v28 = vpack.c.bf16 %v8700_v24, %v8696_v23  ;;  %v16772_v38 = vsub.f32 %v8636_v1, %v8716_v2  ;;  %v8651_v1 = vld [vmem:[%s17880_s2 + $0xe8] sm:$0xff] }
0x11a6   : > { %8584 = vmatprep.subr.bf16.mxu1 %v14457_v55  ;;  %v16739_v55 = vsub.f32 %v8626_v9, %v8696_v23  ;;  %v8730_v23 = vand.u32 4294901760, %v8645_v36  ;;  %v8742_v6 = vand.u32 4294901760, %v8651_v1 }
0x11a7   : > { %17884 = vst [vmem:[#allocation19_spill] sm:$0xff] %v16737_v28  ;;  %13531 = vmatpush1.bf16.msra.mxu0 %v16737_v28  ;;  %17897 = vst [vmem:[#allocation32_spill] sm:$0xff] %v16772_v38  ;;  %v8661_v28 = vld [vmem:[%s17880_s2 + $0x138] sm:$0xff] }
0x11a8   : > { %17885 = vst [vmem:[#allocation20_spill] sm:$0xff] %v16739_v55 }
0x11a9   : > { %8585 = vmatpush1.bf16.msra.mxu1 %v14455_v34  ;;  %v16741_v34 = vsub.f32 %v8628_v14, %v8700_v24  ;;  %v8728_v24 = vand.u32 4294901760, %v8642_v44 }
0x11aa   : > { %8586 = vmatprep.subr.bf16.mxu1 %v14460_v40  ;;  %v16743_v40 = vsub.f32 %v8631_v16, %v8702_v32  ;;  %v16786_v16 = vld [vmem:[%s17880_s2 + $0xc0] sm:$0xff] }
0x11ab   : > { %17886 = vst [vmem:[#allocation21_spill] sm:$0xff] %v16741_v34 }
0x11ac   : > { %17887 = vst [vmem:[#allocation22_spill] sm:$0xff] %v16743_v40 }
0x11ad   : > { %8587 = vmatpush1.bf16.msra.mxu1 %v14458_v52  ;;  %v8639_v52 = vld [vmem:[%s17880_s2 + $0x88] sm:$0xff] }
0x11ae   : > { %8588 = vmatprep.subr.bf16.mxu1 %v14463_v30  ;;  %v8641_v30 = vld [vmem:[%s17880_s2 + $0x98] sm:$0xff] }
0x11b1   : > { %8589 = vmatpush1.bf16.msra.mxu1 %v14461_v7  ;;  %v8638_v7 = vld [vmem:[%s17880_s2 + $0x80] sm:$0xff] }
0x11b2   : > { %8590 = vmatprep.subr.bf16.mxu1 %v14466_v19  ;;  %v16748_v19 = vpack.c.bf16 %v8706_v43, %v8702_v32  ;;  %v8720_v29 = vand.u32 4294901760, %v8638_v7  ;;  %v8732_v32 = vand.u32 4294901760, %v8644_v53 }
0x11b4   : > { %17888 = vst [vmem:[#allocation23_spill] sm:$0xff] %v16748_v19  ;;  %13533 = vmatprep.subr.bf16.mxu0 %v16748_v19  ;;  %v16781_v9 = vsub.f32 %v8638_v7, %v8720_v29  ;;  %v16806_v7 = vsub.f32 %v8642_v44, %v8728_v24  ;;  %v8659_v19 = vld [vmem:[%s17880_s2 + $0x128] sm:$0xff] }
0x11b5   : > { %8591 = vmatpush1.bf16.msra.mxu1 %v14464_v59  ;;  %v16750_v59 = vsub.f32 %v8633_v41, %v8706_v43  ;;  %v16789_v41 = vld [vmem:[%s17880_s2 + $0xd0] sm:$0xff]  ;;  %v8738_v43 = vand.u32 4294901760, %v8649_v62 }
0x11b6   : > { %8592 = vmatprep.subr.bf16.mxu1 %v14469_v31  ;;  %v16752_v31 = vpack.c.bf16 %v8708_v42, %v8704_v54  ;;  %17900 = vst [vmem:[#allocation35_spill] sm:$0xff] %v16781_v9  ;;  %17906 = vst [vmem:[#allocation41_spill] sm:$0xff] %v16806_v7  ;;  %v8680_v7 = vld [vmem:[%s17880_s2 + $0x1d0] sm:$0xff] }
0x11b7   : > { %17889 = vst [vmem:[#allocation24_spill] sm:$0xff] %v16750_v59 }
0x11b8   : > { %17890 = vst [vmem:[#allocation25_spill] sm:$0xff] %v16752_v31  ;;  %13535 = vmatpush1.bf16.msra.mxu0 %v16752_v31 }
0x11b9   : > { %8593 = vmatpush1.bf16.msra.mxu1 %v14467_v33  ;;  %v16754_v33 = vsub.f32 %v8630_v25, %v8704_v54 }
0x11ba   : > { %8594 = vmatprep.subr.bf16.mxu1 %v14472_v39  ;;  %v8640_v39 = vld [vmem:[%s17880_s2 + $0x90] sm:$0xff] }
0x11bb   : > { %17891 = vst [vmem:[#allocation26_spill] sm:$0xff] %v16754_v33  ;;  %v8724_v51 = vand.u32 4294901760, %v8640_v39 }
0x11bd   : > { %8595 = vmatpush1.bf16.msra.mxu1 %v14470_v60  ;;  %v16757_v60 = vsub.f32 %v8632_v57, %v8708_v42  ;;  %v16783_v14 = vsub.f32 %v8640_v39, %v8724_v51  ;;  %v16799_v42 = vsub.f32 %v8645_v36, %v8730_v23  ;;  %v16808_v39 = vsub.f32 %v8644_v53, %v8732_v32  ;;  %v8654_v53 = vld [vmem:[%s17880_s2 + $0x100] sm:$0xff] }
0x11be   : > { %8596 = vmatprep.subr.bf16.mxu1 %v14475_v22  ;;  %v16759_v22 = vsub.f32 %v8635_v20, %v8710_v58  ;;  %v8726_v20 = vand.u32 4294901760, %v8643_v50 }
0x11bf   : > { %17892 = vst [vmem:[#allocation27_spill] sm:$0xff] %v16757_v60  ;;  %17901 = vst [vmem:[#allocation36_spill] sm:$0xff] %v16783_v14 }
0x11c0   : > { %17893 = vst [vmem:[#allocation28_spill] sm:$0xff] %v16759_v22  ;;  %v16797_v54 = vsub.f32 %v8643_v50, %v8726_v20  ;;  %17905 = vst [vmem:[#allocation40_spill] sm:$0xff] %v16799_v42  ;;  %v16818_v50 = vsub.f32 %v8649_v62, %v8738_v43  ;;  %v16829_v3 = vpack.c.bf16 %v8730_v23, %v8726_v20 }
0x11c1   : > { %8597 = vmatpush1.bf16.msra.mxu1 %v14473_v8  ;;  %v8712_v8 = vand.u32 4294901760, %v8634_v61  ;;  %17907 = vst [vmem:[#allocation42_spill] sm:$0xff] %v16808_v39  ;;  %v16838_v20 = vpack.c.bf16 %v8732_v32, %v8728_v24  ;;  %v8758_v24 = vand.u32 4294901760, %v8659_v19  ;;  %v8762_v32 = vand.u32 4294901760, %v8661_v28  ;;  %v8678_v39 = vld [vmem:[%s17880_s2 + $0x1c0] sm:$0xff] }
0x11c2   : > { %8598 = vmatprep.subr.bf16.mxu1 %v14478_v5  ;;  %v8718_v5 = vand.u32 4294901760, %v8639_v52  ;;  %17904 = vst [vmem:[#allocation39_spill] sm:$0xff] %v16797_v54  ;;  %17910 = vst [vmem:[#allocation45_spill] sm:$0xff] %v16818_v50  ;;  %v8679_v50 = vld [vmem:[%s17880_s2 + $0x1c8] sm:$0xff]  ;;  %v8800_v54 = vand.u32 4294901760, %v8678_v39 }
0x11c3   : > { %v16767_v63 = vsub.f32 %v8634_v61, %v8712_v8  ;;  %v16792_v25 = vpack.c.bf16 %v8716_v2, %v8712_v8  ;;  %v8740_v61 = vand.u32 4294901760, %v16789_v41  ;;  %v8652_v8 = vld [vmem:[%s17880_s2 + $0xf0] sm:$0xff]  ;;  %v8655_v2 = vld [vmem:[%s17880_s2 + $0x108] sm:$0xff]  ;;  %17913 = vst [vmem:[#allocation48_spill] sm:$0xff] %v16829_v3  ;;  %17916 = vst [vmem:[#allocation51_spill] sm:$0xff] %v16838_v20 }
0x11c4   : > { %v16774_v56 = vsub.f32 %v8639_v52, %v8718_v5  ;;  %v8653_v52 = vld [vmem:[%s17880_s2 + $0xf8] sm:$0xff]  ;;  %v8750_v62 = vand.u32 4294901760, %v8655_v2 }
0x11c5   : > { %8599 = vmatpush1.bf16.msra.mxu1 %v14476_v10  ;;  %v8722_v10 = vand.u32 4294901760, %v8641_v30  ;;  %17896 = vst [vmem:[#allocation31_spill] sm:$0xff] %v16767_v63  ;;  %17902 = vst [vmem:[#allocation37_spill] sm:$0xff] %v16792_v25  ;;  %v16824_v44 = vsub.f32 %v16789_v41, %v8740_v61  ;;  %v8746_v49 = vand.u32 4294901760, %v8653_v52  ;;  %v8752_v41 = vand.u32 4294901760, %v8654_v53 }
0x11c6   : > { %17898 = vst [vmem:[#allocation33_spill] sm:$0xff] %v16774_v56  ;;  %v16844_v46 = vsub.f32 %v8655_v2, %v8750_v62  ;;  %v16860_v2 = vsub.f32 %v8659_v19, %v8758_v24 }
0x11c7   : > { %v16779_v13 = vsub.f32 %v8641_v30, %v8722_v10  ;;  %v16794_v57 = vpack.c.bf16 %v8722_v10, %v8718_v5  ;;  %v8650_v30 = vld [vmem:[%s17880_s2 + $0xe0] sm:$0xff]  ;;  %v8657_v5 = vld [vmem:[%s17880_s2 + $0x118] sm:$0xff]  ;;  %v16816_v10 = vpack.c.bf16 %v8724_v51, %v8720_v29  ;;  %17912 = vst [vmem:[#allocation47_spill] sm:$0xff] %v16824_v44  ;;  %v8748_v51 = vand.u32 4294901760, %v8652_v8 }
0x11c8   : > { %8601 = vmatmul.mubr.bf16.vlgmr.msra.gmra.mrb[68].mxu1 %v8129_v27  ;;  %v16763_v27 = vpack.c.bf16 %v8714_v48, %v8710_v58  ;;  %v8736_v58 = vand.u32 4294901760, %v16786_v16  ;;  %v16810_v48 = vsub.f32 %v8647_v12, %v8734_v17  ;;  %v8656_v12 = vld [vmem:[%s17880_s2 + $0x110] sm:$0xff]  ;;  %v8744_v29 = vand.u32 4294901760, %v8650_v30  ;;  %17919 = vst [vmem:[#allocation54_spill] sm:$0xff] %v16844_v46  ;;  %17925 = vst [vmem:[#allocation60_spill] sm:$0xff] %v16860_v2  ;;  %v8675_v2 = vld [vmem:[%s17880_s2 + $0x1a8] sm:$0xff] }
0x11c9   : > { %17899 = vst [vmem:[#allocation34_spill] sm:$0xff] %v16779_v13  ;;  %17903 = vst [vmem:[#allocation38_spill] sm:$0xff] %v16794_v57  ;;  %v8756_v31 = vand.u32 4294901760, %v8656_v12  ;;  %v16862_v46 = vsub.f32 %v8661_v28, %v8762_v32 }
0x11ca   : > { %17894 = vst [vmem:[#allocation29_spill] sm:$0xff] %v16763_v27  ;;  %13537 = vmatprep.subr.bf16.mxu0 %v16763_v27  ;;  %17908 = vst [vmem:[#allocation43_spill] sm:$0xff] %v16810_v48  ;;  %v16821_v36 = vsub.f32 %v16786_v16, %v8736_v58  ;;  %v8754_v16 = vand.u32 4294901760, %v8657_v5  ;;  %v16833_v27 = vsub.f32 %v8653_v52, %v8746_v49  ;;  %v8681_v48 = vld [vmem:[%s17880_s2 + $0x1d8] sm:$0xff] }
0x11cb   : > { %13539 = vmatpush1.bf16.msra.mxu0 %v16792_v25  ;;  %17909 = vst [vmem:[#allocation44_spill] sm:$0xff] %v16816_v10  ;;  %v16831_v25 = vsub.f32 %v8651_v1, %v8742_v6  ;;  %v16840_v23 = vsub.f32 %v8650_v30, %v8744_v29  ;;  %v16849_v1 = vpack.c.bf16 %v8738_v43, %v8734_v17  ;;  %v8760_v30 = vand.u32 4294901760, %v8658_v11 }
0x11cc   : > { %17911 = vst [vmem:[#allocation46_spill] sm:$0xff] %v16821_v36  ;;  %13541 = vmatprep.subr.bf16.mxu0 %v16794_v57  ;;  %17915 = vst [vmem:[#allocation50_spill] sm:$0xff] %v16833_v27  ;;  %v16842_v57 = vsub.f32 %v8652_v8, %v8748_v51  ;;  %v16851_v52 = vsub.f32 %v8657_v5, %v8754_v16  ;;  %v16853_v27 = vsub.f32 %v8654_v53, %v8752_v41 }
0x11cd   : > { %17914 = vst [vmem:[#allocation49_spill] sm:$0xff] %v16831_v25  ;;  %17917 = vst [vmem:[#allocation52_spill] sm:$0xff] %v16840_v23  ;;  %v16855_v25 = vsub.f32 %v8656_v12, %v8756_v31  ;;  %v16858_v8 = vpack.c.bf16 %v8740_v61, %v8736_v58  ;;  %v16865_v17 = vpack.c.bf16 %v8746_v49, %v8742_v6  ;;  %v8802_v42 = vand.u32 4294901760, %v8681_v48 }
0x11ce   : > { %17918 = vst [vmem:[#allocation53_spill] sm:$0xff] %v16842_v57  ;;  %17920 = vst [vmem:[#allocation55_spill] sm:$0xff] %v16849_v1  ;;  %v16867_v43 = vsub.f32 %v8658_v11, %v8760_v30  ;;  %v16872_v53 = vpack.c.bf16 %v8748_v51, %v8744_v29  ;;  %v16875_v58 = vpack.c.bf16 %v8754_v16, %v8750_v62  ;;  %v8676_v57 = vld [vmem:[%s17880_s2 + $0x1b0] sm:$0xff] }
0x11cf   : > { %13543 = vmatpush1.bf16.msra.mxu0 %v16816_v10  ;;  %17921 = vst [vmem:[#allocation56_spill] sm:$0xff] %v16851_v52  ;;  %17922 = vst [vmem:[#allocation57_spill] sm:$0xff] %v16853_v27  ;;  %v8764_v10 = vand.u32 4294901760, %v8660_v18  ;;  %v16878_v28 = vpack.c.bf16 %v8756_v31, %v8752_v41  ;;  %v16881_v6 = vpack.c.bf16 %v8762_v32, %v8758_v24  ;;  %v8674_v52 = vld [vmem:[%s17880_s2 + $0x1a0] sm:$0xff]  ;;  %v8796_v23 = vand.u32 4294901760, %v8676_v57 }
0x11d0   : > { %13545 = vmatprep.subr.bf16.mxu0 %v16829_v3  ;;  %17923 = vst [vmem:[#allocation58_spill] sm:$0xff] %v16855_v25  ;;  %17924 = vst [vmem:[#allocation59_spill] sm:$0xff] %v16858_v8  ;;  %v8672_v3 = vld [vmem:[%s17880_s2 + $0x190] sm:$0xff]  ;;  %v8677_v25 = vld [vmem:[%s17880_s2 + $0x1b8] sm:$0xff] }
0x11d1   : > { %17926 = vst [vmem:[#allocation61_spill] sm:$0xff] %v16862_v46  ;;  %17928 = vst [vmem:[#allocation62_spill] sm:$0xff] %v16865_v17  ;;  %v16869_v5 = vsub.f32 %v8660_v18, %v8764_v10  ;;  %v16884_v49 = vpack.c.bf16 %v8764_v10, %v8760_v30  ;;  %v8195_v18 = vld [vmem:[%s17927_s7] sm:$0x3]  ;;  %v8663_v30 = vld [vmem:[%s17880_s2 + $0x148] sm:$0xff]  ;;  %v8794_v27 = vand.u32 4294901760, %v8677_v25  ;;  %s943_s7 = scalar_lea.vmem %s14689_s12, %s18190_s16 }
0x11d2   : > { %17929 = vst [vmem:[#allocation63_spill] sm:$0xff] %v16867_v43  ;;  %17931 = vst [vmem:[#allocation65_spill] sm:$0xff] %v16872_v53  ;;  %v8520_v11 = vrot.slane %v8195_v18, %v16398_v0  ;;  %v8524_v19 = vrot.slane %v8195_v18, %v16353_v15  ;;  %v8665_v18 = vld [vmem:[%s17880_s2 + $0x158] sm:$0xff] }
0x11d3   : > { %13547 = vmatpush1.bf16.msra.mxu0 %v16838_v20  ;;  %17930 = vst [vmem:[#allocation64_spill] sm:$0xff] %v16869_v5  ;;  %17932 = vst [vmem:[#allocation66_spill] sm:$0xff] %v16875_v58  ;;  %v8670_v20 = vld [vmem:[%s17880_s2 + $0x180] sm:$0xff]  ;;  %v8788_v5 = vand.u32 4294901760, %v8672_v3 }
0x11d4   : > { %13549 = vmatprep.subr.bf16.mxu0 %v16849_v1  ;;  %17933 = vst [vmem:[#allocation67_spill] sm:$0xff] %v16878_v28  ;;  %17934 = vst [vmem:[#allocation68_spill] sm:$0xff] %v16881_v6 }
0x11d5   : > { %17935 = vst [vmem:[#allocation69_spill] sm:$0xff] %v16884_v49 }
0x11d7   : > { %13551 = vmatpush1.bf16.msra.mxu0 %v16858_v8  ;;  %v8673_v8 = vld [vmem:[%s17880_s2 + $0x198] sm:$0xff] }
0x11d8   : > { %13553 = vmatprep.subr.bf16.mxu0 %v16865_v17  ;;  %v8671_v17 = vld [vmem:[%s17880_s2 + $0x188] sm:$0xff]  ;;  %v8786_v1 = vand.u32 4294901760, %v8673_v8 }
0x11db   : > { %13555 = vmatpush1.bf16.msra.mxu0 %v16872_v53 }
0x11dc   : > { %13557 = vmatprep.subr.bf16.mxu0 %v16875_v58 }
0x11df   : > { %13559 = vmatpush1.bf16.msra.mxu0 %v16878_v28 }
0x11e0   : > { %13561 = vmatprep.subr.bf16.mxu0 %v16881_v6 }
0x11e3   : > { %13563 = vmatpush1.bf16.msra.mxu0 %v16884_v49  ;;  %v8668_v49 = vld [vmem:[%s17880_s2 + $0x170] sm:$0xff] }
0x11e4   : > { %v8780_v28 = vand.u32 4294901760, %v8668_v49 }
0x11e6   : > { %v16959_v63 = vsub.f32 %v8668_v49, %v8780_v28  ;;  %v8684_v49 = vld [vmem:[%s17880_s2 + $0x1f0] sm:$0xff] }
0x129b   : > { %v8602_v61 = vpop.f32.mrb[68].mxu1 }
0x129c   : > { %v13999_v31 = vadd.f32 %v8602_v61, %v8520_v11  ;;  %v8604_v12 = vpop.f32.mrb[69].mxu1  ;;  %v8766_v11 = vand.u32 4294901760, %v8663_v30  ;;  %v8662_v61 = vld [vmem:[%s17880_s2 + $0x140] sm:$0xff] }
0x129d   : > { %v14000_v29 = vadd.f32 %v8604_v12, %v8524_v19  ;;  %v8606_v51 = vpop.f32.mrb[70].mxu1  ;;  %v8770_v19 = vand.u32 4294901760, %v8665_v18  ;;  %v8768_v12 = vand.u32 4294901760, %v8662_v61 }
0x129e   : > { %14479 = vtanh.f32 %v13999_v31  ;;  %v8607_v10 = vpop.f32.mrb[71].mxu1  ;;  %v8664_v31 = vld [vmem:[%s17880_s2 + $0x150] sm:$0xff]  ;;  %v16945_v14 = vsub.f32 %v8663_v30, %v8766_v11  ;;  %v16963_v30 = vsub.f32 %v8673_v8, %v8786_v1  ;;  %v16989_v8 = vsub.f32 %v8678_v39, %v8800_v54 }
0x129f   : > { %14481 = vtanh.f32 %v14000_v29  ;;  %v8772_v29 = vand.u32 4294901760, %v8664_v31  ;;  %v16905_v51 = vpack.c.bf16 %v8770_v19, %v8766_v11  ;;  %v16947_v9 = vsub.f32 %v8665_v18, %v8770_v19  ;;  %v8683_v19 = vld [vmem:[%s17880_s2 + $0x1e8] sm:$0xff] }
0x12a0   : > { %v16949_v13 = vsub.f32 %v8662_v61, %v8768_v12  ;;  %v16967_v11 = vsub.f32 %v8672_v3, %v8788_v5  ;;  %v8685_v61 = vld [vmem:[%s17880_s2 + $0x1f8] sm:$0xff] }
0x12a1   : > { %17936 = vst [vmem:[#allocation70_spill] sm:$0xff] %v16905_v51  ;;  %v16907_v10 = vpack.c.bf16 %v8772_v29, %v8768_v12  ;;  %13565 = vmatprep.subr.bf16.mxu0 %v16905_v51  ;;  %v8782_v51 = vand.u32 4294901760, %v8671_v17  ;;  %v16951_v56 = vsub.f32 %v8664_v31, %v8772_v29  ;;  %v16973_v12 = vsub.f32 %v8677_v25, %v8794_v27 }
0x12a2   : > { %v8810_v25 = vand.u32 4294901760, %v8685_v61 }
0x12a3   : > { %17937 = vst [vmem:[#allocation71_spill] sm:$0xff] %v16907_v10  ;;  %13567 = vmatpush1.bf16.msra.mxu0 %v16907_v10  ;;  %v8784_v10 = vand.u32 4294901760, %v8670_v20  ;;  %v16925_v43 = vpack.c.bf16 %v8786_v1, %v8782_v51  ;;  %v16961_v26 = vsub.f32 %v8671_v17, %v8782_v51 }
0x12a5   : > { %17940 = vst [vmem:[#allocation74_spill] sm:$0xff] %v16925_v43  ;;  %v16927_v46 = vpack.c.bf16 %v8788_v5, %v8784_v10  ;;  %v16965_v18 = vsub.f32 %v8670_v20, %v8784_v10  ;;  %v16985_v20 = vsub.f32 %v8681_v48, %v8802_v42  ;;  %v17766_v5 = vand.u32 4294901760, %v16713_v47 }
0x12a7   : > { %17941 = vst [vmem:[#allocation75_spill] sm:$0xff] %v16927_v46 }
0x12a8   : > { %v16891_v62 = vpop.eup %14479 }
0x12a9   : > { %v16893_v16 = vpop.eup %14481  ;;  %v8611_v0 = vmul.f32 %v16891_v62, %v16891_v62 }
0x12aa   : > { %v8612_v15 = vmul.f32 %v16893_v16, %v16893_v16 }
0x12ab   : > { %v8613_v41 = vsel %vm3715_vm5, %v8611_v0, 0.0  ;;  %v8667_v0 = vld [vmem:[%s17880_s2 + $0x168] sm:$0xff] }
0x12ac   : > { %v8614_v24 = vsel %vm3715_vm5, %v8612_v15, 0.0  ;;  %v8669_v15 = vld [vmem:[%s17880_s2 + $0x178] sm:$0xff] }
0x12ad   : > { %v8615_v32 = vadd.f32 %v8614_v24, %v8613_v41  ;;  %v8774_v41 = vand.u32 4294901760, %v8667_v0  ;;  %v8778_v24 = vand.u32 4294901760, %v8669_v15 }
0x12af   : > { %8616 = vadd.xlane.f32.xlu0 %v8615_v32  ;;  %v8666_v32 = vld [vmem:[%s17880_s2 + $0x160] sm:$0xff]  ;;  %v16915_v58 = vpack.c.bf16 %v8778_v24, %v8774_v41  ;;  %v16955_v38 = vsub.f32 %v8669_v15, %v8778_v24  ;;  %v17764_v15 = vand.u32 4294901760, %v16715_v4  ;;  %v17761_v24 = vand.u32 4294901760, %v16726_v35 }
0x12b0   : > { %v8776_v6 = vand.u32 4294901760, %v8666_v32 }
0x12b1   : > { %17938 = vst [vmem:[#allocation72_spill] sm:$0xff] %v16915_v58  ;;  %13569 = vmatprep.subr.bf16.mxu0 %v16915_v58  ;;  %v8790_v58 = vand.u32 4294901760, %v8675_v2 }
0x12b2   : > { %v16917_v53 = vpack.c.bf16 %v8780_v28, %v8776_v6  ;;  %v8682_v28 = vld [vmem:[%s17880_s2 + $0x1e0] sm:$0xff] }
0x12b3   : > { %v16935_v44 = vpack.c.bf16 %v8794_v27, %v8790_v58  ;;  %v16971_v31 = vsub.f32 %v8675_v2, %v8790_v58  ;;  %v8806_v27 = vand.u32 4294901760, %v8683_v19 }
0x12b4   : > { %17939 = vst [vmem:[#allocation73_spill] sm:$0xff] %v16917_v53  ;;  %13571 = vmatpush1.bf16.msra.mxu0 %v16917_v53  ;;  %v8792_v53 = vand.u32 4294901760, %v8674_v52 }
0x12b5   : > { %13573 = vmatprep.subr.bf16.mxu0 %v16925_v43  ;;  %17942 = vst [vmem:[#allocation76_spill] sm:$0xff] %v16935_v44  ;;  %v8798_v43 = vand.u32 4294901760, %v8679_v50  ;;  %v16999_v48 = vsub.f32 %v8683_v19, %v8806_v27  ;;  %v17762_v19 = vand.u32 4294901760, %v16739_v55 }
0x12b6   : > { %v16937_v36 = vpack.c.bf16 %v8796_v23, %v8792_v53  ;;  %v16975_v29 = vsub.f32 %v8674_v52, %v8792_v53  ;;  %v17767_v52 = vand.u32 4294901760, %v16711_v37 }
0x12b7   : > { %v16981_v17 = vpack.c.bf16 %v8802_v42, %v8798_v43  ;;  %v16983_v1 = vsub.f32 %v8679_v50, %v8798_v43  ;;  %v16997_v42 = vpack.c.bf16 %v8810_v25, %v8806_v27  ;;  %v8846_v43 = vsub.f32 %v16713_v47, %v17766_v5 }
0x12b8   : > { %13575 = vmatpush1.bf16.msra.mxu0 %v16927_v46  ;;  %17943 = vst [vmem:[#allocation77_spill] sm:$0xff] %v16937_v36  ;;  %v8804_v46 = vand.u32 4294901760, %v8680_v7  ;;  %v8834_v50 = vsub.f32 %v16711_v37, %v17767_v52 }
0x12b9   : > { %13577 = vmatprep.subr.bf16.mxu0 %v16935_v44  ;;  %v16953_v44 = vsub.f32 %v8667_v0, %v8774_v41  ;;  %17945 = vst [vmem:[#allocation79_spill] sm:$0xff] %v16981_v17  ;;  %17948 = vst [vmem:[#allocation82_spill] sm:$0xff] %v16997_v42  ;;  %v8847_v58 = vand.u32 4294901760, %v8846_v43  ;;  %v17763_v41 = vand.u32 4294901760, %v16722_v45 }
0x12ba   : > { %v16987_v3 = vpack.c.bf16 %v8804_v46, %v8800_v54  ;;  %v16991_v2 = vsub.f32 %v8680_v7, %v8804_v46  ;;  %v17001_v54 = vsub.f32 %v8685_v61, %v8810_v25  ;;  %v8835_v53 = vand.u32 4294901760, %v8834_v50 }
0x12bb   : > { %v17765_v61 = vand.u32 4294901760, %v16741_v34  ;;  %v8840_v25 = vsub.f32 %v16715_v4, %v17764_v15 }
0x12bc   : > { %13579 = vmatpush1.bf16.msra.mxu0 %v16937_v36  ;;  %v16957_v36 = vsub.f32 %v8666_v32, %v8776_v6  ;;  %v16977_v6 = vsub.f32 %v8676_v57, %v8796_v23  ;;  %17946 = vst [vmem:[#allocation80_spill] sm:$0xff] %v16987_v3  ;;  %17947 = vst [vmem:[#allocation81_spill] sm:$0xff] %v16991_v2  ;;  %v8808_v57 = vand.u32 4294901760, %v8682_v28  ;;  %v8812_v23 = vand.u32 4294901760, %v8684_v49 }
0x12bd   : > { %13581 = vmatprep.subr.bf16.mxu0 %v16981_v17  ;;  %17949 = vst [vmem:[#allocation83_spill] sm:$0xff] %v17001_v54  ;;  %v13588_v51 = vpack.c.bf16 %v8847_v58, %v8835_v53  ;;  %v17760_v32 = vand.u32 4294901760, %v16730_v21  ;;  %v8876_v53 = vsub.f32 %v16741_v34, %v17765_v61  ;;  %v17768_v58 = vand.u32 4294901760, %v16743_v40 }
0x12be   : > { %17944 = vst [vmem:[#allocation78_spill] sm:$0xff] %v16977_v6  ;;  %v17003_v46 = vpack.c.bf16 %v8812_v23, %v8808_v57  ;;  %v17005_v7 = vsub.f32 %v8682_v28, %v8808_v57  ;;  %v17007_v39 = vsub.f32 %v8684_v49, %v8812_v23  ;;  %v8852_v57 = vsub.f32 %v16722_v45, %v17763_v41 }
0x12bf   : > { %v8858_v23 = vsub.f32 %v16726_v35, %v17761_v24  ;;  %v8870_v50 = vsub.f32 %v16730_v21, %v17760_v32  ;;  %v8841_v24 = vand.u32 4294901760, %v8840_v25  ;;  %v17957_v25 = vld [vmem:[#allocation30_spill] sm:$0xff] }
0x12c0   : > { %13583 = vmatpush1.bf16.msra.mxu0 %v16987_v3  ;;  %17950 = vst [vmem:[#allocation84_spill] sm:$0xff] %v17003_v46  ;;  %17951 = vst [vmem:[#allocation85_spill] sm:$0xff] %v17007_v39  ;;  %v17961_v3 = vld [vmem:[#allocation32_spill] sm:$0xff] }
0x12c1   : > { %13585 = vmatprep.subr.bf16.mxu0 %v16997_v42  ;;  %v8859_v41 = vand.u32 4294901760, %v8858_v23  ;;  %v8871_v15 = vand.u32 4294901760, %v8870_v50  ;;  %v17960_v42 = vld [vmem:[#allocation31_spill] sm:$0xff] }
0x12c3   : > { %v13592_v32 = vpack.c.bf16 %v8871_v15, %v8859_v41 }
0x12c4   : > { %13587 = vmatpush1.bf16.msra.mxu0 %v17003_v46 }
0x12c5   : > { %13589 = vmatprep.subr.bf16.mxu0 %v13588_v51  ;;  %v8877_v51 = vand.u32 4294901760, %v8876_v53 }
0x133c   : > { %v8617_v10 = vpop.xlane.xlu0 %8616 }
0x133d   : > { %v8618_v0 = vmax.f32 %v8617_v10, 1e-24 }
0x133f   : > { %14483 = vrsqrt.f32 %v8618_v0 }
0x1349   : > { %v14484_v28 = vpop.eup %14483 }
0x134a   : > { %v8620_v49 = vmul.f32 %v14484_v28, %v16891_v62  ;;  %v8621_v27 = vmul.f32 %v14484_v28, %v16893_v16  ;;  %v8864_v16 = vsub.f32 %v16739_v55, %v17762_v19  ;;  %v8853_v19 = vand.u32 4294901760, %v8852_v57  ;;  %v17963_v55 = vld [vmem:[#allocation34_spill] sm:$0xff] }
0x134b   : > { %v17795_v57 = vand.u32 4294901760, %v17960_v42 }
0x134c   : > { %v17037_v43 = vand.u32 4294901760, %v8620_v49  ;;  %v17039_v62 = vand.u32 4294901760, %v8621_v27  ;;  %v8865_v52 = vand.u32 4294901760, %v8864_v16  ;;  %v17958_v16 = vand.u32 4294901760, %v16754_v33 }
0x134d   : > { %v13590_v46 = vpack.c.bf16 %v8853_v19, %v8841_v24  ;;  %v17966_v19 = vld [vmem:[#allocation35_spill] sm:$0xff] }
0x134e   : > { %17952 = vst [vmem:[#allocation86_spill] sm:$0xff] %v17037_v43  ;;  %17953 = vst [vmem:[#allocation87_spill] sm:$0xff] %v17039_v62  ;;  %v17050_v10 = vsub.f32 %v8621_v27, %v17039_v62  ;;  %v17053_v0 = vsub.f32 %v8620_v49, %v17037_v43  ;;  %v8882_v27 = vsub.f32 %v16743_v40, %v17768_v58  ;;  %v17956_v49 = vand.u32 4294901760, %v16750_v59  ;;  %v17962_v40 = vld [vmem:[#allocation33_spill] sm:$0xff] }
0x134f   : > { %v8888_v53 = vsub.f32 %v16754_v33, %v17958_v16  ;;  %v17959_v58 = vand.u32 4294901760, %v16757_v60  ;;  %v17964_v16 = vand.u32 4294901760, %v16759_v22  ;;  %v13594_v34 = vpack.c.bf16 %v8877_v51, %v8865_v52 }
0x1350   : > { %17954 = vst [vmem:[#allocation88_spill] sm:$0xff] %v17050_v10  ;;  %17955 = vst [vmem:[#allocation89_spill] sm:$0xff] %v17053_v0  ;;  %v17779_v61 = vand.u32 4294901760, %v17050_v10  ;;  %v17786_v5 = vand.u32 4294901760, %v17053_v0  ;;  %v8894_v28 = vsub.f32 %v16750_v59, %v17956_v49  ;;  %v17972_v52 = vand.u32 4294901760, %v17963_v55 }
0x1351   : > { %v8900_v49 = vsub.f32 %v16757_v60, %v17959_v58  ;;  %v8906_v33 = vsub.f32 %v16759_v22, %v17964_v16  ;;  %v17965_v58 = vand.u32 4294901760, %v17957_v25  ;;  %v8889_v41 = vand.u32 4294901760, %v8888_v53  ;;  %v17969_v16 = vld [vmem:[#allocation40_spill] sm:$0xff] }
0x1352   : > { %v8817_v23 = vsub.f32 %v17050_v10, %v17779_v61  ;;  %v8823_v50 = vsub.f32 %v17053_v0, %v17786_v5  ;;  %v8883_v0 = vand.u32 4294901760, %v8882_v27  ;;  %v8895_v10 = vand.u32 4294901760, %v8894_v28  ;;  %v17968_v27 = vld [vmem:[#allocation39_spill] sm:$0xff] }
0x1353   : > { %v8918_v15 = vsub.f32 %v17957_v25, %v17965_v58  ;;  %v8901_v24 = vand.u32 4294901760, %v8900_v49  ;;  %v8912_v28 = vsub.f32 %v17960_v42, %v17795_v57  ;;  %v17971_v49 = vand.u32 4294901760, %v17962_v40  ;;  %v17979_v42 = vld [vmem:[#allocation46_spill] sm:$0xff] }
0x1354   : > { %v8818_v59 = vand.u32 4294901760, %v8817_v23  ;;  %v8824_v61 = vand.u32 4294901760, %v8823_v50  ;;  %v17799_v23 = vand.u32 4294901760, %v17966_v19  ;;  %v17967_v50 = vld [vmem:[#allocation36_spill] sm:$0xff]  ;;  %v8942_v51 = vsub.f32 %v17963_v55, %v17972_v52  ;;  %v17978_v55 = vld [vmem:[#allocation45_spill] sm:$0xff] }
0x1355   : > { %v17801_v17 = vand.u32 4294901760, %v17967_v50  ;;  %v13596_v58 = vpack.c.bf16 %v8895_v10, %v8883_v0  ;;  %v8907_v57 = vand.u32 4294901760, %v8906_v33  ;;  %v8919_v5 = vand.u32 4294901760, %v8918_v15  ;;  %v17975_v10 = vld [vmem:[#allocation41_spill] sm:$0xff]  ;;  %v17976_v0 = vld [vmem:[#allocation42_spill] sm:$0xff] }
0x1356   : > { %8819 = vmatprep.mubr.f32.mxu0 %v8818_v59  ;;  %v17970_v59 = vand.u32 4294901760, %v17961_v3  ;;  %v13598_v22 = vpack.c.bf16 %v8901_v24, %v8889_v41  ;;  %v17813_v15 = vand.u32 4294901760, %v17976_v0  ;;  %v8913_v41 = vand.u32 4294901760, %v8912_v28 }
0x1357   : > { %8825 = vmatmul.mubr.f32.vlgmr.msra.gmra.mrb[244].mxu0 %v8824_v61  ;;  %v8930_v61 = vsub.f32 %v17962_v40, %v17971_v49  ;;  %v17974_v40 = vand.u32 4294901760, %v17969_v16  ;;  %v17816_v25 = vand.u32 4294901760, %v17979_v42 }
0x1358   : > { %13591 = vmatpush1.bf16.msra.mxu0 %v13590_v46  ;;  %9216 = vmatprep.mubr.f32.mxu0 %v17039_v62  ;;  %v8924_v53 = vsub.f32 %v17961_v3, %v17970_v59  ;;  %v8936_v46 = vsub.f32 %v17966_v19, %v17799_v23  ;;  %v8948_v59 = vsub.f32 %v17967_v50, %v17801_v17  ;;  %v17973_v62 = vand.u32 4294901760, %v17968_v27  ;;  %v17977_v17 = vld [vmem:[#allocation43_spill] sm:$0xff] }
0x1359   : > { %13593 = vmatprep.subr.bf16.mxu0 %v13592_v32  ;;  %v8966_v32 = vsub.f32 %v17969_v16, %v17974_v40  ;;  %v8931_v52 = vand.u32 4294901760, %v8930_v61  ;;  %v8943_v23 = vand.u32 4294901760, %v8942_v51  ;;  %v13600_v19 = vpack.c.bf16 %v8919_v5, %v8907_v57  ;;  %v17980_v40 = vld [vmem:[#allocation47_spill] sm:$0xff] }
0x135a   : > { %v8954_v49 = vsub.f32 %v17968_v27, %v17973_v62  ;;  %v8925_v24 = vand.u32 4294901760, %v8924_v53  ;;  %v17812_v50 = vand.u32 4294901760, %v17977_v17  ;;  %v17811_v3 = vand.u32 4294901760, %v17978_v55 }
0x135b   : > { %v8937_v62 = vand.u32 4294901760, %v8936_v46  ;;  %v8949_v27 = vand.u32 4294901760, %v8948_v59  ;;  %v17818_v16 = vand.u32 4294901760, %v17980_v40  ;;  %v8967_v60 = vand.u32 4294901760, %v8966_v32  ;;  %v17983_v59 = vld [vmem:[#allocation50_spill] sm:$0xff] }
0x135c   : > { %13595 = vmatpush1.bf16.msra.mxu0 %v13594_v34  ;;  %v8955_v33 = vand.u32 4294901760, %v8954_v49  ;;  %v17981_v34 = vand.u32 4294901760, %v17975_v10  ;;  %v8972_v5 = vsub.f32 %v17976_v0, %v17813_v15  ;;  %v13602_v57 = vpack.c.bf16 %v8925_v24, %v8913_v41  ;;  %v17986_v15 = vld [vmem:[#allocation54_spill] sm:$0xff]  ;;  %v17987_v49 = vld [vmem:[#allocation56_spill] sm:$0xff] }
0x135d   : > { %13597 = vmatprep.subr.bf16.mxu0 %v13596_v58  ;;  %v13604_v53 = vpack.c.bf16 %v8943_v23, %v8931_v52  ;;  %v8978_v61 = vsub.f32 %v17977_v17, %v17812_v50  ;;  %v8990_v51 = vsub.f32 %v17978_v55, %v17811_v3  ;;  %v17982_v58 = vld [vmem:[#allocation49_spill] sm:$0xff]  ;;  %v8984_v32 = vsub.f32 %v17979_v42, %v17816_v25  ;;  %v17984_v52 = vld [vmem:[#allocation52_spill] sm:$0xff] }
0x135e   : > { %v8960_v28 = vsub.f32 %v17975_v10, %v17981_v34  ;;  %v13608_v23 = vpack.c.bf16 %v8967_v60, %v8955_v33  ;;  %v8973_v24 = vand.u32 4294901760, %v8972_v5  ;;  %v17985_v3 = vld [vmem:[#allocation53_spill] sm:$0xff]  ;;  %v17988_v42 = vand.u32 4294901760, %v17982_v58  ;;  %v17992_v34 = vld [vmem:[#allocation60_spill] sm:$0xff] }
0x135f   : > { %v8979_v17 = vand.u32 4294901760, %v8978_v61  ;;  %v8991_v25 = vand.u32 4294901760, %v8990_v51  ;;  %v17989_v60 = vand.u32 4294901760, %v17983_v59  ;;  %v8985_v33 = vand.u32 4294901760, %v8984_v32 }
0x1360   : > { %13599 = vmatpush1.bf16.msra.mxu0 %v13598_v22  ;;  %v8996_v22 = vsub.f32 %v17980_v40, %v17818_v16  ;;  %v8961_v41 = vand.u32 4294901760, %v8960_v28  ;;  %v9002_v16 = vsub.f32 %v17982_v58, %v17988_v42  ;;  %v17990_v28 = vld [vmem:[#allocation57_spill] sm:$0xff]  ;;  %v17994_v51 = vand.u32 4294901760, %v17984_v52 }
0x1361   : > { %13601 = vmatprep.subr.bf16.mxu0 %v13600_v19  ;;  %v13606_v19 = vpack.c.bf16 %v8949_v27, %v8937_v62  ;;  %v9014_v27 = vsub.f32 %v17983_v59, %v17989_v60  ;;  %v17823_v5 = vand.u32 4294901760, %v17990_v28  ;;  %v17995_v58 = vand.u32 4294901760, %v17985_v3 }
0x1362   : > { %v8997_v62 = vand.u32 4294901760, %v8996_v22  ;;  %v13610_v46 = vpack.c.bf16 %v8973_v24, %v8961_v41  ;;  %v9008_v42 = vsub.f32 %v17984_v52, %v17994_v51  ;;  %v17996_v32 = vand.u32 4294901760, %v17986_v15 }
0x1363   : > { %v9020_v60 = vsub.f32 %v17985_v3, %v17995_v58  ;;  %v17997_v50 = vand.u32 4294901760, %v17987_v49  ;;  %v13612_v24 = vpack.c.bf16 %v8991_v25, %v8979_v17  ;;  %v9003_v61 = vand.u32 4294901760, %v9002_v16  ;;  %v18001_v17 = vld [vmem:[#allocation63_spill] sm:$0xff]  ;;  %v18002_v16 = vld [vmem:[#allocation64_spill] sm:$0xff] }
0x1364   : > { %13603 = vmatpush1.bf16.msra.mxu0 %v13602_v57  ;;  %v17991_v57 = vld [vmem:[#allocation58_spill] sm:$0xff]  ;;  %v9026_v22 = vsub.f32 %v17986_v15, %v17996_v32  ;;  %v13614_v55 = vpack.c.bf16 %v8997_v62, %v8985_v33  ;;  %v9032_v51 = vsub.f32 %v17990_v28, %v17823_v5  ;;  %v17999_v3 = vand.u32 4294901760, %v17992_v34 }
0x1365   : > { %13605 = vmatprep.subr.bf16.mxu0 %v13604_v53  ;;  %v17993_v53 = vld [vmem:[#allocation61_spill] sm:$0xff]  ;;  %v9038_v41 = vsub.f32 %v17987_v49, %v17997_v50  ;;  %v17998_v52 = vand.u32 4294901760, %v17991_v57  ;;  %v9021_v33 = vand.u32 4294901760, %v9020_v60  ;;  %v17830_v49 = vand.u32 4294901760, %v16949_v13 }
0x1366   : > { %v9050_v32 = vsub.f32 %v17992_v34, %v17999_v3  ;;  %v18000_v15 = vand.u32 4294901760, %v17993_v53  ;;  %v9027_v62 = vand.u32 4294901760, %v9026_v22  ;;  %v9033_v3 = vand.u32 4294901760, %v9032_v51 }
0x1367   : > { %v9044_v58 = vsub.f32 %v17991_v57, %v17998_v52  ;;  %v9039_v5 = vand.u32 4294901760, %v9038_v41  ;;  %v17841_v52 = vand.u32 4294901760, %v16945_v14  ;;  %v17829_v57 = vand.u32 4294901760, %v16947_v9 }
0x1368   : > { %13607 = vmatpush1.bf16.msra.mxu0 %v13606_v19  ;;  %v9015_v19 = vand.u32 4294901760, %v9014_v27  ;;  %v9062_v50 = vsub.f32 %v17993_v53, %v18000_v15  ;;  %v9009_v27 = vand.u32 4294901760, %v9008_v42  ;;  %v17831_v15 = vand.u32 4294901760, %v16951_v56 }
0x1369   : > { %13609 = vmatprep.subr.bf16.mxu0 %v13608_v23  ;;  %v17842_v23 = vand.u32 4294901760, %v18002_v16  ;;  %v9045_v34 = vand.u32 4294901760, %v9044_v58  ;;  %v9051_v25 = vand.u32 4294901760, %v9050_v32  ;;  %v13620_v22 = vpack.c.bf16 %v9039_v5, %v9027_v62 }
0x136a   : > { %v13616_v28 = vpack.c.bf16 %v9015_v19, %v9003_v61  ;;  %v9063_v53 = vand.u32 4294901760, %v9062_v50  ;;  %v13618_v60 = vpack.c.bf16 %v9021_v33, %v9009_v27  ;;  %v9074_v41 = vsub.f32 %v16945_v14, %v17841_v52 }
0x136b   : > { %v9068_v61 = vsub.f32 %v18002_v16, %v17842_v23  ;;  %v17840_v19 = vand.u32 4294901760, %v16953_v44  ;;  %v17832_v51 = vand.u32 4294901760, %v16955_v38  ;;  %v9080_v58 = vsub.f32 %v16949_v13, %v17830_v49 }
0x136c   : > { %13611 = vmatpush1.bf16.msra.mxu0 %v13610_v46  ;;  %v18003_v46 = vand.u32 4294901760, %v18001_v17  ;;  %v13624_v5 = vpack.c.bf16 %v9063_v53, %v9051_v25  ;;  %v17833_v27 = vand.u32 4294901760, %v16957_v36  ;;  %v17834_v33 = vand.u32 4294901760, %v16959_v63 }
0x136d   : > { %13613 = vmatprep.subr.bf16.mxu0 %v13612_v24  ;;  %v9086_v24 = vsub.f32 %v16947_v9, %v17829_v57  ;;  %v9069_v50 = vand.u32 4294901760, %v9068_v61  ;;  %v17835_v62 = vand.u32 4294901760, %v16961_v26  ;;  %v9075_v57 = vand.u32 4294901760, %v9074_v41 }
0x136e   : > { %v9056_v42 = vsub.f32 %v18001_v17, %v18003_v46  ;;  %v17838_v46 = vand.u32 4294901760, %v16963_v30  ;;  %v9081_v53 = vand.u32 4294901760, %v9080_v58  ;;  %v9104_v41 = vsub.f32 %v16957_v36, %v17833_v27 }
0x136f   : > { %v9087_v49 = vand.u32 4294901760, %v9086_v24  ;;  %v9116_v24 = vsub.f32 %v16959_v63, %v17834_v33  ;;  %v9122_v58 = vsub.f32 %v16961_v26, %v17835_v62 }
0x1370   : > { %13615 = vmatpush1.bf16.msra.mxu0 %v13614_v55  ;;  %v9092_v55 = vsub.f32 %v16951_v56, %v17831_v15  ;;  %v9057_v32 = vand.u32 4294901760, %v9056_v42  ;;  %v9098_v15 = vsub.f32 %v16953_v44, %v17840_v19  ;;  %v17837_v42 = vand.u32 4294901760, %v16967_v11 }
0x1371   : > { %13617 = vmatprep.subr.bf16.mxu0 %v13616_v28  ;;  %v13622_v28 = vpack.c.bf16 %v9045_v34, %v9033_v3  ;;  %v9110_v34 = vsub.f32 %v16955_v38, %v17832_v51  ;;  %v17836_v3 = vand.u32 4294901760, %v16965_v18 }
0x1372   : > { %v9093_v25 = vand.u32 4294901760, %v9092_v55  ;;  %v13626_v61 = vpack.c.bf16 %v9069_v50, %v9057_v32  ;;  %v9134_v55 = vsub.f32 %v16963_v30, %v17838_v46  ;;  %v13628_v32 = vpack.c.bf16 %v9087_v49, %v9075_v57 }
0x1373   : > { %v9099_v50 = vand.u32 4294901760, %v9098_v15  ;;  %v9128_v27 = vsub.f32 %v16965_v18, %v17836_v3  ;;  %v9140_v33 = vsub.f32 %v16967_v11, %v17837_v42  ;;  %v17853_v49 = vand.u32 4294901760, %v16975_v29 }
0x1374   : > { %13619 = vmatpush1.bf16.msra.mxu0 %v13618_v60  ;;  %v17839_v60 = vand.u32 4294901760, %v16971_v31  ;;  %v13630_v51 = vpack.c.bf16 %v9093_v25, %v9081_v53  ;;  %v17852_v57 = vand.u32 4294901760, %v16977_v6  ;;  %v9105_v15 = vand.u32 4294901760, %v9104_v41 }
0x1375   : > { %13621 = vmatprep.subr.bf16.mxu0 %v13620_v22  ;;  %v17843_v22 = vand.u32 4294901760, %v16973_v12  ;;  %v9123_v53 = vand.u32 4294901760, %v9122_v58  ;;  %v9135_v25 = vand.u32 4294901760, %v9134_v55  ;;  %v17851_v42 = vand.u32 4294901760, %v16983_v1 }
0x1376   : > { %v9146_v62 = vsub.f32 %v16971_v31, %v17839_v60  ;;  %v17844_v46 = vand.u32 4294901760, %v16985_v20  ;;  %v9129_v60 = vand.u32 4294901760, %v9128_v27  ;;  %v9141_v19 = vand.u32 4294901760, %v9140_v33 }
0x1377   : > { %v17850_v58 = vand.u32 4294901760, %v16989_v8  ;;  %v17846_v55 = vand.u32 4294901760, %v16991_v2  ;;  %v9170_v27 = vsub.f32 %v16983_v1, %v17851_v42  ;;  %v18022_v42 = vld [vmem:[#allocation45_spill] sm:$0xff] }
0x1378   : > { %13623 = vmatpush1.bf16.msra.mxu0 %v13622_v28  ;;  %v9111_v28 = vand.u32 4294901760, %v9110_v34  ;;  %v9117_v34 = vand.u32 4294901760, %v9116_v24  ;;  %v9147_v52 = vand.u32 4294901760, %v9146_v62  ;;  %v13636_v24 = vpack.c.bf16 %v9135_v25, %v9123_v53 }
0x1379   : > { %13625 = vmatprep.subr.bf16.mxu0 %v13624_v5  ;;  %v9158_v5 = vsub.f32 %v16973_v12, %v17843_v22  ;;  %v9152_v22 = vsub.f32 %v16975_v29, %v17853_v49  ;;  %v9182_v33 = vsub.f32 %v16985_v20, %v17844_v46  ;;  %v17845_v62 = vand.u32 4294901760, %v16999_v48 }
0x137a   : > { %v13632_v3 = vpack.c.bf16 %v9111_v28, %v9099_v50  ;;  %v13634_v41 = vpack.c.bf16 %v9117_v34, %v9105_v15  ;;  %v9188_v15 = vsub.f32 %v16991_v2, %v17846_v55  ;;  %v17849_v34 = vand.u32 4294901760, %v17005_v7 }
0x137b   : > { %v9159_v23 = vand.u32 4294901760, %v9158_v5  ;;  %v9153_v28 = vand.u32 4294901760, %v9152_v22  ;;  %v17848_v53 = vand.u32 4294901760, %v17007_v39  ;;  %v9171_v25 = vand.u32 4294901760, %v9170_v27 }
0x137c   : > { %13627 = vmatpush1.bf16.msra.mxu0 %v13626_v61  ;;  %v9164_v61 = vsub.f32 %v16977_v6, %v17852_v57  ;;  %v9183_v46 = vand.u32 4294901760, %v9182_v33  ;;  %v9189_v22 = vand.u32 4294901760, %v9188_v15  ;;  %v18005_v15 = vld [vmem:[#allocation20_spill] sm:$0xff] }
0x137d   : > { %13629 = vmatprep.subr.bf16.mxu0 %v13628_v32  ;;  %v17847_v32 = vand.u32 4294901760, %v17001_v54  ;;  %v13640_v50 = vpack.c.bf16 %v9159_v23, %v9147_v52  ;;  %v9194_v23 = vsub.f32 %v16999_v48, %v17845_v62 }
0x137e   : > { %v9165_v5 = vand.u32 4294901760, %v9164_v61  ;;  %v9200_v61 = vsub.f32 %v17005_v7, %v17849_v34  ;;  %v18020_v34 = vld [vmem:[#allocation40_spill] sm:$0xff] }
0x137f   : > { %v9206_v52 = vsub.f32 %v17001_v54, %v17847_v32  ;;  %v9195_v27 = vand.u32 4294901760, %v9194_v23 }
0x1380   : > { %13631 = vmatpush1.bf16.msra.mxu0 %v13630_v51  ;;  %v13638_v51 = vpack.c.bf16 %v9141_v19, %v9129_v60  ;;  %v13642_v19 = vpack.c.bf16 %v9165_v5, %v9153_v28  ;;  %v9201_v55 = vand.u32 4294901760, %v9200_v61  ;;  %v13652_v5 = vpack.c.bf16 %v16713_v47, %v16711_v37  ;;  %v18012_v61 = vld [vmem:[#allocation30_spill] sm:$0xff] }
0x1381   : > { %13633 = vmatprep.subr.bf16.mxu0 %v13632_v3  ;;  %v9176_v3 = vsub.f32 %v16989_v8, %v17850_v58  ;;  %v9207_v33 = vand.u32 4294901760, %v9206_v52  ;;  %v18009_v52 = vld [vmem:[#allocation26_spill] sm:$0xff] }
0x1383   : > { %v9177_v60 = vand.u32 4294901760, %v9176_v3  ;;  %v13654_v3 = vpack.c.bf16 %v16722_v45, %v16715_v4 }
0x1384   : > { %13635 = vmatpush1.bf16.msra.mxu0 %v13634_v41  ;;  %v9212_v41 = vsub.f32 %v17007_v39, %v17848_v53 }
0x1385   : > { %13637 = vmatprep.subr.bf16.mxu0 %v13636_v24  ;;  %v13644_v24 = vpack.c.bf16 %v9183_v46, %v9171_v25  ;;  %v13646_v62 = vpack.c.bf16 %v9189_v22, %v9177_v60  ;;  %v13656_v46 = vpack.c.bf16 %v16730_v21, %v16726_v35  ;;  %v18008_v25 = vld [vmem:[#allocation24_spill] sm:$0xff] }
0x1386   : > { %v9213_v32 = vand.u32 4294901760, %v9212_v41  ;;  %v18011_v22 = vld [vmem:[#allocation28_spill] sm:$0xff] }
0x1387   : > { %v13664_v41 = vpack.c.bf16 %v18012_v61, %v18011_v22 }
0x1388   : > { %13639 = vmatpush1.bf16.msra.mxu0 %v13638_v51  ;;  %v13648_v51 = vpack.c.bf16 %v9207_v33, %v9195_v27  ;;  %v13650_v28 = vpack.c.bf16 %v9213_v32, %v9201_v55  ;;  %v18007_v32 = vld [vmem:[#allocation22_spill] sm:$0xff]  ;;  %v18014_v27 = vld [vmem:[#allocation32_spill] sm:$0xff] }
0x1389   : > { %13641 = vmatprep.subr.bf16.mxu0 %v13640_v50  ;;  %v18004_v50 = vld [vmem:[#allocation88_spill] sm:$0xff]  ;;  %v13660_v23 = vpack.c.bf16 %v18008_v25, %v18007_v32 }
0x138c   : > { %13643 = vmatpush1.bf16.msra.mxu0 %v13642_v19  ;;  %v18010_v19 = vld [vmem:[#allocation27_spill] sm:$0xff] }
0x138d   : > { %13645 = vmatprep.subr.bf16.mxu0 %v13644_v24  ;;  %v13662_v60 = vpack.c.bf16 %v18010_v19, %v18009_v52  ;;  %v18013_v24 = vld [vmem:[#allocation31_spill] sm:$0xff] }
0x138e   : > { %v13666_v33 = vpack.c.bf16 %v18014_v27, %v18013_v24 }
0x1390   : > { %13647 = vmatpush1.bf16.msra.mxu0 %v13646_v62  ;;  %v18006_v62 = vld [vmem:[#allocation21_spill] sm:$0xff] }
0x1391   : > { %13649 = vmatprep.subr.bf16.mxu0 %v13648_v51  ;;  %v13658_v55 = vpack.c.bf16 %v18006_v62, %v18005_v15  ;;  %v18015_v51 = vld [vmem:[#allocation33_spill] sm:$0xff] }
0x1394   : > { %13651 = vmatpush1.bf16.msra.mxu0 %v13650_v28  ;;  %v18016_v28 = vld [vmem:[#allocation34_spill] sm:$0xff] }
0x1395   : > { %13653 = vmatprep.subr.bf16.mxu0 %v13652_v5  ;;  %v13668_v5 = vpack.c.bf16 %v18016_v28, %v18015_v51 }
0x1397   : > { %9218 = vmatmul.mubr.f32.vlgmr.msra.gmra.mrb[244].mxu0 %v17037_v43 }
0x1398   : > { %13655 = vmatpush1.bf16.msra.mxu0 %v13654_v3  ;;  %9418 = vmatprep.mubr.f32.mxu0 %v18004_v50  ;;  %v18017_v3 = vld [vmem:[#allocation35_spill] sm:$0xff] }
0x1399   : > { %13657 = vmatprep.subr.bf16.mxu0 %v13656_v46  ;;  %v18018_v46 = vld [vmem:[#allocation36_spill] sm:$0xff] }
0x139a   : > { %v13670_v53 = vpack.c.bf16 %v18018_v46, %v18017_v3  ;;  %v18026_v46 = vld [vmem:[#allocation53_spill] sm:$0xff] }
0x139c   : > { %13659 = vmatpush1.bf16.msra.mxu0 %v13658_v55  ;;  %v18019_v55 = vld [vmem:[#allocation39_spill] sm:$0xff] }
0x139d   : > { %13661 = vmatprep.subr.bf16.mxu0 %v13660_v23  ;;  %v13672_v58 = vpack.c.bf16 %v18020_v34, %v18019_v55  ;;  %v13674_v23 = vpack.c.bf16 %v17976_v0, %v17975_v10  ;;  %v18028_v55 = vld [vmem:[#allocation56_spill] sm:$0xff]  ;;  %v18030_v10 = vld [vmem:[#allocation58_spill] sm:$0xff] }
0x13a0   : > { %13663 = vmatpush1.bf16.msra.mxu0 %v13662_v60  ;;  %v18021_v60 = vld [vmem:[#allocation43_spill] sm:$0xff] }
0x13a1   : > { %13665 = vmatprep.subr.bf16.mxu0 %v13664_v41  ;;  %v13676_v57 = vpack.c.bf16 %v18022_v42, %v18021_v60  ;;  %v18023_v41 = vld [vmem:[#allocation46_spill] sm:$0xff]  ;;  %v18032_v60 = vld [vmem:[#allocation61_spill] sm:$0xff] }
0x13a2   : > { %v13678_v49 = vpack.c.bf16 %v17980_v40, %v18023_v41 }
0x13a4   : > { %13667 = vmatpush1.bf16.msra.mxu0 %v13666_v33  ;;  %v18024_v33 = vld [vmem:[#allocation49_spill] sm:$0xff] }
0x13a5   : > { %13669 = vmatprep.subr.bf16.mxu0 %v13668_v5  ;;  %v13680_v43 = vpack.c.bf16 %v17983_v59, %v18024_v33  ;;  %v18025_v5 = vld [vmem:[#allocation52_spill] sm:$0xff] }
0x13a6   : > { %v13682_v34 = vpack.c.bf16 %v18026_v46, %v18025_v5 }
0x13a8   : > { %13671 = vmatpush1.bf16.msra.mxu0 %v13670_v53  ;;  %v18027_v53 = vld [vmem:[#allocation54_spill] sm:$0xff] }
0x13a9   : > { %13673 = vmatprep.subr.bf16.mxu0 %v13672_v58  ;;  %v13684_v0 = vpack.c.bf16 %v18028_v55, %v18027_v53  ;;  %v18029_v58 = vld [vmem:[#allocation57_spill] sm:$0xff] }
0x13aa   : > { %v13686_v42 = vpack.c.bf16 %v18030_v10, %v18029_v58 }
0x13ac   : > { %13675 = vmatpush1.bf16.msra.mxu0 %v13674_v23  ;;  %v18031_v23 = vld [vmem:[#allocation60_spill] sm:$0xff] }
0x13ad   : > { %13677 = vmatprep.subr.bf16.mxu0 %v13676_v57  ;;  %v13688_v40 = vpack.c.bf16 %v18032_v60, %v18031_v23  ;;  %v13690_v57 = vpack.c.bf16 %v18002_v16, %v18001_v17 }
0x13b0   : > { %13679 = vmatpush1.bf16.msra.mxu0 %v13678_v49  ;;  %v13692_v49 = vpack.c.bf16 %v16947_v9, %v16945_v14 }
0x13b1   : > { %13681 = vmatprep.subr.bf16.mxu0 %v13680_v43  ;;  %v13694_v43 = vpack.c.bf16 %v16951_v56, %v16949_v13 }
0x13b4   : > { %13683 = vmatpush1.bf16.msra.mxu0 %v13682_v34  ;;  %v13696_v34 = vpack.c.bf16 %v16955_v38, %v16953_v44 }
0x13b5   : > { %13685 = vmatprep.subr.bf16.mxu0 %v13684_v0  ;;  %v13698_v0 = vpack.c.bf16 %v16959_v63, %v16957_v36 }
0x13b8   : > { %13687 = vmatpush1.bf16.msra.mxu0 %v13686_v42  ;;  %v13700_v42 = vpack.c.bf16 %v16963_v30, %v16961_v26 }
0x13b9   : > { %13689 = vmatprep.subr.bf16.mxu0 %v13688_v40  ;;  %v13702_v40 = vpack.c.bf16 %v16967_v11, %v16965_v18 }
0x13bc   : > { %13691 = vmatpush1.bf16.msra.mxu0 %v13690_v57  ;;  %v13704_v57 = vpack.c.bf16 %v16973_v12, %v16971_v31 }
0x13bd   : > { %13693 = vmatprep.subr.bf16.mxu0 %v13692_v49  ;;  %v13706_v49 = vpack.c.bf16 %v16977_v6, %v16975_v29  ;;  %v18035_v6 = vld [vmem:[#allocation17_spill] sm:$0xff] }
0x13c0   : > { %13695 = vmatpush1.bf16.msra.mxu0 %v13694_v43  ;;  %v13708_v43 = vpack.c.bf16 %v16985_v20, %v16983_v1 }
0x13c1   : > { %13697 = vmatprep.subr.bf16.mxu0 %v13696_v34  ;;  %v13710_v34 = vpack.c.bf16 %v16991_v2, %v16989_v8  ;;  %v18037_v2 = vld [vmem:[#allocation18_spill] sm:$0xff] }
0x13c4   : > { %13699 = vmatpush1.bf16.msra.mxu0 %v13698_v0  ;;  %v13712_v0 = vpack.c.bf16 %v17001_v54, %v16999_v48  ;;  %v18039_v54 = vld [vmem:[#allocation23_spill] sm:$0xff] }
0x13c5   : > { %13701 = vmatprep.subr.bf16.mxu0 %v13700_v42  ;;  %v13714_v42 = vpack.c.bf16 %v17007_v39, %v17005_v7  ;;  %v18041_v39 = vld [vmem:[#allocation29_spill] sm:$0xff] }
0x13c8   : > { %13703 = vmatpush1.bf16.msra.mxu0 %v13702_v40  ;;  %v18033_v40 = vld [vmem:[#allocation16_spill] sm:$0xff] }
0x13c9   : > { %13705 = vmatprep.subr.bf16.mxu0 %v13704_v57  ;;  %v18034_v57 = vld [vmem:[#allocation89_spill] sm:$0xff] }
0x13cc   : > { %13707 = vmatpush1.bf16.msra.mxu0 %v13706_v49  ;;  %v18036_v49 = vand.u32 4294901760, %v18004_v50  ;;  %v18046_v50 = vld [vmem:[#allocation51_spill] sm:$0xff] }
0x13cd   : > { %13709 = vmatprep.subr.bf16.mxu0 %v13708_v43  ;;  %v18038_v43 = vld [vmem:[#allocation19_spill] sm:$0xff] }
0x13d0   : > { %13711 = vmatpush1.bf16.msra.mxu0 %v13710_v34  ;;  %v18040_v34 = vld [vmem:[#allocation25_spill] sm:$0xff] }
0x13d1   : > { %13713 = vmatprep.subr.bf16.mxu0 %v13712_v0  ;;  %v18042_v0 = vld [vmem:[#allocation37_spill] sm:$0xff] }
0x13d4   : > { %13715 = vmatpush1.bf16.msra.mxu0 %v13714_v42  ;;  %v18043_v42 = vld [vmem:[#allocation38_spill] sm:$0xff] }
0x13d5   : > { %13717 = vmatprep.subr.bf16.mxu0 %v18033_v40  ;;  %v18044_v40 = vld [vmem:[#allocation44_spill] sm:$0xff] }
0x13d7   : > { %9421 = vmatmul.mubr.f32.vlgmr.msra.gmra.mrb[244].mxu0 %v18034_v57 }
0x13d8   : > { %13719 = vmatpush1.bf16.msra.mxu0 %v18035_v6  ;;  %9558 = vmatprep.mubr.f32.mxu0 %v18036_v49  ;;  %v18045_v6 = vld [vmem:[#allocation48_spill] sm:$0xff]  ;;  %v18047_v49 = vld [vmem:[#allocation55_spill] sm:$0xff] }
0x13d9   : > { %13721 = vmatprep.subr.bf16.mxu0 %v18037_v2  ;;  %v18048_v2 = vld [vmem:[#allocation59_spill] sm:$0xff] }
0x13dc   : > { %13723 = vmatpush1.bf16.msra.mxu0 %v18038_v43  ;;  %v18049_v43 = vld [vmem:[#allocation62_spill] sm:$0xff] }
0x13dd   : > { %13725 = vmatprep.subr.bf16.mxu0 %v18039_v54  ;;  %v18050_v54 = vld [vmem:[#allocation65_spill] sm:$0xff] }
0x13e0   : > { %13727 = vmatpush1.bf16.msra.mxu0 %v18040_v34  ;;  %v18051_v34 = vld [vmem:[#allocation66_spill] sm:$0xff] }
0x13e1   : > { %13729 = vmatprep.subr.bf16.mxu0 %v18041_v39  ;;  %v18052_v39 = vld [vmem:[#allocation67_spill] sm:$0xff] }
0x13e4   : > { %13731 = vmatpush1.bf16.msra.mxu0 %v18042_v0  ;;  %v18053_v0 = vld [vmem:[#allocation68_spill] sm:$0xff] }
0x13e5   : > { %13733 = vmatprep.subr.bf16.mxu0 %v18043_v42  ;;  %v18054_v42 = vld [vmem:[#allocation69_spill] sm:$0xff] }
0x13e8   : > { %13735 = vmatpush1.bf16.msra.mxu0 %v18044_v40  ;;  %v18055_v40 = vld [vmem:[#allocation70_spill] sm:$0xff] }
0x13e9   : > { %13737 = vmatprep.subr.bf16.mxu0 %v18045_v6  ;;  %v18056_v6 = vld [vmem:[#allocation71_spill] sm:$0xff] }
0x13ec   : > { %13739 = vmatpush1.bf16.msra.mxu0 %v18046_v50  ;;  %v18057_v50 = vld [vmem:[#allocation72_spill] sm:$0xff] }
0x13ed   : > { %13741 = vmatprep.subr.bf16.mxu0 %v18047_v49 }
0x13f0   : > { %13743 = vmatpush1.bf16.msra.mxu0 %v18048_v2  ;;  %v18059_v2 = vld [vmem:[#allocation73_spill] sm:$0xff] }
0x13f1   : > { %13745 = vmatprep.subr.bf16.mxu0 %v18049_v43  ;;  %v18060_v43 = vld [vmem:[#allocation74_spill] sm:$0xff] }
0x13f4   : > { %13747 = vmatpush1.bf16.msra.mxu0 %v18050_v54  ;;  %v18069_v54 = vld [vmem:[#allocation84_spill] sm:$0xff] }
0x13f5   : > { %13749 = vmatprep.subr.bf16.mxu0 %v18051_v34  ;;  %v18061_v34 = vld [vmem:[#allocation75_spill] sm:$0xff] }
0x13f8   : > { %13751 = vmatpush1.bf16.msra.mxu0 %v18052_v39  ;;  %v18062_v39 = vld [vmem:[#allocation76_spill] sm:$0xff] }
0x13f9   : > { %13753 = vmatprep.subr.bf16.mxu0 %v18053_v0  ;;  %v18063_v0 = vld [vmem:[#allocation77_spill] sm:$0xff] }
0x13fc   : > { %13755 = vmatpush1.bf16.msra.mxu0 %v18054_v42  ;;  %v18064_v42 = vld [vmem:[#allocation79_spill] sm:$0xff] }
0x13fd   : > { %13757 = vmatprep.subr.bf16.mxu0 %v18055_v40  ;;  %v18065_v40 = vld [vmem:[#allocation80_spill] sm:$0xff] }
0x1400   : > { %13759 = vmatpush1.bf16.msra.mxu0 %v18056_v6  ;;  %v18066_v6 = vld [vmem:[#allocation82_spill] sm:$0xff] }
0x1401   : > { %13761 = vmatprep.subr.bf16.mxu0 %v18057_v50  ;;  %v18067_v50 = vand.u32 4294901760, %v16711_v37  ;;  %v9988_v37 = vld [vmem:[%s18058_s10 + $0x80] sm:$0xff] }
0x1404   : > { %13763 = vmatpush1.bf16.msra.mxu0 %v18059_v2  ;;  %v18068_v2 = vand.u32 4294901760, %v16713_v47  ;;  %v9989_v47 = vld [vmem:[%s18058_s10 + $0x88] sm:$0xff] }
0x1405   : > { %13765 = vmatprep.subr.bf16.mxu0 %v18060_v43 }
0x1406   : > { %v13780_v43 = vpack.c.bf16 %v18068_v2, %v18067_v50  ;;  %v9972_v2 = vld [vmem:[%s18058_s10] sm:$0xff] }
0x1408   : > { %13767 = vmatpush1.bf16.msra.mxu0 %v18061_v34 }
0x1409   : > { %13769 = vmatprep.subr.bf16.mxu0 %v18062_v39  ;;  %v18070_v39 = vand.u32 4294901760, %v16715_v4  ;;  %v18075_v4 = vld [vmem:[#allocation87_spill] sm:$0xff] }
0x140c   : > { %13771 = vmatpush1.bf16.msra.mxu0 %v18063_v0  ;;  %v18071_v0 = vand.u32 4294901760, %v16722_v45  ;;  %v18076_v45 = vand.u32 4294901760, %v18005_v15  ;;  %v9975_v15 = vld [vmem:[%s18058_s10 + $0x18] sm:$0xff] }
0x140d   : > { %13773 = vmatprep.subr.bf16.mxu0 %v18064_v42  ;;  %v18072_v42 = vand.u32 4294901760, %v16726_v35  ;;  %v18077_v35 = vand.u32 4294901760, %v18006_v62  ;;  %v9992_v62 = vld [vmem:[%s18058_s10 + $0xa0] sm:$0xff] }
0x140e   : > { %v13782_v34 = vpack.c.bf16 %v18071_v0, %v18070_v39  ;;  %v18079_v0 = vand.u32 4294901760, %v18008_v25 }
0x140f   : > { %v13786_v39 = vpack.c.bf16 %v18077_v35, %v18076_v45  ;;  %v9976_v45 = vld [vmem:[%s18058_s10 + $0x20] sm:$0xff]  ;;  %v9977_v35 = vld [vmem:[%s18058_s10 + $0x28] sm:$0xff] }
0x1410   : > { %13775 = vmatpush1.bf16.msra.mxu0 %v18065_v40  ;;  %v18073_v40 = vand.u32 4294901760, %v16730_v21  ;;  %v13908_v21 = vpack.c.bf16 %v9989_v47, %v9988_v37  ;;  %v9993_v37 = vld [vmem:[%s18058_s10 + $0xa8] sm:$0xff] }
0x1411   : > { %13777 = vmatprep.subr.bf16.mxu0 %v18066_v6  ;;  %v18074_v6 = vand.u32 4294901760, %v18034_v57  ;;  %v9991_v57 = vld [vmem:[%s18058_s10 + $0x98] sm:$0xff] }
0x1412   : > { %v13784_v49 = vpack.c.bf16 %v18073_v40, %v18072_v42  ;;  %v9973_v40 = vld [vmem:[%s18058_s10 + $0x8] sm:$0xff]  ;;  %13909 = vmatprep.subr.bf16.mxu1 %v13908_v21  ;;  %v18082_v21 = vand.u32 4294901760, %v18011_v22  ;;  %v9979_v22 = vld [vmem:[%s18058_s10 + $0x38] sm:$0xff] }
0x1414   : > { %13779 = vmatpush1.bf16.msra.mxu0 %v18069_v54  ;;  %v9974_v54 = vld [vmem:[%s18058_s10 + $0x10] sm:$0xff] }
0x1415   : > { %13781 = vmatprep.subr.bf16.mxu0 %v13780_v43  ;;  %v9990_v43 = vld [vmem:[%s18058_s10 + $0x90] sm:$0xff]  ;;  %v13914_v47 = vpack.c.bf16 %v9975_v15, %v9974_v54  ;;  %v9996_v15 = vld [vmem:[%s18058_s10 + $0xc0] sm:$0xff] }
0x1416   : > { %v13912_v50 = vpack.c.bf16 %v9991_v57, %v9990_v43  ;;  %v9995_v43 = vld [vmem:[%s18058_s10 + $0xb8] sm:$0xff]  ;;  %v18085_v57 = vand.u32 4294901760, %v18014_v27  ;;  %v18088_v27 = vand.u32 4294901760, %v18017_v3 }
0x1417   : > { %9562 = vmatmul.mubr.f32.vlgmr.msra.gmra.mrb[244].mxu0 %v18074_v6  ;;  %v18078_v6 = vand.u32 4294901760, %v18007_v32  ;;  %v18081_v32 = vand.u32 4294901760, %v18010_v19  ;;  %v18084_v19 = vand.u32 4294901760, %v18013_v24 }
0x1418   : > { %13783 = vmatpush1.bf16.msra.mxu0 %v13782_v34  ;;  %9825 = vmatprep.mubr.f32.mxu0 %v18075_v4  ;;  %v13910_v34 = vpack.c.bf16 %v9973_v40, %v9972_v2  ;;  %v13916_v2 = vpack.c.bf16 %v9993_v37, %v9992_v62  ;;  %v18083_v40 = vand.u32 4294901760, %v18012_v61  ;;  %v18086_v61 = vand.u32 4294901760, %v18015_v51  ;;  %v9997_v62 = vld [vmem:[%s18058_s10 + $0xc8] sm:$0xff] }
0x1419   : > { %13785 = vmatprep.subr.bf16.mxu0 %v13784_v49  ;;  %v13788_v42 = vpack.c.bf16 %v18079_v0, %v18078_v6  ;;  %v18080_v49 = vand.u32 4294901760, %v18009_v52  ;;  %v13918_v52 = vpack.c.bf16 %v9977_v35, %v9976_v45  ;;  %v13794_v6 = vpack.c.bf16 %v18085_v57, %v18084_v19  ;;  %v18089_v37 = vld [vmem:[#allocation36_spill] sm:$0xff] }
0x141a   : > { %13911 = vmatpush3.bf16.msra.mxu1 %v13910_v34  ;;  %v13792_v54 = vpack.c.bf16 %v18083_v40, %v18082_v21  ;;  %v18087_v34 = vand.u32 4294901760, %v18016_v28  ;;  %v9981_v51 = vld [vmem:[%s18058_s10 + $0x48] sm:$0xff]  ;;  %v18091_v28 = vld [vmem:[#allocation39_spill] sm:$0xff]  ;;  %v9998_v40 = vld [vmem:[%s18058_s10 + $0xd0] sm:$0xff] }
0x141b   : > { %v13790_v25 = vpack.c.bf16 %v18081_v32, %v18080_v49  ;;  %13913 = vmatprep.subr.bf16.mxu1 %v13912_v50  ;;  %v13924_v32 = vpack.c.bf16 %v9997_v62, %v9996_v15  ;;  %v18093_v45 = vld [vmem:[#allocation40_spill] sm:$0xff]  ;;  %v10000_v62 = vld [vmem:[%s18058_s10 + $0xe0] sm:$0xff] }
0x141c   : > { %13787 = vmatpush1.bf16.msra.mxu0 %v13786_v39  ;;  %v9994_v39 = vld [vmem:[%s18058_s10 + $0xb0] sm:$0xff]  ;;  %v13796_v50 = vpack.c.bf16 %v18087_v34, %v18086_v61  ;;  %v18094_v35 = vand.u32 4294901760, %v18093_v45  ;;  %v18107_v45 = vand.u32 4294901760, %v17983_v59  ;;  %v18112_v59 = vand.u32 4294901760, %v18029_v58 }
0x141d   : > { %13789 = vmatprep.subr.bf16.mxu0 %v13788_v42  ;;  %v13920_v0 = vpack.c.bf16 %v9995_v43, %v9994_v39  ;;  %v9978_v42 = vld [vmem:[%s18058_s10 + $0x30] sm:$0xff]  ;;  %v18119_v58 = vand.u32 4294901760, %v16947_v9  ;;  %v18126_v9 = vand.u32 4294901760, %v16961_v26 }
0x141e   : > { %13915 = vmatpush3.bf16.msra.mxu1 %v13914_v47  ;;  %v13922_v24 = vpack.c.bf16 %v9979_v22, %v9978_v42  ;;  %v18090_v47 = vand.u32 4294901760, %v18089_v37  ;;  %v18095_v39 = vld [vmem:[#allocation41_spill] sm:$0xff]  ;;  %v9983_v42 = vld [vmem:[%s18058_s10 + $0x58] sm:$0xff]  ;;  %v18099_v22 = vld [vmem:[#allocation43_spill] sm:$0xff]  ;;  %v18103_v37 = vand.u32 4294901760, %v18023_v41  ;;  %v18109_v41 = vand.u32 4294901760, %v18026_v46 }
0x141f   : > { %13917 = vmatprep.subr.bf16.mxu1 %v13916_v2  ;;  %v18092_v2 = vand.u32 4294901760, %v18091_v28  ;;  %v18096_v43 = vand.u32 4294901760, %v18095_v39  ;;  %v18100_v61 = vand.u32 4294901760, %v18099_v22  ;;  %v18101_v34 = vld [vmem:[#allocation45_spill] sm:$0xff]  ;;  %v9985_v28 = vld [vmem:[%s18058_s10 + $0x68] sm:$0xff]  ;;  %v18111_v39 = vand.u32 4294901760, %v18028_v55 }
0x1420   : > { %13791 = vmatpush1.bf16.msra.mxu0 %v13790_v25  ;;  %v13798_v49 = vpack.c.bf16 %v18090_v47, %v18088_v27  ;;  %v9980_v25 = vld [vmem:[%s18058_s10 + $0x40] sm:$0xff]  ;;  %v18115_v46 = vand.u32 4294901760, %v18032_v60  ;;  %v18122_v60 = vand.u32 4294901760, %v16953_v44  ;;  %v18129_v44 = vand.u32 4294901760, %v16967_v11 }
0x1421   : > { %13793 = vmatprep.subr.bf16.mxu0 %v13792_v54  ;;  %v13800_v21 = vpack.c.bf16 %v18094_v35, %v18092_v2  ;;  %v9999_v54 = vld [vmem:[%s18058_s10 + $0xd8] sm:$0xff]  ;;  %v13926_v3 = vpack.c.bf16 %v9981_v51, %v9980_v25  ;;  %v18104_v47 = vld [vmem:[#allocation47_spill] sm:$0xff]  ;;  %v18106_v2 = vand.u32 4294901760, %v18024_v33  ;;  %v18113_v33 = vand.u32 4294901760, %v18030_v10 }
0x1422   : > { %13919 = vmatpush3.bf16.msra.mxu1 %v13918_v52  ;;  %v18097_v52 = vld [vmem:[#allocation42_spill] sm:$0xff]  ;;  %v9984_v51 = vld [vmem:[%s18058_s10 + $0x60] sm:$0xff]  ;;  %v18120_v10 = vand.u32 4294901760, %v16949_v13  ;;  %v18127_v13 = vand.u32 4294901760, %v16963_v30  ;;  %v18135_v30 = vand.u32 4294901760, %v16983_v1  ;;  %v18137_v11 = vand.u32 4294901760, %v16989_v8 }
0x1423   : > { %13921 = vmatprep.subr.bf16.mxu1 %v13920_v0  ;;  %v18098_v19 = vand.u32 4294901760, %v18097_v52  ;;  %v9982_v0 = vld [vmem:[%s18058_s10 + $0x50] sm:$0xff]  ;;  %v13808_v35 = vpack.c.bf16 %v18107_v45, %v18106_v2  ;;  %v13814_v52 = vpack.c.bf16 %v18113_v33, %v18112_v59  ;;  %v18147_v8 = vld [vmem:[#allocation86_spill] sm:$0xff]  ;;  %v18150_v45 = vld [vmem:[#allocation19_spill] sm:$0xff] }
0x1424   : > { %13795 = vmatpush1.bf16.msra.mxu0 %v13794_v6  ;;  %v13928_v6 = vpack.c.bf16 %v9999_v54, %v9998_v40  ;;  %v13930_v27 = vpack.c.bf16 %v9983_v42, %v9982_v0  ;;  %v18108_v40 = vand.u32 4294901760, %v18025_v5  ;;  %v18114_v5 = vand.u32 4294901760, %v18031_v23  ;;  %v18148_v2 = vld [vmem:[#allocation17_spill] sm:$0xff]  ;;  %v18161_v59 = vld [vmem:[#allocation62_spill] sm:$0xff] }
0x1425   : > { %13797 = vmatprep.subr.bf16.mxu0 %v13796_v50  ;;  %v13802_v57 = vpack.c.bf16 %v18098_v19, %v18096_v43  ;;  %v18102_v50 = vand.u32 4294901760, %v18101_v34  ;;  %v18121_v23 = vand.u32 4294901760, %v16951_v56  ;;  %v13828_v34 = vpack.c.bf16 %v18127_v13, %v18126_v9  ;;  %v18162_v33 = vld [vmem:[#allocation65_spill] sm:$0xff]  ;;  %v9987_v13 = vld [vmem:[%s18058_s10 + $0x78] sm:$0xff] }
0x1426   : > { %13923 = vmatpush3.bf16.msra.mxu1 %v13922_v24  ;;  %v10001_v24 = vld [vmem:[%s18058_s10 + $0xe8] sm:$0xff]  ;;  %v13810_v54 = vpack.c.bf16 %v18109_v41, %v18108_v40  ;;  %v13816_v19 = vpack.c.bf16 %v18115_v46, %v18114_v5  ;;  %v18128_v56 = vand.u32 4294901760, %v16965_v18  ;;  %v18136_v18 = vand.u32 4294901760, %v16985_v20  ;;  %v18154_v40 = vld [vmem:[#allocation37_spill] sm:$0xff]  ;;  %v18155_v41 = vld [vmem:[#allocation38_spill] sm:$0xff] }
0x1427   : > { %13925 = vmatprep.subr.bf16.mxu1 %v13924_v32  ;;  %v13804_v15 = vpack.c.bf16 %v18102_v50, %v18100_v61  ;;  %v13932_v32 = vpack.c.bf16 %v10001_v24, %v10000_v62  ;;  %v13822_v42 = vpack.c.bf16 %v18121_v23, %v18120_v10  ;;  %v18133_v62 = vld [vmem:[#allocation78_spill] sm:$0xff]  ;;  %v18146_v20 = vld [vmem:[#allocation16_spill] sm:$0xff]  ;;  %v18164_v5 = vld [vmem:[#allocation67_spill] sm:$0xff] }
0x1428   : > { %13799 = vmatpush1.bf16.msra.mxu0 %v13798_v49  ;;  %v18105_v49 = vand.u32 4294901760, %v18104_v47  ;;  %v13830_v50 = vpack.c.bf16 %v18129_v44, %v18128_v56  ;;  %v18134_v26 = vand.u32 4294901760, %v18133_v62  ;;  %v18165_v46 = vld [vmem:[#allocation68_spill] sm:$0xff]  ;;  %v18174_v23 = vld [vmem:[#allocation77_spill] sm:$0xff]  ;;  %v18181_v56 = vmov 0.0   ;;  %v10074_v62 = vld [vmem:[%s18180_s0] sm:$0xff] }
0x1429   : > { %13801 = vmatprep.subr.bf16.mxu0 %v13800_v21  ;;  %v13934_v21 = vpack.c.bf16 %v9985_v28, %v9984_v51  ;;  %v18144_v51 = vld [vmem:[#allocation85_spill] sm:$0xff]  ;;  %v18173_v10 = vld [vmem:[#allocation76_spill] sm:$0xff] }
0x142a   : > { %13927 = vmatpush3.bf16.msra.mxu1 %v13926_v3  ;;  %v13806_v25 = vpack.c.bf16 %v18105_v49, %v18103_v37  ;;  %v18110_v3 = vand.u32 4294901760, %v18027_v53  ;;  %v18117_v53 = vand.u32 4294901760, %v18002_v16  ;;  %v18124_v16 = vand.u32 4294901760, %v16957_v36  ;;  %v18138_v37 = vld [vmem:[#allocation81_spill] sm:$0xff]  ;;  %v18141_v49 = vld [vmem:[#allocation83_spill] sm:$0xff] }
0x142b   : > { %13929 = vmatprep.subr.bf16.mxu1 %v13928_v6  ;;  %v18118_v6 = vand.u32 4294901760, %v16945_v14  ;;  %v18125_v14 = vand.u32 4294901760, %v16959_v63  ;;  %v18131_v36 = vand.u32 4294901760, %v16973_v12  ;;  %v18132_v63 = vand.u32 4294901760, %v16975_v29  ;;  %v9986_v9 = vld [vmem:[%s18058_s10 + $0x70] sm:$0xff] }
0x142c   : > { %13803 = vmatpush1.bf16.msra.mxu0 %v13802_v57  ;;  %v13812_v43 = vpack.c.bf16 %v18111_v39, %v18110_v3  ;;  %v18116_v57 = vand.u32 4294901760, %v18001_v17  ;;  %v18123_v17 = vand.u32 4294901760, %v16955_v38  ;;  %v18130_v38 = vand.u32 4294901760, %v16971_v31  ;;  %v18157_v3 = vld [vmem:[#allocation48_spill] sm:$0xff]  ;;  %v18158_v39 = vld [vmem:[#allocation51_spill] sm:$0xff] }
0x142d   : > { %13805 = vmatprep.subr.bf16.mxu0 %v13804_v15  ;;  %v13820_v0 = vpack.c.bf16 %v18119_v58, %v18118_v6  ;;  %v13826_v61 = vpack.c.bf16 %v18125_v14, %v18124_v16  ;;  %v13834_v24 = vpack.c.bf16 %v18134_v26, %v18132_v63  ;;  %v18139_v31 = vand.u32 4294901760, %v18138_v37  ;;  %v18170_v6 = vld [vmem:[#allocation73_spill] sm:$0xff]  ;;  %v18171_v58 = vld [vmem:[#allocation74_spill] sm:$0xff]  ;;  %v10075_v26 = vld [vmem:[%s18180_s0 + $0x8] sm:$0xff] }
0x142e   : > { %13931 = vmatpush3.bf16.msra.mxu1 %v13930_v27  ;;  %v13818_v55 = vpack.c.bf16 %v18117_v53, %v18116_v57  ;;  %v13824_v22 = vpack.c.bf16 %v18123_v17, %v18122_v60  ;;  %v13832_v15 = vpack.c.bf16 %v18131_v36, %v18130_v38  ;;  %v13836_v27 = vpack.c.bf16 %v18136_v18, %v18135_v30  ;;  %v18167_v57 = vld [vmem:[#allocation70_spill] sm:$0xff]  ;;  %v18168_v53 = vld [vmem:[#allocation71_spill] sm:$0xff]  ;;  %v18176_v60 = vld [vmem:[#allocation80_spill] sm:$0xff] }
0x142f   : > { %13933 = vmatprep.subr.bf16.mxu1 %v13932_v32  ;;  %v13838_v47 = vpack.c.bf16 %v18139_v31, %v18137_v11  ;;  %v18140_v12 = vand.u32 4294901760, %v16999_v48  ;;  %v18142_v29 = vand.u32 4294901760, %v18141_v49  ;;  %v18143_v32 = vand.u32 4294901760, %v17005_v7  ;;  %v18149_v48 = vld [vmem:[#allocation18_spill] sm:$0xff]  ;;  %v18152_v7 = vld [vmem:[#allocation25_spill] sm:$0xff] }
0x1430   : > { %13807 = vmatpush1.bf16.msra.mxu0 %v13806_v25  ;;  %v18145_v1 = vand.u32 4294901760, %v18144_v51  ;;  %v18177_v17 = vld [vmem:[#allocation82_spill] sm:$0xff]  ;;  %v10002_v16 = vld [vmem:[%s18058_s10 + $0xf0] sm:$0xff]  ;;  %v18182_v63 = vmov 0.0|0.0   ;;  %v13941_v18 = vpack.c.bf16 %v10075_v26, %v10074_v62  ;;  %v10252_v26 = vld [vmem:[%s18188_s1] sm:$0x1] }
0x1431   : > { %13809 = vmatprep.subr.bf16.mxu0 %v13808_v35  ;;  %v13840_v25 = vpack.c.bf16 %v18142_v29, %v18140_v12  ;;  %v18151_v35 = vld [vmem:[#allocation23_spill] sm:$0xff]  ;;  %v10003_v14 = vld [vmem:[%s18058_s10 + $0xf8] sm:$0xff]  ;;  %v10076_v11 = vld [vmem:[%s18180_s0 + $0x10] sm:$0xff] }
0x1432   : > { %13935 = vmatpush3.bf16.msra.mxu1 %v13934_v21  ;;  %v13842_v28 = vpack.c.bf16 %v18145_v1, %v18143_v32  ;;  %v18153_v21 = vld [vmem:[#allocation29_spill] sm:$0xff]  ;;  %v10077_v37 = vld [vmem:[%s18180_s0 + $0x18] sm:$0xff]  ;;  %v10079_v12 = vld [vmem:[%s18180_s0 + $0x28] sm:$0xff] }
0x1433   : > { %v13944_v31 = vpack.c.bf16 %v10077_v37, %v10076_v11  ;;  %v10080_v29 = vld [vmem:[%s18180_s0 + $0x30] sm:$0xff]  ;;  %v6478_v32 = vld [vmem:[%s18183_s18] sm:$0x1] }
0x1434   : > { %13811 = vmatpush1.bf16.msra.mxu0 %v13810_v54  ;;  %v18156_v54 = vld [vmem:[#allocation44_spill] sm:$0xff]  ;;  %v18185_v1 = vld [vmem:[#allocation15_spill] sm:$0xff] }
0x1435   : > { %13813 = vmatprep.subr.bf16.mxu0 %v13812_v43  ;;  %v18160_v43 = vld [vmem:[#allocation59_spill] sm:$0xff] }
0x1438   : > { %13815 = vmatpush1.bf16.msra.mxu0 %v13814_v52  ;;  %v18163_v52 = vld [vmem:[#allocation66_spill] sm:$0xff] }
0x1439   : > { %13817 = vmatprep.subr.bf16.mxu0 %v13816_v19  ;;  %v18166_v19 = vld [vmem:[#allocation69_spill] sm:$0xff] }
0x143c   : > { %13819 = vmatpush1.bf16.msra.mxu0 %v13818_v55  ;;  %v18169_v55 = vld [vmem:[#allocation72_spill] sm:$0xff] }
0x143d   : > { %13821 = vmatprep.subr.bf16.mxu0 %v13820_v0  ;;  %v18172_v0 = vld [vmem:[#allocation75_spill] sm:$0xff] }
0x1440   : > { %13823 = vmatpush1.bf16.msra.mxu0 %v13822_v42  ;;  %v18175_v42 = vld [vmem:[#allocation79_spill] sm:$0xff] }
0x1441   : > { %13825 = vmatprep.subr.bf16.mxu0 %v13824_v22  ;;  %v18178_v22 = vld [vmem:[#allocation84_spill] sm:$0xff] }
0x1444   : > { %13827 = vmatpush1.bf16.msra.mxu0 %v13826_v61  ;;  %v13936_v61 = vpack.c.bf16 %v10003_v14, %v10002_v16 }
0x1445   : > { %13829 = vmatprep.subr.bf16.mxu0 %v13828_v34  ;;  %v13938_v34 = vpack.c.bf16 %v9987_v13, %v9986_v9  ;;  %v10326_v9 = vld [vmem:[%s18187_s26 + $0x10] sm:$0xff]  ;;  %v10327_v13 = vld [vmem:[%s18187_s26 + $0x18] sm:$0xff] }
0x1446   : > { %13937 = vmatprep.subr.bf16.mxu1 %v13936_v61 }
0x1447   : > { %13939 = vmatpush3.bf16.msra.mxu1 %v13938_v34  ;;  %v13980_v34 = vpack.c.bf16 %v10327_v13, %v10326_v9 }
0x1448   : > { %13831 = vmatpush1.bf16.msra.mxu0 %v13830_v50  ;;  %12862 = vmatprep.subr.mxu1 %v18181_v56 }
0x1449   : > { %13833 = vmatprep.subr.bf16.mxu0 %v13832_v15  ;;  %v10082_v15 = vld [vmem:[%s18179_s11] sm:$0xf] }
0x144c   : > { %13835 = vmatpush1.bf16.msra.mxu0 %v13834_v24 }
0x144d   : > { %13837 = vmatprep.subr.bf16.mxu0 %v13836_v27 }
0x1450   : > { %13839 = vmatpush1.bf16.msra.mxu0 %v13838_v47  ;;  %v10078_v47 = vld [vmem:[%s18180_s0 + $0x20] sm:$0xff] }
0x1451   : > { %13841 = vmatprep.subr.bf16.mxu0 %v13840_v25  ;;  %v13947_v49 = vpack.c.bf16 %v10079_v12, %v10078_v47  ;;  %v10081_v25 = vld [vmem:[%s18180_s0 + $0x38] sm:$0xff]  ;;  %v10409_v47 = vld [vmem:[%s14679_s27 + $0x10] sm:$0xff] }
0x1452   : > { %v13950_v51 = vpack.c.bf16 %v10081_v25, %v10080_v29  ;;  %v10410_v12 = vld [vmem:[%s14679_s27 + $0x18] sm:$0xff]  ;;  %v10332_v29 = vld [vmem:[%s14674_s30] sm:$0x1] }
0x1454   : > { %13843 = vmatpush1.bf16.msra.mxu0 %v13842_v28  ;;  %v6546_v28 = vadd.f32 %v18185_v1, %v6478_v32 }
0x1455   : > { %13845 = vmatprep.subr.bf16.mxu0 %v18146_v20  ;;  %v10236_v20 = vld [vmem:[%s18184_s22] sm:$0xff] }
0x1457   : > { %9827 = vmatmul.mubr.f32.vlgmr.msra.gmra.mrb[244].mxu0 %v18147_v8 }
0x1458   : > { %13847 = vmatpush1.bf16.msra.mxu0 %v18148_v2  ;;  %9962 = vmatprep.mubr.f32.mxu0 %v18075_v4  ;;  %v18159_v4 = vld [vmem:[#allocation55_spill] sm:$0xff] }
0x1459   : > { %13849 = vmatprep.subr.bf16.mxu0 %v18149_v48  ;;  %v6549_v48 = vmax.f32 %v6546_v28, 0.0  ;;  %v10411_v28 = vld [vmem:[%s14684_s4] sm:$0x1] }
0x145c   : > { %13851 = vmatpush1.bf16.msra.mxu0 %v18150_v45  ;;  %v10238_v45 = vld [vmem:[%s18184_s22 + $0x10] sm:$0xff] }
0x145d   : > { %13853 = vmatprep.subr.bf16.mxu0 %v18151_v35  ;;  %v10239_v35 = vld [vmem:[%s18184_s22 + $0x18] sm:$0xff] }
0x1460   : > { %13855 = vmatpush1.bf16.msra.mxu0 %v18152_v7  ;;  %v13956_v7 = vpack.c.bf16 %v10239_v35, %v10238_v45 }
0x1461   : > { %13857 = vmatprep.subr.bf16.mxu0 %v18153_v21  ;;  %v10240_v21 = vld [vmem:[%s18184_s22 + $0x20] sm:$0xff] }
0x1464   : > { %13859 = vmatpush1.bf16.msra.mxu0 %v18154_v40  ;;  %v10241_v40 = vld [vmem:[%s18184_s22 + $0x28] sm:$0xff] }
0x1465   : > { %13861 = vmatprep.subr.bf16.mxu0 %v18155_v41  ;;  %v13959_v41 = vpack.c.bf16 %v10241_v40, %v10240_v21 }
0x1468   : > { %13863 = vmatpush1.bf16.msra.mxu0 %v18156_v54  ;;  %v10242_v54 = vld [vmem:[%s18184_s22 + $0x30] sm:$0xff] }
0x1469   : > { %13865 = vmatprep.subr.bf16.mxu0 %v18157_v3  ;;  %v10243_v3 = vld [vmem:[%s18184_s22 + $0x38] sm:$0xff] }
0x146c   : > { %13867 = vmatpush1.bf16.msra.mxu0 %v18158_v39  ;;  %v10244_v39 = vld [vmem:[%s18184_s22 + $0x40] sm:$0xff] }
0x146d   : > { %13869 = vmatprep.subr.bf16.mxu0 %v18159_v4  ;;  %v13962_v4 = vpack.c.bf16 %v10243_v3, %v10242_v54 }
0x1470   : > { %13871 = vmatpush1.bf16.msra.mxu0 %v18160_v43  ;;  %v10245_v43 = vld [vmem:[%s18184_s22 + $0x48] sm:$0xff] }
0x1471   : > { %13873 = vmatprep.subr.bf16.mxu0 %v18161_v59  ;;  %v13965_v59 = vpack.c.bf16 %v10245_v43, %v10244_v39 }
0x1474   : > { %13875 = vmatpush1.bf16.msra.mxu0 %v18162_v33  ;;  %v10246_v33 = vld [vmem:[%s18184_s22 + $0x50] sm:$0xff] }
0x1475   : > { %13877 = vmatprep.subr.bf16.mxu0 %v18163_v52  ;;  %v10247_v52 = vld [vmem:[%s18184_s22 + $0x58] sm:$0xff] }
0x1478   : > { %13879 = vmatpush1.bf16.msra.mxu0 %v18164_v5  ;;  %v13968_v5 = vpack.c.bf16 %v10247_v52, %v10246_v33 }
0x1479   : > { %13881 = vmatprep.subr.bf16.mxu0 %v18165_v46  ;;  %v10248_v46 = vld [vmem:[%s18184_s22 + $0x60] sm:$0xff] }
0x147c   : > { %13883 = vmatpush1.bf16.msra.mxu0 %v18166_v19  ;;  %v10249_v19 = vld [vmem:[%s18184_s22 + $0x68] sm:$0xff] }
0x147d   : > { %13885 = vmatprep.subr.bf16.mxu0 %v18167_v57  ;;  %v13971_v57 = vpack.c.bf16 %v10249_v19, %v10248_v46 }
0x1480   : > { %13887 = vmatpush1.bf16.msra.mxu0 %v18168_v53  ;;  %v10250_v53 = vld [vmem:[%s18184_s22 + $0x70] sm:$0xff] }
0x1481   : > { %13889 = vmatprep.subr.bf16.mxu0 %v18169_v55  ;;  %v10251_v55 = vld [vmem:[%s18184_s22 + $0x78] sm:$0xff] }
0x1484   : > { %13891 = vmatpush1.bf16.msra.mxu0 %v18170_v6  ;;  %v13974_v6 = vpack.c.bf16 %v10251_v55, %v10250_v53 }
0x1485   : > { %13893 = vmatprep.subr.bf16.mxu0 %v18171_v58 }
0x1488   : > { %13895 = vmatpush1.bf16.msra.mxu0 %v18172_v0 }
0x1489   : > { %13897 = vmatprep.subr.bf16.mxu0 %v18173_v10 }
0x148c   : > { %13899 = vmatpush1.bf16.msra.mxu0 %v18174_v23  ;;  %v10233_v23 = vld [vmem:[%s18186_s23] sm:$0x1] }
0x148d   : > { %13901 = vmatprep.subr.bf16.mxu0 %v18175_v42 }
0x1490   : > { %13903 = vmatpush1.bf16.msra.mxu0 %v18176_v60 }
0x1491   : > { %13905 = vmatprep.subr.bf16.mxu0 %v18177_v17  ;;  %v10324_v17 = vld [vmem:[%s18187_s26] sm:$0xff] }
0x1494   : > { %13907 = vmatpush1.bf16.msra.mxu0 %v18178_v22  ;;  %v10325_v22 = vld [vmem:[%s18187_s26 + $0x8] sm:$0xff] }
0x1495   : > { %v13977_v14 = vpack.c.bf16 %v10325_v22, %v10324_v17 }
0x1497   : > { %9964 = vmatmul.mubr.f32.vlgmr.msra.gmra.mrb[244].mxu0 %v18147_v8  ;;  %v10237_v8 = vld [vmem:[%s18184_s22 + $0x8] sm:$0xff] }
0x1498   : > { %v13953_v2 = vpack.c.bf16 %v10237_v8, %v10236_v20 }
0x156a   : > { %v9965_v44 = vpop.f32.mrb[244].mxu0 }
0x156b   : > { %v9967_v50 = vpop.f32.mrb[245].mxu0  ;;  %v9970_v36 = vmul.f32 %v9965_v44, %v9965_v44  ;;  %v10328_v44 = vld [vmem:[%s18187_s26 + $0x20] sm:$0xff] }
0x156c   : > { %v9971_v38 = vmul.f32 %v9967_v50, %v9967_v50  ;;  %v10329_v50 = vld [vmem:[%s18187_s26 + $0x28] sm:$0xff] }
0x156e   : > { %10068 = vmatprep.mubr.f32.mxu1 %v9971_v38  ;;  %v13983_v38 = vpack.c.bf16 %v10329_v50, %v10328_v44 }
0x156f   : > { %10069 = vmatmul.mubr.f32.vlgmr.msra.gmra.mrb[72].mxu1 %v9970_v36  ;;  %v10330_v36 = vld [vmem:[%s18187_s26 + $0x30] sm:$0xff] }
0x1570   : > { %12864 = vmatprep.mubr.msk.f32.mxu1 %vm14528_vm0, %v18181_v56  ;;  %12863 = vmatpush3.msk.msra.mxu1 %vm1308_vm3, %v10082_v15  ;;  %v10331_v15 = vld [vmem:[%s18187_s26 + $0x38] sm:$0xff] }
0x1571   : > { %13940 = vmatprep.subr.bf16.mxu1 %v18182_v63  ;;  %v13986_v62 = vpack.c.bf16 %v10331_v15, %v10330_v36 }
0x1642   : > { %v11805_v24 = vpop.f32.mrb[72].mxu1 }
0x1643   : > { %v11806_v30 = vpop.f32.mrb[73].mxu1 }
0x1644   : > { %v11807_v27 = vadd.f32 %v11806_v30, %v11805_v24  ;;  %v10407_v24 = vld [vmem:[%s14679_s27] sm:$0xff]  ;;  %v10408_v30 = vld [vmem:[%s14679_s27 + $0x8] sm:$0xff] }
0x1645   : > { %v13989_v37 = vpack.c.bf16 %v10408_v30, %v10407_v24 }
0x1646   : > { %12865 = vmatmul.mubr.msk.f32.vlgmr.msra.gmra.mrb[74].mxu1 %vm10083_vm8, %v11807_v27 }
0x1647   : > { %13942 = vmatpush3.bf16.msra.mxu1 %v13941_v18  ;;  %12883 = vmatprep.mubr.msk.f32.mxu1 %vm14528_vm0, %v18181_v56 }
0x1648   : > { %13943 = vmatprep.subr.bf16.mxu1 %v18182_v63 }
0x164b   : > { %13945 = vmatpush3.bf16.msra.mxu1 %v13944_v31 }
0x164c   : > { %13946 = vmatprep.subr.bf16.mxu1 %v18182_v63 }
0x164f   : > { %13948 = vmatpush3.bf16.msra.mxu1 %v13947_v49  ;;  %v13992_v49 = vpack.c.bf16 %v10410_v12, %v10409_v47 }
0x1650   : > { %13949 = vmatprep.subr.bf16.mxu1 %v18182_v63 }
0x1653   : > { %13951 = vmatpush3.bf16.msra.mxu1 %v13950_v51 }
0x1654   : > { %13952 = vmatprep.subr.bf16.mxu1 %v18182_v63 }
0x1656   : > { %12884 = vmatmul.mubr.msk.f32.vlgmr.msra.gmra.mrb[76].mxu1 %vm6140_vm7, %v6549_v48 }
0x1657   : > { %13954 = vmatpush3.bf16.msra.mxu1 %v13953_v2  ;;  %12918 = vmatprep.mubr.msk.f32.mxu1 %vm14528_vm0, %v18181_v56 }
0x1658   : > { %13955 = vmatprep.subr.bf16.mxu1 %v18182_v63 }
0x165b   : > { %13957 = vmatpush3.bf16.msra.mxu1 %v13956_v7 }
0x165c   : > { %13958 = vmatprep.subr.bf16.mxu1 %v18182_v63 }
0x165f   : > { %13960 = vmatpush3.bf16.msra.mxu1 %v13959_v41 }
0x1660   : > { %13961 = vmatprep.subr.bf16.mxu1 %v18182_v63 }
0x1663   : > { %13963 = vmatpush3.bf16.msra.mxu1 %v13962_v4 }
0x1664   : > { %13964 = vmatprep.subr.bf16.mxu1 %v18182_v63 }
0x1667   : > { %13966 = vmatpush3.bf16.msra.mxu1 %v13965_v59 }
0x1668   : > { %13967 = vmatprep.subr.bf16.mxu1 %v18182_v63 }
0x166b   : > { %13969 = vmatpush3.bf16.msra.mxu1 %v13968_v5 }
0x166c   : > { %13970 = vmatprep.subr.bf16.mxu1 %v18182_v63 }
0x166f   : > { %13972 = vmatpush3.bf16.msra.mxu1 %v13971_v57 }
0x1670   : > { %13973 = vmatprep.subr.bf16.mxu1 %v18182_v63 }
0x1673   : > { %13975 = vmatpush3.bf16.msra.mxu1 %v13974_v6 }
0x1674   : > { %13976 = vmatprep.subr.bf16.mxu1 %v18182_v63 }
0x1719   : > { %v10156_v58 = vpop.f32.mrb[74].mxu1 }
0x171a   : > { %v12866_v0 = vpop.f32.mrb[75].mxu1 }
0x1729   : > { %v10229_v10 = vpop.f32.mrb[76].mxu1 }
0x172a   : > { %v10230_v42 = vadd.f32 %v10229_v10, %v10156_v58  ;;  %v12885_v60 = vpop.f32.mrb[77].mxu1 }
0x172c   : > { %v10234_v16 = vadd.f32 %v10233_v23, %v10230_v42 }
0x172e   : > { %v10235_v61 = vmax.f32 %v10234_v16, 0.0 }
0x1730   : > { %12919 = vmatmul.mubr.f32.vlgmr.msra.gmra.mrb[78].mxu1 %v10235_v61 }
0x1731   : > { %13978 = vmatpush3.bf16.msra.mxu1 %v13977_v14  ;;  %12937 = vmatprep.mubr.msk.f32.mxu1 %vm14528_vm0, %v18181_v56 }
0x1732   : > { %13979 = vmatprep.subr.bf16.mxu1 %v18182_v63 }
0x1735   : > { %13981 = vmatpush3.bf16.msra.mxu1 %v13980_v34 }
0x1736   : > { %13982 = vmatprep.subr.bf16.mxu1 %v18182_v63 }
0x1739   : > { %13984 = vmatpush3.bf16.msra.mxu1 %v13983_v38 }
0x173a   : > { %13985 = vmatprep.subr.bf16.mxu1 %v18182_v63 }
0x173d   : > { %13987 = vmatpush3.bf16.msra.mxu1 %v13986_v62 }
0x173e   : > { %13988 = vmatprep.subr.bf16.mxu1 %v18182_v63 }
0x1803   : > { %v10319_v18 = vpop.f32.mrb[78].mxu1 }
0x1804   : > { %v10320_v27 = vadd.f32 %v10319_v18, %v10252_v26  ;;  %v12920_v11 = vpop.f32.mrb[79].mxu1 }
0x1806   : > { %v10323_v31 = vmax.f32 %v10320_v27, 0.0 }
0x1808   : > { %12938 = vmatmul.mubr.msk.f32.vlgmr.msra.gmra.mrb[80].mxu1 %vm6140_vm7, %v10323_v31 }
0x1809   : > { %13990 = vmatpush3.bf16.msra.mxu1 %v13989_v37  ;;  %12948 = vmatprep.mubr.msk.f32.mxu1 %vm14528_vm0, %v18181_v56 }
0x180a   : > { %13991 = vmatprep.subr.bf16.mxu1 %v18182_v63 }
0x180d   : > { %13993 = vmatpush3.bf16.msra.mxu1 %v13992_v49 }
0x18db   : > { %v10402_v25 = vpop.f32.mrb[80].mxu1 }
0x18dc   : > { %v10403_v32 = vadd.f32 %v10402_v25, %v10332_v29  ;;  %v12939_v51 = vpop.f32.mrb[81].mxu1 }
0x18de   : > { %v10406_v1 = vmax.f32 %v10403_v32, 0.0 }
0x18e0   : > { %12949 = vmatmul.mubr.msk.f32.vlgmr.msra.gmra.mrb[82].mxu1 %vm981_vm1, %v10406_v1 }
0x19b3   : > { %v10481_v20 = vpop.f32.mrb[82].mxu1 }
0x19b4   : > { %v10482_v8 = vadd.f32 %v10481_v20, %v10411_v28  ;;  %v12950_v2 = vpop.f32.mrb[83].mxu1 }
0x19b6   : > { %v11374_v56 = vmul.f32 -1.442695, %v10482_v8 }
0x19b8   : > { %14485 = vpow2.f32 %v11374_v56 }
0x19c2   : > { %v14486_v63 = vpop.eup %14485 }
0x19c3   : > { %v10488_v48 = vadd.f32 1.0, %v14486_v63 }
0x19c5   : > { %14487 = vrcp.f32 %v10488_v48 }
0x19cf   : > { %v14488_v45 = vpop.eup %14487 }
0x19d0   : > { %10491 = vst [vmem:[%s943_s7] sm:$0x1] %v14488_v45 }
0x19d1 PF: > { %s71_s15 = sadd.s32 1, %s14495_s15  }
0x19d2   : > { %p68_p4 = scmp.ge.s32.totalorder %s71_s15, 4  }
0x19d4   :  { %70 = sbr.rel (!%p68_p4) target bundleno = 45 (0x2d), region = 235 }

</bundles_post_ra>
